<compile_context>
chip_gen: v6e
topology: v6e:2x2x1
jax: 0.10.0
libtpu: 0.0.40
codegen_flags: <defaults>
</compile_context>

<pallas_src>
import functools
import math

import jax
import jax.numpy as jnp
from jax.experimental import pallas as pl
from jax.experimental.pallas import tpu as pltpu  # noqa: F401  (imported per template)

# ---------------- hyperparameters (match the PyTorch module's globals) -------
D_MODEL = 32
D_K = 8
D_V = 8
N_HEADS = 4
D_FF = 64
N_LAYERS = 2
SRC_VOCAB = 16
TGT_VOCAB = 16
MAX_LEN = 64
LN_EPS = 1e-5
NEG_INF = -1000000000.0
HK = N_HEADS * D_K
HV = N_HEADS * D_V

# =============================== in-kernel helpers ============================


def _layer_norm(y, g, b):
    mu = jnp.mean(y, axis=-1, keepdims=True)
    var = jnp.mean(jnp.square(y - mu), axis=-1, keepdims=True)   # biased var (PyTorch)
    return (y - mu) * jax.lax.rsqrt(var + LN_EPS) * g + b


def _embed(tok_flat, table, n_rows, vocab):
    """Embedding lookup as one-hot @ table (vocab=16 -> tiny MXU matmul);
    avoids a data-dependent gather lowering inside the kernel."""
    iota = jax.lax.broadcasted_iota(jnp.int32, (n_rows, vocab), 1)
    onehot = jnp.where(iota == tok_flat, 1.0, 0.0)                # (n_rows, vocab) f32
    return jnp.dot(onehot, table, preferred_element_type=jnp.float32)


def _mha_block(q, k, v, mask, wo, bo, residual, ln_g, ln_b, B, Lq, Lk):
    """q:(B*Lq,HK) (scale already folded into the weights), k:(B*Lk,HK),
    v:(B*Lk,HV), mask: bool (B,Lq,Lk) with True = masked, wo:(HV,D_MODEL).
    The output projection is folded into the per-head loop (no lane-concat of
    per-head contexts); attention probs are returned as (B,H,Lq,Lk)."""
    o = residual + bo
    attn_heads = []
    for h in range(N_HEADS):
        qh = q[:, h * D_K:(h + 1) * D_K].reshape(B, Lq, D_K)
        kh = k[:, h * D_K:(h + 1) * D_K].reshape(B, Lk, D_K)
        vh = v[:, h * D_V:(h + 1) * D_V].reshape(B, Lk, D_V)
        s = jnp.einsum("bqd,bkd->bqk", qh, kh, preferred_element_type=jnp.float32)
        s = jnp.where(mask, NEG_INF, s)
        s = s - jnp.max(s, axis=-1, keepdims=True)
        e = jnp.exp(s)
        a = e * pl.reciprocal(jnp.sum(e, axis=-1, keepdims=True), approx=True)
        c = jnp.einsum("bqk,bkd->bqd", a, vh, preferred_element_type=jnp.float32)
        # fused per-head output projection: accumulate against 8-row W_O slice
        o = o + jnp.dot(c.reshape(B * Lq, D_V), wo[h * D_V:(h + 1) * D_V, :],
                        preferred_element_type=jnp.float32)
        attn_heads.append(a)
    attn = jnp.stack(attn_heads, axis=1)          # (B, H, Lq, Lk) — PyTorch layout
    return _layer_norm(o, ln_g, ln_b), attn


def _ffn_block(x, w1, b1, w2, b2, ln_g, ln_b):
    h = jnp.maximum(jnp.dot(x, w1, preferred_element_type=jnp.float32) + b1, 0.0)
    f = jnp.dot(h, w2, preferred_element_type=jnp.float32) + b2
    return _layer_norm(f + x, ln_g, ln_b)


# ============================ single fused kernel =============================


def _transformer_kernel(
    enc_tok_ref, dec_tok_ref, enc_flat_ref, dec_flat_ref,
    src_emb_ref, tgt_emb_ref, pe_ref,
    # encoder params (stacked over layers)
    e_wqkv_ref, e_bqkv_ref, e_wo_ref, e_bo_ref, e_ln1g_ref, e_ln1b_ref,
    e_w1_ref, e_b1_ref, e_w2_ref, e_b2_ref, e_ln2g_ref, e_ln2b_ref,
    # decoder params
    d_wqkv_ref, d_bqkv_ref, d_wos_ref, d_bos_ref, d_lnsg_ref, d_lnsb_ref,
    d_wqe_ref, d_bqe_ref, d_wkv_ref, d_bkv_ref, d_woe_ref, d_boe_ref,
    d_lneg_ref, d_lneb_ref,
    d_w1_ref, d_b1_ref, d_w2_ref, d_b2_ref, d_lnfg_ref, d_lnfb_ref,
    proj_w_ref,
    # outputs
    logits_ref, enc_attn_ref, dec_self_attn_ref, dec_enc_attn_ref,
    *, B, Ls, Lt):
    pe = pe_ref[...]

    # ---- masks, built once from int32 tokens (no per-head fp mask traffic) ----
    enc_pad = enc_tok_ref[...] == 0                                  # (B, Ls)
    dec_pad = dec_tok_ref[...] == 0                                  # (B, Lt)
    enc_mask = jnp.broadcast_to(enc_pad[:, None, :], (B, Ls, Ls))
    row = jax.lax.broadcasted_iota(jnp.int32, (Lt, Lt), 0)
    col = jax.lax.broadcasted_iota(jnp.int32, (Lt, Lt), 1)
    causal = col > row                                               # triu(k=1)
    self_mask = (jnp.broadcast_to(dec_pad[:, None, :], (B, Lt, Lt))
                 | jnp.broadcast_to(causal[None, :, :], (B, Lt, Lt)))
    cross_mask = jnp.broadcast_to(enc_pad[:, None, :], (B, Lt, Ls))

    # ---- embeddings + positional encoding (in-kernel) ----
    # TODO(synk): nn.Dropout(p=0.1) in PositionalEncoding is a no-op here (eval semantics).
    enc_x = _embed(enc_flat_ref[...], src_emb_ref[...], B * Ls, SRC_VOCAB)
    enc_x = (enc_x.reshape(B, Ls, D_MODEL) + pe[0:Ls][None, :, :]).reshape(B * Ls, D_MODEL)
    dec_x = _embed(dec_flat_ref[...], tgt_emb_ref[...], B * Lt, TGT_VOCAB)
    dec_x = (dec_x.reshape(B, Lt, D_MODEL) + pe[0:Lt][None, :, :]).reshape(B * Lt, D_MODEL)

    # ---- encoder stack ----
    x = enc_x
    for l in range(N_LAYERS):
        qkv = jnp.dot(x, e_wqkv_ref[l], preferred_element_type=jnp.float32) + e_bqkv_ref[l]
        x, attn = _mha_block(qkv[:, :HK], qkv[:, HK:2 * HK], qkv[:, 2 * HK:], enc_mask,
                             e_wo_ref[l], e_bo_ref[l], x,
                             e_ln1g_ref[l], e_ln1b_ref[l], B, Ls, Ls)
        enc_attn_ref[l] = attn
        x = _ffn_block(x, e_w1_ref[l], e_b1_ref[l], e_w2_ref[l], e_b2_ref[l],
                       e_ln2g_ref[l], e_ln2b_ref[l])
    enc_out = x

    # ---- hoisted cross-attention K/V: enc_out is layer-invariant ----
    # single (B*Ls, 32) @ (32, N_LAYERS*64=128) matmul, lane-dense result.
    kv_all = (jnp.dot(enc_out, d_wkv_ref[...], preferred_element_type=jnp.float32)
              + d_bkv_ref[...])

    # ---- decoder stack ----
    x = dec_x
    for l in range(N_LAYERS):
        qkv = jnp.dot(x, d_wqkv_ref[l], preferred_element_type=jnp.float32) + d_bqkv_ref[l]
        x, sattn = _mha_block(qkv[:, :HK], qkv[:, HK:2 * HK], qkv[:, 2 * HK:], self_mask,
                              d_wos_ref[l], d_bos_ref[l], x,
                              d_lnsg_ref[l], d_lnsb_ref[l], B, Lt, Lt)
        dec_self_attn_ref[l] = sattn
        qe = jnp.dot(x, d_wqe_ref[l], preferred_element_type=jnp.float32) + d_bqe_ref[l]
        base = l * 2 * HK
        x, eattn = _mha_block(qe, kv_all[:, base:base + HK], kv_all[:, base + HK:base + 2 * HK],
                              cross_mask, d_woe_ref[l], d_boe_ref[l], x,
                              d_lneg_ref[l], d_lneb_ref[l], B, Lt, Ls)
        dec_enc_attn_ref[l] = eattn
        x = _ffn_block(x, d_w1_ref[l], d_b1_ref[l], d_w2_ref[l], d_b2_ref[l],
                       d_lnfg_ref[l], d_lnfb_ref[l])

    # final vocab projection (bias-free), fused into the same kernel
    logits_ref[...] = jnp.dot(x, proj_w_ref[...], preferred_element_type=jnp.float32)


def transformer_forward(params, enc_inputs, dec_inputs):
    B, Ls = enc_inputs.shape
    _, Lt = dec_inputs.shape
    enc_flat = enc_inputs.reshape(B * Ls, 1)     # (rows, 1) form for one-hot compare
    dec_flat = dec_inputs.reshape(B * Lt, 1)
    e, d = params["enc"], params["dec"]
    logits, enc_attn, dec_self_attn, dec_enc_attn = pl.pallas_call(
        functools.partial(_transformer_kernel, B=B, Ls=Ls, Lt=Lt),
        out_shape=(
            jax.ShapeDtypeStruct((B * Lt, TGT_VOCAB), jnp.float32),
            jax.ShapeDtypeStruct((N_LAYERS, B, N_HEADS, Ls, Ls), jnp.float32),
            jax.ShapeDtypeStruct((N_LAYERS, B, N_HEADS, Lt, Lt), jnp.float32),
            jax.ShapeDtypeStruct((N_LAYERS, B, N_HEADS, Lt, Ls), jnp.float32),
        ),
    )(enc_inputs, dec_inputs, enc_flat, dec_flat,
      params["src_emb"], params["tgt_emb"], params["pe"],
      e["wqkv"], e["bqkv"], e["wo"], e["bo"], e["ln1g"], e["ln1b"],
      e["w1"], e["b1"], e["w2"], e["b2"], e["ln2g"], e["ln2b"],
      d["wqkv"], d["bqkv"], d["wo_s"], d["bo_s"], d["ln_sg"], d["ln_sb"],
      d["wq_e"], d["bq_e"], d["wkv_all"], d["bkv_all"], d["wo_e"], d["bo_e"],
      d["ln_eg"], d["ln_eb"],
      d["w1"], d["b1"], d["w2"], d["b2"], d["ln_fg"], d["ln_fb"],
      d["proj_w"])
    # attention probs already in the PyTorch (B, H, Lq, Lk) layout; just split layers.
    return (logits,
            [enc_attn[l] for l in range(N_LAYERS)],
            [dec_self_attn[l] for l in range(N_LAYERS)],
            [dec_enc_attn[l] for l in range(N_LAYERS)])


# ============================= parameter init =================================


def _uniform(key, shape, bound):
    return jax.random.uniform(key, shape, jnp.float32, -bound, bound)


def _init_linear_t(key, in_d, out_d):
    # nn.Linear default init; weight stored pre-transposed (in, out).
    kw, kb = jax.random.split(key)
    bound = 1.0 / math.sqrt(in_d)
    return _uniform(kw, (in_d, out_d), bound), _uniform(kb, (1, out_d), bound)


def _init_attn(key):
    ks = jax.random.split(key, 4)
    wq, bq = _init_linear_t(ks[0], D_MODEL, HK)
    wk, bk = _init_linear_t(ks[1], D_MODEL, HK)
    wv, bv = _init_linear_t(ks[2], D_MODEL, HV)
    wo, bo = _init_linear_t(ks[3], HV, D_MODEL)
    return dict(wq=wq, bq=bq, wk=wk, bk=bk, wv=wv, bv=bv, wo=wo, bo=bo,
                ln_g=jnp.ones((1, D_MODEL), jnp.float32),
                ln_b=jnp.zeros((1, D_MODEL), jnp.float32))


def _init_ffn(key):
    k1, k2 = jax.random.split(key)
    w1, b1 = _init_linear_t(k1, D_MODEL, D_FF)   # Conv1d(d_model->d_ff, k=1)
    w2, b2 = _init_linear_t(k2, D_FF, D_MODEL)   # Conv1d(d_ff->d_model, k=1)
    return dict(w1=w1, b1=b1, w2=w2, b2=b2,
                ln_g=jnp.ones((1, D_MODEL), jnp.float32),
                ln_b=jnp.zeros((1, D_MODEL), jnp.float32))


def positional_encoding_table():
    pos = jnp.arange(MAX_LEN, dtype=jnp.float32)[:, None]
    div = jnp.exp(
        jnp.arange(0, D_MODEL, 2, dtype=jnp.float32) * (-math.log(10000.0) / D_MODEL))
    pe = jnp.zeros((MAX_LEN, D_MODEL), jnp.float32)
    pe = pe.at[:, 0::2].set(jnp.sin(pos * div))
    pe = pe.at[:, 1::2].set(jnp.cos(pos * div))
    return pe


def init_params(key):
    k_src, k_tgt, k_proj, k_enc, k_dec = jax.random.split(key, 5)
    scale = 1.0 / math.sqrt(D_K)   # folded into Q weights/biases (scores = QK^T/sqrt(dk))

    enc_sa, enc_ff = [], []
    for k in jax.random.split(k_enc, N_LAYERS):
        ka, kf = jax.random.split(k)
        enc_sa.append(_init_attn(ka))
        enc_ff.append(_init_ffn(kf))
    enc = dict(
        wqkv=jnp.stack([jnp.concatenate([a["wq"] * scale, a["wk"], a["wv"]], axis=1)
                        for a in enc_sa]),
        bqkv=jnp.stack([jnp.concatenate([a["bq"] * scale, a["bk"], a["bv"]], axis=1)
                        for a in enc_sa]),
        wo=jnp.stack([a["wo"] for a in enc_sa]),
        bo=jnp.stack([a["bo"] for a in enc_sa]),
        ln1g=jnp.stack([a["ln_g"] for a in enc_sa]),
        ln1b=jnp.stack([a["ln_b"] for a in enc_sa]),
        w1=jnp.stack([f["w1"] for f in enc_ff]),
        b1=jnp.stack([f["b1"] for f in enc_ff]),
        w2=jnp.stack([f["w2"] for f in enc_ff]),
        b2=jnp.stack([f["b2"] for f in enc_ff]),
        ln2g=jnp.stack([f["ln_g"] for f in enc_ff]),
        ln2b=jnp.stack([f["ln_b"] for f in enc_ff]),
    )

    dec_sa, dec_ea, dec_ff = [], [], []
    for k in jax.random.split(k_dec, N_LAYERS):
        ka, kb, kf = jax.random.split(k, 3)
        dec_sa.append(_init_attn(ka))
        dec_ea.append(_init_attn(kb))
        dec_ff.append(_init_ffn(kf))
    proj_w = _uniform(k_proj, (D_MODEL, TGT_VOCAB), 1.0 / math.sqrt(D_MODEL))
    dec = dict(
        wqkv=jnp.stack([jnp.concatenate([a["wq"] * scale, a["wk"], a["wv"]], axis=1)
                        for a in dec_sa]),
        bqkv=jnp.stack([jnp.concatenate([a["bq"] * scale, a["bk"], a["bv"]], axis=1)
                        for a in dec_sa]),
        wo_s=jnp.stack([a["wo"] for a in dec_sa]),
        bo_s=jnp.stack([a["bo"] for a in dec_sa]),
        ln_sg=jnp.stack([a["ln_g"] for a in dec_sa]),
        ln_sb=jnp.stack([a["ln_b"] for a in dec_sa]),
        wq_e=jnp.stack([a["wq"] * scale for a in dec_ea]),
        bq_e=jnp.stack([a["bq"] * scale for a in dec_ea]),
        # layer-invariant cross-attn K/V, concatenated over layers: (32, 128)
        wkv_all=jnp.concatenate(
            [jnp.concatenate([a["wk"], a["wv"]], axis=1) for a in dec_ea], axis=1),
        bkv_all=jnp.concatenate(
            [jnp.concatenate([a["bk"], a["bv"]], axis=1) for a in dec_ea], axis=1),
        wo_e=jnp.stack([a["wo"] for a in dec_ea]),
        bo_e=jnp.stack([a["bo"] for a in dec_ea]),
        ln_eg=jnp.stack([a["ln_g"] for a in dec_ea]),
        ln_eb=jnp.stack([a["ln_b"] for a in dec_ea]),
        w1=jnp.stack([f["w1"] for f in dec_ff]),
        b1=jnp.stack([f["b1"] for f in dec_ff]),
        w2=jnp.stack([f["w2"] for f in dec_ff]),
        b2=jnp.stack([f["b2"] for f in dec_ff]),
        ln_fg=jnp.stack([f["ln_g"] for f in dec_ff]),
        ln_fb=jnp.stack([f["ln_b"] for f in dec_ff]),
        proj_w=proj_w,
    )
    return dict(
        src_emb=jax.random.normal(k_src, (SRC_VOCAB, D_MODEL), jnp.float32),
        tgt_emb=jax.random.normal(k_tgt, (TGT_VOCAB, D_MODEL), jnp.float32),
        pe=positional_encoding_table(),
        enc=enc, dec=dec,
    )


# =================================== main =====================================

if __name__ == "__main__":
    key = jax.random.PRNGKey(0)
    kp, ke, kd = jax.random.split(key, 3)
    params = init_params(kp)

    B, SRC_LEN, TGT_LEN = 2, 8, 8
    enc_inputs = jax.random.randint(ke, (B, SRC_LEN), 0, SRC_VOCAB, dtype=jnp.int32)
    dec_inputs = jax.random.randint(kd, (B, TGT_LEN), 0, TGT_VOCAB, dtype=jnp.int32)

    fwd = jax.jit(transformer_forward)
    logits, enc_self_attns, dec_self_attns, dec_enc_attns = fwd(
        params, enc_inputs, dec_inputs)
    jax.block_until_ready(logits)

    assert logits.shape == (B * TGT_LEN, TGT_VOCAB)
    assert len(enc_self_attns) == N_LAYERS
    assert len(dec_self_attns) == N_LAYERS
    assert len(dec_enc_attns) == N_LAYERS
    assert enc_self_attns[0].shape == (B, N_HEADS, SRC_LEN, SRC_LEN)
    assert dec_self_attns[0].shape == (B, N_HEADS, TGT_LEN, TGT_LEN)
    assert dec_enc_attns[0].shape == (B, N_HEADS, TGT_LEN, SRC_LEN)
    print("KERNEL_OK")
</pallas_src>

<mosaic_0001>
module attributes {stable_mosaic.version = 11 : i64} {
  func.func @_transformer_kernel(%arg0: memref<2x8xi32, #tpu.memory_space<vmem>>, %arg1: memref<2x8xi32, #tpu.memory_space<vmem>>, %arg2: memref<16x1xi32, #tpu.memory_space<vmem>>, %arg3: memref<16x1xi32, #tpu.memory_space<vmem>>, %arg4: memref<16x32xf32, #tpu.memory_space<vmem>>, %arg5: memref<16x32xf32, #tpu.memory_space<vmem>>, %arg6: memref<64x32xf32, #tpu.memory_space<vmem>>, %arg7: memref<2x32x96xf32, #tpu.memory_space<vmem>>, %arg8: memref<2x1x96xf32, #tpu.memory_space<vmem>>, %arg9: memref<2x32x32xf32, #tpu.memory_space<vmem>>, %arg10: memref<2x1x32xf32, #tpu.memory_space<vmem>>, %arg11: memref<2x1x32xf32, #tpu.memory_space<vmem>>, %arg12: memref<2x1x32xf32, #tpu.memory_space<vmem>>, %arg13: memref<2x32x64xf32, #tpu.memory_space<vmem>>, %arg14: memref<2x1x64xf32, #tpu.memory_space<vmem>>, %arg15: memref<2x64x32xf32, #tpu.memory_space<vmem>>, %arg16: memref<2x1x32xf32, #tpu.memory_space<vmem>>, %arg17: memref<2x1x32xf32, #tpu.memory_space<vmem>>, %arg18: memref<2x1x32xf32, #tpu.memory_space<vmem>>, %arg19: memref<2x32x96xf32, #tpu.memory_space<vmem>>, %arg20: memref<2x1x96xf32, #tpu.memory_space<vmem>>, %arg21: memref<2x32x32xf32, #tpu.memory_space<vmem>>, %arg22: memref<2x1x32xf32, #tpu.memory_space<vmem>>, %arg23: memref<2x1x32xf32, #tpu.memory_space<vmem>>, %arg24: memref<2x1x32xf32, #tpu.memory_space<vmem>>, %arg25: memref<2x32x32xf32, #tpu.memory_space<vmem>>, %arg26: memref<2x1x32xf32, #tpu.memory_space<vmem>>, %arg27: memref<32x128xf32, #tpu.memory_space<vmem>>, %arg28: memref<1x128xf32, #tpu.memory_space<vmem>>, %arg29: memref<2x32x32xf32, #tpu.memory_space<vmem>>, %arg30: memref<2x1x32xf32, #tpu.memory_space<vmem>>, %arg31: memref<2x1x32xf32, #tpu.memory_space<vmem>>, %arg32: memref<2x1x32xf32, #tpu.memory_space<vmem>>, %arg33: memref<2x32x64xf32, #tpu.memory_space<vmem>>, %arg34: memref<2x1x64xf32, #tpu.memory_space<vmem>>, %arg35: memref<2x64x32xf32, #tpu.memory_space<vmem>>, %arg36: memref<2x1x32xf32, #tpu.memory_space<vmem>>, %arg37: memref<2x1x32xf32, #tpu.memory_space<vmem>>, %arg38: memref<2x1x32xf32, #tpu.memory_space<vmem>>, %arg39: memref<32x16xf32, #tpu.memory_space<vmem>>, %arg40: memref<16x16xf32, #tpu.memory_space<vmem>>, %arg41: memref<2x2x4x8x8xf32, #tpu.memory_space<vmem>>, %arg42: memref<2x2x4x8x8xf32, #tpu.memory_space<vmem>>, %arg43: memref<2x2x4x8x8xf32, #tpu.memory_space<vmem>>) attributes {dimension_semantics = [], scalar_prefetch = 0 : i64, scratch_operands = 0 : i64, tpu.core_type = #tpu.core_type<tc>} {
    %c0 = arith.constant 0 : index
    %c0_0 = arith.constant 0 : index
    %0 = vector.load %arg6[%c0, %c0_0] : memref<64x32xf32, #tpu.memory_space<vmem>>, vector<64x32xf32>
    %c0_1 = arith.constant 0 : index
    %c0_2 = arith.constant 0 : index
    %1 = vector.load %arg0[%c0_1, %c0_2] : memref<2x8xi32, #tpu.memory_space<vmem>>, vector<2x8xi32>
    %c0_i32 = arith.constant 0 : i32
    %2 = vector.broadcast %c0_i32 : i32 to vector<2x8xi32>
    %3 = arith.cmpi eq, %1, %2 : vector<2x8xi32>
    %c0_3 = arith.constant 0 : index
    %c0_4 = arith.constant 0 : index
    %4 = vector.load %arg1[%c0_3, %c0_4] : memref<2x8xi32, #tpu.memory_space<vmem>>, vector<2x8xi32>
    %c0_i32_5 = arith.constant 0 : i32
    %5 = vector.broadcast %c0_i32_5 : i32 to vector<2x8xi32>
    %6 = arith.cmpi eq, %4, %5 : vector<2x8xi32>
    %7 = vector.shape_cast %3 : vector<2x8xi1> to vector<2x1x8xi1>
    %8 = vector.shape_cast %7 : vector<2x1x8xi1> to vector<2x1x8xi1>
    %9 = vector.broadcast %8 : vector<2x1x8xi1> to vector<2x8x8xi1>
    %10 = tpu.iota {dimensions = array<i32: 0>} : vector<8x8xi32>
    %11 = tpu.iota {dimensions = array<i32: 1>} : vector<8x8xi32>
    %12 = arith.cmpi sgt, %11, %10 : vector<8x8xi32>
    %13 = vector.shape_cast %6 : vector<2x8xi1> to vector<2x1x8xi1>
    %14 = vector.shape_cast %13 : vector<2x1x8xi1> to vector<2x1x8xi1>
    %15 = vector.broadcast %14 : vector<2x1x8xi1> to vector<2x8x8xi1>
    %16 = vector.shape_cast %12 : vector<8x8xi1> to vector<1x8x8xi1>
    %17 = vector.shape_cast %16 : vector<1x8x8xi1> to vector<1x8x8xi1>
    %18 = vector.broadcast %17 : vector<1x8x8xi1> to vector<2x8x8xi1>
    %19 = arith.ori %15, %18 : vector<2x8x8xi1>
    %20 = vector.shape_cast %3 : vector<2x8xi1> to vector<2x1x8xi1>
    %21 = vector.shape_cast %20 : vector<2x1x8xi1> to vector<2x1x8xi1>
    %22 = vector.broadcast %21 : vector<2x1x8xi1> to vector<2x8x8xi1>
    %c0_6 = arith.constant 0 : index
    %c0_7 = arith.constant 0 : index
    %23 = vector.load %arg2[%c0_6, %c0_7] : memref<16x1xi32, #tpu.memory_space<vmem>>, vector<16x1xi32>
    %c0_8 = arith.constant 0 : index
    %c0_9 = arith.constant 0 : index
    %24 = vector.load %arg4[%c0_8, %c0_9] : memref<16x32xf32, #tpu.memory_space<vmem>>, vector<16x32xf32>
    %25 = tpu.iota {dimensions = array<i32: 1>} : vector<16x16xi32>
    %26 = vector.broadcast %23 : vector<16x1xi32> to vector<16x16xi32>
    %27 = arith.cmpi eq, %25, %26 : vector<16x16xi32>
    %cst = arith.constant 1.000000e+00 : f32
    %cst_10 = arith.constant 0.000000e+00 : f32
    %28 = vector.broadcast %cst : f32 to vector<16x16xf32>
    %29 = vector.broadcast %cst_10 : f32 to vector<16x16xf32>
    %30 = arith.select %27, %28, %29 : vector<16x16xi1>, vector<16x16xf32>
    %cst_11 = arith.constant dense<0.000000e+00> : vector<16x32xf32>
    %31 = tpu.matmul %30, %24, %cst_11 {dimension_numbers = #tpu.dot_dimension_numbers<[1], [0], [0], [1], [0, 0, 1, 1], [], []>} : vector<16x16xf32>, vector<16x32xf32>, vector<16x32xf32> -> vector<16x32xf32>
    %32 = vector.shape_cast %31 : vector<16x32xf32> to vector<2x8x32xf32>
    %33 = vector.extract_strided_slice %0 {offsets = [0, 0], sizes = [8, 32], strides = [1, 1]} : vector<64x32xf32> to vector<8x32xf32>
    %34 = vector.shape_cast %33 : vector<8x32xf32> to vector<1x8x32xf32>
    %35 = vector.broadcast %34 : vector<1x8x32xf32> to vector<2x8x32xf32>
    %36 = arith.addf %32, %35 : vector<2x8x32xf32>
    %37 = vector.shape_cast %36 : vector<2x8x32xf32> to vector<16x32xf32>
    %c0_12 = arith.constant 0 : index
    %c0_13 = arith.constant 0 : index
    %38 = vector.load %arg3[%c0_12, %c0_13] : memref<16x1xi32, #tpu.memory_space<vmem>>, vector<16x1xi32>
    %c0_14 = arith.constant 0 : index
    %c0_15 = arith.constant 0 : index
    %39 = vector.load %arg5[%c0_14, %c0_15] : memref<16x32xf32, #tpu.memory_space<vmem>>, vector<16x32xf32>
    %40 = tpu.iota {dimensions = array<i32: 1>} : vector<16x16xi32>
    %41 = vector.broadcast %38 : vector<16x1xi32> to vector<16x16xi32>
    %42 = arith.cmpi eq, %40, %41 : vector<16x16xi32>
    %cst_16 = arith.constant 1.000000e+00 : f32
    %cst_17 = arith.constant 0.000000e+00 : f32
    %43 = vector.broadcast %cst_16 : f32 to vector<16x16xf32>
    %44 = vector.broadcast %cst_17 : f32 to vector<16x16xf32>
    %45 = arith.select %42, %43, %44 : vector<16x16xi1>, vector<16x16xf32>
    %cst_18 = arith.constant dense<0.000000e+00> : vector<16x32xf32>
    %46 = tpu.matmul %45, %39, %cst_18 {dimension_numbers = #tpu.dot_dimension_numbers<[1], [0], [0], [1], [0, 0, 1, 1], [], []>} : vector<16x16xf32>, vector<16x32xf32>, vector<16x32xf32> -> vector<16x32xf32>
    %47 = vector.shape_cast %46 : vector<16x32xf32> to vector<2x8x32xf32>
    %48 = vector.extract_strided_slice %0 {offsets = [0, 0], sizes = [8, 32], strides = [1, 1]} : vector<64x32xf32> to vector<8x32xf32>
    %49 = vector.shape_cast %48 : vector<8x32xf32> to vector<1x8x32xf32>
    %50 = vector.broadcast %49 : vector<1x8x32xf32> to vector<2x8x32xf32>
    %51 = arith.addf %47, %50 : vector<2x8x32xf32>
    %52 = vector.shape_cast %51 : vector<2x8x32xf32> to vector<16x32xf32>
    %c0_19 = arith.constant 0 : index
    %c0_20 = arith.constant 0 : index
    %c0_21 = arith.constant 0 : index
    %53 = vector.load %arg7[%c0_19, %c0_20, %c0_21] : memref<2x32x96xf32, #tpu.memory_space<vmem>>, vector<1x32x96xf32>
    %54 = vector.shape_cast %53 : vector<1x32x96xf32> to vector<32x96xf32>
    %cst_22 = arith.constant dense<0.000000e+00> : vector<16x96xf32>
    %55 = tpu.matmul %37, %54, %cst_22 {dimension_numbers = #tpu.dot_dimension_numbers<[1], [0], [0], [1], [0, 0, 1, 1], [], []>} : vector<16x32xf32>, vector<32x96xf32>, vector<16x96xf32> -> vector<16x96xf32>
    %c0_23 = arith.constant 0 : index
    %c0_24 = arith.constant 0 : index
    %c0_25 = arith.constant 0 : index
    %56 = vector.load %arg8[%c0_23, %c0_24, %c0_25] : memref<2x1x96xf32, #tpu.memory_space<vmem>>, vector<1x1x96xf32>
    %57 = vector.shape_cast %56 : vector<1x1x96xf32> to vector<1x96xf32>
    %58 = vector.broadcast %57 : vector<1x96xf32> to vector<16x96xf32>
    %59 = arith.addf %55, %58 : vector<16x96xf32>
    %60 = vector.extract_strided_slice %59 {offsets = [0, 0], sizes = [16, 32], strides = [1, 1]} : vector<16x96xf32> to vector<16x32xf32>
    %61 = vector.extract_strided_slice %59 {offsets = [0, 32], sizes = [16, 32], strides = [1, 1]} : vector<16x96xf32> to vector<16x32xf32>
    %62 = vector.extract_strided_slice %59 {offsets = [0, 64], sizes = [16, 32], strides = [1, 1]} : vector<16x96xf32> to vector<16x32xf32>
    %c0_26 = arith.constant 0 : index
    %c0_27 = arith.constant 0 : index
    %c0_28 = arith.constant 0 : index
    %63 = vector.load %arg9[%c0_26, %c0_27, %c0_28] : memref<2x32x32xf32, #tpu.memory_space<vmem>>, vector<1x32x32xf32>
    %64 = vector.shape_cast %63 : vector<1x32x32xf32> to vector<32x32xf32>
    %c0_29 = arith.constant 0 : index
    %c0_30 = arith.constant 0 : index
    %c0_31 = arith.constant 0 : index
    %65 = vector.load %arg10[%c0_29, %c0_30, %c0_31] : memref<2x1x32xf32, #tpu.memory_space<vmem>>, vector<1x1x32xf32>
    %66 = vector.shape_cast %65 : vector<1x1x32xf32> to vector<1x32xf32>
    %c0_32 = arith.constant 0 : index
    %c0_33 = arith.constant 0 : index
    %c0_34 = arith.constant 0 : index
    %67 = vector.load %arg11[%c0_32, %c0_33, %c0_34] : memref<2x1x32xf32, #tpu.memory_space<vmem>>, vector<1x1x32xf32>
    %68 = vector.shape_cast %67 : vector<1x1x32xf32> to vector<1x32xf32>
    %c0_35 = arith.constant 0 : index
    %c0_36 = arith.constant 0 : index
    %c0_37 = arith.constant 0 : index
    %69 = vector.load %arg12[%c0_35, %c0_36, %c0_37] : memref<2x1x32xf32, #tpu.memory_space<vmem>>, vector<1x1x32xf32>
    %70 = vector.shape_cast %69 : vector<1x1x32xf32> to vector<1x32xf32>
    %71 = vector.broadcast %66 : vector<1x32xf32> to vector<16x32xf32>
    %72 = arith.addf %37, %71 : vector<16x32xf32>
    %73 = vector.extract_strided_slice %60 {offsets = [0, 0], sizes = [16, 8], strides = [1, 1]} : vector<16x32xf32> to vector<16x8xf32>
    %74 = vector.shape_cast %73 : vector<16x8xf32> to vector<2x8x8xf32>
    %75 = vector.extract_strided_slice %61 {offsets = [0, 0], sizes = [16, 8], strides = [1, 1]} : vector<16x32xf32> to vector<16x8xf32>
    %76 = vector.shape_cast %75 : vector<16x8xf32> to vector<2x8x8xf32>
    %77 = vector.extract_strided_slice %62 {offsets = [0, 0], sizes = [16, 8], strides = [1, 1]} : vector<16x32xf32> to vector<16x8xf32>
    %78 = vector.shape_cast %77 : vector<16x8xf32> to vector<2x8x8xf32>
    "tpu.trace_start"() <{level = 10 : i32, message = "bqd,bkd->bqk"}> : () -> ()
    %cst_38 = arith.constant dense<0.000000e+00> : vector<2x8x8xf32>
    %79 = tpu.matmul %74, %76, %cst_38 {dimension_numbers = #tpu.dot_dimension_numbers<[2], [2], [1], [1], [0, 0, 0, 1, 1, 1], [0], [0]>} : vector<2x8x8xf32>, vector<2x8x8xf32>, vector<2x8x8xf32> -> vector<2x8x8xf32>
    %cst_39 = arith.constant -1.000000e+09 : f32
    "tpu.trace_stop"() : () -> ()
    %80 = vector.broadcast %cst_39 : f32 to vector<2x8x8xf32>
    %81 = arith.select %9, %80, %79 : vector<2x8x8xi1>, vector<2x8x8xf32>
    %cst_40 = arith.constant dense<0xFF800000> : vector<2x8xf32>
    %82 = vector.multi_reduction <maximumf>, %81, %cst_40 [2] : vector<2x8x8xf32> to vector<2x8xf32>
    %83 = vector.shape_cast %82 : vector<2x8xf32> to vector<2x8x1xf32>
    %84 = vector.broadcast %83 : vector<2x8x1xf32> to vector<2x8x8xf32>
    %85 = arith.subf %81, %84 : vector<2x8x8xf32>
    %86 = math.exp %85 : vector<2x8x8xf32>
    %cst_41 = arith.constant dense<0.000000e+00> : vector<2x8xf32>
    %87 = vector.multi_reduction <add>, %86, %cst_41 [2] : vector<2x8x8xf32> to vector<2x8xf32>
    %88 = vector.shape_cast %87 : vector<2x8xf32> to vector<2x8x1xf32>
    %89 = tpu.reciprocal %88 {approx = true} : vector<2x8x1xf32> -> vector<2x8x1xf32>
    %90 = vector.broadcast %89 : vector<2x8x1xf32> to vector<2x8x8xf32>
    %91 = arith.mulf %86, %90 : vector<2x8x8xf32>
    "tpu.trace_start"() <{level = 10 : i32, message = "bqk,bkd->bqd"}> : () -> ()
    %cst_42 = arith.constant dense<0.000000e+00> : vector<2x8x8xf32>
    %92 = tpu.matmul %91, %78, %cst_42 {dimension_numbers = #tpu.dot_dimension_numbers<[2], [1], [1], [2], [0, 0, 0, 1, 1, 2], [0], [0]>} : vector<2x8x8xf32>, vector<2x8x8xf32>, vector<2x8x8xf32> -> vector<2x8x8xf32>
    "tpu.trace_stop"() : () -> ()
    %93 = vector.shape_cast %92 : vector<2x8x8xf32> to vector<16x8xf32>
    %94 = vector.extract_strided_slice %64 {offsets = [0, 0], sizes = [8, 32], strides = [1, 1]} : vector<32x32xf32> to vector<8x32xf32>
    %cst_43 = arith.constant dense<0.000000e+00> : vector<16x32xf32>
    %95 = tpu.matmul %93, %94, %cst_43 {dimension_numbers = #tpu.dot_dimension_numbers<[1], [0], [0], [1], [0, 0, 1, 1], [], []>} : vector<16x8xf32>, vector<8x32xf32>, vector<16x32xf32> -> vector<16x32xf32>
    %96 = arith.addf %72, %95 : vector<16x32xf32>
    %97 = vector.extract_strided_slice %60 {offsets = [0, 8], sizes = [16, 8], strides = [1, 1]} : vector<16x32xf32> to vector<16x8xf32>
    %98 = vector.shape_cast %97 : vector<16x8xf32> to vector<2x8x8xf32>
    %99 = vector.extract_strided_slice %61 {offsets = [0, 8], sizes = [16, 8], strides = [1, 1]} : vector<16x32xf32> to vector<16x8xf32>
    %100 = vector.shape_cast %99 : vector<16x8xf32> to vector<2x8x8xf32>
    %101 = vector.extract_strided_slice %62 {offsets = [0, 8], sizes = [16, 8], strides = [1, 1]} : vector<16x32xf32> to vector<16x8xf32>
    %102 = vector.shape_cast %101 : vector<16x8xf32> to vector<2x8x8xf32>
    "tpu.trace_start"() <{level = 10 : i32, message = "bqd,bkd->bqk"}> : () -> ()
    %cst_44 = arith.constant dense<0.000000e+00> : vector<2x8x8xf32>
    %103 = tpu.matmul %98, %100, %cst_44 {dimension_numbers = #tpu.dot_dimension_numbers<[2], [2], [1], [1], [0, 0, 0, 1, 1, 1], [0], [0]>} : vector<2x8x8xf32>, vector<2x8x8xf32>, vector<2x8x8xf32> -> vector<2x8x8xf32>
    %cst_45 = arith.constant -1.000000e+09 : f32
    "tpu.trace_stop"() : () -> ()
    %104 = vector.broadcast %cst_45 : f32 to vector<2x8x8xf32>
    %105 = arith.select %9, %104, %103 : vector<2x8x8xi1>, vector<2x8x8xf32>
    %cst_46 = arith.constant dense<0xFF800000> : vector<2x8xf32>
    %106 = vector.multi_reduction <maximumf>, %105, %cst_46 [2] : vector<2x8x8xf32> to vector<2x8xf32>
    %107 = vector.shape_cast %106 : vector<2x8xf32> to vector<2x8x1xf32>
    %108 = vector.broadcast %107 : vector<2x8x1xf32> to vector<2x8x8xf32>
    %109 = arith.subf %105, %108 : vector<2x8x8xf32>
    %110 = math.exp %109 : vector<2x8x8xf32>
    %cst_47 = arith.constant dense<0.000000e+00> : vector<2x8xf32>
    %111 = vector.multi_reduction <add>, %110, %cst_47 [2] : vector<2x8x8xf32> to vector<2x8xf32>
    %112 = vector.shape_cast %111 : vector<2x8xf32> to vector<2x8x1xf32>
    %113 = tpu.reciprocal %112 {approx = true} : vector<2x8x1xf32> -> vector<2x8x1xf32>
    %114 = vector.broadcast %113 : vector<2x8x1xf32> to vector<2x8x8xf32>
    %115 = arith.mulf %110, %114 : vector<2x8x8xf32>
    "tpu.trace_start"() <{level = 10 : i32, message = "bqk,bkd->bqd"}> : () -> ()
    %cst_48 = arith.constant dense<0.000000e+00> : vector<2x8x8xf32>
    %116 = tpu.matmul %115, %102, %cst_48 {dimension_numbers = #tpu.dot_dimension_numbers<[2], [1], [1], [2], [0, 0, 0, 1, 1, 2], [0], [0]>} : vector<2x8x8xf32>, vector<2x8x8xf32>, vector<2x8x8xf32> -> vector<2x8x8xf32>
    "tpu.trace_stop"() : () -> ()
    %117 = vector.shape_cast %116 : vector<2x8x8xf32> to vector<16x8xf32>
    %118 = vector.extract_strided_slice %64 {offsets = [8, 0], sizes = [8, 32], strides = [1, 1]} : vector<32x32xf32> to vector<8x32xf32>
    %cst_49 = arith.constant dense<0.000000e+00> : vector<16x32xf32>
    %119 = tpu.matmul %117, %118, %cst_49 {dimension_numbers = #tpu.dot_dimension_numbers<[1], [0], [0], [1], [0, 0, 1, 1], [], []>} : vector<16x8xf32>, vector<8x32xf32>, vector<16x32xf32> -> vector<16x32xf32>
    %120 = arith.addf %96, %119 : vector<16x32xf32>
    %121 = vector.extract_strided_slice %60 {offsets = [0, 16], sizes = [16, 8], strides = [1, 1]} : vector<16x32xf32> to vector<16x8xf32>
    %122 = vector.shape_cast %121 : vector<16x8xf32> to vector<2x8x8xf32>
    %123 = vector.extract_strided_slice %61 {offsets = [0, 16], sizes = [16, 8], strides = [1, 1]} : vector<16x32xf32> to vector<16x8xf32>
    %124 = vector.shape_cast %123 : vector<16x8xf32> to vector<2x8x8xf32>
    %125 = vector.extract_strided_slice %62 {offsets = [0, 16], sizes = [16, 8], strides = [1, 1]} : vector<16x32xf32> to vector<16x8xf32>
    %126 = vector.shape_cast %125 : vector<16x8xf32> to vector<2x8x8xf32>
    "tpu.trace_start"() <{level = 10 : i32, message = "bqd,bkd->bqk"}> : () -> ()
    %cst_50 = arith.constant dense<0.000000e+00> : vector<2x8x8xf32>
    %127 = tpu.matmul %122, %124, %cst_50 {dimension_numbers = #tpu.dot_dimension_numbers<[2], [2], [1], [1], [0, 0, 0, 1, 1, 1], [0], [0]>} : vector<2x8x8xf32>, vector<2x8x8xf32>, vector<2x8x8xf32> -> vector<2x8x8xf32>
    %cst_51 = arith.constant -1.000000e+09 : f32
    "tpu.trace_stop"() : () -> ()
    %128 = vector.broadcast %cst_51 : f32 to vector<2x8x8xf32>
    %129 = arith.select %9, %128, %127 : vector<2x8x8xi1>, vector<2x8x8xf32>
    %cst_52 = arith.constant dense<0xFF800000> : vector<2x8xf32>
    %130 = vector.multi_reduction <maximumf>, %129, %cst_52 [2] : vector<2x8x8xf32> to vector<2x8xf32>
    %131 = vector.shape_cast %130 : vector<2x8xf32> to vector<2x8x1xf32>
    %132 = vector.broadcast %131 : vector<2x8x1xf32> to vector<2x8x8xf32>
    %133 = arith.subf %129, %132 : vector<2x8x8xf32>
    %134 = math.exp %133 : vector<2x8x8xf32>
    %cst_53 = arith.constant dense<0.000000e+00> : vector<2x8xf32>
    %135 = vector.multi_reduction <add>, %134, %cst_53 [2] : vector<2x8x8xf32> to vector<2x8xf32>
    %136 = vector.shape_cast %135 : vector<2x8xf32> to vector<2x8x1xf32>
    %137 = tpu.reciprocal %136 {approx = true} : vector<2x8x1xf32> -> vector<2x8x1xf32>
    %138 = vector.broadcast %137 : vector<2x8x1xf32> to vector<2x8x8xf32>
    %139 = arith.mulf %134, %138 : vector<2x8x8xf32>
    "tpu.trace_start"() <{level = 10 : i32, message = "bqk,bkd->bqd"}> : () -> ()
    %cst_54 = arith.constant dense<0.000000e+00> : vector<2x8x8xf32>
    %140 = tpu.matmul %139, %126, %cst_54 {dimension_numbers = #tpu.dot_dimension_numbers<[2], [1], [1], [2], [0, 0, 0, 1, 1, 2], [0], [0]>} : vector<2x8x8xf32>, vector<2x8x8xf32>, vector<2x8x8xf32> -> vector<2x8x8xf32>
    "tpu.trace_stop"() : () -> ()
    %141 = vector.shape_cast %140 : vector<2x8x8xf32> to vector<16x8xf32>
    %142 = vector.extract_strided_slice %64 {offsets = [16, 0], sizes = [8, 32], strides = [1, 1]} : vector<32x32xf32> to vector<8x32xf32>
    %cst_55 = arith.constant dense<0.000000e+00> : vector<16x32xf32>
    %143 = tpu.matmul %141, %142, %cst_55 {dimension_numbers = #tpu.dot_dimension_numbers<[1], [0], [0], [1], [0, 0, 1, 1], [], []>} : vector<16x8xf32>, vector<8x32xf32>, vector<16x32xf32> -> vector<16x32xf32>
    %144 = arith.addf %120, %143 : vector<16x32xf32>
    %145 = vector.extract_strided_slice %60 {offsets = [0, 24], sizes = [16, 8], strides = [1, 1]} : vector<16x32xf32> to vector<16x8xf32>
    %146 = vector.shape_cast %145 : vector<16x8xf32> to vector<2x8x8xf32>
    %147 = vector.extract_strided_slice %61 {offsets = [0, 24], sizes = [16, 8], strides = [1, 1]} : vector<16x32xf32> to vector<16x8xf32>
    %148 = vector.shape_cast %147 : vector<16x8xf32> to vector<2x8x8xf32>
    %149 = vector.extract_strided_slice %62 {offsets = [0, 24], sizes = [16, 8], strides = [1, 1]} : vector<16x32xf32> to vector<16x8xf32>
    %150 = vector.shape_cast %149 : vector<16x8xf32> to vector<2x8x8xf32>
    "tpu.trace_start"() <{level = 10 : i32, message = "bqd,bkd->bqk"}> : () -> ()
    %cst_56 = arith.constant dense<0.000000e+00> : vector<2x8x8xf32>
    %151 = tpu.matmul %146, %148, %cst_56 {dimension_numbers = #tpu.dot_dimension_numbers<[2], [2], [1], [1], [0, 0, 0, 1, 1, 1], [0], [0]>} : vector<2x8x8xf32>, vector<2x8x8xf32>, vector<2x8x8xf32> -> vector<2x8x8xf32>
    %cst_57 = arith.constant -1.000000e+09 : f32
    "tpu.trace_stop"() : () -> ()
    %152 = vector.broadcast %cst_57 : f32 to vector<2x8x8xf32>
    %153 = arith.select %9, %152, %151 : vector<2x8x8xi1>, vector<2x8x8xf32>
    %cst_58 = arith.constant dense<0xFF800000> : vector<2x8xf32>
    %154 = vector.multi_reduction <maximumf>, %153, %cst_58 [2] : vector<2x8x8xf32> to vector<2x8xf32>
    %155 = vector.shape_cast %154 : vector<2x8xf32> to vector<2x8x1xf32>
    %156 = vector.broadcast %155 : vector<2x8x1xf32> to vector<2x8x8xf32>
    %157 = arith.subf %153, %156 : vector<2x8x8xf32>
    %158 = math.exp %157 : vector<2x8x8xf32>
    %cst_59 = arith.constant dense<0.000000e+00> : vector<2x8xf32>
    %159 = vector.multi_reduction <add>, %158, %cst_59 [2] : vector<2x8x8xf32> to vector<2x8xf32>
    %160 = vector.shape_cast %159 : vector<2x8xf32> to vector<2x8x1xf32>
    %161 = tpu.reciprocal %160 {approx = true} : vector<2x8x1xf32> -> vector<2x8x1xf32>
    %162 = vector.broadcast %161 : vector<2x8x1xf32> to vector<2x8x8xf32>
    %163 = arith.mulf %158, %162 : vector<2x8x8xf32>
    "tpu.trace_start"() <{level = 10 : i32, message = "bqk,bkd->bqd"}> : () -> ()
    %cst_60 = arith.constant dense<0.000000e+00> : vector<2x8x8xf32>
    %164 = tpu.matmul %163, %150, %cst_60 {dimension_numbers = #tpu.dot_dimension_numbers<[2], [1], [1], [2], [0, 0, 0, 1, 1, 2], [0], [0]>} : vector<2x8x8xf32>, vector<2x8x8xf32>, vector<2x8x8xf32> -> vector<2x8x8xf32>
    "tpu.trace_stop"() : () -> ()
    %165 = vector.shape_cast %164 : vector<2x8x8xf32> to vector<16x8xf32>
    %166 = vector.extract_strided_slice %64 {offsets = [24, 0], sizes = [8, 32], strides = [1, 1]} : vector<32x32xf32> to vector<8x32xf32>
    %cst_61 = arith.constant dense<0.000000e+00> : vector<16x32xf32>
    %167 = tpu.matmul %165, %166, %cst_61 {dimension_numbers = #tpu.dot_dimension_numbers<[1], [0], [0], [1], [0, 0, 1, 1], [], []>} : vector<16x8xf32>, vector<8x32xf32>, vector<16x32xf32> -> vector<16x32xf32>
    %168 = arith.addf %144, %167 : vector<16x32xf32>
    %169 = vector.shape_cast %91 : vector<2x8x8xf32> to vector<2x1x8x8xf32>
    %170 = vector.shape_cast %115 : vector<2x8x8xf32> to vector<2x1x8x8xf32>
    %171 = vector.shape_cast %139 : vector<2x8x8xf32> to vector<2x1x8x8xf32>
    %172 = vector.shape_cast %163 : vector<2x8x8xf32> to vector<2x1x8x8xf32>
    %173 = tpu.concatenate %169, %170, %171, %172 in 1 : vector<2x1x8x8xf32>, vector<2x1x8x8xf32>, vector<2x1x8x8xf32>, vector<2x1x8x8xf32> -> vector<2x4x8x8xf32>
    %cst_62 = arith.constant dense<0.000000e+00> : vector<16xf32>
    %174 = vector.multi_reduction <add>, %168, %cst_62 [1] : vector<16x32xf32> to vector<16xf32>
    %175 = vector.shape_cast %174 : vector<16xf32> to vector<16x1xf32>
    %cst_63 = arith.constant 3.200000e+01 : f32
    %176 = vector.broadcast %cst_63 : f32 to vector<16x1xf32>
    %177 = arith.divf %175, %176 : vector<16x1xf32>
    %178 = vector.broadcast %177 : vector<16x1xf32> to vector<16x32xf32>
    %179 = arith.subf %168, %178 : vector<16x32xf32>
    %180 = arith.mulf %179, %179 : vector<16x32xf32>
    %cst_64 = arith.constant dense<0.000000e+00> : vector<16xf32>
    %181 = vector.multi_reduction <add>, %180, %cst_64 [1] : vector<16x32xf32> to vector<16xf32>
    %182 = vector.shape_cast %181 : vector<16xf32> to vector<16x1xf32>
    %cst_65 = arith.constant 3.200000e+01 : f32
    %183 = vector.broadcast %cst_65 : f32 to vector<16x1xf32>
    %184 = arith.divf %182, %183 : vector<16x1xf32>
    %185 = vector.broadcast %177 : vector<16x1xf32> to vector<16x32xf32>
    %186 = arith.subf %168, %185 : vector<16x32xf32>
    %cst_66 = arith.constant 9.99999974E-6 : f32
    %187 = vector.broadcast %cst_66 : f32 to vector<16x1xf32>
    %188 = arith.addf %184, %187 : vector<16x1xf32>
    %189 = math.rsqrt %188 : vector<16x1xf32>
    %190 = vector.broadcast %189 : vector<16x1xf32> to vector<16x32xf32>
    %191 = arith.mulf %186, %190 : vector<16x32xf32>
    %192 = vector.broadcast %68 : vector<1x32xf32> to vector<16x32xf32>
    %193 = arith.mulf %191, %192 : vector<16x32xf32>
    %194 = vector.broadcast %70 : vector<1x32xf32> to vector<16x32xf32>
    %195 = arith.addf %193, %194 : vector<16x32xf32>
    %c0_67 = arith.constant 0 : index
    %c0_68 = arith.constant 0 : index
    %c0_69 = arith.constant 0 : index
    %c0_70 = arith.constant 0 : index
    %c0_71 = arith.constant 0 : index
    %196 = vector.load %arg41[%c0_67, %c0_68, %c0_69, %c0_70, %c0_71] : memref<2x2x4x8x8xf32, #tpu.memory_space<vmem>>, vector<1x2x4x8x8xf32>
    %197 = vector.shape_cast %196 : vector<1x2x4x8x8xf32> to vector<2x4x8x8xf32>
    %198 = vector.shape_cast %173 : vector<2x4x8x8xf32> to vector<1x2x4x8x8xf32>
    tpu.vector_store %arg41[%c0_67, %c0_68, %c0_69, %c0_70, %c0_71], %198 {strides = array<i32>} : memref<2x2x4x8x8xf32, #tpu.memory_space<vmem>>, vector<1x2x4x8x8xf32>,
    %c0_72 = arith.constant 0 : index
    %c0_73 = arith.constant 0 : index
    %c0_74 = arith.constant 0 : index
    %199 = vector.load %arg13[%c0_72, %c0_73, %c0_74] : memref<2x32x64xf32, #tpu.memory_space<vmem>>, vector<1x32x64xf32>
    %200 = vector.shape_cast %199 : vector<1x32x64xf32> to vector<32x64xf32>
    %c0_75 = arith.constant 0 : index
    %c0_76 = arith.constant 0 : index
    %c0_77 = arith.constant 0 : index
    %201 = vector.load %arg14[%c0_75, %c0_76, %c0_77] : memref<2x1x64xf32, #tpu.memory_space<vmem>>, vector<1x1x64xf32>
    %202 = vector.shape_cast %201 : vector<1x1x64xf32> to vector<1x64xf32>
    %c0_78 = arith.constant 0 : index
    %c0_79 = arith.constant 0 : index
    %c0_80 = arith.constant 0 : index
    %203 = vector.load %arg15[%c0_78, %c0_79, %c0_80] : memref<2x64x32xf32, #tpu.memory_space<vmem>>, vector<1x64x32xf32>
    %204 = vector.shape_cast %203 : vector<1x64x32xf32> to vector<64x32xf32>
    %c0_81 = arith.constant 0 : index
    %c0_82 = arith.constant 0 : index
    %c0_83 = arith.constant 0 : index
    %205 = vector.load %arg16[%c0_81, %c0_82, %c0_83] : memref<2x1x32xf32, #tpu.memory_space<vmem>>, vector<1x1x32xf32>
    %206 = vector.shape_cast %205 : vector<1x1x32xf32> to vector<1x32xf32>
    %c0_84 = arith.constant 0 : index
    %c0_85 = arith.constant 0 : index
    %c0_86 = arith.constant 0 : index
    %207 = vector.load %arg17[%c0_84, %c0_85, %c0_86] : memref<2x1x32xf32, #tpu.memory_space<vmem>>, vector<1x1x32xf32>
    %208 = vector.shape_cast %207 : vector<1x1x32xf32> to vector<1x32xf32>
    %c0_87 = arith.constant 0 : index
    %c0_88 = arith.constant 0 : index
    %c0_89 = arith.constant 0 : index
    %209 = vector.load %arg18[%c0_87, %c0_88, %c0_89] : memref<2x1x32xf32, #tpu.memory_space<vmem>>, vector<1x1x32xf32>
    %210 = vector.shape_cast %209 : vector<1x1x32xf32> to vector<1x32xf32>
    %cst_90 = arith.constant dense<0.000000e+00> : vector<16x64xf32>
    %211 = tpu.matmul %195, %200, %cst_90 {dimension_numbers = #tpu.dot_dimension_numbers<[1], [0], [0], [1], [0, 0, 1, 1], [], []>} : vector<16x32xf32>, vector<32x64xf32>, vector<16x64xf32> -> vector<16x64xf32>
    %212 = vector.broadcast %202 : vector<1x64xf32> to vector<16x64xf32>
    %213 = arith.addf %211, %212 : vector<16x64xf32>
    %cst_91 = arith.constant 0.000000e+00 : f32
    %214 = vector.broadcast %cst_91 : f32 to vector<16x64xf32>
    %215 = arith.maximumf %213, %214 : vector<16x64xf32>
    %cst_92 = arith.constant dense<0.000000e+00> : vector<16x32xf32>
    %216 = tpu.matmul %215, %204, %cst_92 {dimension_numbers = #tpu.dot_dimension_numbers<[1], [0], [0], [1], [0, 0, 1, 1], [], []>} : vector<16x64xf32>, vector<64x32xf32>, vector<16x32xf32> -> vector<16x32xf32>
    %217 = vector.broadcast %206 : vector<1x32xf32> to vector<16x32xf32>
    %218 = arith.addf %216, %217 : vector<16x32xf32>
    %219 = arith.addf %218, %195 : vector<16x32xf32>
    %cst_93 = arith.constant dense<0.000000e+00> : vector<16xf32>
    %220 = vector.multi_reduction <add>, %219, %cst_93 [1] : vector<16x32xf32> to vector<16xf32>
    %221 = vector.shape_cast %220 : vector<16xf32> to vector<16x1xf32>
    %cst_94 = arith.constant 3.200000e+01 : f32
    %222 = vector.broadcast %cst_94 : f32 to vector<16x1xf32>
    %223 = arith.divf %221, %222 : vector<16x1xf32>
    %224 = vector.broadcast %223 : vector<16x1xf32> to vector<16x32xf32>
    %225 = arith.subf %219, %224 : vector<16x32xf32>
    %226 = arith.mulf %225, %225 : vector<16x32xf32>
    %cst_95 = arith.constant dense<0.000000e+00> : vector<16xf32>
    %227 = vector.multi_reduction <add>, %226, %cst_95 [1] : vector<16x32xf32> to vector<16xf32>
    %228 = vector.shape_cast %227 : vector<16xf32> to vector<16x1xf32>
    %cst_96 = arith.constant 3.200000e+01 : f32
    %229 = vector.broadcast %cst_96 : f32 to vector<16x1xf32>
    %230 = arith.divf %228, %229 : vector<16x1xf32>
    %231 = vector.broadcast %223 : vector<16x1xf32> to vector<16x32xf32>
    %232 = arith.subf %219, %231 : vector<16x32xf32>
    %cst_97 = arith.constant 9.99999974E-6 : f32
    %233 = vector.broadcast %cst_97 : f32 to vector<16x1xf32>
    %234 = arith.addf %230, %233 : vector<16x1xf32>
    %235 = math.rsqrt %234 : vector<16x1xf32>
    %236 = vector.broadcast %235 : vector<16x1xf32> to vector<16x32xf32>
    %237 = arith.mulf %232, %236 : vector<16x32xf32>
    %238 = vector.broadcast %208 : vector<1x32xf32> to vector<16x32xf32>
    %239 = arith.mulf %237, %238 : vector<16x32xf32>
    %240 = vector.broadcast %210 : vector<1x32xf32> to vector<16x32xf32>
    %241 = arith.addf %239, %240 : vector<16x32xf32>
    %c1 = arith.constant 1 : index
    %c0_98 = arith.constant 0 : index
    %c0_99 = arith.constant 0 : index
    %242 = vector.load %arg7[%c1, %c0_98, %c0_99] : memref<2x32x96xf32, #tpu.memory_space<vmem>>, vector<1x32x96xf32>
    %243 = vector.shape_cast %242 : vector<1x32x96xf32> to vector<32x96xf32>
    %cst_100 = arith.constant dense<0.000000e+00> : vector<16x96xf32>
    %244 = tpu.matmul %241, %243, %cst_100 {dimension_numbers = #tpu.dot_dimension_numbers<[1], [0], [0], [1], [0, 0, 1, 1], [], []>} : vector<16x32xf32>, vector<32x96xf32>, vector<16x96xf32> -> vector<16x96xf32>
    %c1_101 = arith.constant 1 : index
    %c0_102 = arith.constant 0 : index
    %c0_103 = arith.constant 0 : index
    %245 = vector.load %arg8[%c1_101, %c0_102, %c0_103] : memref<2x1x96xf32, #tpu.memory_space<vmem>>, vector<1x1x96xf32>
    %246 = vector.shape_cast %245 : vector<1x1x96xf32> to vector<1x96xf32>
    %247 = vector.broadcast %246 : vector<1x96xf32> to vector<16x96xf32>
    %248 = arith.addf %244, %247 : vector<16x96xf32>
    %249 = vector.extract_strided_slice %248 {offsets = [0, 0], sizes = [16, 32], strides = [1, 1]} : vector<16x96xf32> to vector<16x32xf32>
    %250 = vector.extract_strided_slice %248 {offsets = [0, 32], sizes = [16, 32], strides = [1, 1]} : vector<16x96xf32> to vector<16x32xf32>
    %251 = vector.extract_strided_slice %248 {offsets = [0, 64], sizes = [16, 32], strides = [1, 1]} : vector<16x96xf32> to vector<16x32xf32>
    %c1_104 = arith.constant 1 : index
    %c0_105 = arith.constant 0 : index
    %c0_106 = arith.constant 0 : index
    %252 = vector.load %arg9[%c1_104, %c0_105, %c0_106] : memref<2x32x32xf32, #tpu.memory_space<vmem>>, vector<1x32x32xf32>
    %253 = vector.shape_cast %252 : vector<1x32x32xf32> to vector<32x32xf32>
    %c1_107 = arith.constant 1 : index
    %c0_108 = arith.constant 0 : index
    %c0_109 = arith.constant 0 : index
    %254 = vector.load %arg10[%c1_107, %c0_108, %c0_109] : memref<2x1x32xf32, #tpu.memory_space<vmem>>, vector<1x1x32xf32>
    %255 = vector.shape_cast %254 : vector<1x1x32xf32> to vector<1x32xf32>
    %c1_110 = arith.constant 1 : index
    %c0_111 = arith.constant 0 : index
    %c0_112 = arith.constant 0 : index
    %256 = vector.load %arg11[%c1_110, %c0_111, %c0_112] : memref<2x1x32xf32, #tpu.memory_space<vmem>>, vector<1x1x32xf32>
    %257 = vector.shape_cast %256 : vector<1x1x32xf32> to vector<1x32xf32>
    %c1_113 = arith.constant 1 : index
    %c0_114 = arith.constant 0 : index
    %c0_115 = arith.constant 0 : index
    %258 = vector.load %arg12[%c1_113, %c0_114, %c0_115] : memref<2x1x32xf32, #tpu.memory_space<vmem>>, vector<1x1x32xf32>
    %259 = vector.shape_cast %258 : vector<1x1x32xf32> to vector<1x32xf32>
    %260 = vector.broadcast %255 : vector<1x32xf32> to vector<16x32xf32>
    %261 = arith.addf %241, %260 : vector<16x32xf32>
    %262 = vector.extract_strided_slice %249 {offsets = [0, 0], sizes = [16, 8], strides = [1, 1]} : vector<16x32xf32> to vector<16x8xf32>
    %263 = vector.shape_cast %262 : vector<16x8xf32> to vector<2x8x8xf32>
    %264 = vector.extract_strided_slice %250 {offsets = [0, 0], sizes = [16, 8], strides = [1, 1]} : vector<16x32xf32> to vector<16x8xf32>
    %265 = vector.shape_cast %264 : vector<16x8xf32> to vector<2x8x8xf32>
    %266 = vector.extract_strided_slice %251 {offsets = [0, 0], sizes = [16, 8], strides = [1, 1]} : vector<16x32xf32> to vector<16x8xf32>
    %267 = vector.shape_cast %266 : vector<16x8xf32> to vector<2x8x8xf32>
    "tpu.trace_start"() <{level = 10 : i32, message = "bqd,bkd->bqk"}> : () -> ()
    %cst_116 = arith.constant dense<0.000000e+00> : vector<2x8x8xf32>
    %268 = tpu.matmul %263, %265, %cst_116 {dimension_numbers = #tpu.dot_dimension_numbers<[2], [2], [1], [1], [0, 0, 0, 1, 1, 1], [0], [0]>} : vector<2x8x8xf32>, vector<2x8x8xf32>, vector<2x8x8xf32> -> vector<2x8x8xf32>
    %cst_117 = arith.constant -1.000000e+09 : f32
    "tpu.trace_stop"() : () -> ()
    %269 = vector.broadcast %cst_117 : f32 to vector<2x8x8xf32>
    %270 = arith.select %9, %269, %268 : vector<2x8x8xi1>, vector<2x8x8xf32>
    %cst_118 = arith.constant dense<0xFF800000> : vector<2x8xf32>
    %271 = vector.multi_reduction <maximumf>, %270, %cst_118 [2] : vector<2x8x8xf32> to vector<2x8xf32>
    %272 = vector.shape_cast %271 : vector<2x8xf32> to vector<2x8x1xf32>
    %273 = vector.broadcast %272 : vector<2x8x1xf32> to vector<2x8x8xf32>
    %274 = arith.subf %270, %273 : vector<2x8x8xf32>
    %275 = math.exp %274 : vector<2x8x8xf32>
    %cst_119 = arith.constant dense<0.000000e+00> : vector<2x8xf32>
    %276 = vector.multi_reduction <add>, %275, %cst_119 [2] : vector<2x8x8xf32> to vector<2x8xf32>
    %277 = vector.shape_cast %276 : vector<2x8xf32> to vector<2x8x1xf32>
    %278 = tpu.reciprocal %277 {approx = true} : vector<2x8x1xf32> -> vector<2x8x1xf32>
    %279 = vector.broadcast %278 : vector<2x8x1xf32> to vector<2x8x8xf32>
    %280 = arith.mulf %275, %279 : vector<2x8x8xf32>
    "tpu.trace_start"() <{level = 10 : i32, message = "bqk,bkd->bqd"}> : () -> ()
    %cst_120 = arith.constant dense<0.000000e+00> : vector<2x8x8xf32>
    %281 = tpu.matmul %280, %267, %cst_120 {dimension_numbers = #tpu.dot_dimension_numbers<[2], [1], [1], [2], [0, 0, 0, 1, 1, 2], [0], [0]>} : vector<2x8x8xf32>, vector<2x8x8xf32>, vector<2x8x8xf32> -> vector<2x8x8xf32>
    "tpu.trace_stop"() : () -> ()
    %282 = vector.shape_cast %281 : vector<2x8x8xf32> to vector<16x8xf32>
    %283 = vector.extract_strided_slice %253 {offsets = [0, 0], sizes = [8, 32], strides = [1, 1]} : vector<32x32xf32> to vector<8x32xf32>
    %cst_121 = arith.constant dense<0.000000e+00> : vector<16x32xf32>
    %284 = tpu.matmul %282, %283, %cst_121 {dimension_numbers = #tpu.dot_dimension_numbers<[1], [0], [0], [1], [0, 0, 1, 1], [], []>} : vector<16x8xf32>, vector<8x32xf32>, vector<16x32xf32> -> vector<16x32xf32>
    %285 = arith.addf %261, %284 : vector<16x32xf32>
    %286 = vector.extract_strided_slice %249 {offsets = [0, 8], sizes = [16, 8], strides = [1, 1]} : vector<16x32xf32> to vector<16x8xf32>
    %287 = vector.shape_cast %286 : vector<16x8xf32> to vector<2x8x8xf32>
    %288 = vector.extract_strided_slice %250 {offsets = [0, 8], sizes = [16, 8], strides = [1, 1]} : vector<16x32xf32> to vector<16x8xf32>
    %289 = vector.shape_cast %288 : vector<16x8xf32> to vector<2x8x8xf32>
    %290 = vector.extract_strided_slice %251 {offsets = [0, 8], sizes = [16, 8], strides = [1, 1]} : vector<16x32xf32> to vector<16x8xf32>
    %291 = vector.shape_cast %290 : vector<16x8xf32> to vector<2x8x8xf32>
    "tpu.trace_start"() <{level = 10 : i32, message = "bqd,bkd->bqk"}> : () -> ()
    %cst_122 = arith.constant dense<0.000000e+00> : vector<2x8x8xf32>
    %292 = tpu.matmul %287, %289, %cst_122 {dimension_numbers = #tpu.dot_dimension_numbers<[2], [2], [1], [1], [0, 0, 0, 1, 1, 1], [0], [0]>} : vector<2x8x8xf32>, vector<2x8x8xf32>, vector<2x8x8xf32> -> vector<2x8x8xf32>
    %cst_123 = arith.constant -1.000000e+09 : f32
    "tpu.trace_stop"() : () -> ()
    %293 = vector.broadcast %cst_123 : f32 to vector<2x8x8xf32>
    %294 = arith.select %9, %293, %292 : vector<2x8x8xi1>, vector<2x8x8xf32>
    %cst_124 = arith.constant dense<0xFF800000> : vector<2x8xf32>
    %295 = vector.multi_reduction <maximumf>, %294, %cst_124 [2] : vector<2x8x8xf32> to vector<2x8xf32>
    %296 = vector.shape_cast %295 : vector<2x8xf32> to vector<2x8x1xf32>
    %297 = vector.broadcast %296 : vector<2x8x1xf32> to vector<2x8x8xf32>
    %298 = arith.subf %294, %297 : vector<2x8x8xf32>
    %299 = math.exp %298 : vector<2x8x8xf32>
    %cst_125 = arith.constant dense<0.000000e+00> : vector<2x8xf32>
    %300 = vector.multi_reduction <add>, %299, %cst_125 [2] : vector<2x8x8xf32> to vector<2x8xf32>
    %301 = vector.shape_cast %300 : vector<2x8xf32> to vector<2x8x1xf32>
    %302 = tpu.reciprocal %301 {approx = true} : vector<2x8x1xf32> -> vector<2x8x1xf32>
    %303 = vector.broadcast %302 : vector<2x8x1xf32> to vector<2x8x8xf32>
    %304 = arith.mulf %299, %303 : vector<2x8x8xf32>
    "tpu.trace_start"() <{level = 10 : i32, message = "bqk,bkd->bqd"}> : () -> ()
    %cst_126 = arith.constant dense<0.000000e+00> : vector<2x8x8xf32>
    %305 = tpu.matmul %304, %291, %cst_126 {dimension_numbers = #tpu.dot_dimension_numbers<[2], [1], [1], [2], [0, 0, 0, 1, 1, 2], [0], [0]>} : vector<2x8x8xf32>, vector<2x8x8xf32>, vector<2x8x8xf32> -> vector<2x8x8xf32>
    "tpu.trace_stop"() : () -> ()
    %306 = vector.shape_cast %305 : vector<2x8x8xf32> to vector<16x8xf32>
    %307 = vector.extract_strided_slice %253 {offsets = [8, 0], sizes = [8, 32], strides = [1, 1]} : vector<32x32xf32> to vector<8x32xf32>
    %cst_127 = arith.constant dense<0.000000e+00> : vector<16x32xf32>
    %308 = tpu.matmul %306, %307, %cst_127 {dimension_numbers = #tpu.dot_dimension_numbers<[1], [0], [0], [1], [0, 0, 1, 1], [], []>} : vector<16x8xf32>, vector<8x32xf32>, vector<16x32xf32> -> vector<16x32xf32>
    %309 = arith.addf %285, %308 : vector<16x32xf32>
    %310 = vector.extract_strided_slice %249 {offsets = [0, 16], sizes = [16, 8], strides = [1, 1]} : vector<16x32xf32> to vector<16x8xf32>
    %311 = vector.shape_cast %310 : vector<16x8xf32> to vector<2x8x8xf32>
    %312 = vector.extract_strided_slice %250 {offsets = [0, 16], sizes = [16, 8], strides = [1, 1]} : vector<16x32xf32> to vector<16x8xf32>
    %313 = vector.shape_cast %312 : vector<16x8xf32> to vector<2x8x8xf32>
    %314 = vector.extract_strided_slice %251 {offsets = [0, 16], sizes = [16, 8], strides = [1, 1]} : vector<16x32xf32> to vector<16x8xf32>
    %315 = vector.shape_cast %314 : vector<16x8xf32> to vector<2x8x8xf32>
    "tpu.trace_start"() <{level = 10 : i32, message = "bqd,bkd->bqk"}> : () -> ()
    %cst_128 = arith.constant dense<0.000000e+00> : vector<2x8x8xf32>
    %316 = tpu.matmul %311, %313, %cst_128 {dimension_numbers = #tpu.dot_dimension_numbers<[2], [2], [1], [1], [0, 0, 0, 1, 1, 1], [0], [0]>} : vector<2x8x8xf32>, vector<2x8x8xf32>, vector<2x8x8xf32> -> vector<2x8x8xf32>
    %cst_129 = arith.constant -1.000000e+09 : f32
    "tpu.trace_stop"() : () -> ()
    %317 = vector.broadcast %cst_129 : f32 to vector<2x8x8xf32>
    %318 = arith.select %9, %317, %316 : vector<2x8x8xi1>, vector<2x8x8xf32>
    %cst_130 = arith.constant dense<0xFF800000> : vector<2x8xf32>
    %319 = vector.multi_reduction <maximumf>, %318, %cst_130 [2] : vector<2x8x8xf32> to vector<2x8xf32>
    %320 = vector.shape_cast %319 : vector<2x8xf32> to vector<2x8x1xf32>
    %321 = vector.broadcast %320 : vector<2x8x1xf32> to vector<2x8x8xf32>
    %322 = arith.subf %318, %321 : vector<2x8x8xf32>
    %323 = math.exp %322 : vector<2x8x8xf32>
    %cst_131 = arith.constant dense<0.000000e+00> : vector<2x8xf32>
    %324 = vector.multi_reduction <add>, %323, %cst_131 [2] : vector<2x8x8xf32> to vector<2x8xf32>
    %325 = vector.shape_cast %324 : vector<2x8xf32> to vector<2x8x1xf32>
    %326 = tpu.reciprocal %325 {approx = true} : vector<2x8x1xf32> -> vector<2x8x1xf32>
    %327 = vector.broadcast %326 : vector<2x8x1xf32> to vector<2x8x8xf32>
    %328 = arith.mulf %323, %327 : vector<2x8x8xf32>
    "tpu.trace_start"() <{level = 10 : i32, message = "bqk,bkd->bqd"}> : () -> ()
    %cst_132 = arith.constant dense<0.000000e+00> : vector<2x8x8xf32>
    %329 = tpu.matmul %328, %315, %cst_132 {dimension_numbers = #tpu.dot_dimension_numbers<[2], [1], [1], [2], [0, 0, 0, 1, 1, 2], [0], [0]>} : vector<2x8x8xf32>, vector<2x8x8xf32>, vector<2x8x8xf32> -> vector<2x8x8xf32>
    "tpu.trace_stop"() : () -> ()
    %330 = vector.shape_cast %329 : vector<2x8x8xf32> to vector<16x8xf32>
    %331 = vector.extract_strided_slice %253 {offsets = [16, 0], sizes = [8, 32], strides = [1, 1]} : vector<32x32xf32> to vector<8x32xf32>
    %cst_133 = arith.constant dense<0.000000e+00> : vector<16x32xf32>
    %332 = tpu.matmul %330, %331, %cst_133 {dimension_numbers = #tpu.dot_dimension_numbers<[1], [0], [0], [1], [0, 0, 1, 1], [], []>} : vector<16x8xf32>, vector<8x32xf32>, vector<16x32xf32> -> vector<16x32xf32>
    %333 = arith.addf %309, %332 : vector<16x32xf32>
    %334 = vector.extract_strided_slice %249 {offsets = [0, 24], sizes = [16, 8], strides = [1, 1]} : vector<16x32xf32> to vector<16x8xf32>
    %335 = vector.shape_cast %334 : vector<16x8xf32> to vector<2x8x8xf32>
    %336 = vector.extract_strided_slice %250 {offsets = [0, 24], sizes = [16, 8], strides = [1, 1]} : vector<16x32xf32> to vector<16x8xf32>
    %337 = vector.shape_cast %336 : vector<16x8xf32> to vector<2x8x8xf32>
    %338 = vector.extract_strided_slice %251 {offsets = [0, 24], sizes = [16, 8], strides = [1, 1]} : vector<16x32xf32> to vector<16x8xf32>
    %339 = vector.shape_cast %338 : vector<16x8xf32> to vector<2x8x8xf32>
    "tpu.trace_start"() <{level = 10 : i32, message = "bqd,bkd->bqk"}> : () -> ()
    %cst_134 = arith.constant dense<0.000000e+00> : vector<2x8x8xf32>
    %340 = tpu.matmul %335, %337, %cst_134 {dimension_numbers = #tpu.dot_dimension_numbers<[2], [2], [1], [1], [0, 0, 0, 1, 1, 1], [0], [0]>} : vector<2x8x8xf32>, vector<2x8x8xf32>, vector<2x8x8xf32> -> vector<2x8x8xf32>
    %cst_135 = arith.constant -1.000000e+09 : f32
    "tpu.trace_stop"() : () -> ()
    %341 = vector.broadcast %cst_135 : f32 to vector<2x8x8xf32>
    %342 = arith.select %9, %341, %340 : vector<2x8x8xi1>, vector<2x8x8xf32>
    %cst_136 = arith.constant dense<0xFF800000> : vector<2x8xf32>
    %343 = vector.multi_reduction <maximumf>, %342, %cst_136 [2] : vector<2x8x8xf32> to vector<2x8xf32>
    %344 = vector.shape_cast %343 : vector<2x8xf32> to vector<2x8x1xf32>
    %345 = vector.broadcast %344 : vector<2x8x1xf32> to vector<2x8x8xf32>
    %346 = arith.subf %342, %345 : vector<2x8x8xf32>
    %347 = math.exp %346 : vector<2x8x8xf32>
    %cst_137 = arith.constant dense<0.000000e+00> : vector<2x8xf32>
    %348 = vector.multi_reduction <add>, %347, %cst_137 [2] : vector<2x8x8xf32> to vector<2x8xf32>
    %349 = vector.shape_cast %348 : vector<2x8xf32> to vector<2x8x1xf32>
    %350 = tpu.reciprocal %349 {approx = true} : vector<2x8x1xf32> -> vector<2x8x1xf32>
    %351 = vector.broadcast %350 : vector<2x8x1xf32> to vector<2x8x8xf32>
    %352 = arith.mulf %347, %351 : vector<2x8x8xf32>
    "tpu.trace_start"() <{level = 10 : i32, message = "bqk,bkd->bqd"}> : () -> ()
    %cst_138 = arith.constant dense<0.000000e+00> : vector<2x8x8xf32>
    %353 = tpu.matmul %352, %339, %cst_138 {dimension_numbers = #tpu.dot_dimension_numbers<[2], [1], [1], [2], [0, 0, 0, 1, 1, 2], [0], [0]>} : vector<2x8x8xf32>, vector<2x8x8xf32>, vector<2x8x8xf32> -> vector<2x8x8xf32>
    "tpu.trace_stop"() : () -> ()
    %354 = vector.shape_cast %353 : vector<2x8x8xf32> to vector<16x8xf32>
    %355 = vector.extract_strided_slice %253 {offsets = [24, 0], sizes = [8, 32], strides = [1, 1]} : vector<32x32xf32> to vector<8x32xf32>
    %cst_139 = arith.constant dense<0.000000e+00> : vector<16x32xf32>
    %356 = tpu.matmul %354, %355, %cst_139 {dimension_numbers = #tpu.dot_dimension_numbers<[1], [0], [0], [1], [0, 0, 1, 1], [], []>} : vector<16x8xf32>, vector<8x32xf32>, vector<16x32xf32> -> vector<16x32xf32>
    %357 = arith.addf %333, %356 : vector<16x32xf32>
    %358 = vector.shape_cast %280 : vector<2x8x8xf32> to vector<2x1x8x8xf32>
    %359 = vector.shape_cast %304 : vector<2x8x8xf32> to vector<2x1x8x8xf32>
    %360 = vector.shape_cast %328 : vector<2x8x8xf32> to vector<2x1x8x8xf32>
    %361 = vector.shape_cast %352 : vector<2x8x8xf32> to vector<2x1x8x8xf32>
    %362 = tpu.concatenate %358, %359, %360, %361 in 1 : vector<2x1x8x8xf32>, vector<2x1x8x8xf32>, vector<2x1x8x8xf32>, vector<2x1x8x8xf32> -> vector<2x4x8x8xf32>
    %cst_140 = arith.constant dense<0.000000e+00> : vector<16xf32>
    %363 = vector.multi_reduction <add>, %357, %cst_140 [1] : vector<16x32xf32> to vector<16xf32>
    %364 = vector.shape_cast %363 : vector<16xf32> to vector<16x1xf32>
    %cst_141 = arith.constant 3.200000e+01 : f32
    %365 = vector.broadcast %cst_141 : f32 to vector<16x1xf32>
    %366 = arith.divf %364, %365 : vector<16x1xf32>
    %367 = vector.broadcast %366 : vector<16x1xf32> to vector<16x32xf32>
    %368 = arith.subf %357, %367 : vector<16x32xf32>
    %369 = arith.mulf %368, %368 : vector<16x32xf32>
    %cst_142 = arith.constant dense<0.000000e+00> : vector<16xf32>
    %370 = vector.multi_reduction <add>, %369, %cst_142 [1] : vector<16x32xf32> to vector<16xf32>
    %371 = vector.shape_cast %370 : vector<16xf32> to vector<16x1xf32>
    %cst_143 = arith.constant 3.200000e+01 : f32
    %372 = vector.broadcast %cst_143 : f32 to vector<16x1xf32>
    %373 = arith.divf %371, %372 : vector<16x1xf32>
    %374 = vector.broadcast %366 : vector<16x1xf32> to vector<16x32xf32>
    %375 = arith.subf %357, %374 : vector<16x32xf32>
    %cst_144 = arith.constant 9.99999974E-6 : f32
    %376 = vector.broadcast %cst_144 : f32 to vector<16x1xf32>
    %377 = arith.addf %373, %376 : vector<16x1xf32>
    %378 = math.rsqrt %377 : vector<16x1xf32>
    %379 = vector.broadcast %378 : vector<16x1xf32> to vector<16x32xf32>
    %380 = arith.mulf %375, %379 : vector<16x32xf32>
    %381 = vector.broadcast %257 : vector<1x32xf32> to vector<16x32xf32>
    %382 = arith.mulf %380, %381 : vector<16x32xf32>
    %383 = vector.broadcast %259 : vector<1x32xf32> to vector<16x32xf32>
    %384 = arith.addf %382, %383 : vector<16x32xf32>
    %c1_145 = arith.constant 1 : index
    %c0_146 = arith.constant 0 : index
    %c0_147 = arith.constant 0 : index
    %c0_148 = arith.constant 0 : index
    %c0_149 = arith.constant 0 : index
    %385 = vector.load %arg41[%c1_145, %c0_146, %c0_147, %c0_148, %c0_149] : memref<2x2x4x8x8xf32, #tpu.memory_space<vmem>>, vector<1x2x4x8x8xf32>
    %386 = vector.shape_cast %385 : vector<1x2x4x8x8xf32> to vector<2x4x8x8xf32>
    %387 = vector.shape_cast %362 : vector<2x4x8x8xf32> to vector<1x2x4x8x8xf32>
    tpu.vector_store %arg41[%c1_145, %c0_146, %c0_147, %c0_148, %c0_149], %387 {strides = array<i32>} : memref<2x2x4x8x8xf32, #tpu.memory_space<vmem>>, vector<1x2x4x8x8xf32>,
    %c1_150 = arith.constant 1 : index
    %c0_151 = arith.constant 0 : index
    %c0_152 = arith.constant 0 : index
    %388 = vector.load %arg13[%c1_150, %c0_151, %c0_152] : memref<2x32x64xf32, #tpu.memory_space<vmem>>, vector<1x32x64xf32>
    %389 = vector.shape_cast %388 : vector<1x32x64xf32> to vector<32x64xf32>
    %c1_153 = arith.constant 1 : index
    %c0_154 = arith.constant 0 : index
    %c0_155 = arith.constant 0 : index
    %390 = vector.load %arg14[%c1_153, %c0_154, %c0_155] : memref<2x1x64xf32, #tpu.memory_space<vmem>>, vector<1x1x64xf32>
    %391 = vector.shape_cast %390 : vector<1x1x64xf32> to vector<1x64xf32>
    %c1_156 = arith.constant 1 : index
    %c0_157 = arith.constant 0 : index
    %c0_158 = arith.constant 0 : index
    %392 = vector.load %arg15[%c1_156, %c0_157, %c0_158] : memref<2x64x32xf32, #tpu.memory_space<vmem>>, vector<1x64x32xf32>
    %393 = vector.shape_cast %392 : vector<1x64x32xf32> to vector<64x32xf32>
    %c1_159 = arith.constant 1 : index
    %c0_160 = arith.constant 0 : index
    %c0_161 = arith.constant 0 : index
    %394 = vector.load %arg16[%c1_159, %c0_160, %c0_161] : memref<2x1x32xf32, #tpu.memory_space<vmem>>, vector<1x1x32xf32>
    %395 = vector.shape_cast %394 : vector<1x1x32xf32> to vector<1x32xf32>
    %c1_162 = arith.constant 1 : index
    %c0_163 = arith.constant 0 : index
    %c0_164 = arith.constant 0 : index
    %396 = vector.load %arg17[%c1_162, %c0_163, %c0_164] : memref<2x1x32xf32, #tpu.memory_space<vmem>>, vector<1x1x32xf32>
    %397 = vector.shape_cast %396 : vector<1x1x32xf32> to vector<1x32xf32>
    %c1_165 = arith.constant 1 : index
    %c0_166 = arith.constant 0 : index
    %c0_167 = arith.constant 0 : index
    %398 = vector.load %arg18[%c1_165, %c0_166, %c0_167] : memref<2x1x32xf32, #tpu.memory_space<vmem>>, vector<1x1x32xf32>
    %399 = vector.shape_cast %398 : vector<1x1x32xf32> to vector<1x32xf32>
    %cst_168 = arith.constant dense<0.000000e+00> : vector<16x64xf32>
    %400 = tpu.matmul %384, %389, %cst_168 {dimension_numbers = #tpu.dot_dimension_numbers<[1], [0], [0], [1], [0, 0, 1, 1], [], []>} : vector<16x32xf32>, vector<32x64xf32>, vector<16x64xf32> -> vector<16x64xf32>
    %401 = vector.broadcast %391 : vector<1x64xf32> to vector<16x64xf32>
    %402 = arith.addf %400, %401 : vector<16x64xf32>
    %cst_169 = arith.constant 0.000000e+00 : f32
    %403 = vector.broadcast %cst_169 : f32 to vector<16x64xf32>
    %404 = arith.maximumf %402, %403 : vector<16x64xf32>
    %cst_170 = arith.constant dense<0.000000e+00> : vector<16x32xf32>
    %405 = tpu.matmul %404, %393, %cst_170 {dimension_numbers = #tpu.dot_dimension_numbers<[1], [0], [0], [1], [0, 0, 1, 1], [], []>} : vector<16x64xf32>, vector<64x32xf32>, vector<16x32xf32> -> vector<16x32xf32>
    %406 = vector.broadcast %395 : vector<1x32xf32> to vector<16x32xf32>
    %407 = arith.addf %405, %406 : vector<16x32xf32>
    %408 = arith.addf %407, %384 : vector<16x32xf32>
    %cst_171 = arith.constant dense<0.000000e+00> : vector<16xf32>
    %409 = vector.multi_reduction <add>, %408, %cst_171 [1] : vector<16x32xf32> to vector<16xf32>
    %410 = vector.shape_cast %409 : vector<16xf32> to vector<16x1xf32>
    %cst_172 = arith.constant 3.200000e+01 : f32
    %411 = vector.broadcast %cst_172 : f32 to vector<16x1xf32>
    %412 = arith.divf %410, %411 : vector<16x1xf32>
    %413 = vector.broadcast %412 : vector<16x1xf32> to vector<16x32xf32>
    %414 = arith.subf %408, %413 : vector<16x32xf32>
    %415 = arith.mulf %414, %414 : vector<16x32xf32>
    %cst_173 = arith.constant dense<0.000000e+00> : vector<16xf32>
    %416 = vector.multi_reduction <add>, %415, %cst_173 [1] : vector<16x32xf32> to vector<16xf32>
    %417 = vector.shape_cast %416 : vector<16xf32> to vector<16x1xf32>
    %cst_174 = arith.constant 3.200000e+01 : f32
    %418 = vector.broadcast %cst_174 : f32 to vector<16x1xf32>
    %419 = arith.divf %417, %418 : vector<16x1xf32>
    %420 = vector.broadcast %412 : vector<16x1xf32> to vector<16x32xf32>
    %421 = arith.subf %408, %420 : vector<16x32xf32>
    %cst_175 = arith.constant 9.99999974E-6 : f32
    %422 = vector.broadcast %cst_175 : f32 to vector<16x1xf32>
    %423 = arith.addf %419, %422 : vector<16x1xf32>
    %424 = math.rsqrt %423 : vector<16x1xf32>
    %425 = vector.broadcast %424 : vector<16x1xf32> to vector<16x32xf32>
    %426 = arith.mulf %421, %425 : vector<16x32xf32>
    %427 = vector.broadcast %397 : vector<1x32xf32> to vector<16x32xf32>
    %428 = arith.mulf %426, %427 : vector<16x32xf32>
    %429 = vector.broadcast %399 : vector<1x32xf32> to vector<16x32xf32>
    %430 = arith.addf %428, %429 : vector<16x32xf32>
    %c0_176 = arith.constant 0 : index
    %c0_177 = arith.constant 0 : index
    %431 = vector.load %arg27[%c0_176, %c0_177] : memref<32x128xf32, #tpu.memory_space<vmem>>, vector<32x128xf32>
    %cst_178 = arith.constant dense<0.000000e+00> : vector<16x128xf32>
    %432 = tpu.matmul %430, %431, %cst_178 {dimension_numbers = #tpu.dot_dimension_numbers<[1], [0], [0], [1], [0, 0, 1, 1], [], []>} : vector<16x32xf32>, vector<32x128xf32>, vector<16x128xf32> -> vector<16x128xf32>
    %c0_179 = arith.constant 0 : index
    %c0_180 = arith.constant 0 : index
    %433 = vector.load %arg28[%c0_179, %c0_180] : memref<1x128xf32, #tpu.memory_space<vmem>>, vector<1x128xf32>
    %434 = vector.broadcast %433 : vector<1x128xf32> to vector<16x128xf32>
    %435 = arith.addf %432, %434 : vector<16x128xf32>
    %c0_181 = arith.constant 0 : index
    %c0_182 = arith.constant 0 : index
    %c0_183 = arith.constant 0 : index
    %436 = vector.load %arg19[%c0_181, %c0_182, %c0_183] : memref<2x32x96xf32, #tpu.memory_space<vmem>>, vector<1x32x96xf32>
    %437 = vector.shape_cast %436 : vector<1x32x96xf32> to vector<32x96xf32>
    %cst_184 = arith.constant dense<0.000000e+00> : vector<16x96xf32>
    %438 = tpu.matmul %52, %437, %cst_184 {dimension_numbers = #tpu.dot_dimension_numbers<[1], [0], [0], [1], [0, 0, 1, 1], [], []>} : vector<16x32xf32>, vector<32x96xf32>, vector<16x96xf32> -> vector<16x96xf32>
    %c0_185 = arith.constant 0 : index
    %c0_186 = arith.constant 0 : index
    %c0_187 = arith.constant 0 : index
    %439 = vector.load %arg20[%c0_185, %c0_186, %c0_187] : memref<2x1x96xf32, #tpu.memory_space<vmem>>, vector<1x1x96xf32>
    %440 = vector.shape_cast %439 : vector<1x1x96xf32> to vector<1x96xf32>
    %441 = vector.broadcast %440 : vector<1x96xf32> to vector<16x96xf32>
    %442 = arith.addf %438, %441 : vector<16x96xf32>
    %443 = vector.extract_strided_slice %442 {offsets = [0, 0], sizes = [16, 32], strides = [1, 1]} : vector<16x96xf32> to vector<16x32xf32>
    %444 = vector.extract_strided_slice %442 {offsets = [0, 32], sizes = [16, 32], strides = [1, 1]} : vector<16x96xf32> to vector<16x32xf32>
    %445 = vector.extract_strided_slice %442 {offsets = [0, 64], sizes = [16, 32], strides = [1, 1]} : vector<16x96xf32> to vector<16x32xf32>
    %c0_188 = arith.constant 0 : index
    %c0_189 = arith.constant 0 : index
    %c0_190 = arith.constant 0 : index
    %446 = vector.load %arg21[%c0_188, %c0_189, %c0_190] : memref<2x32x32xf32, #tpu.memory_space<vmem>>, vector<1x32x32xf32>
    %447 = vector.shape_cast %446 : vector<1x32x32xf32> to vector<32x32xf32>
    %c0_191 = arith.constant 0 : index
    %c0_192 = arith.constant 0 : index
    %c0_193 = arith.constant 0 : index
    %448 = vector.load %arg22[%c0_191, %c0_192, %c0_193] : memref<2x1x32xf32, #tpu.memory_space<vmem>>, vector<1x1x32xf32>
    %449 = vector.shape_cast %448 : vector<1x1x32xf32> to vector<1x32xf32>
    %c0_194 = arith.constant 0 : index
    %c0_195 = arith.constant 0 : index
    %c0_196 = arith.constant 0 : index
    %450 = vector.load %arg23[%c0_194, %c0_195, %c0_196] : memref<2x1x32xf32, #tpu.memory_space<vmem>>, vector<1x1x32xf32>
    %451 = vector.shape_cast %450 : vector<1x1x32xf32> to vector<1x32xf32>
    %c0_197 = arith.constant 0 : index
    %c0_198 = arith.constant 0 : index
    %c0_199 = arith.constant 0 : index
    %452 = vector.load %arg24[%c0_197, %c0_198, %c0_199] : memref<2x1x32xf32, #tpu.memory_space<vmem>>, vector<1x1x32xf32>
    %453 = vector.shape_cast %452 : vector<1x1x32xf32> to vector<1x32xf32>
    %454 = vector.broadcast %449 : vector<1x32xf32> to vector<16x32xf32>
    %455 = arith.addf %52, %454 : vector<16x32xf32>
    %456 = vector.extract_strided_slice %443 {offsets = [0, 0], sizes = [16, 8], strides = [1, 1]} : vector<16x32xf32> to vector<16x8xf32>
    %457 = vector.shape_cast %456 : vector<16x8xf32> to vector<2x8x8xf32>
    %458 = vector.extract_strided_slice %444 {offsets = [0, 0], sizes = [16, 8], strides = [1, 1]} : vector<16x32xf32> to vector<16x8xf32>
    %459 = vector.shape_cast %458 : vector<16x8xf32> to vector<2x8x8xf32>
    %460 = vector.extract_strided_slice %445 {offsets = [0, 0], sizes = [16, 8], strides = [1, 1]} : vector<16x32xf32> to vector<16x8xf32>
    %461 = vector.shape_cast %460 : vector<16x8xf32> to vector<2x8x8xf32>
    "tpu.trace_start"() <{level = 10 : i32, message = "bqd,bkd->bqk"}> : () -> ()
    %cst_200 = arith.constant dense<0.000000e+00> : vector<2x8x8xf32>
    %462 = tpu.matmul %457, %459, %cst_200 {dimension_numbers = #tpu.dot_dimension_numbers<[2], [2], [1], [1], [0, 0, 0, 1, 1, 1], [0], [0]>} : vector<2x8x8xf32>, vector<2x8x8xf32>, vector<2x8x8xf32> -> vector<2x8x8xf32>
    %cst_201 = arith.constant -1.000000e+09 : f32
    "tpu.trace_stop"() : () -> ()
    %463 = vector.broadcast %cst_201 : f32 to vector<2x8x8xf32>
    %464 = arith.select %19, %463, %462 : vector<2x8x8xi1>, vector<2x8x8xf32>
    %cst_202 = arith.constant dense<0xFF800000> : vector<2x8xf32>
    %465 = vector.multi_reduction <maximumf>, %464, %cst_202 [2] : vector<2x8x8xf32> to vector<2x8xf32>
    %466 = vector.shape_cast %465 : vector<2x8xf32> to vector<2x8x1xf32>
    %467 = vector.broadcast %466 : vector<2x8x1xf32> to vector<2x8x8xf32>
    %468 = arith.subf %464, %467 : vector<2x8x8xf32>
    %469 = math.exp %468 : vector<2x8x8xf32>
    %cst_203 = arith.constant dense<0.000000e+00> : vector<2x8xf32>
    %470 = vector.multi_reduction <add>, %469, %cst_203 [2] : vector<2x8x8xf32> to vector<2x8xf32>
    %471 = vector.shape_cast %470 : vector<2x8xf32> to vector<2x8x1xf32>
    %472 = tpu.reciprocal %471 {approx = true} : vector<2x8x1xf32> -> vector<2x8x1xf32>
    %473 = vector.broadcast %472 : vector<2x8x1xf32> to vector<2x8x8xf32>
    %474 = arith.mulf %469, %473 : vector<2x8x8xf32>
    "tpu.trace_start"() <{level = 10 : i32, message = "bqk,bkd->bqd"}> : () -> ()
    %cst_204 = arith.constant dense<0.000000e+00> : vector<2x8x8xf32>
    %475 = tpu.matmul %474, %461, %cst_204 {dimension_numbers = #tpu.dot_dimension_numbers<[2], [1], [1], [2], [0, 0, 0, 1, 1, 2], [0], [0]>} : vector<2x8x8xf32>, vector<2x8x8xf32>, vector<2x8x8xf32> -> vector<2x8x8xf32>
    "tpu.trace_stop"() : () -> ()
    %476 = vector.shape_cast %475 : vector<2x8x8xf32> to vector<16x8xf32>
    %477 = vector.extract_strided_slice %447 {offsets = [0, 0], sizes = [8, 32], strides = [1, 1]} : vector<32x32xf32> to vector<8x32xf32>
    %cst_205 = arith.constant dense<0.000000e+00> : vector<16x32xf32>
    %478 = tpu.matmul %476, %477, %cst_205 {dimension_numbers = #tpu.dot_dimension_numbers<[1], [0], [0], [1], [0, 0, 1, 1], [], []>} : vector<16x8xf32>, vector<8x32xf32>, vector<16x32xf32> -> vector<16x32xf32>
    %479 = arith.addf %455, %478 : vector<16x32xf32>
    %480 = vector.extract_strided_slice %443 {offsets = [0, 8], sizes = [16, 8], strides = [1, 1]} : vector<16x32xf32> to vector<16x8xf32>
    %481 = vector.shape_cast %480 : vector<16x8xf32> to vector<2x8x8xf32>
    %482 = vector.extract_strided_slice %444 {offsets = [0, 8], sizes = [16, 8], strides = [1, 1]} : vector<16x32xf32> to vector<16x8xf32>
    %483 = vector.shape_cast %482 : vector<16x8xf32> to vector<2x8x8xf32>
    %484 = vector.extract_strided_slice %445 {offsets = [0, 8], sizes = [16, 8], strides = [1, 1]} : vector<16x32xf32> to vector<16x8xf32>
    %485 = vector.shape_cast %484 : vector<16x8xf32> to vector<2x8x8xf32>
    "tpu.trace_start"() <{level = 10 : i32, message = "bqd,bkd->bqk"}> : () -> ()
    %cst_206 = arith.constant dense<0.000000e+00> : vector<2x8x8xf32>
    %486 = tpu.matmul %481, %483, %cst_206 {dimension_numbers = #tpu.dot_dimension_numbers<[2], [2], [1], [1], [0, 0, 0, 1, 1, 1], [0], [0]>} : vector<2x8x8xf32>, vector<2x8x8xf32>, vector<2x8x8xf32> -> vector<2x8x8xf32>
    %cst_207 = arith.constant -1.000000e+09 : f32
    "tpu.trace_stop"() : () -> ()
    %487 = vector.broadcast %cst_207 : f32 to vector<2x8x8xf32>
    %488 = arith.select %19, %487, %486 : vector<2x8x8xi1>, vector<2x8x8xf32>
    %cst_208 = arith.constant dense<0xFF800000> : vector<2x8xf32>
    %489 = vector.multi_reduction <maximumf>, %488, %cst_208 [2] : vector<2x8x8xf32> to vector<2x8xf32>
    %490 = vector.shape_cast %489 : vector<2x8xf32> to vector<2x8x1xf32>
    %491 = vector.broadcast %490 : vector<2x8x1xf32> to vector<2x8x8xf32>
    %492 = arith.subf %488, %491 : vector<2x8x8xf32>
    %493 = math.exp %492 : vector<2x8x8xf32>
    %cst_209 = arith.constant dense<0.000000e+00> : vector<2x8xf32>
    %494 = vector.multi_reduction <add>, %493, %cst_209 [2] : vector<2x8x8xf32> to vector<2x8xf32>
    %495 = vector.shape_cast %494 : vector<2x8xf32> to vector<2x8x1xf32>
    %496 = tpu.reciprocal %495 {approx = true} : vector<2x8x1xf32> -> vector<2x8x1xf32>
    %497 = vector.broadcast %496 : vector<2x8x1xf32> to vector<2x8x8xf32>
    %498 = arith.mulf %493, %497 : vector<2x8x8xf32>
    "tpu.trace_start"() <{level = 10 : i32, message = "bqk,bkd->bqd"}> : () -> ()
    %cst_210 = arith.constant dense<0.000000e+00> : vector<2x8x8xf32>
    %499 = tpu.matmul %498, %485, %cst_210 {dimension_numbers = #tpu.dot_dimension_numbers<[2], [1], [1], [2], [0, 0, 0, 1, 1, 2], [0], [0]>} : vector<2x8x8xf32>, vector<2x8x8xf32>, vector<2x8x8xf32> -> vector<2x8x8xf32>
    "tpu.trace_stop"() : () -> ()
    %500 = vector.shape_cast %499 : vector<2x8x8xf32> to vector<16x8xf32>
    %501 = vector.extract_strided_slice %447 {offsets = [8, 0], sizes = [8, 32], strides = [1, 1]} : vector<32x32xf32> to vector<8x32xf32>
    %cst_211 = arith.constant dense<0.000000e+00> : vector<16x32xf32>
    %502 = tpu.matmul %500, %501, %cst_211 {dimension_numbers = #tpu.dot_dimension_numbers<[1], [0], [0], [1], [0, 0, 1, 1], [], []>} : vector<16x8xf32>, vector<8x32xf32>, vector<16x32xf32> -> vector<16x32xf32>
    %503 = arith.addf %479, %502 : vector<16x32xf32>
    %504 = vector.extract_strided_slice %443 {offsets = [0, 16], sizes = [16, 8], strides = [1, 1]} : vector<16x32xf32> to vector<16x8xf32>
    %505 = vector.shape_cast %504 : vector<16x8xf32> to vector<2x8x8xf32>
    %506 = vector.extract_strided_slice %444 {offsets = [0, 16], sizes = [16, 8], strides = [1, 1]} : vector<16x32xf32> to vector<16x8xf32>
    %507 = vector.shape_cast %506 : vector<16x8xf32> to vector<2x8x8xf32>
    %508 = vector.extract_strided_slice %445 {offsets = [0, 16], sizes = [16, 8], strides = [1, 1]} : vector<16x32xf32> to vector<16x8xf32>
    %509 = vector.shape_cast %508 : vector<16x8xf32> to vector<2x8x8xf32>
    "tpu.trace_start"() <{level = 10 : i32, message = "bqd,bkd->bqk"}> : () -> ()
    %cst_212 = arith.constant dense<0.000000e+00> : vector<2x8x8xf32>
    %510 = tpu.matmul %505, %507, %cst_212 {dimension_numbers = #tpu.dot_dimension_numbers<[2], [2], [1], [1], [0, 0, 0, 1, 1, 1], [0], [0]>} : vector<2x8x8xf32>, vector<2x8x8xf32>, vector<2x8x8xf32> -> vector<2x8x8xf32>
    %cst_213 = arith.constant -1.000000e+09 : f32
    "tpu.trace_stop"() : () -> ()
    %511 = vector.broadcast %cst_213 : f32 to vector<2x8x8xf32>
    %512 = arith.select %19, %511, %510 : vector<2x8x8xi1>, vector<2x8x8xf32>
    %cst_214 = arith.constant dense<0xFF800000> : vector<2x8xf32>
    %513 = vector.multi_reduction <maximumf>, %512, %cst_214 [2] : vector<2x8x8xf32> to vector<2x8xf32>
    %514 = vector.shape_cast %513 : vector<2x8xf32> to vector<2x8x1xf32>
    %515 = vector.broadcast %514 : vector<2x8x1xf32> to vector<2x8x8xf32>
    %516 = arith.subf %512, %515 : vector<2x8x8xf32>
    %517 = math.exp %516 : vector<2x8x8xf32>
    %cst_215 = arith.constant dense<0.000000e+00> : vector<2x8xf32>
    %518 = vector.multi_reduction <add>, %517, %cst_215 [2] : vector<2x8x8xf32> to vector<2x8xf32>
    %519 = vector.shape_cast %518 : vector<2x8xf32> to vector<2x8x1xf32>
    %520 = tpu.reciprocal %519 {approx = true} : vector<2x8x1xf32> -> vector<2x8x1xf32>
    %521 = vector.broadcast %520 : vector<2x8x1xf32> to vector<2x8x8xf32>
    %522 = arith.mulf %517, %521 : vector<2x8x8xf32>
    "tpu.trace_start"() <{level = 10 : i32, message = "bqk,bkd->bqd"}> : () -> ()
    %cst_216 = arith.constant dense<0.000000e+00> : vector<2x8x8xf32>
    %523 = tpu.matmul %522, %509, %cst_216 {dimension_numbers = #tpu.dot_dimension_numbers<[2], [1], [1], [2], [0, 0, 0, 1, 1, 2], [0], [0]>} : vector<2x8x8xf32>, vector<2x8x8xf32>, vector<2x8x8xf32> -> vector<2x8x8xf32>
    "tpu.trace_stop"() : () -> ()
    %524 = vector.shape_cast %523 : vector<2x8x8xf32> to vector<16x8xf32>
    %525 = vector.extract_strided_slice %447 {offsets = [16, 0], sizes = [8, 32], strides = [1, 1]} : vector<32x32xf32> to vector<8x32xf32>
    %cst_217 = arith.constant dense<0.000000e+00> : vector<16x32xf32>
    %526 = tpu.matmul %524, %525, %cst_217 {dimension_numbers = #tpu.dot_dimension_numbers<[1], [0], [0], [1], [0, 0, 1, 1], [], []>} : vector<16x8xf32>, vector<8x32xf32>, vector<16x32xf32> -> vector<16x32xf32>
    %527 = arith.addf %503, %526 : vector<16x32xf32>
    %528 = vector.extract_strided_slice %443 {offsets = [0, 24], sizes = [16, 8], strides = [1, 1]} : vector<16x32xf32> to vector<16x8xf32>
    %529 = vector.shape_cast %528 : vector<16x8xf32> to vector<2x8x8xf32>
    %530 = vector.extract_strided_slice %444 {offsets = [0, 24], sizes = [16, 8], strides = [1, 1]} : vector<16x32xf32> to vector<16x8xf32>
    %531 = vector.shape_cast %530 : vector<16x8xf32> to vector<2x8x8xf32>
    %532 = vector.extract_strided_slice %445 {offsets = [0, 24], sizes = [16, 8], strides = [1, 1]} : vector<16x32xf32> to vector<16x8xf32>
    %533 = vector.shape_cast %532 : vector<16x8xf32> to vector<2x8x8xf32>
    "tpu.trace_start"() <{level = 10 : i32, message = "bqd,bkd->bqk"}> : () -> ()
    %cst_218 = arith.constant dense<0.000000e+00> : vector<2x8x8xf32>
    %534 = tpu.matmul %529, %531, %cst_218 {dimension_numbers = #tpu.dot_dimension_numbers<[2], [2], [1], [1], [0, 0, 0, 1, 1, 1], [0], [0]>} : vector<2x8x8xf32>, vector<2x8x8xf32>, vector<2x8x8xf32> -> vector<2x8x8xf32>
    %cst_219 = arith.constant -1.000000e+09 : f32
    "tpu.trace_stop"() : () -> ()
    %535 = vector.broadcast %cst_219 : f32 to vector<2x8x8xf32>
    %536 = arith.select %19, %535, %534 : vector<2x8x8xi1>, vector<2x8x8xf32>
    %cst_220 = arith.constant dense<0xFF800000> : vector<2x8xf32>
    %537 = vector.multi_reduction <maximumf>, %536, %cst_220 [2] : vector<2x8x8xf32> to vector<2x8xf32>
    %538 = vector.shape_cast %537 : vector<2x8xf32> to vector<2x8x1xf32>
    %539 = vector.broadcast %538 : vector<2x8x1xf32> to vector<2x8x8xf32>
    %540 = arith.subf %536, %539 : vector<2x8x8xf32>
    %541 = math.exp %540 : vector<2x8x8xf32>
    %cst_221 = arith.constant dense<0.000000e+00> : vector<2x8xf32>
    %542 = vector.multi_reduction <add>, %541, %cst_221 [2] : vector<2x8x8xf32> to vector<2x8xf32>
    %543 = vector.shape_cast %542 : vector<2x8xf32> to vector<2x8x1xf32>
    %544 = tpu.reciprocal %543 {approx = true} : vector<2x8x1xf32> -> vector<2x8x1xf32>
    %545 = vector.broadcast %544 : vector<2x8x1xf32> to vector<2x8x8xf32>
    %546 = arith.mulf %541, %545 : vector<2x8x8xf32>
    "tpu.trace_start"() <{level = 10 : i32, message = "bqk,bkd->bqd"}> : () -> ()
    %cst_222 = arith.constant dense<0.000000e+00> : vector<2x8x8xf32>
    %547 = tpu.matmul %546, %533, %cst_222 {dimension_numbers = #tpu.dot_dimension_numbers<[2], [1], [1], [2], [0, 0, 0, 1, 1, 2], [0], [0]>} : vector<2x8x8xf32>, vector<2x8x8xf32>, vector<2x8x8xf32> -> vector<2x8x8xf32>
    "tpu.trace_stop"() : () -> ()
    %548 = vector.shape_cast %547 : vector<2x8x8xf32> to vector<16x8xf32>
    %549 = vector.extract_strided_slice %447 {offsets = [24, 0], sizes = [8, 32], strides = [1, 1]} : vector<32x32xf32> to vector<8x32xf32>
    %cst_223 = arith.constant dense<0.000000e+00> : vector<16x32xf32>
    %550 = tpu.matmul %548, %549, %cst_223 {dimension_numbers = #tpu.dot_dimension_numbers<[1], [0], [0], [1], [0, 0, 1, 1], [], []>} : vector<16x8xf32>, vector<8x32xf32>, vector<16x32xf32> -> vector<16x32xf32>
    %551 = arith.addf %527, %550 : vector<16x32xf32>
    %552 = vector.shape_cast %474 : vector<2x8x8xf32> to vector<2x1x8x8xf32>
    %553 = vector.shape_cast %498 : vector<2x8x8xf32> to vector<2x1x8x8xf32>
    %554 = vector.shape_cast %522 : vector<2x8x8xf32> to vector<2x1x8x8xf32>
    %555 = vector.shape_cast %546 : vector<2x8x8xf32> to vector<2x1x8x8xf32>
    %556 = tpu.concatenate %552, %553, %554, %555 in 1 : vector<2x1x8x8xf32>, vector<2x1x8x8xf32>, vector<2x1x8x8xf32>, vector<2x1x8x8xf32> -> vector<2x4x8x8xf32>
    %cst_224 = arith.constant dense<0.000000e+00> : vector<16xf32>
    %557 = vector.multi_reduction <add>, %551, %cst_224 [1] : vector<16x32xf32> to vector<16xf32>
    %558 = vector.shape_cast %557 : vector<16xf32> to vector<16x1xf32>
    %cst_225 = arith.constant 3.200000e+01 : f32
    %559 = vector.broadcast %cst_225 : f32 to vector<16x1xf32>
    %560 = arith.divf %558, %559 : vector<16x1xf32>
    %561 = vector.broadcast %560 : vector<16x1xf32> to vector<16x32xf32>
    %562 = arith.subf %551, %561 : vector<16x32xf32>
    %563 = arith.mulf %562, %562 : vector<16x32xf32>
    %cst_226 = arith.constant dense<0.000000e+00> : vector<16xf32>
    %564 = vector.multi_reduction <add>, %563, %cst_226 [1] : vector<16x32xf32> to vector<16xf32>
    %565 = vector.shape_cast %564 : vector<16xf32> to vector<16x1xf32>
    %cst_227 = arith.constant 3.200000e+01 : f32
    %566 = vector.broadcast %cst_227 : f32 to vector<16x1xf32>
    %567 = arith.divf %565, %566 : vector<16x1xf32>
    %568 = vector.broadcast %560 : vector<16x1xf32> to vector<16x32xf32>
    %569 = arith.subf %551, %568 : vector<16x32xf32>
    %cst_228 = arith.constant 9.99999974E-6 : f32
    %570 = vector.broadcast %cst_228 : f32 to vector<16x1xf32>
    %571 = arith.addf %567, %570 : vector<16x1xf32>
    %572 = math.rsqrt %571 : vector<16x1xf32>
    %573 = vector.broadcast %572 : vector<16x1xf32> to vector<16x32xf32>
    %574 = arith.mulf %569, %573 : vector<16x32xf32>
    %575 = vector.broadcast %451 : vector<1x32xf32> to vector<16x32xf32>
    %576 = arith.mulf %574, %575 : vector<16x32xf32>
    %577 = vector.broadcast %453 : vector<1x32xf32> to vector<16x32xf32>
    %578 = arith.addf %576, %577 : vector<16x32xf32>
    %c0_229 = arith.constant 0 : index
    %c0_230 = arith.constant 0 : index
    %c0_231 = arith.constant 0 : index
    %c0_232 = arith.constant 0 : index
    %c0_233 = arith.constant 0 : index
    %579 = vector.load %arg42[%c0_229, %c0_230, %c0_231, %c0_232, %c0_233] : memref<2x2x4x8x8xf32, #tpu.memory_space<vmem>>, vector<1x2x4x8x8xf32>
    %580 = vector.shape_cast %579 : vector<1x2x4x8x8xf32> to vector<2x4x8x8xf32>
    %581 = vector.shape_cast %556 : vector<2x4x8x8xf32> to vector<1x2x4x8x8xf32>
    tpu.vector_store %arg42[%c0_229, %c0_230, %c0_231, %c0_232, %c0_233], %581 {strides = array<i32>} : memref<2x2x4x8x8xf32, #tpu.memory_space<vmem>>, vector<1x2x4x8x8xf32>,
    %c0_234 = arith.constant 0 : index
    %c0_235 = arith.constant 0 : index
    %c0_236 = arith.constant 0 : index
    %582 = vector.load %arg25[%c0_234, %c0_235, %c0_236] : memref<2x32x32xf32, #tpu.memory_space<vmem>>, vector<1x32x32xf32>
    %583 = vector.shape_cast %582 : vector<1x32x32xf32> to vector<32x32xf32>
    %cst_237 = arith.constant dense<0.000000e+00> : vector<16x32xf32>
    %584 = tpu.matmul %578, %583, %cst_237 {dimension_numbers = #tpu.dot_dimension_numbers<[1], [0], [0], [1], [0, 0, 1, 1], [], []>} : vector<16x32xf32>, vector<32x32xf32>, vector<16x32xf32> -> vector<16x32xf32>
    %c0_238 = arith.constant 0 : index
    %c0_239 = arith.constant 0 : index
    %c0_240 = arith.constant 0 : index
    %585 = vector.load %arg26[%c0_238, %c0_239, %c0_240] : memref<2x1x32xf32, #tpu.memory_space<vmem>>, vector<1x1x32xf32>
    %586 = vector.shape_cast %585 : vector<1x1x32xf32> to vector<1x32xf32>
    %587 = vector.broadcast %586 : vector<1x32xf32> to vector<16x32xf32>
    %588 = arith.addf %584, %587 : vector<16x32xf32>
    %589 = vector.extract_strided_slice %435 {offsets = [0, 0], sizes = [16, 32], strides = [1, 1]} : vector<16x128xf32> to vector<16x32xf32>
    %590 = vector.extract_strided_slice %435 {offsets = [0, 32], sizes = [16, 32], strides = [1, 1]} : vector<16x128xf32> to vector<16x32xf32>
    %c0_241 = arith.constant 0 : index
    %c0_242 = arith.constant 0 : index
    %c0_243 = arith.constant 0 : index
    %591 = vector.load %arg29[%c0_241, %c0_242, %c0_243] : memref<2x32x32xf32, #tpu.memory_space<vmem>>, vector<1x32x32xf32>
    %592 = vector.shape_cast %591 : vector<1x32x32xf32> to vector<32x32xf32>
    %c0_244 = arith.constant 0 : index
    %c0_245 = arith.constant 0 : index
    %c0_246 = arith.constant 0 : index
    %593 = vector.load %arg30[%c0_244, %c0_245, %c0_246] : memref<2x1x32xf32, #tpu.memory_space<vmem>>, vector<1x1x32xf32>
    %594 = vector.shape_cast %593 : vector<1x1x32xf32> to vector<1x32xf32>
    %c0_247 = arith.constant 0 : index
    %c0_248 = arith.constant 0 : index
    %c0_249 = arith.constant 0 : index
    %595 = vector.load %arg31[%c0_247, %c0_248, %c0_249] : memref<2x1x32xf32, #tpu.memory_space<vmem>>, vector<1x1x32xf32>
    %596 = vector.shape_cast %595 : vector<1x1x32xf32> to vector<1x32xf32>
    %c0_250 = arith.constant 0 : index
    %c0_251 = arith.constant 0 : index
    %c0_252 = arith.constant 0 : index
    %597 = vector.load %arg32[%c0_250, %c0_251, %c0_252] : memref<2x1x32xf32, #tpu.memory_space<vmem>>, vector<1x1x32xf32>
    %598 = vector.shape_cast %597 : vector<1x1x32xf32> to vector<1x32xf32>
    %599 = vector.broadcast %594 : vector<1x32xf32> to vector<16x32xf32>
    %600 = arith.addf %578, %599 : vector<16x32xf32>
    %601 = vector.extract_strided_slice %588 {offsets = [0, 0], sizes = [16, 8], strides = [1, 1]} : vector<16x32xf32> to vector<16x8xf32>
    %602 = vector.shape_cast %601 : vector<16x8xf32> to vector<2x8x8xf32>
    %603 = vector.extract_strided_slice %589 {offsets = [0, 0], sizes = [16, 8], strides = [1, 1]} : vector<16x32xf32> to vector<16x8xf32>
    %604 = vector.shape_cast %603 : vector<16x8xf32> to vector<2x8x8xf32>
    %605 = vector.extract_strided_slice %590 {offsets = [0, 0], sizes = [16, 8], strides = [1, 1]} : vector<16x32xf32> to vector<16x8xf32>
    %606 = vector.shape_cast %605 : vector<16x8xf32> to vector<2x8x8xf32>
    "tpu.trace_start"() <{level = 10 : i32, message = "bqd,bkd->bqk"}> : () -> ()
    %cst_253 = arith.constant dense<0.000000e+00> : vector<2x8x8xf32>
    %607 = tpu.matmul %602, %604, %cst_253 {dimension_numbers = #tpu.dot_dimension_numbers<[2], [2], [1], [1], [0, 0, 0, 1, 1, 1], [0], [0]>} : vector<2x8x8xf32>, vector<2x8x8xf32>, vector<2x8x8xf32> -> vector<2x8x8xf32>
    %cst_254 = arith.constant -1.000000e+09 : f32
    "tpu.trace_stop"() : () -> ()
    %608 = vector.broadcast %cst_254 : f32 to vector<2x8x8xf32>
    %609 = arith.select %22, %608, %607 : vector<2x8x8xi1>, vector<2x8x8xf32>
    %cst_255 = arith.constant dense<0xFF800000> : vector<2x8xf32>
    %610 = vector.multi_reduction <maximumf>, %609, %cst_255 [2] : vector<2x8x8xf32> to vector<2x8xf32>
    %611 = vector.shape_cast %610 : vector<2x8xf32> to vector<2x8x1xf32>
    %612 = vector.broadcast %611 : vector<2x8x1xf32> to vector<2x8x8xf32>
    %613 = arith.subf %609, %612 : vector<2x8x8xf32>
    %614 = math.exp %613 : vector<2x8x8xf32>
    %cst_256 = arith.constant dense<0.000000e+00> : vector<2x8xf32>
    %615 = vector.multi_reduction <add>, %614, %cst_256 [2] : vector<2x8x8xf32> to vector<2x8xf32>
    %616 = vector.shape_cast %615 : vector<2x8xf32> to vector<2x8x1xf32>
    %617 = tpu.reciprocal %616 {approx = true} : vector<2x8x1xf32> -> vector<2x8x1xf32>
    %618 = vector.broadcast %617 : vector<2x8x1xf32> to vector<2x8x8xf32>
    %619 = arith.mulf %614, %618 : vector<2x8x8xf32>
    "tpu.trace_start"() <{level = 10 : i32, message = "bqk,bkd->bqd"}> : () -> ()
    %cst_257 = arith.constant dense<0.000000e+00> : vector<2x8x8xf32>
    %620 = tpu.matmul %619, %606, %cst_257 {dimension_numbers = #tpu.dot_dimension_numbers<[2], [1], [1], [2], [0, 0, 0, 1, 1, 2], [0], [0]>} : vector<2x8x8xf32>, vector<2x8x8xf32>, vector<2x8x8xf32> -> vector<2x8x8xf32>
    "tpu.trace_stop"() : () -> ()
    %621 = vector.shape_cast %620 : vector<2x8x8xf32> to vector<16x8xf32>
    %622 = vector.extract_strided_slice %592 {offsets = [0, 0], sizes = [8, 32], strides = [1, 1]} : vector<32x32xf32> to vector<8x32xf32>
    %cst_258 = arith.constant dense<0.000000e+00> : vector<16x32xf32>
    %623 = tpu.matmul %621, %622, %cst_258 {dimension_numbers = #tpu.dot_dimension_numbers<[1], [0], [0], [1], [0, 0, 1, 1], [], []>} : vector<16x8xf32>, vector<8x32xf32>, vector<16x32xf32> -> vector<16x32xf32>
    %624 = arith.addf %600, %623 : vector<16x32xf32>
    %625 = vector.extract_strided_slice %588 {offsets = [0, 8], sizes = [16, 8], strides = [1, 1]} : vector<16x32xf32> to vector<16x8xf32>
    %626 = vector.shape_cast %625 : vector<16x8xf32> to vector<2x8x8xf32>
    %627 = vector.extract_strided_slice %589 {offsets = [0, 8], sizes = [16, 8], strides = [1, 1]} : vector<16x32xf32> to vector<16x8xf32>
    %628 = vector.shape_cast %627 : vector<16x8xf32> to vector<2x8x8xf32>
    %629 = vector.extract_strided_slice %590 {offsets = [0, 8], sizes = [16, 8], strides = [1, 1]} : vector<16x32xf32> to vector<16x8xf32>
    %630 = vector.shape_cast %629 : vector<16x8xf32> to vector<2x8x8xf32>
    "tpu.trace_start"() <{level = 10 : i32, message = "bqd,bkd->bqk"}> : () -> ()
    %cst_259 = arith.constant dense<0.000000e+00> : vector<2x8x8xf32>
    %631 = tpu.matmul %626, %628, %cst_259 {dimension_numbers = #tpu.dot_dimension_numbers<[2], [2], [1], [1], [0, 0, 0, 1, 1, 1], [0], [0]>} : vector<2x8x8xf32>, vector<2x8x8xf32>, vector<2x8x8xf32> -> vector<2x8x8xf32>
    %cst_260 = arith.constant -1.000000e+09 : f32
    "tpu.trace_stop"() : () -> ()
    %632 = vector.broadcast %cst_260 : f32 to vector<2x8x8xf32>
    %633 = arith.select %22, %632, %631 : vector<2x8x8xi1>, vector<2x8x8xf32>
    %cst_261 = arith.constant dense<0xFF800000> : vector<2x8xf32>
    %634 = vector.multi_reduction <maximumf>, %633, %cst_261 [2] : vector<2x8x8xf32> to vector<2x8xf32>
    %635 = vector.shape_cast %634 : vector<2x8xf32> to vector<2x8x1xf32>
    %636 = vector.broadcast %635 : vector<2x8x1xf32> to vector<2x8x8xf32>
    %637 = arith.subf %633, %636 : vector<2x8x8xf32>
    %638 = math.exp %637 : vector<2x8x8xf32>
    %cst_262 = arith.constant dense<0.000000e+00> : vector<2x8xf32>
    %639 = vector.multi_reduction <add>, %638, %cst_262 [2] : vector<2x8x8xf32> to vector<2x8xf32>
    %640 = vector.shape_cast %639 : vector<2x8xf32> to vector<2x8x1xf32>
    %641 = tpu.reciprocal %640 {approx = true} : vector<2x8x1xf32> -> vector<2x8x1xf32>
    %642 = vector.broadcast %641 : vector<2x8x1xf32> to vector<2x8x8xf32>
    %643 = arith.mulf %638, %642 : vector<2x8x8xf32>
    "tpu.trace_start"() <{level = 10 : i32, message = "bqk,bkd->bqd"}> : () -> ()
    %cst_263 = arith.constant dense<0.000000e+00> : vector<2x8x8xf32>
    %644 = tpu.matmul %643, %630, %cst_263 {dimension_numbers = #tpu.dot_dimension_numbers<[2], [1], [1], [2], [0, 0, 0, 1, 1, 2], [0], [0]>} : vector<2x8x8xf32>, vector<2x8x8xf32>, vector<2x8x8xf32> -> vector<2x8x8xf32>
    "tpu.trace_stop"() : () -> ()
    %645 = vector.shape_cast %644 : vector<2x8x8xf32> to vector<16x8xf32>
    %646 = vector.extract_strided_slice %592 {offsets = [8, 0], sizes = [8, 32], strides = [1, 1]} : vector<32x32xf32> to vector<8x32xf32>
    %cst_264 = arith.constant dense<0.000000e+00> : vector<16x32xf32>
    %647 = tpu.matmul %645, %646, %cst_264 {dimension_numbers = #tpu.dot_dimension_numbers<[1], [0], [0], [1], [0, 0, 1, 1], [], []>} : vector<16x8xf32>, vector<8x32xf32>, vector<16x32xf32> -> vector<16x32xf32>
    %648 = arith.addf %624, %647 : vector<16x32xf32>
    %649 = vector.extract_strided_slice %588 {offsets = [0, 16], sizes = [16, 8], strides = [1, 1]} : vector<16x32xf32> to vector<16x8xf32>
    %650 = vector.shape_cast %649 : vector<16x8xf32> to vector<2x8x8xf32>
    %651 = vector.extract_strided_slice %589 {offsets = [0, 16], sizes = [16, 8], strides = [1, 1]} : vector<16x32xf32> to vector<16x8xf32>
    %652 = vector.shape_cast %651 : vector<16x8xf32> to vector<2x8x8xf32>
    %653 = vector.extract_strided_slice %590 {offsets = [0, 16], sizes = [16, 8], strides = [1, 1]} : vector<16x32xf32> to vector<16x8xf32>
    %654 = vector.shape_cast %653 : vector<16x8xf32> to vector<2x8x8xf32>
    "tpu.trace_start"() <{level = 10 : i32, message = "bqd,bkd->bqk"}> : () -> ()
    %cst_265 = arith.constant dense<0.000000e+00> : vector<2x8x8xf32>
    %655 = tpu.matmul %650, %652, %cst_265 {dimension_numbers = #tpu.dot_dimension_numbers<[2], [2], [1], [1], [0, 0, 0, 1, 1, 1], [0], [0]>} : vector<2x8x8xf32>, vector<2x8x8xf32>, vector<2x8x8xf32> -> vector<2x8x8xf32>
    %cst_266 = arith.constant -1.000000e+09 : f32
    "tpu.trace_stop"() : () -> ()
    %656 = vector.broadcast %cst_266 : f32 to vector<2x8x8xf32>
    %657 = arith.select %22, %656, %655 : vector<2x8x8xi1>, vector<2x8x8xf32>
    %cst_267 = arith.constant dense<0xFF800000> : vector<2x8xf32>
    %658 = vector.multi_reduction <maximumf>, %657, %cst_267 [2] : vector<2x8x8xf32> to vector<2x8xf32>
    %659 = vector.shape_cast %658 : vector<2x8xf32> to vector<2x8x1xf32>
    %660 = vector.broadcast %659 : vector<2x8x1xf32> to vector<2x8x8xf32>
    %661 = arith.subf %657, %660 : vector<2x8x8xf32>
    %662 = math.exp %661 : vector<2x8x8xf32>
    %cst_268 = arith.constant dense<0.000000e+00> : vector<2x8xf32>
    %663 = vector.multi_reduction <add>, %662, %cst_268 [2] : vector<2x8x8xf32> to vector<2x8xf32>
    %664 = vector.shape_cast %663 : vector<2x8xf32> to vector<2x8x1xf32>
    %665 = tpu.reciprocal %664 {approx = true} : vector<2x8x1xf32> -> vector<2x8x1xf32>
    %666 = vector.broadcast %665 : vector<2x8x1xf32> to vector<2x8x8xf32>
    %667 = arith.mulf %662, %666 : vector<2x8x8xf32>
    "tpu.trace_start"() <{level = 10 : i32, message = "bqk,bkd->bqd"}> : () -> ()
    %cst_269 = arith.constant dense<0.000000e+00> : vector<2x8x8xf32>
    %668 = tpu.matmul %667, %654, %cst_269 {dimension_numbers = #tpu.dot_dimension_numbers<[2], [1], [1], [2], [0, 0, 0, 1, 1, 2], [0], [0]>} : vector<2x8x8xf32>, vector<2x8x8xf32>, vector<2x8x8xf32> -> vector<2x8x8xf32>
    "tpu.trace_stop"() : () -> ()
    %669 = vector.shape_cast %668 : vector<2x8x8xf32> to vector<16x8xf32>
    %670 = vector.extract_strided_slice %592 {offsets = [16, 0], sizes = [8, 32], strides = [1, 1]} : vector<32x32xf32> to vector<8x32xf32>
    %cst_270 = arith.constant dense<0.000000e+00> : vector<16x32xf32>
    %671 = tpu.matmul %669, %670, %cst_270 {dimension_numbers = #tpu.dot_dimension_numbers<[1], [0], [0], [1], [0, 0, 1, 1], [], []>} : vector<16x8xf32>, vector<8x32xf32>, vector<16x32xf32> -> vector<16x32xf32>
    %672 = arith.addf %648, %671 : vector<16x32xf32>
    %673 = vector.extract_strided_slice %588 {offsets = [0, 24], sizes = [16, 8], strides = [1, 1]} : vector<16x32xf32> to vector<16x8xf32>
    %674 = vector.shape_cast %673 : vector<16x8xf32> to vector<2x8x8xf32>
    %675 = vector.extract_strided_slice %589 {offsets = [0, 24], sizes = [16, 8], strides = [1, 1]} : vector<16x32xf32> to vector<16x8xf32>
    %676 = vector.shape_cast %675 : vector<16x8xf32> to vector<2x8x8xf32>
    %677 = vector.extract_strided_slice %590 {offsets = [0, 24], sizes = [16, 8], strides = [1, 1]} : vector<16x32xf32> to vector<16x8xf32>
    %678 = vector.shape_cast %677 : vector<16x8xf32> to vector<2x8x8xf32>
    "tpu.trace_start"() <{level = 10 : i32, message = "bqd,bkd->bqk"}> : () -> ()
    %cst_271 = arith.constant dense<0.000000e+00> : vector<2x8x8xf32>
    %679 = tpu.matmul %674, %676, %cst_271 {dimension_numbers = #tpu.dot_dimension_numbers<[2], [2], [1], [1], [0, 0, 0, 1, 1, 1], [0], [0]>} : vector<2x8x8xf32>, vector<2x8x8xf32>, vector<2x8x8xf32> -> vector<2x8x8xf32>
    %cst_272 = arith.constant -1.000000e+09 : f32
    "tpu.trace_stop"() : () -> ()
    %680 = vector.broadcast %cst_272 : f32 to vector<2x8x8xf32>
    %681 = arith.select %22, %680, %679 : vector<2x8x8xi1>, vector<2x8x8xf32>
    %cst_273 = arith.constant dense<0xFF800000> : vector<2x8xf32>
    %682 = vector.multi_reduction <maximumf>, %681, %cst_273 [2] : vector<2x8x8xf32> to vector<2x8xf32>
    %683 = vector.shape_cast %682 : vector<2x8xf32> to vector<2x8x1xf32>
    %684 = vector.broadcast %683 : vector<2x8x1xf32> to vector<2x8x8xf32>
    %685 = arith.subf %681, %684 : vector<2x8x8xf32>
    %686 = math.exp %685 : vector<2x8x8xf32>
    %cst_274 = arith.constant dense<0.000000e+00> : vector<2x8xf32>
    %687 = vector.multi_reduction <add>, %686, %cst_274 [2] : vector<2x8x8xf32> to vector<2x8xf32>
    %688 = vector.shape_cast %687 : vector<2x8xf32> to vector<2x8x1xf32>
    %689 = tpu.reciprocal %688 {approx = true} : vector<2x8x1xf32> -> vector<2x8x1xf32>
    %690 = vector.broadcast %689 : vector<2x8x1xf32> to vector<2x8x8xf32>
    %691 = arith.mulf %686, %690 : vector<2x8x8xf32>
    "tpu.trace_start"() <{level = 10 : i32, message = "bqk,bkd->bqd"}> : () -> ()
    %cst_275 = arith.constant dense<0.000000e+00> : vector<2x8x8xf32>
    %692 = tpu.matmul %691, %678, %cst_275 {dimension_numbers = #tpu.dot_dimension_numbers<[2], [1], [1], [2], [0, 0, 0, 1, 1, 2], [0], [0]>} : vector<2x8x8xf32>, vector<2x8x8xf32>, vector<2x8x8xf32> -> vector<2x8x8xf32>
    "tpu.trace_stop"() : () -> ()
    %693 = vector.shape_cast %692 : vector<2x8x8xf32> to vector<16x8xf32>
    %694 = vector.extract_strided_slice %592 {offsets = [24, 0], sizes = [8, 32], strides = [1, 1]} : vector<32x32xf32> to vector<8x32xf32>
    %cst_276 = arith.constant dense<0.000000e+00> : vector<16x32xf32>
    %695 = tpu.matmul %693, %694, %cst_276 {dimension_numbers = #tpu.dot_dimension_numbers<[1], [0], [0], [1], [0, 0, 1, 1], [], []>} : vector<16x8xf32>, vector<8x32xf32>, vector<16x32xf32> -> vector<16x32xf32>
    %696 = arith.addf %672, %695 : vector<16x32xf32>
    %697 = vector.shape_cast %619 : vector<2x8x8xf32> to vector<2x1x8x8xf32>
    %698 = vector.shape_cast %643 : vector<2x8x8xf32> to vector<2x1x8x8xf32>
    %699 = vector.shape_cast %667 : vector<2x8x8xf32> to vector<2x1x8x8xf32>
    %700 = vector.shape_cast %691 : vector<2x8x8xf32> to vector<2x1x8x8xf32>
    %701 = tpu.concatenate %697, %698, %699, %700 in 1 : vector<2x1x8x8xf32>, vector<2x1x8x8xf32>, vector<2x1x8x8xf32>, vector<2x1x8x8xf32> -> vector<2x4x8x8xf32>
    %cst_277 = arith.constant dense<0.000000e+00> : vector<16xf32>
    %702 = vector.multi_reduction <add>, %696, %cst_277 [1] : vector<16x32xf32> to vector<16xf32>
    %703 = vector.shape_cast %702 : vector<16xf32> to vector<16x1xf32>
    %cst_278 = arith.constant 3.200000e+01 : f32
    %704 = vector.broadcast %cst_278 : f32 to vector<16x1xf32>
    %705 = arith.divf %703, %704 : vector<16x1xf32>
    %706 = vector.broadcast %705 : vector<16x1xf32> to vector<16x32xf32>
    %707 = arith.subf %696, %706 : vector<16x32xf32>
    %708 = arith.mulf %707, %707 : vector<16x32xf32>
    %cst_279 = arith.constant dense<0.000000e+00> : vector<16xf32>
    %709 = vector.multi_reduction <add>, %708, %cst_279 [1] : vector<16x32xf32> to vector<16xf32>
    %710 = vector.shape_cast %709 : vector<16xf32> to vector<16x1xf32>
    %cst_280 = arith.constant 3.200000e+01 : f32
    %711 = vector.broadcast %cst_280 : f32 to vector<16x1xf32>
    %712 = arith.divf %710, %711 : vector<16x1xf32>
    %713 = vector.broadcast %705 : vector<16x1xf32> to vector<16x32xf32>
    %714 = arith.subf %696, %713 : vector<16x32xf32>
    %cst_281 = arith.constant 9.99999974E-6 : f32
    %715 = vector.broadcast %cst_281 : f32 to vector<16x1xf32>
    %716 = arith.addf %712, %715 : vector<16x1xf32>
    %717 = math.rsqrt %716 : vector<16x1xf32>
    %718 = vector.broadcast %717 : vector<16x1xf32> to vector<16x32xf32>
    %719 = arith.mulf %714, %718 : vector<16x32xf32>
    %720 = vector.broadcast %596 : vector<1x32xf32> to vector<16x32xf32>
    %721 = arith.mulf %719, %720 : vector<16x32xf32>
    %722 = vector.broadcast %598 : vector<1x32xf32> to vector<16x32xf32>
    %723 = arith.addf %721, %722 : vector<16x32xf32>
    %c0_282 = arith.constant 0 : index
    %c0_283 = arith.constant 0 : index
    %c0_284 = arith.constant 0 : index
    %c0_285 = arith.constant 0 : index
    %c0_286 = arith.constant 0 : index
    %724 = vector.load %arg43[%c0_282, %c0_283, %c0_284, %c0_285, %c0_286] : memref<2x2x4x8x8xf32, #tpu.memory_space<vmem>>, vector<1x2x4x8x8xf32>
    %725 = vector.shape_cast %724 : vector<1x2x4x8x8xf32> to vector<2x4x8x8xf32>
    %726 = vector.shape_cast %701 : vector<2x4x8x8xf32> to vector<1x2x4x8x8xf32>
    tpu.vector_store %arg43[%c0_282, %c0_283, %c0_284, %c0_285, %c0_286], %726 {strides = array<i32>} : memref<2x2x4x8x8xf32, #tpu.memory_space<vmem>>, vector<1x2x4x8x8xf32>,
    %c0_287 = arith.constant 0 : index
    %c0_288 = arith.constant 0 : index
    %c0_289 = arith.constant 0 : index
    %727 = vector.load %arg33[%c0_287, %c0_288, %c0_289] : memref<2x32x64xf32, #tpu.memory_space<vmem>>, vector<1x32x64xf32>
    %728 = vector.shape_cast %727 : vector<1x32x64xf32> to vector<32x64xf32>
    %c0_290 = arith.constant 0 : index
    %c0_291 = arith.constant 0 : index
    %c0_292 = arith.constant 0 : index
    %729 = vector.load %arg34[%c0_290, %c0_291, %c0_292] : memref<2x1x64xf32, #tpu.memory_space<vmem>>, vector<1x1x64xf32>
    %730 = vector.shape_cast %729 : vector<1x1x64xf32> to vector<1x64xf32>
    %c0_293 = arith.constant 0 : index
    %c0_294 = arith.constant 0 : index
    %c0_295 = arith.constant 0 : index
    %731 = vector.load %arg35[%c0_293, %c0_294, %c0_295] : memref<2x64x32xf32, #tpu.memory_space<vmem>>, vector<1x64x32xf32>
    %732 = vector.shape_cast %731 : vector<1x64x32xf32> to vector<64x32xf32>
    %c0_296 = arith.constant 0 : index
    %c0_297 = arith.constant 0 : index
    %c0_298 = arith.constant 0 : index
    %733 = vector.load %arg36[%c0_296, %c0_297, %c0_298] : memref<2x1x32xf32, #tpu.memory_space<vmem>>, vector<1x1x32xf32>
    %734 = vector.shape_cast %733 : vector<1x1x32xf32> to vector<1x32xf32>
    %c0_299 = arith.constant 0 : index
    %c0_300 = arith.constant 0 : index
    %c0_301 = arith.constant 0 : index
    %735 = vector.load %arg37[%c0_299, %c0_300, %c0_301] : memref<2x1x32xf32, #tpu.memory_space<vmem>>, vector<1x1x32xf32>
    %736 = vector.shape_cast %735 : vector<1x1x32xf32> to vector<1x32xf32>
    %c0_302 = arith.constant 0 : index
    %c0_303 = arith.constant 0 : index
    %c0_304 = arith.constant 0 : index
    %737 = vector.load %arg38[%c0_302, %c0_303, %c0_304] : memref<2x1x32xf32, #tpu.memory_space<vmem>>, vector<1x1x32xf32>
    %738 = vector.shape_cast %737 : vector<1x1x32xf32> to vector<1x32xf32>
    %cst_305 = arith.constant dense<0.000000e+00> : vector<16x64xf32>
    %739 = tpu.matmul %723, %728, %cst_305 {dimension_numbers = #tpu.dot_dimension_numbers<[1], [0], [0], [1], [0, 0, 1, 1], [], []>} : vector<16x32xf32>, vector<32x64xf32>, vector<16x64xf32> -> vector<16x64xf32>
    %740 = vector.broadcast %730 : vector<1x64xf32> to vector<16x64xf32>
    %741 = arith.addf %739, %740 : vector<16x64xf32>
    %cst_306 = arith.constant 0.000000e+00 : f32
    %742 = vector.broadcast %cst_306 : f32 to vector<16x64xf32>
    %743 = arith.maximumf %741, %742 : vector<16x64xf32>
    %cst_307 = arith.constant dense<0.000000e+00> : vector<16x32xf32>
    %744 = tpu.matmul %743, %732, %cst_307 {dimension_numbers = #tpu.dot_dimension_numbers<[1], [0], [0], [1], [0, 0, 1, 1], [], []>} : vector<16x64xf32>, vector<64x32xf32>, vector<16x32xf32> -> vector<16x32xf32>
    %745 = vector.broadcast %734 : vector<1x32xf32> to vector<16x32xf32>
    %746 = arith.addf %744, %745 : vector<16x32xf32>
    %747 = arith.addf %746, %723 : vector<16x32xf32>
    %cst_308 = arith.constant dense<0.000000e+00> : vector<16xf32>
    %748 = vector.multi_reduction <add>, %747, %cst_308 [1] : vector<16x32xf32> to vector<16xf32>
    %749 = vector.shape_cast %748 : vector<16xf32> to vector<16x1xf32>
    %cst_309 = arith.constant 3.200000e+01 : f32
    %750 = vector.broadcast %cst_309 : f32 to vector<16x1xf32>
    %751 = arith.divf %749, %750 : vector<16x1xf32>
    %752 = vector.broadcast %751 : vector<16x1xf32> to vector<16x32xf32>
    %753 = arith.subf %747, %752 : vector<16x32xf32>
    %754 = arith.mulf %753, %753 : vector<16x32xf32>
    %cst_310 = arith.constant dense<0.000000e+00> : vector<16xf32>
    %755 = vector.multi_reduction <add>, %754, %cst_310 [1] : vector<16x32xf32> to vector<16xf32>
    %756 = vector.shape_cast %755 : vector<16xf32> to vector<16x1xf32>
    %cst_311 = arith.constant 3.200000e+01 : f32
    %757 = vector.broadcast %cst_311 : f32 to vector<16x1xf32>
    %758 = arith.divf %756, %757 : vector<16x1xf32>
    %759 = vector.broadcast %751 : vector<16x1xf32> to vector<16x32xf32>
    %760 = arith.subf %747, %759 : vector<16x32xf32>
    %cst_312 = arith.constant 9.99999974E-6 : f32
    %761 = vector.broadcast %cst_312 : f32 to vector<16x1xf32>
    %762 = arith.addf %758, %761 : vector<16x1xf32>
    %763 = math.rsqrt %762 : vector<16x1xf32>
    %764 = vector.broadcast %763 : vector<16x1xf32> to vector<16x32xf32>
    %765 = arith.mulf %760, %764 : vector<16x32xf32>
    %766 = vector.broadcast %736 : vector<1x32xf32> to vector<16x32xf32>
    %767 = arith.mulf %765, %766 : vector<16x32xf32>
    %768 = vector.broadcast %738 : vector<1x32xf32> to vector<16x32xf32>
    %769 = arith.addf %767, %768 : vector<16x32xf32>
    %c1_313 = arith.constant 1 : index
    %c0_314 = arith.constant 0 : index
    %c0_315 = arith.constant 0 : index
    %770 = vector.load %arg19[%c1_313, %c0_314, %c0_315] : memref<2x32x96xf32, #tpu.memory_space<vmem>>, vector<1x32x96xf32>
    %771 = vector.shape_cast %770 : vector<1x32x96xf32> to vector<32x96xf32>
    %cst_316 = arith.constant dense<0.000000e+00> : vector<16x96xf32>
    %772 = tpu.matmul %769, %771, %cst_316 {dimension_numbers = #tpu.dot_dimension_numbers<[1], [0], [0], [1], [0, 0, 1, 1], [], []>} : vector<16x32xf32>, vector<32x96xf32>, vector<16x96xf32> -> vector<16x96xf32>
    %c1_317 = arith.constant 1 : index
    %c0_318 = arith.constant 0 : index
    %c0_319 = arith.constant 0 : index
    %773 = vector.load %arg20[%c1_317, %c0_318, %c0_319] : memref<2x1x96xf32, #tpu.memory_space<vmem>>, vector<1x1x96xf32>
    %774 = vector.shape_cast %773 : vector<1x1x96xf32> to vector<1x96xf32>
    %775 = vector.broadcast %774 : vector<1x96xf32> to vector<16x96xf32>
    %776 = arith.addf %772, %775 : vector<16x96xf32>
    %777 = vector.extract_strided_slice %776 {offsets = [0, 0], sizes = [16, 32], strides = [1, 1]} : vector<16x96xf32> to vector<16x32xf32>
    %778 = vector.extract_strided_slice %776 {offsets = [0, 32], sizes = [16, 32], strides = [1, 1]} : vector<16x96xf32> to vector<16x32xf32>
    %779 = vector.extract_strided_slice %776 {offsets = [0, 64], sizes = [16, 32], strides = [1, 1]} : vector<16x96xf32> to vector<16x32xf32>
    %c1_320 = arith.constant 1 : index
    %c0_321 = arith.constant 0 : index
    %c0_322 = arith.constant 0 : index
    %780 = vector.load %arg21[%c1_320, %c0_321, %c0_322] : memref<2x32x32xf32, #tpu.memory_space<vmem>>, vector<1x32x32xf32>
    %781 = vector.shape_cast %780 : vector<1x32x32xf32> to vector<32x32xf32>
    %c1_323 = arith.constant 1 : index
    %c0_324 = arith.constant 0 : index
    %c0_325 = arith.constant 0 : index
    %782 = vector.load %arg22[%c1_323, %c0_324, %c0_325] : memref<2x1x32xf32, #tpu.memory_space<vmem>>, vector<1x1x32xf32>
    %783 = vector.shape_cast %782 : vector<1x1x32xf32> to vector<1x32xf32>
    %c1_326 = arith.constant 1 : index
    %c0_327 = arith.constant 0 : index
    %c0_328 = arith.constant 0 : index
    %784 = vector.load %arg23[%c1_326, %c0_327, %c0_328] : memref<2x1x32xf32, #tpu.memory_space<vmem>>, vector<1x1x32xf32>
    %785 = vector.shape_cast %784 : vector<1x1x32xf32> to vector<1x32xf32>
    %c1_329 = arith.constant 1 : index
    %c0_330 = arith.constant 0 : index
    %c0_331 = arith.constant 0 : index
    %786 = vector.load %arg24[%c1_329, %c0_330, %c0_331] : memref<2x1x32xf32, #tpu.memory_space<vmem>>, vector<1x1x32xf32>
    %787 = vector.shape_cast %786 : vector<1x1x32xf32> to vector<1x32xf32>
    %788 = vector.broadcast %783 : vector<1x32xf32> to vector<16x32xf32>
    %789 = arith.addf %769, %788 : vector<16x32xf32>
    %790 = vector.extract_strided_slice %777 {offsets = [0, 0], sizes = [16, 8], strides = [1, 1]} : vector<16x32xf32> to vector<16x8xf32>
    %791 = vector.shape_cast %790 : vector<16x8xf32> to vector<2x8x8xf32>
    %792 = vector.extract_strided_slice %778 {offsets = [0, 0], sizes = [16, 8], strides = [1, 1]} : vector<16x32xf32> to vector<16x8xf32>
    %793 = vector.shape_cast %792 : vector<16x8xf32> to vector<2x8x8xf32>
    %794 = vector.extract_strided_slice %779 {offsets = [0, 0], sizes = [16, 8], strides = [1, 1]} : vector<16x32xf32> to vector<16x8xf32>
    %795 = vector.shape_cast %794 : vector<16x8xf32> to vector<2x8x8xf32>
    "tpu.trace_start"() <{level = 10 : i32, message = "bqd,bkd->bqk"}> : () -> ()
    %cst_332 = arith.constant dense<0.000000e+00> : vector<2x8x8xf32>
    %796 = tpu.matmul %791, %793, %cst_332 {dimension_numbers = #tpu.dot_dimension_numbers<[2], [2], [1], [1], [0, 0, 0, 1, 1, 1], [0], [0]>} : vector<2x8x8xf32>, vector<2x8x8xf32>, vector<2x8x8xf32> -> vector<2x8x8xf32>
    %cst_333 = arith.constant -1.000000e+09 : f32
    "tpu.trace_stop"() : () -> ()
    %797 = vector.broadcast %cst_333 : f32 to vector<2x8x8xf32>
    %798 = arith.select %19, %797, %796 : vector<2x8x8xi1>, vector<2x8x8xf32>
    %cst_334 = arith.constant dense<0xFF800000> : vector<2x8xf32>
    %799 = vector.multi_reduction <maximumf>, %798, %cst_334 [2] : vector<2x8x8xf32> to vector<2x8xf32>
    %800 = vector.shape_cast %799 : vector<2x8xf32> to vector<2x8x1xf32>
    %801 = vector.broadcast %800 : vector<2x8x1xf32> to vector<2x8x8xf32>
    %802 = arith.subf %798, %801 : vector<2x8x8xf32>
    %803 = math.exp %802 : vector<2x8x8xf32>
    %cst_335 = arith.constant dense<0.000000e+00> : vector<2x8xf32>
    %804 = vector.multi_reduction <add>, %803, %cst_335 [2] : vector<2x8x8xf32> to vector<2x8xf32>
    %805 = vector.shape_cast %804 : vector<2x8xf32> to vector<2x8x1xf32>
    %806 = tpu.reciprocal %805 {approx = true} : vector<2x8x1xf32> -> vector<2x8x1xf32>
    %807 = vector.broadcast %806 : vector<2x8x1xf32> to vector<2x8x8xf32>
    %808 = arith.mulf %803, %807 : vector<2x8x8xf32>
    "tpu.trace_start"() <{level = 10 : i32, message = "bqk,bkd->bqd"}> : () -> ()
    %cst_336 = arith.constant dense<0.000000e+00> : vector<2x8x8xf32>
    %809 = tpu.matmul %808, %795, %cst_336 {dimension_numbers = #tpu.dot_dimension_numbers<[2], [1], [1], [2], [0, 0, 0, 1, 1, 2], [0], [0]>} : vector<2x8x8xf32>, vector<2x8x8xf32>, vector<2x8x8xf32> -> vector<2x8x8xf32>
    "tpu.trace_stop"() : () -> ()
    %810 = vector.shape_cast %809 : vector<2x8x8xf32> to vector<16x8xf32>
    %811 = vector.extract_strided_slice %781 {offsets = [0, 0], sizes = [8, 32], strides = [1, 1]} : vector<32x32xf32> to vector<8x32xf32>
    %cst_337 = arith.constant dense<0.000000e+00> : vector<16x32xf32>
    %812 = tpu.matmul %810, %811, %cst_337 {dimension_numbers = #tpu.dot_dimension_numbers<[1], [0], [0], [1], [0, 0, 1, 1], [], []>} : vector<16x8xf32>, vector<8x32xf32>, vector<16x32xf32> -> vector<16x32xf32>
    %813 = arith.addf %789, %812 : vector<16x32xf32>
    %814 = vector.extract_strided_slice %777 {offsets = [0, 8], sizes = [16, 8], strides = [1, 1]} : vector<16x32xf32> to vector<16x8xf32>
    %815 = vector.shape_cast %814 : vector<16x8xf32> to vector<2x8x8xf32>
    %816 = vector.extract_strided_slice %778 {offsets = [0, 8], sizes = [16, 8], strides = [1, 1]} : vector<16x32xf32> to vector<16x8xf32>
    %817 = vector.shape_cast %816 : vector<16x8xf32> to vector<2x8x8xf32>
    %818 = vector.extract_strided_slice %779 {offsets = [0, 8], sizes = [16, 8], strides = [1, 1]} : vector<16x32xf32> to vector<16x8xf32>
    %819 = vector.shape_cast %818 : vector<16x8xf32> to vector<2x8x8xf32>
    "tpu.trace_start"() <{level = 10 : i32, message = "bqd,bkd->bqk"}> : () -> ()
    %cst_338 = arith.constant dense<0.000000e+00> : vector<2x8x8xf32>
    %820 = tpu.matmul %815, %817, %cst_338 {dimension_numbers = #tpu.dot_dimension_numbers<[2], [2], [1], [1], [0, 0, 0, 1, 1, 1], [0], [0]>} : vector<2x8x8xf32>, vector<2x8x8xf32>, vector<2x8x8xf32> -> vector<2x8x8xf32>
    %cst_339 = arith.constant -1.000000e+09 : f32
    "tpu.trace_stop"() : () -> ()
    %821 = vector.broadcast %cst_339 : f32 to vector<2x8x8xf32>
    %822 = arith.select %19, %821, %820 : vector<2x8x8xi1>, vector<2x8x8xf32>
    %cst_340 = arith.constant dense<0xFF800000> : vector<2x8xf32>
    %823 = vector.multi_reduction <maximumf>, %822, %cst_340 [2] : vector<2x8x8xf32> to vector<2x8xf32>
    %824 = vector.shape_cast %823 : vector<2x8xf32> to vector<2x8x1xf32>
    %825 = vector.broadcast %824 : vector<2x8x1xf32> to vector<2x8x8xf32>
    %826 = arith.subf %822, %825 : vector<2x8x8xf32>
    %827 = math.exp %826 : vector<2x8x8xf32>
    %cst_341 = arith.constant dense<0.000000e+00> : vector<2x8xf32>
    %828 = vector.multi_reduction <add>, %827, %cst_341 [2] : vector<2x8x8xf32> to vector<2x8xf32>
    %829 = vector.shape_cast %828 : vector<2x8xf32> to vector<2x8x1xf32>
    %830 = tpu.reciprocal %829 {approx = true} : vector<2x8x1xf32> -> vector<2x8x1xf32>
    %831 = vector.broadcast %830 : vector<2x8x1xf32> to vector<2x8x8xf32>
    %832 = arith.mulf %827, %831 : vector<2x8x8xf32>
    "tpu.trace_start"() <{level = 10 : i32, message = "bqk,bkd->bqd"}> : () -> ()
    %cst_342 = arith.constant dense<0.000000e+00> : vector<2x8x8xf32>
    %833 = tpu.matmul %832, %819, %cst_342 {dimension_numbers = #tpu.dot_dimension_numbers<[2], [1], [1], [2], [0, 0, 0, 1, 1, 2], [0], [0]>} : vector<2x8x8xf32>, vector<2x8x8xf32>, vector<2x8x8xf32> -> vector<2x8x8xf32>
    "tpu.trace_stop"() : () -> ()
    %834 = vector.shape_cast %833 : vector<2x8x8xf32> to vector<16x8xf32>
    %835 = vector.extract_strided_slice %781 {offsets = [8, 0], sizes = [8, 32], strides = [1, 1]} : vector<32x32xf32> to vector<8x32xf32>
    %cst_343 = arith.constant dense<0.000000e+00> : vector<16x32xf32>
    %836 = tpu.matmul %834, %835, %cst_343 {dimension_numbers = #tpu.dot_dimension_numbers<[1], [0], [0], [1], [0, 0, 1, 1], [], []>} : vector<16x8xf32>, vector<8x32xf32>, vector<16x32xf32> -> vector<16x32xf32>
    %837 = arith.addf %813, %836 : vector<16x32xf32>
    %838 = vector.extract_strided_slice %777 {offsets = [0, 16], sizes = [16, 8], strides = [1, 1]} : vector<16x32xf32> to vector<16x8xf32>
    %839 = vector.shape_cast %838 : vector<16x8xf32> to vector<2x8x8xf32>
    %840 = vector.extract_strided_slice %778 {offsets = [0, 16], sizes = [16, 8], strides = [1, 1]} : vector<16x32xf32> to vector<16x8xf32>
    %841 = vector.shape_cast %840 : vector<16x8xf32> to vector<2x8x8xf32>
    %842 = vector.extract_strided_slice %779 {offsets = [0, 16], sizes = [16, 8], strides = [1, 1]} : vector<16x32xf32> to vector<16x8xf32>
    %843 = vector.shape_cast %842 : vector<16x8xf32> to vector<2x8x8xf32>
    "tpu.trace_start"() <{level = 10 : i32, message = "bqd,bkd->bqk"}> : () -> ()
    %cst_344 = arith.constant dense<0.000000e+00> : vector<2x8x8xf32>
    %844 = tpu.matmul %839, %841, %cst_344 {dimension_numbers = #tpu.dot_dimension_numbers<[2], [2], [1], [1], [0, 0, 0, 1, 1, 1], [0], [0]>} : vector<2x8x8xf32>, vector<2x8x8xf32>, vector<2x8x8xf32> -> vector<2x8x8xf32>
    %cst_345 = arith.constant -1.000000e+09 : f32
    "tpu.trace_stop"() : () -> ()
    %845 = vector.broadcast %cst_345 : f32 to vector<2x8x8xf32>
    %846 = arith.select %19, %845, %844 : vector<2x8x8xi1>, vector<2x8x8xf32>
    %cst_346 = arith.constant dense<0xFF800000> : vector<2x8xf32>
    %847 = vector.multi_reduction <maximumf>, %846, %cst_346 [2] : vector<2x8x8xf32> to vector<2x8xf32>
    %848 = vector.shape_cast %847 : vector<2x8xf32> to vector<2x8x1xf32>
    %849 = vector.broadcast %848 : vector<2x8x1xf32> to vector<2x8x8xf32>
    %850 = arith.subf %846, %849 : vector<2x8x8xf32>
    %851 = math.exp %850 : vector<2x8x8xf32>
    %cst_347 = arith.constant dense<0.000000e+00> : vector<2x8xf32>
    %852 = vector.multi_reduction <add>, %851, %cst_347 [2] : vector<2x8x8xf32> to vector<2x8xf32>
    %853 = vector.shape_cast %852 : vector<2x8xf32> to vector<2x8x1xf32>
    %854 = tpu.reciprocal %853 {approx = true} : vector<2x8x1xf32> -> vector<2x8x1xf32>
    %855 = vector.broadcast %854 : vector<2x8x1xf32> to vector<2x8x8xf32>
    %856 = arith.mulf %851, %855 : vector<2x8x8xf32>
    "tpu.trace_start"() <{level = 10 : i32, message = "bqk,bkd->bqd"}> : () -> ()
    %cst_348 = arith.constant dense<0.000000e+00> : vector<2x8x8xf32>
    %857 = tpu.matmul %856, %843, %cst_348 {dimension_numbers = #tpu.dot_dimension_numbers<[2], [1], [1], [2], [0, 0, 0, 1, 1, 2], [0], [0]>} : vector<2x8x8xf32>, vector<2x8x8xf32>, vector<2x8x8xf32> -> vector<2x8x8xf32>
    "tpu.trace_stop"() : () -> ()
    %858 = vector.shape_cast %857 : vector<2x8x8xf32> to vector<16x8xf32>
    %859 = vector.extract_strided_slice %781 {offsets = [16, 0], sizes = [8, 32], strides = [1, 1]} : vector<32x32xf32> to vector<8x32xf32>
    %cst_349 = arith.constant dense<0.000000e+00> : vector<16x32xf32>
    %860 = tpu.matmul %858, %859, %cst_349 {dimension_numbers = #tpu.dot_dimension_numbers<[1], [0], [0], [1], [0, 0, 1, 1], [], []>} : vector<16x8xf32>, vector<8x32xf32>, vector<16x32xf32> -> vector<16x32xf32>
    %861 = arith.addf %837, %860 : vector<16x32xf32>
    %862 = vector.extract_strided_slice %777 {offsets = [0, 24], sizes = [16, 8], strides = [1, 1]} : vector<16x32xf32> to vector<16x8xf32>
    %863 = vector.shape_cast %862 : vector<16x8xf32> to vector<2x8x8xf32>
    %864 = vector.extract_strided_slice %778 {offsets = [0, 24], sizes = [16, 8], strides = [1, 1]} : vector<16x32xf32> to vector<16x8xf32>
    %865 = vector.shape_cast %864 : vector<16x8xf32> to vector<2x8x8xf32>
    %866 = vector.extract_strided_slice %779 {offsets = [0, 24], sizes = [16, 8], strides = [1, 1]} : vector<16x32xf32> to vector<16x8xf32>
    %867 = vector.shape_cast %866 : vector<16x8xf32> to vector<2x8x8xf32>
    "tpu.trace_start"() <{level = 10 : i32, message = "bqd,bkd->bqk"}> : () -> ()
    %cst_350 = arith.constant dense<0.000000e+00> : vector<2x8x8xf32>
    %868 = tpu.matmul %863, %865, %cst_350 {dimension_numbers = #tpu.dot_dimension_numbers<[2], [2], [1], [1], [0, 0, 0, 1, 1, 1], [0], [0]>} : vector<2x8x8xf32>, vector<2x8x8xf32>, vector<2x8x8xf32> -> vector<2x8x8xf32>
    %cst_351 = arith.constant -1.000000e+09 : f32
    "tpu.trace_stop"() : () -> ()
    %869 = vector.broadcast %cst_351 : f32 to vector<2x8x8xf32>
    %870 = arith.select %19, %869, %868 : vector<2x8x8xi1>, vector<2x8x8xf32>
    %cst_352 = arith.constant dense<0xFF800000> : vector<2x8xf32>
    %871 = vector.multi_reduction <maximumf>, %870, %cst_352 [2] : vector<2x8x8xf32> to vector<2x8xf32>
    %872 = vector.shape_cast %871 : vector<2x8xf32> to vector<2x8x1xf32>
    %873 = vector.broadcast %872 : vector<2x8x1xf32> to vector<2x8x8xf32>
    %874 = arith.subf %870, %873 : vector<2x8x8xf32>
    %875 = math.exp %874 : vector<2x8x8xf32>
    %cst_353 = arith.constant dense<0.000000e+00> : vector<2x8xf32>
    %876 = vector.multi_reduction <add>, %875, %cst_353 [2] : vector<2x8x8xf32> to vector<2x8xf32>
    %877 = vector.shape_cast %876 : vector<2x8xf32> to vector<2x8x1xf32>
    %878 = tpu.reciprocal %877 {approx = true} : vector<2x8x1xf32> -> vector<2x8x1xf32>
    %879 = vector.broadcast %878 : vector<2x8x1xf32> to vector<2x8x8xf32>
    %880 = arith.mulf %875, %879 : vector<2x8x8xf32>
    "tpu.trace_start"() <{level = 10 : i32, message = "bqk,bkd->bqd"}> : () -> ()
    %cst_354 = arith.constant dense<0.000000e+00> : vector<2x8x8xf32>
    %881 = tpu.matmul %880, %867, %cst_354 {dimension_numbers = #tpu.dot_dimension_numbers<[2], [1], [1], [2], [0, 0, 0, 1, 1, 2], [0], [0]>} : vector<2x8x8xf32>, vector<2x8x8xf32>, vector<2x8x8xf32> -> vector<2x8x8xf32>
    "tpu.trace_stop"() : () -> ()
    %882 = vector.shape_cast %881 : vector<2x8x8xf32> to vector<16x8xf32>
    %883 = vector.extract_strided_slice %781 {offsets = [24, 0], sizes = [8, 32], strides = [1, 1]} : vector<32x32xf32> to vector<8x32xf32>
    %cst_355 = arith.constant dense<0.000000e+00> : vector<16x32xf32>
    %884 = tpu.matmul %882, %883, %cst_355 {dimension_numbers = #tpu.dot_dimension_numbers<[1], [0], [0], [1], [0, 0, 1, 1], [], []>} : vector<16x8xf32>, vector<8x32xf32>, vector<16x32xf32> -> vector<16x32xf32>
    %885 = arith.addf %861, %884 : vector<16x32xf32>
    %886 = vector.shape_cast %808 : vector<2x8x8xf32> to vector<2x1x8x8xf32>
    %887 = vector.shape_cast %832 : vector<2x8x8xf32> to vector<2x1x8x8xf32>
    %888 = vector.shape_cast %856 : vector<2x8x8xf32> to vector<2x1x8x8xf32>
    %889 = vector.shape_cast %880 : vector<2x8x8xf32> to vector<2x1x8x8xf32>
    %890 = tpu.concatenate %886, %887, %888, %889 in 1 : vector<2x1x8x8xf32>, vector<2x1x8x8xf32>, vector<2x1x8x8xf32>, vector<2x1x8x8xf32> -> vector<2x4x8x8xf32>
    %cst_356 = arith.constant dense<0.000000e+00> : vector<16xf32>
    %891 = vector.multi_reduction <add>, %885, %cst_356 [1] : vector<16x32xf32> to vector<16xf32>
    %892 = vector.shape_cast %891 : vector<16xf32> to vector<16x1xf32>
    %cst_357 = arith.constant 3.200000e+01 : f32
    %893 = vector.broadcast %cst_357 : f32 to vector<16x1xf32>
    %894 = arith.divf %892, %893 : vector<16x1xf32>
    %895 = vector.broadcast %894 : vector<16x1xf32> to vector<16x32xf32>
    %896 = arith.subf %885, %895 : vector<16x32xf32>
    %897 = arith.mulf %896, %896 : vector<16x32xf32>
    %cst_358 = arith.constant dense<0.000000e+00> : vector<16xf32>
    %898 = vector.multi_reduction <add>, %897, %cst_358 [1] : vector<16x32xf32> to vector<16xf32>
    %899 = vector.shape_cast %898 : vector<16xf32> to vector<16x1xf32>
    %cst_359 = arith.constant 3.200000e+01 : f32
    %900 = vector.broadcast %cst_359 : f32 to vector<16x1xf32>
    %901 = arith.divf %899, %900 : vector<16x1xf32>
    %902 = vector.broadcast %894 : vector<16x1xf32> to vector<16x32xf32>
    %903 = arith.subf %885, %902 : vector<16x32xf32>
    %cst_360 = arith.constant 9.99999974E-6 : f32
    %904 = vector.broadcast %cst_360 : f32 to vector<16x1xf32>
    %905 = arith.addf %901, %904 : vector<16x1xf32>
    %906 = math.rsqrt %905 : vector<16x1xf32>
    %907 = vector.broadcast %906 : vector<16x1xf32> to vector<16x32xf32>
    %908 = arith.mulf %903, %907 : vector<16x32xf32>
    %909 = vector.broadcast %785 : vector<1x32xf32> to vector<16x32xf32>
    %910 = arith.mulf %908, %909 : vector<16x32xf32>
    %911 = vector.broadcast %787 : vector<1x32xf32> to vector<16x32xf32>
    %912 = arith.addf %910, %911 : vector<16x32xf32>
    %c1_361 = arith.constant 1 : index
    %c0_362 = arith.constant 0 : index
    %c0_363 = arith.constant 0 : index
    %c0_364 = arith.constant 0 : index
    %c0_365 = arith.constant 0 : index
    %913 = vector.load %arg42[%c1_361, %c0_362, %c0_363, %c0_364, %c0_365] : memref<2x2x4x8x8xf32, #tpu.memory_space<vmem>>, vector<1x2x4x8x8xf32>
    %914 = vector.shape_cast %913 : vector<1x2x4x8x8xf32> to vector<2x4x8x8xf32>
    %915 = vector.shape_cast %890 : vector<2x4x8x8xf32> to vector<1x2x4x8x8xf32>
    tpu.vector_store %arg42[%c1_361, %c0_362, %c0_363, %c0_364, %c0_365], %915 {strides = array<i32>} : memref<2x2x4x8x8xf32, #tpu.memory_space<vmem>>, vector<1x2x4x8x8xf32>,
    %c1_366 = arith.constant 1 : index
    %c0_367 = arith.constant 0 : index
    %c0_368 = arith.constant 0 : index
    %916 = vector.load %arg25[%c1_366, %c0_367, %c0_368] : memref<2x32x32xf32, #tpu.memory_space<vmem>>, vector<1x32x32xf32>
    %917 = vector.shape_cast %916 : vector<1x32x32xf32> to vector<32x32xf32>
    %cst_369 = arith.constant dense<0.000000e+00> : vector<16x32xf32>
    %918 = tpu.matmul %912, %917, %cst_369 {dimension_numbers = #tpu.dot_dimension_numbers<[1], [0], [0], [1], [0, 0, 1, 1], [], []>} : vector<16x32xf32>, vector<32x32xf32>, vector<16x32xf32> -> vector<16x32xf32>
    %c1_370 = arith.constant 1 : index
    %c0_371 = arith.constant 0 : index
    %c0_372 = arith.constant 0 : index
    %919 = vector.load %arg26[%c1_370, %c0_371, %c0_372] : memref<2x1x32xf32, #tpu.memory_space<vmem>>, vector<1x1x32xf32>
    %920 = vector.shape_cast %919 : vector<1x1x32xf32> to vector<1x32xf32>
    %921 = vector.broadcast %920 : vector<1x32xf32> to vector<16x32xf32>
    %922 = arith.addf %918, %921 : vector<16x32xf32>
    %923 = vector.extract_strided_slice %435 {offsets = [0, 64], sizes = [16, 32], strides = [1, 1]} : vector<16x128xf32> to vector<16x32xf32>
    %924 = vector.extract_strided_slice %435 {offsets = [0, 96], sizes = [16, 32], strides = [1, 1]} : vector<16x128xf32> to vector<16x32xf32>
    %c1_373 = arith.constant 1 : index
    %c0_374 = arith.constant 0 : index
    %c0_375 = arith.constant 0 : index
    %925 = vector.load %arg29[%c1_373, %c0_374, %c0_375] : memref<2x32x32xf32, #tpu.memory_space<vmem>>, vector<1x32x32xf32>
    %926 = vector.shape_cast %925 : vector<1x32x32xf32> to vector<32x32xf32>
    %c1_376 = arith.constant 1 : index
    %c0_377 = arith.constant 0 : index
    %c0_378 = arith.constant 0 : index
    %927 = vector.load %arg30[%c1_376, %c0_377, %c0_378] : memref<2x1x32xf32, #tpu.memory_space<vmem>>, vector<1x1x32xf32>
    %928 = vector.shape_cast %927 : vector<1x1x32xf32> to vector<1x32xf32>
    %c1_379 = arith.constant 1 : index
    %c0_380 = arith.constant 0 : index
    %c0_381 = arith.constant 0 : index
    %929 = vector.load %arg31[%c1_379, %c0_380, %c0_381] : memref<2x1x32xf32, #tpu.memory_space<vmem>>, vector<1x1x32xf32>
    %930 = vector.shape_cast %929 : vector<1x1x32xf32> to vector<1x32xf32>
    %c1_382 = arith.constant 1 : index
    %c0_383 = arith.constant 0 : index
    %c0_384 = arith.constant 0 : index
    %931 = vector.load %arg32[%c1_382, %c0_383, %c0_384] : memref<2x1x32xf32, #tpu.memory_space<vmem>>, vector<1x1x32xf32>
    %932 = vector.shape_cast %931 : vector<1x1x32xf32> to vector<1x32xf32>
    %933 = vector.broadcast %928 : vector<1x32xf32> to vector<16x32xf32>
    %934 = arith.addf %912, %933 : vector<16x32xf32>
    %935 = vector.extract_strided_slice %922 {offsets = [0, 0], sizes = [16, 8], strides = [1, 1]} : vector<16x32xf32> to vector<16x8xf32>
    %936 = vector.shape_cast %935 : vector<16x8xf32> to vector<2x8x8xf32>
    %937 = vector.extract_strided_slice %923 {offsets = [0, 0], sizes = [16, 8], strides = [1, 1]} : vector<16x32xf32> to vector<16x8xf32>
    %938 = vector.shape_cast %937 : vector<16x8xf32> to vector<2x8x8xf32>
    %939 = vector.extract_strided_slice %924 {offsets = [0, 0], sizes = [16, 8], strides = [1, 1]} : vector<16x32xf32> to vector<16x8xf32>
    %940 = vector.shape_cast %939 : vector<16x8xf32> to vector<2x8x8xf32>
    "tpu.trace_start"() <{level = 10 : i32, message = "bqd,bkd->bqk"}> : () -> ()
    %cst_385 = arith.constant dense<0.000000e+00> : vector<2x8x8xf32>
    %941 = tpu.matmul %936, %938, %cst_385 {dimension_numbers = #tpu.dot_dimension_numbers<[2], [2], [1], [1], [0, 0, 0, 1, 1, 1], [0], [0]>} : vector<2x8x8xf32>, vector<2x8x8xf32>, vector<2x8x8xf32> -> vector<2x8x8xf32>
    %cst_386 = arith.constant -1.000000e+09 : f32
    "tpu.trace_stop"() : () -> ()
    %942 = vector.broadcast %cst_386 : f32 to vector<2x8x8xf32>
    %943 = arith.select %22, %942, %941 : vector<2x8x8xi1>, vector<2x8x8xf32>
    %cst_387 = arith.constant dense<0xFF800000> : vector<2x8xf32>
    %944 = vector.multi_reduction <maximumf>, %943, %cst_387 [2] : vector<2x8x8xf32> to vector<2x8xf32>
    %945 = vector.shape_cast %944 : vector<2x8xf32> to vector<2x8x1xf32>
    %946 = vector.broadcast %945 : vector<2x8x1xf32> to vector<2x8x8xf32>
    %947 = arith.subf %943, %946 : vector<2x8x8xf32>
    %948 = math.exp %947 : vector<2x8x8xf32>
    %cst_388 = arith.constant dense<0.000000e+00> : vector<2x8xf32>
    %949 = vector.multi_reduction <add>, %948, %cst_388 [2] : vector<2x8x8xf32> to vector<2x8xf32>
    %950 = vector.shape_cast %949 : vector<2x8xf32> to vector<2x8x1xf32>
    %951 = tpu.reciprocal %950 {approx = true} : vector<2x8x1xf32> -> vector<2x8x1xf32>
    %952 = vector.broadcast %951 : vector<2x8x1xf32> to vector<2x8x8xf32>
    %953 = arith.mulf %948, %952 : vector<2x8x8xf32>
    "tpu.trace_start"() <{level = 10 : i32, message = "bqk,bkd->bqd"}> : () -> ()
    %cst_389 = arith.constant dense<0.000000e+00> : vector<2x8x8xf32>
    %954 = tpu.matmul %953, %940, %cst_389 {dimension_numbers = #tpu.dot_dimension_numbers<[2], [1], [1], [2], [0, 0, 0, 1, 1, 2], [0], [0]>} : vector<2x8x8xf32>, vector<2x8x8xf32>, vector<2x8x8xf32> -> vector<2x8x8xf32>
    "tpu.trace_stop"() : () -> ()
    %955 = vector.shape_cast %954 : vector<2x8x8xf32> to vector<16x8xf32>
    %956 = vector.extract_strided_slice %926 {offsets = [0, 0], sizes = [8, 32], strides = [1, 1]} : vector<32x32xf32> to vector<8x32xf32>
    %cst_390 = arith.constant dense<0.000000e+00> : vector<16x32xf32>
    %957 = tpu.matmul %955, %956, %cst_390 {dimension_numbers = #tpu.dot_dimension_numbers<[1], [0], [0], [1], [0, 0, 1, 1], [], []>} : vector<16x8xf32>, vector<8x32xf32>, vector<16x32xf32> -> vector<16x32xf32>
    %958 = arith.addf %934, %957 : vector<16x32xf32>
    %959 = vector.extract_strided_slice %922 {offsets = [0, 8], sizes = [16, 8], strides = [1, 1]} : vector<16x32xf32> to vector<16x8xf32>
    %960 = vector.shape_cast %959 : vector<16x8xf32> to vector<2x8x8xf32>
    %961 = vector.extract_strided_slice %923 {offsets = [0, 8], sizes = [16, 8], strides = [1, 1]} : vector<16x32xf32> to vector<16x8xf32>
    %962 = vector.shape_cast %961 : vector<16x8xf32> to vector<2x8x8xf32>
    %963 = vector.extract_strided_slice %924 {offsets = [0, 8], sizes = [16, 8], strides = [1, 1]} : vector<16x32xf32> to vector<16x8xf32>
    %964 = vector.shape_cast %963 : vector<16x8xf32> to vector<2x8x8xf32>
    "tpu.trace_start"() <{level = 10 : i32, message = "bqd,bkd->bqk"}> : () -> ()
    %cst_391 = arith.constant dense<0.000000e+00> : vector<2x8x8xf32>
    %965 = tpu.matmul %960, %962, %cst_391 {dimension_numbers = #tpu.dot_dimension_numbers<[2], [2], [1], [1], [0, 0, 0, 1, 1, 1], [0], [0]>} : vector<2x8x8xf32>, vector<2x8x8xf32>, vector<2x8x8xf32> -> vector<2x8x8xf32>
    %cst_392 = arith.constant -1.000000e+09 : f32
    "tpu.trace_stop"() : () -> ()
    %966 = vector.broadcast %cst_392 : f32 to vector<2x8x8xf32>
    %967 = arith.select %22, %966, %965 : vector<2x8x8xi1>, vector<2x8x8xf32>
    %cst_393 = arith.constant dense<0xFF800000> : vector<2x8xf32>
    %968 = vector.multi_reduction <maximumf>, %967, %cst_393 [2] : vector<2x8x8xf32> to vector<2x8xf32>
    %969 = vector.shape_cast %968 : vector<2x8xf32> to vector<2x8x1xf32>
    %970 = vector.broadcast %969 : vector<2x8x1xf32> to vector<2x8x8xf32>
    %971 = arith.subf %967, %970 : vector<2x8x8xf32>
    %972 = math.exp %971 : vector<2x8x8xf32>
    %cst_394 = arith.constant dense<0.000000e+00> : vector<2x8xf32>
    %973 = vector.multi_reduction <add>, %972, %cst_394 [2] : vector<2x8x8xf32> to vector<2x8xf32>
    %974 = vector.shape_cast %973 : vector<2x8xf32> to vector<2x8x1xf32>
    %975 = tpu.reciprocal %974 {approx = true} : vector<2x8x1xf32> -> vector<2x8x1xf32>
    %976 = vector.broadcast %975 : vector<2x8x1xf32> to vector<2x8x8xf32>
    %977 = arith.mulf %972, %976 : vector<2x8x8xf32>
    "tpu.trace_start"() <{level = 10 : i32, message = "bqk,bkd->bqd"}> : () -> ()
    %cst_395 = arith.constant dense<0.000000e+00> : vector<2x8x8xf32>
    %978 = tpu.matmul %977, %964, %cst_395 {dimension_numbers = #tpu.dot_dimension_numbers<[2], [1], [1], [2], [0, 0, 0, 1, 1, 2], [0], [0]>} : vector<2x8x8xf32>, vector<2x8x8xf32>, vector<2x8x8xf32> -> vector<2x8x8xf32>
    "tpu.trace_stop"() : () -> ()
    %979 = vector.shape_cast %978 : vector<2x8x8xf32> to vector<16x8xf32>
    %980 = vector.extract_strided_slice %926 {offsets = [8, 0], sizes = [8, 32], strides = [1, 1]} : vector<32x32xf32> to vector<8x32xf32>
    %cst_396 = arith.constant dense<0.000000e+00> : vector<16x32xf32>
    %981 = tpu.matmul %979, %980, %cst_396 {dimension_numbers = #tpu.dot_dimension_numbers<[1], [0], [0], [1], [0, 0, 1, 1], [], []>} : vector<16x8xf32>, vector<8x32xf32>, vector<16x32xf32> -> vector<16x32xf32>
    %982 = arith.addf %958, %981 : vector<16x32xf32>
    %983 = vector.extract_strided_slice %922 {offsets = [0, 16], sizes = [16, 8], strides = [1, 1]} : vector<16x32xf32> to vector<16x8xf32>
    %984 = vector.shape_cast %983 : vector<16x8xf32> to vector<2x8x8xf32>
    %985 = vector.extract_strided_slice %923 {offsets = [0, 16], sizes = [16, 8], strides = [1, 1]} : vector<16x32xf32> to vector<16x8xf32>
    %986 = vector.shape_cast %985 : vector<16x8xf32> to vector<2x8x8xf32>
    %987 = vector.extract_strided_slice %924 {offsets = [0, 16], sizes = [16, 8], strides = [1, 1]} : vector<16x32xf32> to vector<16x8xf32>
    %988 = vector.shape_cast %987 : vector<16x8xf32> to vector<2x8x8xf32>
    "tpu.trace_start"() <{level = 10 : i32, message = "bqd,bkd->bqk"}> : () -> ()
    %cst_397 = arith.constant dense<0.000000e+00> : vector<2x8x8xf32>
    %989 = tpu.matmul %984, %986, %cst_397 {dimension_numbers = #tpu.dot_dimension_numbers<[2], [2], [1], [1], [0, 0, 0, 1, 1, 1], [0], [0]>} : vector<2x8x8xf32>, vector<2x8x8xf32>, vector<2x8x8xf32> -> vector<2x8x8xf32>
    %cst_398 = arith.constant -1.000000e+09 : f32
    "tpu.trace_stop"() : () -> ()
    %990 = vector.broadcast %cst_398 : f32 to vector<2x8x8xf32>
    %991 = arith.select %22, %990, %989 : vector<2x8x8xi1>, vector<2x8x8xf32>
    %cst_399 = arith.constant dense<0xFF800000> : vector<2x8xf32>
    %992 = vector.multi_reduction <maximumf>, %991, %cst_399 [2] : vector<2x8x8xf32> to vector<2x8xf32>
    %993 = vector.shape_cast %992 : vector<2x8xf32> to vector<2x8x1xf32>
    %994 = vector.broadcast %993 : vector<2x8x1xf32> to vector<2x8x8xf32>
    %995 = arith.subf %991, %994 : vector<2x8x8xf32>
    %996 = math.exp %995 : vector<2x8x8xf32>
    %cst_400 = arith.constant dense<0.000000e+00> : vector<2x8xf32>
    %997 = vector.multi_reduction <add>, %996, %cst_400 [2] : vector<2x8x8xf32> to vector<2x8xf32>
    %998 = vector.shape_cast %997 : vector<2x8xf32> to vector<2x8x1xf32>
    %999 = tpu.reciprocal %998 {approx = true} : vector<2x8x1xf32> -> vector<2x8x1xf32>
    %1000 = vector.broadcast %999 : vector<2x8x1xf32> to vector<2x8x8xf32>
    %1001 = arith.mulf %996, %1000 : vector<2x8x8xf32>
    "tpu.trace_start"() <{level = 10 : i32, message = "bqk,bkd->bqd"}> : () -> ()
    %cst_401 = arith.constant dense<0.000000e+00> : vector<2x8x8xf32>
    %1002 = tpu.matmul %1001, %988, %cst_401 {dimension_numbers = #tpu.dot_dimension_numbers<[2], [1], [1], [2], [0, 0, 0, 1, 1, 2], [0], [0]>} : vector<2x8x8xf32>, vector<2x8x8xf32>, vector<2x8x8xf32> -> vector<2x8x8xf32>
    "tpu.trace_stop"() : () -> ()
    %1003 = vector.shape_cast %1002 : vector<2x8x8xf32> to vector<16x8xf32>
    %1004 = vector.extract_strided_slice %926 {offsets = [16, 0], sizes = [8, 32], strides = [1, 1]} : vector<32x32xf32> to vector<8x32xf32>
    %cst_402 = arith.constant dense<0.000000e+00> : vector<16x32xf32>
    %1005 = tpu.matmul %1003, %1004, %cst_402 {dimension_numbers = #tpu.dot_dimension_numbers<[1], [0], [0], [1], [0, 0, 1, 1], [], []>} : vector<16x8xf32>, vector<8x32xf32>, vector<16x32xf32> -> vector<16x32xf32>
    %1006 = arith.addf %982, %1005 : vector<16x32xf32>
    %1007 = vector.extract_strided_slice %922 {offsets = [0, 24], sizes = [16, 8], strides = [1, 1]} : vector<16x32xf32> to vector<16x8xf32>
    %1008 = vector.shape_cast %1007 : vector<16x8xf32> to vector<2x8x8xf32>
    %1009 = vector.extract_strided_slice %923 {offsets = [0, 24], sizes = [16, 8], strides = [1, 1]} : vector<16x32xf32> to vector<16x8xf32>
    %1010 = vector.shape_cast %1009 : vector<16x8xf32> to vector<2x8x8xf32>
    %1011 = vector.extract_strided_slice %924 {offsets = [0, 24], sizes = [16, 8], strides = [1, 1]} : vector<16x32xf32> to vector<16x8xf32>
    %1012 = vector.shape_cast %1011 : vector<16x8xf32> to vector<2x8x8xf32>
    "tpu.trace_start"() <{level = 10 : i32, message = "bqd,bkd->bqk"}> : () -> ()
    %cst_403 = arith.constant dense<0.000000e+00> : vector<2x8x8xf32>
    %1013 = tpu.matmul %1008, %1010, %cst_403 {dimension_numbers = #tpu.dot_dimension_numbers<[2], [2], [1], [1], [0, 0, 0, 1, 1, 1], [0], [0]>} : vector<2x8x8xf32>, vector<2x8x8xf32>, vector<2x8x8xf32> -> vector<2x8x8xf32>
    %cst_404 = arith.constant -1.000000e+09 : f32
    "tpu.trace_stop"() : () -> ()
    %1014 = vector.broadcast %cst_404 : f32 to vector<2x8x8xf32>
    %1015 = arith.select %22, %1014, %1013 : vector<2x8x8xi1>, vector<2x8x8xf32>
    %cst_405 = arith.constant dense<0xFF800000> : vector<2x8xf32>
    %1016 = vector.multi_reduction <maximumf>, %1015, %cst_405 [2] : vector<2x8x8xf32> to vector<2x8xf32>
    %1017 = vector.shape_cast %1016 : vector<2x8xf32> to vector<2x8x1xf32>
    %1018 = vector.broadcast %1017 : vector<2x8x1xf32> to vector<2x8x8xf32>
    %1019 = arith.subf %1015, %1018 : vector<2x8x8xf32>
    %1020 = math.exp %1019 : vector<2x8x8xf32>
    %cst_406 = arith.constant dense<0.000000e+00> : vector<2x8xf32>
    %1021 = vector.multi_reduction <add>, %1020, %cst_406 [2] : vector<2x8x8xf32> to vector<2x8xf32>
    %1022 = vector.shape_cast %1021 : vector<2x8xf32> to vector<2x8x1xf32>
    %1023 = tpu.reciprocal %1022 {approx = true} : vector<2x8x1xf32> -> vector<2x8x1xf32>
    %1024 = vector.broadcast %1023 : vector<2x8x1xf32> to vector<2x8x8xf32>
    %1025 = arith.mulf %1020, %1024 : vector<2x8x8xf32>
    "tpu.trace_start"() <{level = 10 : i32, message = "bqk,bkd->bqd"}> : () -> ()
    %cst_407 = arith.constant dense<0.000000e+00> : vector<2x8x8xf32>
    %1026 = tpu.matmul %1025, %1012, %cst_407 {dimension_numbers = #tpu.dot_dimension_numbers<[2], [1], [1], [2], [0, 0, 0, 1, 1, 2], [0], [0]>} : vector<2x8x8xf32>, vector<2x8x8xf32>, vector<2x8x8xf32> -> vector<2x8x8xf32>
    "tpu.trace_stop"() : () -> ()
    %1027 = vector.shape_cast %1026 : vector<2x8x8xf32> to vector<16x8xf32>
    %1028 = vector.extract_strided_slice %926 {offsets = [24, 0], sizes = [8, 32], strides = [1, 1]} : vector<32x32xf32> to vector<8x32xf32>
    %cst_408 = arith.constant dense<0.000000e+00> : vector<16x32xf32>
    %1029 = tpu.matmul %1027, %1028, %cst_408 {dimension_numbers = #tpu.dot_dimension_numbers<[1], [0], [0], [1], [0, 0, 1, 1], [], []>} : vector<16x8xf32>, vector<8x32xf32>, vector<16x32xf32> -> vector<16x32xf32>
    %1030 = arith.addf %1006, %1029 : vector<16x32xf32>
    %1031 = vector.shape_cast %953 : vector<2x8x8xf32> to vector<2x1x8x8xf32>
    %1032 = vector.shape_cast %977 : vector<2x8x8xf32> to vector<2x1x8x8xf32>
    %1033 = vector.shape_cast %1001 : vector<2x8x8xf32> to vector<2x1x8x8xf32>
    %1034 = vector.shape_cast %1025 : vector<2x8x8xf32> to vector<2x1x8x8xf32>
    %1035 = tpu.concatenate %1031, %1032, %1033, %1034 in 1 : vector<2x1x8x8xf32>, vector<2x1x8x8xf32>, vector<2x1x8x8xf32>, vector<2x1x8x8xf32> -> vector<2x4x8x8xf32>
    %cst_409 = arith.constant dense<0.000000e+00> : vector<16xf32>
    %1036 = vector.multi_reduction <add>, %1030, %cst_409 [1] : vector<16x32xf32> to vector<16xf32>
    %1037 = vector.shape_cast %1036 : vector<16xf32> to vector<16x1xf32>
    %cst_410 = arith.constant 3.200000e+01 : f32
    %1038 = vector.broadcast %cst_410 : f32 to vector<16x1xf32>
    %1039 = arith.divf %1037, %1038 : vector<16x1xf32>
    %1040 = vector.broadcast %1039 : vector<16x1xf32> to vector<16x32xf32>
    %1041 = arith.subf %1030, %1040 : vector<16x32xf32>
    %1042 = arith.mulf %1041, %1041 : vector<16x32xf32>
    %cst_411 = arith.constant dense<0.000000e+00> : vector<16xf32>
    %1043 = vector.multi_reduction <add>, %1042, %cst_411 [1] : vector<16x32xf32> to vector<16xf32>
    %1044 = vector.shape_cast %1043 : vector<16xf32> to vector<16x1xf32>
    %cst_412 = arith.constant 3.200000e+01 : f32
    %1045 = vector.broadcast %cst_412 : f32 to vector<16x1xf32>
    %1046 = arith.divf %1044, %1045 : vector<16x1xf32>
    %1047 = vector.broadcast %1039 : vector<16x1xf32> to vector<16x32xf32>
    %1048 = arith.subf %1030, %1047 : vector<16x32xf32>
    %cst_413 = arith.constant 9.99999974E-6 : f32
    %1049 = vector.broadcast %cst_413 : f32 to vector<16x1xf32>
    %1050 = arith.addf %1046, %1049 : vector<16x1xf32>
    %1051 = math.rsqrt %1050 : vector<16x1xf32>
    %1052 = vector.broadcast %1051 : vector<16x1xf32> to vector<16x32xf32>
    %1053 = arith.mulf %1048, %1052 : vector<16x32xf32>
    %1054 = vector.broadcast %930 : vector<1x32xf32> to vector<16x32xf32>
    %1055 = arith.mulf %1053, %1054 : vector<16x32xf32>
    %1056 = vector.broadcast %932 : vector<1x32xf32> to vector<16x32xf32>
    %1057 = arith.addf %1055, %1056 : vector<16x32xf32>
    %c1_414 = arith.constant 1 : index
    %c0_415 = arith.constant 0 : index
    %c0_416 = arith.constant 0 : index
    %c0_417 = arith.constant 0 : index
    %c0_418 = arith.constant 0 : index
    %1058 = vector.load %arg43[%c1_414, %c0_415, %c0_416, %c0_417, %c0_418] : memref<2x2x4x8x8xf32, #tpu.memory_space<vmem>>, vector<1x2x4x8x8xf32>
    %1059 = vector.shape_cast %1058 : vector<1x2x4x8x8xf32> to vector<2x4x8x8xf32>
    %1060 = vector.shape_cast %1035 : vector<2x4x8x8xf32> to vector<1x2x4x8x8xf32>
    tpu.vector_store %arg43[%c1_414, %c0_415, %c0_416, %c0_417, %c0_418], %1060 {strides = array<i32>} : memref<2x2x4x8x8xf32, #tpu.memory_space<vmem>>, vector<1x2x4x8x8xf32>,
    %c1_419 = arith.constant 1 : index
    %c0_420 = arith.constant 0 : index
    %c0_421 = arith.constant 0 : index
    %1061 = vector.load %arg33[%c1_419, %c0_420, %c0_421] : memref<2x32x64xf32, #tpu.memory_space<vmem>>, vector<1x32x64xf32>
    %1062 = vector.shape_cast %1061 : vector<1x32x64xf32> to vector<32x64xf32>
    %c1_422 = arith.constant 1 : index
    %c0_423 = arith.constant 0 : index
    %c0_424 = arith.constant 0 : index
    %1063 = vector.load %arg34[%c1_422, %c0_423, %c0_424] : memref<2x1x64xf32, #tpu.memory_space<vmem>>, vector<1x1x64xf32>
    %1064 = vector.shape_cast %1063 : vector<1x1x64xf32> to vector<1x64xf32>
    %c1_425 = arith.constant 1 : index
    %c0_426 = arith.constant 0 : index
    %c0_427 = arith.constant 0 : index
    %1065 = vector.load %arg35[%c1_425, %c0_426, %c0_427] : memref<2x64x32xf32, #tpu.memory_space<vmem>>, vector<1x64x32xf32>
    %1066 = vector.shape_cast %1065 : vector<1x64x32xf32> to vector<64x32xf32>
    %c1_428 = arith.constant 1 : index
    %c0_429 = arith.constant 0 : index
    %c0_430 = arith.constant 0 : index
    %1067 = vector.load %arg36[%c1_428, %c0_429, %c0_430] : memref<2x1x32xf32, #tpu.memory_space<vmem>>, vector<1x1x32xf32>
    %1068 = vector.shape_cast %1067 : vector<1x1x32xf32> to vector<1x32xf32>
    %c1_431 = arith.constant 1 : index
    %c0_432 = arith.constant 0 : index
    %c0_433 = arith.constant 0 : index
    %1069 = vector.load %arg37[%c1_431, %c0_432, %c0_433] : memref<2x1x32xf32, #tpu.memory_space<vmem>>, vector<1x1x32xf32>
    %1070 = vector.shape_cast %1069 : vector<1x1x32xf32> to vector<1x32xf32>
    %c1_434 = arith.constant 1 : index
    %c0_435 = arith.constant 0 : index
    %c0_436 = arith.constant 0 : index
    %1071 = vector.load %arg38[%c1_434, %c0_435, %c0_436] : memref<2x1x32xf32, #tpu.memory_space<vmem>>, vector<1x1x32xf32>
    %1072 = vector.shape_cast %1071 : vector<1x1x32xf32> to vector<1x32xf32>
    %cst_437 = arith.constant dense<0.000000e+00> : vector<16x64xf32>
    %1073 = tpu.matmul %1057, %1062, %cst_437 {dimension_numbers = #tpu.dot_dimension_numbers<[1], [0], [0], [1], [0, 0, 1, 1], [], []>} : vector<16x32xf32>, vector<32x64xf32>, vector<16x64xf32> -> vector<16x64xf32>
    %1074 = vector.broadcast %1064 : vector<1x64xf32> to vector<16x64xf32>
    %1075 = arith.addf %1073, %1074 : vector<16x64xf32>
    %cst_438 = arith.constant 0.000000e+00 : f32
    %1076 = vector.broadcast %cst_438 : f32 to vector<16x64xf32>
    %1077 = arith.maximumf %1075, %1076 : vector<16x64xf32>
    %cst_439 = arith.constant dense<0.000000e+00> : vector<16x32xf32>
    %1078 = tpu.matmul %1077, %1066, %cst_439 {dimension_numbers = #tpu.dot_dimension_numbers<[1], [0], [0], [1], [0, 0, 1, 1], [], []>} : vector<16x64xf32>, vector<64x32xf32>, vector<16x32xf32> -> vector<16x32xf32>
    %1079 = vector.broadcast %1068 : vector<1x32xf32> to vector<16x32xf32>
    %1080 = arith.addf %1078, %1079 : vector<16x32xf32>
    %1081 = arith.addf %1080, %1057 : vector<16x32xf32>
    %cst_440 = arith.constant dense<0.000000e+00> : vector<16xf32>
    %1082 = vector.multi_reduction <add>, %1081, %cst_440 [1] : vector<16x32xf32> to vector<16xf32>
    %1083 = vector.shape_cast %1082 : vector<16xf32> to vector<16x1xf32>
    %cst_441 = arith.constant 3.200000e+01 : f32
    %1084 = vector.broadcast %cst_441 : f32 to vector<16x1xf32>
    %1085 = arith.divf %1083, %1084 : vector<16x1xf32>
    %1086 = vector.broadcast %1085 : vector<16x1xf32> to vector<16x32xf32>
    %1087 = arith.subf %1081, %1086 : vector<16x32xf32>
    %1088 = arith.mulf %1087, %1087 : vector<16x32xf32>
    %cst_442 = arith.constant dense<0.000000e+00> : vector<16xf32>
    %1089 = vector.multi_reduction <add>, %1088, %cst_442 [1] : vector<16x32xf32> to vector<16xf32>
    %1090 = vector.shape_cast %1089 : vector<16xf32> to vector<16x1xf32>
    %cst_443 = arith.constant 3.200000e+01 : f32
    %1091 = vector.broadcast %cst_443 : f32 to vector<16x1xf32>
    %1092 = arith.divf %1090, %1091 : vector<16x1xf32>
    %1093 = vector.broadcast %1085 : vector<16x1xf32> to vector<16x32xf32>
    %1094 = arith.subf %1081, %1093 : vector<16x32xf32>
    %cst_444 = arith.constant 9.99999974E-6 : f32
    %1095 = vector.broadcast %cst_444 : f32 to vector<16x1xf32>
    %1096 = arith.addf %1092, %1095 : vector<16x1xf32>
    %1097 = math.rsqrt %1096 : vector<16x1xf32>
    %1098 = vector.broadcast %1097 : vector<16x1xf32> to vector<16x32xf32>
    %1099 = arith.mulf %1094, %1098 : vector<16x32xf32>
    %1100 = vector.broadcast %1070 : vector<1x32xf32> to vector<16x32xf32>
    %1101 = arith.mulf %1099, %1100 : vector<16x32xf32>
    %1102 = vector.broadcast %1072 : vector<1x32xf32> to vector<16x32xf32>
    %1103 = arith.addf %1101, %1102 : vector<16x32xf32>
    %c0_445 = arith.constant 0 : index
    %c0_446 = arith.constant 0 : index
    %1104 = vector.load %arg39[%c0_445, %c0_446] : memref<32x16xf32, #tpu.memory_space<vmem>>, vector<32x16xf32>
    %cst_447 = arith.constant dense<0.000000e+00> : vector<16x16xf32>
    %1105 = tpu.matmul %1103, %1104, %cst_447 {dimension_numbers = #tpu.dot_dimension_numbers<[1], [0], [0], [1], [0, 0, 1, 1], [], []>} : vector<16x32xf32>, vector<32x16xf32>, vector<16x16xf32> -> vector<16x16xf32>
    %c0_448 = arith.constant 0 : index
    %c0_449 = arith.constant 0 : index
    %1106 = vector.load %arg40[%c0_448, %c0_449] : memref<16x16xf32, #tpu.memory_space<vmem>>, vector<16x16xf32>
    tpu.vector_store %arg40[%c0_448, %c0_449], %1105 {strides = array<i32>} : memref<16x16xf32, #tpu.memory_space<vmem>>, vector<16x16xf32>,
    return
  }
}

</mosaic_0001>

<bundles_post_ra>
// kernel: transformer_forward.1
= control target key start
LH: loop header
LB: loop body
LE: loop exit
PB: predicated region body
PF: predicated region fallthrough
CT: control target
= control target key end

     0   :  { %s15272_s6 = smov 1   ;;  %s15273_s10 = smov 2   ;;  %s17121_s0 = inlined_call_operand.smem [shape: u32[44], index: -1, kind: input, shape index: {}] }
   0x1   :  { %s15368_s5 = sld [smem:[%s17121_s0]]   ;;  %s15274_s14 = smov 3  }
   0x2   :  { %s15373_s9 = sld [smem:[%s17121_s0 + %s15272_s6]]   ;;  %s15275_s18 = smov 4  }
   0x3   :  { %s15378_s13 = sld [smem:[%s17121_s0 + %s15273_s10]]   ;;  %s15276_s22 = smov 5  }
   0x4   :  { %s15383_s17 = sld [smem:[%s17121_s0 + %s15274_s14]]   ;;  %s15277_s26 = smov 6  }
   0x5   :  { %s15388_s21 = sld [smem:[%s17121_s0 + %s15275_s18]]   ;;  %s15278_s30 = smov 7  }
   0x6   :  { %s15393_s25 = sld [smem:[%s17121_s0 + %s15276_s22]]   ;;  %s15279_s4 = smov 8  }
   0x7   :  { %17136 = sst [smem:[#allocation52_spill]] %s15368_s5  ;;  %s15280_s10 = smov 9  }
   0x8   :  { %17137 = sst [smem:[#allocation53_spill]] %s15373_s9  ;;  %s15281_s15 = smov 10  }
   0x9   :  { %17138 = sst [smem:[#allocation54_spill]] %s15378_s13  ;;  %s15282_s20 = smov 11  }
   0xa   :  { %17139 = sst [smem:[#allocation55_spill]] %s15383_s17  ;;  %s15284_s1 = smov 13  }
   0xb   :  { %s15398_s29 = sld [smem:[%s17121_s0 + %s15277_s26]]   ;;  %s15283_s26 = smov 12  }
   0xc   :  { %s15403_s3 = sld [smem:[%s17121_s0 + %s15278_s30]]   ;;  %s15285_s7 = smov 14  }
   0xd   :  { %s15408_s8 = sld [smem:[%s17121_s0 + %s15279_s4]]   ;;  %s15287_s22 = smov 16  }
   0xe   :  { %s15413_s14 = sld [smem:[%s17121_s0 + %s15280_s10]]   ;;  %s15288_s28 = smov 17  }
   0xf   :  { %s15418_s19 = sld [smem:[%s17121_s0 + %s15281_s15]]   ;;  %s15286_s15 = smov 15  }
  0x10   :  { %s15423_s24 = sld [smem:[%s17121_s0 + %s15282_s20]]  }
  0x11   :  { %17140 = sst [smem:[#allocation56_spill]] %s15398_s29 }
  0x12   :  { %17141 = sst [smem:[#allocation57_spill]] %s15403_s3 }
  0x13   :  { %s15428_s30 = sld [smem:[%s17121_s0 + %s15283_s26]]  }
  0x14   :  { %17142 = sst [smem:[#allocation58_spill]] %s15413_s14 }
  0x15   :  { %s15433_s6 = sld [smem:[%s17121_s0 + %s15284_s1]]  }
  0x16   :  { %s15438_s12 = sld [smem:[%s17121_s0 + %s15285_s7]]   ;;  %s15289_s7 = smov 18  }
  0x17   :  { %s15443_s20 = sld [smem:[%s17121_s0 + %s15286_s15]]   ;;  %s15290_s15 = smov 19  }
  0x18   :  { %s15448_s27 = sld [smem:[%s17121_s0 + %s15287_s22]]   ;;  %s15291_s22 = smov 20  }
  0x19   :  { %s15453_s4 = sld [smem:[%s17121_s0 + %s15288_s28]]   ;;  %s15292_s28 = smov 21  }
  0x1a   :  { %s15458_s9 = sld [smem:[%s17121_s0 + %s15289_s7]]   ;;  %s15293_s7 = smov 22  }
  0x1b   :  { %17143 = sst [smem:[#allocation59_spill]] %s15433_s6 }
  0x1c   :  { %17144 = sst [smem:[#allocation60_spill]] %s15438_s12 }
  0x1d   :  { %17145 = sst [smem:[#allocation61_spill]] %s15443_s20 }
  0x1e   :  { %s15463_s20 = sld [smem:[%s17121_s0 + %s15290_s15]]   ;;  %s15294_s15 = smov 23  }
  0x1f   :  { %17146 = sst [smem:[#allocation62_spill]] %s15453_s4 }
  0x20   :  { %17147 = sst [smem:[#allocation63_spill]] %s15458_s9 }
  0x21   :  { %s15468_s6 = sld [smem:[%s17121_s0 + %s15291_s22]]   ;;  %s15295_s22 = smov 24  }
  0x22   :  { %s15473_s4 = sld [smem:[%s17121_s0 + %s15292_s28]]   ;;  %s15296_s28 = smov 25  }
  0x23   :  { %s15478_s14 = sld [smem:[%s17121_s0 + %s15293_s7]]   ;;  %s15297_s7 = smov 26  }
  0x24   :  { %17148 = sst [smem:[#allocation64_spill]] %s15463_s20 }
  0x25   :  { %s15483_s20 = sld [smem:[%s17121_s0 + %s15294_s15]]   ;;  %s15298_s15 = smov 27  }
  0x26   :  { %s15488_s5 = sld [smem:[%s17121_s0 + %s15295_s22]]   ;;  %s15299_s22 = smov 28  }
  0x27   :  { %s15498_s29 = sld [smem:[%s17121_s0 + %s15297_s7]]   ;;  %s15301_s7 = smov 30  }
  0x28   :  { %17149 = sst [smem:[#allocation65_spill]] %s15473_s4 }
  0x29   :  { %17150 = sst [smem:[#allocation66_spill]] %s15478_s14 }
  0x2a   :  { %s15493_s4 = sld [smem:[%s17121_s0 + %s15296_s28]]   ;;  %s15300_s28 = smov 29  }
  0x2b   :  { %s15503_s17 = sld [smem:[%s17121_s0 + %s15298_s15]]   ;;  %s15302_s15 = smov 31  }
  0x2c   :  { %17151 = sst [smem:[#allocation67_spill]] %s15488_s5 }
  0x2d   :  { %s15508_s3 = sld [smem:[%s17121_s0 + %s15299_s22]]   ;;  %s15303_s22 = smov 32  }
  0x2e   :  { %s15518_s13 = sld [smem:[%s17121_s0 + %s15301_s7]]   ;;  %s15305_s7 = smov 34  }
  0x2f   :  { %s15538_s5 = sld [smem:[%s17121_s0 + %s15305_s7]]   ;;  %s15309_s7 = smov 38  }
  0x30   :  { %17152 = sst [smem:[#allocation68_spill]] %s15493_s4 }
  0x31   :  { %17153 = sst [smem:[#allocation69_spill]] %s15503_s17 }
  0x32   :  { %s15513_s4 = sld [smem:[%s17121_s0 + %s15300_s28]]   ;;  %s15304_s28 = smov 33  }
  0x33   :  { %17154 = sst [smem:[#allocation70_spill]] %s15508_s3 }
  0x34   :  { %s15523_s17 = sld [smem:[%s17121_s0 + %s15302_s15]]   ;;  %s15306_s15 = smov 35  }
  0x35   :  { %s15528_s3 = sld [smem:[%s17121_s0 + %s15303_s22]]   ;;  %s15307_s22 = smov 36  }
  0x36   :  { %s15548_s14 = sld [smem:[%s17121_s0 + %s15307_s22]]   ;;  %s15311_s22 = smov 40  }
  0x37   :  { %s15558_s9 = sld [smem:[%s17121_s0 + %s15309_s7]]   ;;  %s15313_s7 = smov 42  }
  0x38   :  { %17155 = sst [smem:[#allocation71_spill]] %s15513_s4 }
  0x39   :  { %s15533_s4 = sld [smem:[%s17121_s0 + %s15304_s28]]   ;;  %s15308_s28 = smov 37  }
  0x3a   :  { %17156 = sst [smem:[#allocation72_spill]] %s15523_s17 }
  0x3b   :  { %s15543_s17 = sld [smem:[%s17121_s0 + %s15306_s15]]   ;;  %s15310_s15 = smov 39  }
  0x3c   :  { %17159 = sst [smem:[#allocation75_spill]] %s15548_s14 }
  0x3d   :  { %17160 = sst [smem:[#allocation76_spill]] %s15558_s9 }
  0x3e   :  { %s15568_s14 = sld [smem:[%s17121_s0 + %s15311_s22]]  }
  0x3f   :  { %17157 = sst [smem:[#allocation73_spill]] %s15533_s4 }
  0x40   :  { %s15553_s4 = sld [smem:[%s17121_s0 + %s15308_s28]]   ;;  %s15312_s28 = smov 41  }
  0x41   :  { %17158 = sst [smem:[#allocation74_spill]] %s15543_s17 }
  0x42   :  { %s15563_s17 = sld [smem:[%s17121_s0 + %s15310_s15]]   ;;  %s15314_s15 = smov 43  }
  0x43   :  { %s15573_s12 = sld [smem:[%s17121_s0 + %s15312_s28]]  }
  0x44   :  { %s15578_s9 = sld [smem:[%s17121_s0 + %s15313_s7]]  }
  0x48   :  { %17161 = sst [smem:[#allocation77_spill]] %s15563_s17 }
  0x49   :  { %s15583_s17 = sld [smem:[%s17121_s0 + %s15314_s15]]  }
  0x4a   :  { %93 = vsyncpa [#allocation3], 0 }
  0x4b   :  { %94 = vsyncpa [#allocation6], 0 }
  0x4c   :  { %95 = vsyncpa [#allocation9], 0 }
  0x4d   :  { %96 = vsyncpa [#allocation12], 0 }
  0x4e   :  { %97 = vsyncpa [#allocation15], 0 }
  0x4f   :  { %98 = vsyncpa [#allocation18], 0 }
  0x50   :  { %99 = vsyncpa [#allocation21], 0 }
  0x51   :  { %100 = vsyncpa [#allocation24], 0 }
  0x52   :  { %101 = vsyncpa [#allocation27], 0 }
  0x53   :  { %102 = vsyncpa [#allocation30], 0 }
  0x54   :  { %103 = vsyncpa [#allocation33], 0 }
  0x55   :  { %104 = vsyncpa [#allocation36], 0 }
  0x56   :  { %105 = vsyncpa [#allocation4], 0  ;;  %s15315_s22 = smov [#allocation5]  }
  0x57   :  { %s131_s23 = sshll.u32 %s15315_s22, 4  ;;  %s132_s23 = int_to_ptr.vmem [resolvable:$true] %s131_s23 }
  0x58   :  { %s14774_s26 = scalar_lea.vmem %s132_s23, 256  ;;  %p14779_p1 = scmp.lt.s32.totalorder %s132_s23, %s132_s23 }
  0x59   :  { %p14775_p0 = scmp.ne.s32.totalorder %s132_s23, %s14774_s26  ;;  %p14780_p2 = scmp.lt.s32.totalorder %s14774_s26, %s14774_s26 }
  0x5b   :  { %p14781_p3 = por %p14780_p2, %p14779_p1 }
  0x5d   :  { %p14782_p4 = pnand %p14781_p3, %p14775_p0 }
  0x5f   :  { %14785 = shalt.err (!%p14782_p4)
}
  0x60   :  { %s15316_s0 = smov 128   ;;  %s15317_s28 = smov 8  }
  0x61   :  { %137 = dma.hbm_to_vmem [thread:$0]  %s15393_s25, 256, %s132_s23, [#allocation6], %s15316_s0, %s15316_s0, %s15317_s28  }
  0x62   :  { %s15318_s1 = smov [#allocation8]   ;;  %s15319_s7 = smov [#allocation11]  }
  0x63   :  { %s161_s2 = sshll.u32 %s15318_s1, 4  ;;  %s185_s10 = sshll.u32 %s15319_s7, 4  ;;  %s162_s2 = int_to_ptr.vmem [resolvable:$true] %s161_s2  ;;  %s186_s10 = int_to_ptr.vmem [resolvable:$true] %s185_s10 }
  0x64   :  { %s14794_s11 = scalar_lea.vmem %s162_s2, 32  ;;  %p14799_p6 = scmp.lt.s32.totalorder %s162_s2, %s162_s2 }
  0x65   :  { %p14795_p5 = scmp.ne.s32.totalorder %s162_s2, %s14794_s11  ;;  %p14800_p7 = scmp.lt.s32.totalorder %s14794_s11, %s14794_s11 }
  0x67   :  { %p14801_p8 = por %p14800_p7, %p14799_p6 }
  0x69   :  { %p14802_p9 = pnand %p14801_p8, %p14795_p5 }
  0x6b   :  { %14805 = shalt.err (!%p14802_p9)
}
  0x6c   :  { %s15320_s15 = smov 16   ;;  %s15321_s16 = smov 1  }
  0x6d   :  { %167 = dma.hbm_to_vmem [thread:$0]  %s15418_s19, 32, %s162_s2, [#allocation9], %s15320_s15, %s15320_s15, %s15321_s16  }
  0x6e   :  { %s14814_s25 = scalar_lea.vmem %s186_s10, 32  ;;  %p14819_p11 = scmp.lt.s32.totalorder %s186_s10, %s186_s10 }
  0x6f   :  { %p14815_p10 = scmp.ne.s32.totalorder %s186_s10, %s14814_s25  ;;  %p14820_p12 = scmp.lt.s32.totalorder %s14814_s25, %s14814_s25 }
  0x71   :  { %p14821_p13 = por %p14820_p12, %p14819_p11 }
  0x73   :  { %p14822_p0 = pnand %p14821_p13, %p14815_p10 }
  0x75   :  { %14825 = shalt.err (!%p14822_p0)
}
  0x76   :  { %191 = dma.hbm_to_vmem [thread:$0]  %s15428_s30, 32, %s186_s10, [#allocation12], %s15320_s15, %s15320_s15, %s15321_s16  }
  0x77   :  { %s15322_s18 = smov [#allocation14]   ;;  %s15323_s23 = smov [#allocation17]  }
  0x78   :  { %s213_s22 = sshll.u32 %s15322_s18, 4  ;;  %s241_s26 = sshll.u32 %s15323_s23, 4  ;;  %s214_s22 = int_to_ptr.vmem [resolvable:$true] %s213_s22  ;;  %s242_s26 = int_to_ptr.vmem [resolvable:$true] %s241_s26 }
  0x79   :  { %s14834_s1 = scalar_lea.vmem %s214_s22, 32  ;;  %p14839_p2 = scmp.lt.s32.totalorder %s214_s22, %s214_s22 }
  0x7a   :  { %p14835_p1 = scmp.ne.s32.totalorder %s214_s22, %s14834_s1  ;;  %p14840_p3 = scmp.lt.s32.totalorder %s14834_s1, %s14834_s1 }
  0x7c   :  { %p14841_p4 = por %p14840_p3, %p14839_p2 }
  0x7e   :  { %p14842_p5 = pnand %p14841_p4, %p14835_p1 }
  0x80   :  { %14845 = shalt.err (!%p14842_p5)
}
  0x81   :  { %219 = dma.hbm_to_vmem [thread:$0]  %s15448_s27, 32, %s214_s22, [#allocation15], %s15320_s15, %s15320_s15, %s15321_s16  }
  0x82   :  { %s14854_s19 = scalar_lea.vmem %s242_s26, 32  ;;  %p14859_p7 = scmp.lt.s32.totalorder %s242_s26, %s242_s26 }
  0x83   :  { %p14855_p6 = scmp.ne.s32.totalorder %s242_s26, %s14854_s19  ;;  %p14860_p8 = scmp.lt.s32.totalorder %s14854_s19, %s14854_s19 }
  0x85   :  { %p14861_p9 = por %p14860_p8, %p14859_p7 }
  0x87   :  { %p14862_p10 = pnand %p14861_p9, %p14855_p6 }
  0x89   :  { %14865 = shalt.err (!%p14862_p10)
}
  0x8a   :  { %247 = dma.hbm_to_vmem [thread:$0]  %s15468_s6, 32, %s242_s26, [#allocation18], %s15320_s15, %s15320_s15, %s15321_s16  }
  0x8b   :  { %s15324_s30 = smov [#allocation20]   ;;  %s15325_s7 = smov [#allocation23]  }
  0x8c   :  { %s267_s2 = sshll.u32 %s15324_s30, 4  ;;  %s293_s10 = sshll.u32 %s15325_s7, 4  ;;  %s268_s2 = int_to_ptr.vmem [resolvable:$true] %s267_s2  ;;  %s294_s10 = int_to_ptr.vmem [resolvable:$true] %s293_s10 }
  0x8d   :  { %s14874_s11 = scalar_lea.vmem %s268_s2, 32  ;;  %p14879_p12 = scmp.lt.s32.totalorder %s268_s2, %s268_s2 }
  0x8e   :  { %p14875_p11 = scmp.ne.s32.totalorder %s268_s2, %s14874_s11  ;;  %p14880_p13 = scmp.lt.s32.totalorder %s14874_s11, %s14874_s11 }
  0x90   :  { %p14881_p0 = por %p14880_p13, %p14879_p12 }
  0x92   :  { %p14882_p1 = pnand %p14881_p0, %p14875_p11 }
  0x94   :  { %14885 = shalt.err (!%p14882_p1)
}
  0x95   :  { %273 = dma.hbm_to_vmem [thread:$0]  %s15483_s20, 32, %s268_s2, [#allocation21], %s15320_s15, %s15320_s15, %s15321_s16  }
  0x96   :  { %s14894_s27 = scalar_lea.vmem %s294_s10, 32  ;;  %p14899_p3 = scmp.lt.s32.totalorder %s294_s10, %s294_s10 }
  0x97   :  { %p14895_p2 = scmp.ne.s32.totalorder %s294_s10, %s14894_s27  ;;  %p14900_p4 = scmp.lt.s32.totalorder %s14894_s27, %s14894_s27 }
  0x99   :  { %p14901_p5 = por %p14900_p4, %p14899_p3 }
  0x9b   :  { %p14902_p6 = pnand %p14901_p5, %p14895_p2 }
  0x9d   :  { %14905 = shalt.err (!%p14902_p6)
}
  0x9e   :  { %299 = dma.hbm_to_vmem [thread:$0]  %s15498_s29, 32, %s294_s10, [#allocation24], %s15320_s15, %s15320_s15, %s15321_s16  }
  0x9f   :  { %s15326_s6 = smov [#allocation26]   ;;  %s15327_s18 = smov [#allocation29]  }
  0xa0   :  { %s321_s25 = sshll.u32 %s15326_s6, 4  ;;  %s345_s22 = sshll.u32 %s15327_s18, 4  ;;  %s322_s25 = int_to_ptr.vmem [resolvable:$true] %s321_s25  ;;  %s346_s22 = int_to_ptr.vmem [resolvable:$true] %s345_s22 }
  0xa1   :  { %s14914_s23 = scalar_lea.vmem %s322_s25, 32  ;;  %p14919_p8 = scmp.lt.s32.totalorder %s322_s25, %s322_s25 }
  0xa2   :  { %p14915_p7 = scmp.ne.s32.totalorder %s322_s25, %s14914_s23  ;;  %p14920_p9 = scmp.lt.s32.totalorder %s14914_s23, %s14914_s23 }
  0xa4   :  { %p14921_p10 = por %p14920_p9, %p14919_p8 }
  0xa6   :  { %p14922_p11 = pnand %p14921_p10, %p14915_p7 }
  0xa8   :  { %14925 = shalt.err (!%p14922_p11)
}
  0xa9   :  { %327 = dma.hbm_to_vmem [thread:$0]  %s15518_s13, 32, %s322_s25, [#allocation27], %s15320_s15, %s15320_s15, %s15321_s16  }
  0xaa   :  { %s14934_s20 = scalar_lea.vmem %s346_s22, 32  ;;  %p14939_p13 = scmp.lt.s32.totalorder %s346_s22, %s346_s22 }
  0xab   :  { %p14935_p12 = scmp.ne.s32.totalorder %s346_s22, %s14934_s20  ;;  %p14940_p0 = scmp.lt.s32.totalorder %s14934_s20, %s14934_s20 }
  0xad   :  { %p14941_p1 = por %p14940_p0, %p14939_p13 }
  0xaf   :  { %p14942_p2 = pnand %p14941_p1, %p14935_p12 }
  0xb1   :  { %14945 = shalt.err (!%p14942_p2)
}
  0xb2   :  { %351 = dma.hbm_to_vmem [thread:$0]  %s15528_s3, 32, %s346_s22, [#allocation30], %s15320_s15, %s15320_s15, %s15321_s16  }
  0xb3   :  { %s15328_s29 = smov [#allocation32]   ;;  %s15329_s1 = smov [#allocation35]  }
  0xb4   :  { %s369_s26 = sshll.u32 %s15328_s29, 4  ;;  %s395_s19 = sshll.u32 %s15329_s1, 4  ;;  %s370_s26 = int_to_ptr.vmem [resolvable:$true] %s369_s26  ;;  %s396_s19 = int_to_ptr.vmem [resolvable:$true] %s395_s19 }
  0xb5   :  { %s14954_s30 = scalar_lea.vmem %s370_s26, 32  ;;  %p14959_p4 = scmp.lt.s32.totalorder %s370_s26, %s370_s26 }
  0xb6   :  { %p14955_p3 = scmp.ne.s32.totalorder %s370_s26, %s14954_s30  ;;  %p14960_p5 = scmp.lt.s32.totalorder %s14954_s30, %s14954_s30 }
  0xb8   :  { %p14961_p6 = por %p14960_p5, %p14959_p4 }
  0xba   :  { %p14962_p7 = pnand %p14961_p6, %p14955_p3 }
  0xbc   :  { %14965 = shalt.err (!%p14962_p7)
}
  0xbd   :  { %375 = dma.hbm_to_vmem [thread:$0]  %s15538_s5, 32, %s370_s26, [#allocation33], %s15320_s15, %s15320_s15, %s15321_s16  }
  0xbe   :  { %s14974_s13 = scalar_lea.vmem %s396_s19, 32  ;;  %p14979_p9 = scmp.lt.s32.totalorder %s396_s19, %s396_s19 }
  0xbf   :  { %p14975_p8 = scmp.ne.s32.totalorder %s396_s19, %s14974_s13  ;;  %p14980_p10 = scmp.lt.s32.totalorder %s14974_s13, %s14974_s13 }
  0xc1   :  { %p14981_p11 = por %p14980_p10, %p14979_p9 }
  0xc3   :  { %p14982_p12 = pnand %p14981_p11, %p14975_p8 }
  0xc5   :  { %14985 = shalt.err (!%p14982_p12)
}
  0xc6   :  { %401 = dma.hbm_to_vmem [thread:$0]  %s15553_s4, 32, %s396_s19, [#allocation36], %s15320_s15, %s15320_s15, %s15321_s16  }
  0xc7   :  { %s15330_s3 = smov [#allocation2]   ;;  %s15331_s7 = smov [#allocation7]  }
  0xc8   :  { %s119_s2 = sshll.u32 %s15330_s3, 4  ;;  %s147_s10 = sshll.u32 %s15331_s7, 4  ;;  %s120_s2 = int_to_ptr.vmem [resolvable:$true] %s119_s2  ;;  %s148_s10 = int_to_ptr.vmem [resolvable:$true] %s147_s10 }
  0xc9   :  { %s14994_s11 = scalar_lea.vmem %s120_s2, 256  ;;  %p14999_p0 = scmp.lt.s32.totalorder %s120_s2, %s120_s2 }
  0xca   :  { %p14995_p13 = scmp.ne.s32.totalorder %s120_s2, %s14994_s11  ;;  %p15000_p1 = scmp.lt.s32.totalorder %s14994_s11, %s14994_s11 }
  0xcc   :  { %p15001_p2 = por %p15000_p1, %p14999_p0 }
  0xce   :  { %p15002_p3 = pnand %p15001_p2, %p14995_p13 }
  0xd0   :  { %15005 = shalt.err (!%p15002_p3)
}
  0xd1   :  { %125 = dma.hbm_to_vmem [thread:$0]  %s15388_s21, 256, %s120_s2, [#allocation3], %s15316_s0, %s15316_s0, %s15317_s28  }
  0xd2   :  { %s15014_s5 = scalar_lea.vmem %s148_s10, 32  ;;  %p15019_p5 = scmp.lt.s32.totalorder %s148_s10, %s148_s10 }
  0xd3   :  { %p15015_p4 = scmp.ne.s32.totalorder %s148_s10, %s15014_s5  ;;  %p15020_p6 = scmp.lt.s32.totalorder %s15014_s5, %s15014_s5 }
  0xd5   :  { %p15021_p7 = por %p15020_p6, %p15019_p5 }
  0xd7   :  { %p15022_p8 = pnand %p15021_p7, %p15015_p4 }
  0xd9   :  { %15025 = shalt.err (!%p15022_p8)
}
  0xda   :  { %153 = dma.hbm_to_vmem [thread:$0]  %s15408_s8, 32, %s148_s10, [#allocation6], %s15320_s15, %s15320_s15, %s15321_s16  }
  0xdb   :  { %s15332_s4 = smov [#allocation10]   ;;  %s15333_s6 = smov [#allocation13]  }
  0xdc   :  { %s173_s27 = sshll.u32 %s15332_s4, 4  ;;  %s199_s25 = sshll.u32 %s15333_s6, 4  ;;  %s174_s27 = int_to_ptr.vmem [resolvable:$true] %s173_s27  ;;  %s200_s25 = int_to_ptr.vmem [resolvable:$true] %s199_s25 }
  0xdd   :  { %s15034_s18 = scalar_lea.vmem %s174_s27, 32  ;;  %p15039_p10 = scmp.lt.s32.totalorder %s174_s27, %s174_s27 }
  0xde   :  { %p15035_p9 = scmp.ne.s32.totalorder %s174_s27, %s15034_s18  ;;  %p15040_p11 = scmp.lt.s32.totalorder %s15034_s18, %s15034_s18 }
  0xe0   :  { %p15041_p12 = por %p15040_p11, %p15039_p10 }
  0xe2   :  { %p15042_p13 = pnand %p15041_p12, %p15035_p9 }
  0xe4   :  { %15045 = shalt.err (!%p15042_p13)
}
  0xe5   :  { %179 = dma.hbm_to_vmem [thread:$0]  %s15423_s24, 32, %s174_s27, [#allocation9], %s15320_s15, %s15320_s15, %s15321_s16  }
  0xe6   :  { %s15054_s21 = scalar_lea.vmem %s200_s25, 32  ;;  %p15059_p1 = scmp.lt.s32.totalorder %s200_s25, %s200_s25 }
  0xe7   :  { %p15055_p0 = scmp.ne.s32.totalorder %s200_s25, %s15054_s21  ;;  %p15060_p2 = scmp.lt.s32.totalorder %s15054_s21, %s15054_s21 }
  0xe9   :  { %p15061_p3 = por %p15060_p2, %p15059_p1 }
  0xeb   :  { %p15062_p4 = pnand %p15061_p3, %p15055_p0 }
  0xed   :  { %15065 = shalt.err (!%p15062_p4)
}
  0xee   :  { %s17162_s8 = sld [smem:[#allocation60_spill]]  ;;  %s15334_s22 = smov [#allocation16]  }
  0xef   :  { %s227_s23 = sshll.u32 %s15334_s22, 4  ;;  %s15335_s20 = smov [#allocation19]   ;;  %s228_s23 = int_to_ptr.vmem [resolvable:$true] %s227_s23 }
  0xf0   :  { %s255_s29 = sshll.u32 %s15335_s20, 4  ;;  %s15074_s26 = scalar_lea.vmem %s228_s23, 32  ;;  %s256_s29 = int_to_ptr.vmem [resolvable:$true] %s255_s29 }
  0xf1   :  { %p15075_p5 = scmp.ne.s32.totalorder %s228_s23, %s15074_s26  ;;  %p15079_p6 = scmp.lt.s32.totalorder %s228_s23, %s228_s23 }
  0xf2   :  { %p15080_p7 = scmp.lt.s32.totalorder %s15074_s26, %s15074_s26 }
  0xf4   :  { %205 = dma.hbm_to_vmem [thread:$0]  %s17162_s8, 32, %s200_s25, [#allocation12], %s15320_s15, %s15320_s15, %s15321_s16  }
  0xf5   :  { %p15081_p8 = por %p15080_p7, %p15079_p6 }
  0xf7   :  { %p15082_p9 = pnand %p15081_p8, %p15075_p5 }
  0xf9   :  { %15085 = shalt.err (!%p15082_p9)
}
  0xfa   :  { %s17163_s24 = sld [smem:[#allocation63_spill]]  ;;  %s15094_s1 = scalar_lea.vmem %s256_s29, 32 }
  0xfb   :  { %p15095_p10 = scmp.ne.s32.totalorder %s256_s29, %s15094_s1  ;;  %p15099_p11 = scmp.lt.s32.totalorder %s256_s29, %s256_s29 }
  0xfc   :  { %p15100_p12 = scmp.lt.s32.totalorder %s15094_s1, %s15094_s1 }
  0xfe   :  { %p15101_p13 = por %p15100_p12, %p15099_p11 }
 0x100   :  { %233 = dma.hbm_to_vmem [thread:$0]  %s17163_s24, 32, %s228_s23, [#allocation15], %s15320_s15, %s15320_s15, %s15321_s16  }
 0x101   :  { %p15102_p0 = pnand %p15101_p13, %p15095_p10 }
 0x103   :  { %15105 = shalt.err (!%p15102_p0)
}
 0x104   :  { %s17164_s19 = sld [smem:[#allocation66_spill]]  ;;  %s15336_s30 = smov [#allocation22]  }
 0x105   :  { %s279_s13 = sshll.u32 %s15336_s30, 4  ;;  %s15337_s3 = smov [#allocation25]   ;;  %s280_s13 = int_to_ptr.vmem [resolvable:$true] %s279_s13 }
 0x106   :  { %s305_s2 = sshll.u32 %s15337_s3, 4  ;;  %s15114_s7 = scalar_lea.vmem %s280_s13, 32  ;;  %s306_s2 = int_to_ptr.vmem [resolvable:$true] %s305_s2 }
 0x107   :  { %p15115_p1 = scmp.ne.s32.totalorder %s280_s13, %s15114_s7  ;;  %p15119_p2 = scmp.lt.s32.totalorder %s280_s13, %s280_s13 }
 0x108   :  { %p15120_p3 = scmp.lt.s32.totalorder %s15114_s7, %s15114_s7 }
 0x10a   :  { %261 = dma.hbm_to_vmem [thread:$0]  %s17164_s19, 32, %s256_s29, [#allocation18], %s15320_s15, %s15320_s15, %s15321_s16  }
 0x10b   :  { %p15121_p4 = por %p15120_p3, %p15119_p2 }
 0x10d   :  { %p15122_p5 = pnand %p15121_p4, %p15115_p1 }
 0x10f   :  { %15125 = shalt.err (!%p15122_p5)
}
 0x110   :  { %s17165_s10 = sld [smem:[#allocation67_spill]]  ;;  %s15134_s11 = scalar_lea.vmem %s306_s2, 512 }
 0x111   :  { %p15135_p6 = scmp.ne.s32.totalorder %s306_s2, %s15134_s11  ;;  %p15139_p7 = scmp.lt.s32.totalorder %s306_s2, %s306_s2 }
 0x112   :  { %p15140_p8 = scmp.lt.s32.totalorder %s15134_s11, %s15134_s11 }
 0x114   :  { %p15141_p9 = por %p15140_p8, %p15139_p7 }
 0x116   :  { %285 = dma.hbm_to_vmem [thread:$0]  %s17165_s10, 32, %s280_s13, [#allocation21], %s15320_s15, %s15320_s15, %s15321_s16  }
 0x117   :  { %p15142_p10 = pnand %p15141_p9, %p15135_p6 }
 0x119   :  { %15145 = shalt.err (!%p15142_p10)
}
 0x11a   :  { %s17166_s5 = sld [smem:[#allocation69_spill]]  ;;  %s15338_s4 = smov [#allocation28]  }
 0x11b   :  { %s333_s27 = sshll.u32 %s15338_s4, 4  ;;  %s15339_s6 = smov [#allocation31]   ;;  %s334_s27 = int_to_ptr.vmem [resolvable:$true] %s333_s27 }
 0x11c   :  { %s357_s25 = sshll.u32 %s15339_s6, 4  ;;  %s15154_s18 = scalar_lea.vmem %s334_s27, 32  ;;  %s358_s25 = int_to_ptr.vmem [resolvable:$true] %s357_s25 }
 0x11d   :  { %p15155_p11 = scmp.ne.s32.totalorder %s334_s27, %s15154_s18  ;;  %p15159_p12 = scmp.lt.s32.totalorder %s334_s27, %s334_s27 }
 0x11e   :  { %p15160_p13 = scmp.lt.s32.totalorder %s15154_s18, %s15154_s18 }
 0x120   :  { %311 = dma.hbm_to_vmem [thread:$0]  %s17166_s5, 512, %s306_s2, [#allocation24], %s15316_s0, %s15316_s0, %s15317_s28  }
 0x121   :  { %p15161_p0 = por %p15160_p13, %p15159_p12 }
 0x123   :  { %p15162_p1 = pnand %p15161_p0, %p15155_p11 }
 0x125   :  { %15165 = shalt.err (!%p15162_p1)
}
 0x126   :  { %s17167_s21 = sld [smem:[#allocation72_spill]]  ;;  %s15174_s8 = scalar_lea.vmem %s358_s25, 1024 }
 0x127   :  { %p15175_p2 = scmp.ne.s32.totalorder %s358_s25, %s15174_s8  ;;  %p15179_p3 = scmp.lt.s32.totalorder %s358_s25, %s358_s25 }
 0x128   :  { %p15180_p4 = scmp.lt.s32.totalorder %s15174_s8, %s15174_s8 }
 0x12a   :  { %p15181_p5 = por %p15180_p4, %p15179_p3 }
 0x12c   :  { %339 = dma.hbm_to_vmem [thread:$0]  %s17167_s21, 32, %s334_s27, [#allocation27], %s15320_s15, %s15320_s15, %s15321_s16  }
 0x12d   :  { %p15182_p6 = pnand %p15181_p5, %p15175_p2 }
 0x12f   :  { %15185 = shalt.err (!%p15182_p6)
}
 0x130   :  { %s17168_s22 = sld [smem:[#allocation73_spill]]  ;;  %s15340_s23 = smov [#allocation34]  }
 0x131   :  { %s383_s20 = sshll.u32 %s15340_s23, 4  ;;  %s15341_s29 = smov [#allocation37]   ;;  %s384_s20 = int_to_ptr.vmem [resolvable:$true] %s383_s20 }
 0x132   :  { %s407_s26 = sshll.u32 %s15341_s29, 4  ;;  %s15194_s24 = scalar_lea.vmem %s384_s20, 32  ;;  %s408_s26 = int_to_ptr.vmem [resolvable:$true] %s407_s26 }
 0x133   :  { %p15195_p7 = scmp.ne.s32.totalorder %s384_s20, %s15194_s24  ;;  %p15199_p8 = scmp.lt.s32.totalorder %s384_s20, %s384_s20 }
 0x134   :  { %p15200_p9 = scmp.lt.s32.totalorder %s15194_s24, %s15194_s24 }
 0x136   :  { %363 = dma.hbm_to_vmem [thread:$0]  %s17168_s22, 1024, %s358_s25, [#allocation30], %s15316_s0, %s15316_s0, %s15317_s28  }
 0x137   :  { %p15201_p10 = por %p15200_p9, %p15199_p8 }
 0x139   :  { %p15202_p11 = pnand %p15201_p10, %p15195_p7 }
 0x13b   :  { %15205 = shalt.err (!%p15202_p11)
}
 0x13c   :  { %s17169_s1 = sld [smem:[#allocation75_spill]]  ;;  %s15214_s19 = scalar_lea.vmem %s408_s26, 32 }
 0x13d   :  { %p15215_p12 = scmp.ne.s32.totalorder %s408_s26, %s15214_s19  ;;  %p15219_p13 = scmp.lt.s32.totalorder %s408_s26, %s408_s26 }
 0x13e   :  { %p15220_p0 = scmp.lt.s32.totalorder %s15214_s19, %s15214_s19 }
 0x140   :  { %p15221_p1 = por %p15220_p0, %p15219_p13 }
 0x142   :  { %389 = dma.hbm_to_vmem [thread:$0]  %s17169_s1, 32, %s384_s20, [#allocation33], %s15320_s15, %s15320_s15, %s15321_s16  }
 0x143   :  { %p15222_p2 = pnand %p15221_p1, %p15215_p12 }
 0x145   :  { %15225 = shalt.err (!%p15222_p2)
}
 0x146   :  { %s17170_s30 = sld [smem:[#allocation76_spill]] }
 0x14c   :  { %413 = dma.hbm_to_vmem [thread:$0]  %s17170_s30, 32, %s408_s26, [#allocation36], %s15320_s15, %s15320_s15, %s15321_s16  }
 0x14d   :  { %15246 = dma.done.wait [#allocation3], 256  }
 0x14e   :  { %15247 = vsyncadd [#allocation3], 4294967040 }
 0x14f   :  { %15248 = dma.done.wait [#allocation6], 288  }
 0x150   :  { %15249 = vsyncadd [#allocation6], 4294967008 }
 0x151   :  { %15250 = dma.done.wait [#allocation9], 64  }
 0x152   :  { %15251 = vsyncadd [#allocation9], 4294967232 }
 0x153   :  { %15252 = dma.done.wait [#allocation12], 64  }
 0x154   :  { %15253 = vsyncadd [#allocation12], 4294967232 }
 0x155   :  { %15254 = dma.done.wait [#allocation15], 64  }
 0x156   :  { %15255 = vsyncadd [#allocation15], 4294967232 }
 0x157   :  { %15256 = dma.done.wait [#allocation18], 64  }
 0x158   :  { %15257 = vsyncadd [#allocation18], 4294967232 }
 0x159   :  { %15258 = dma.done.wait [#allocation21], 64  }
 0x15a   :  { %15259 = vsyncadd [#allocation21], 4294967232 }
 0x15b   :  { %15260 = dma.done.wait [#allocation24], 544  }
 0x15c   :  { %15261 = vsyncadd [#allocation24], 4294966752 }
 0x15d   :  { %15262 = dma.done.wait [#allocation27], 64  }
 0x15e   :  { %15263 = vsyncadd [#allocation27], 4294967232 }
 0x15f   :  { %15264 = dma.done.wait [#allocation30], 1056  }
 0x160   :  { %15265 = vsyncadd [#allocation30], 4294966240 }
 0x161   :  { %15266 = dma.done.wait [#allocation33], 64  }
 0x162   :  { %15267 = vsyncadd [#allocation33], 4294967232 }
 0x163   :  { %15268 = dma.done.wait [#allocation36], 64  }
 0x164   :  { %15269 = vsyncadd [#allocation36], 4294967232  ;;  %s17171_s16 = sld [smem:[#allocation54_spill]]  ;;  %v15342_v0 = vmov 0   ;;  %v576_v2 = vld [vmem:[#allocation2 + $0x8] sm:$0xff]  ;;  %v575_v3 = vld [vmem:[#allocation2] sm:$0xff]  ;;  %v494_v6 = vlaneseq }
 0x165   :  { %s17172_s13 = sld [smem:[#allocation57_spill]]  ;;  %14531 = vset.pattern.permute.xlu0 %v15342_v0  ;;  %14532 = vset.pattern.permute.xlu1 %v15342_v0  ;;  %vm587_vm0 = vcmask 130048   ;;  %v15343_v9 = vmov 0.0   ;;  %vm779_vm3 = vcmask 261120   ;;  %v674_v24 = vld [vmem:[#allocation5 + $0x8] sm:$0xff]  ;;  %v673_v25 = vld [vmem:[#allocation5] sm:$0xff] }
 0x166   :  { %13621 = vmatprep.subr.mxu0 %v576_v2  ;;  %v15683_v7 = vand.u32 127, %v494_v6  ;;  %s17173_s3 = sld [smem:[#allocation55_spill]]  ;;  %13628 = vmatprep.subr.mxu1 %v674_v24  ;;  %vm15344_vm6 = vmmov 0   ;;  %v12903_v29 = vld [vmem:[#allocation7] ss:$0 sm:$0xff]  ;;  %s15345_s7 = smov 96  }
 0x167   :  { %13622 = vmatpush3.msra.mxu0 %v576_v2  ;;  %s17174_s2 = sld [smem:[#allocation56_spill]]  ;;  %13629 = vmatpush3.msra.mxu1 %v674_v24  ;;  %vm879_vm7 = vcmask 64512   ;;  %v15346_v36 = vmov 1966171168   ;;  %v15739_v40 = vshrl.u32 %v494_v6, 7  ;;  %s15347_s11 = smov 64  }
 0x168   :  { %13623 = vmatprep.subr.mxu0 %v575_v3  ;;  %13630 = vmatprep.subr.mxu1 %v673_v25  ;;  %s17175_s10 = sld [smem:[#allocation52_spill]]  ;;  %v492_v37 = vunpack.c.l.s4 %v15346_v36  ;;  %s15348_s5 = smov 88   ;;  %vm2697_vm13 = vcmask 523264  }
 0x169   :  { %13624 = vmatpush3.msra.mxu0 %v575_v3  ;;  %13631 = vmatpush3.msra.mxu1 %v673_v25  ;;  %v15749_v47 = vsub.s32 0, %v15739_v40  ;;  %s15349_s4 = smov 120   ;;  %s17180_s27 = sld [smem:[#allocation58_spill]] }
 0x16a   :  { %v573_v1 = vld [vmem:[%s17171_s16] sm:$0xff]  ;;  %v574_v4 = vld [vmem:[%s17171_s16 + $0x8] sm:$0xff]  ;;  %13646 = vmatprep.subr.mxu1 %v15343_v9  ;;  %v493_v39 = vunpack.c.0.s8 %v492_v37  ;;  %s15350_s6 = smov 56   ;;  %s15351_s25 = smov 80  }
 0x16b   :  { %578 = vperm.xlu0 %14531, %v573_v1   ;;  %v771_v5 = vld [vmem:[%s17172_s13 + $0x18] sm:$0xff]  ;;  %v770_v13 = vld [vmem:[%s17172_s13 + $0x10] sm:$0xff]  ;;  %v769_v14 = vld [vmem:[%s17172_s13 + $0x8] sm:$0xff]  ;;  %s15352_s18 = smov 112   ;;  %s15353_s21 = smov 48  }
 0x16c   :  { %13635 = vmatprep.subr.mxu0 %v771_v5  ;;  %v768_v15 = vld [vmem:[%s17172_s13] sm:$0xff]  ;;  %v672_v17 = vld [vmem:[%s17173_s3 + $0x8] sm:$0xff]  ;;  %v15742_v41 = vsub.s32 %v493_v39, %v15739_v40  ;;  %s15354_s8 = smov 72   ;;  %s15355_s22 = smov 104  }
 0x16d   :  { %v671_v16 = vld [vmem:[%s17173_s3] sm:$0xff]  ;;  %s15356_s23 = smov 40   ;;  %s17181_s20 = sld [smem:[#allocation59_spill]] }
 0x16e   :  { %676 = vperm.xlu1 %14532, %v671_v16   ;;  %v485_v19 = vld [vmem:[%s17174_s2] sm:$0xff]  ;;  %s17182_s29 = sld [smem:[#allocation61_spill]]  ;;  %s15358_s3 = smov 24  }
 0x16f   :  { %581 = vperm.xlu0 %14531, %v574_v4   ;;  %v486_v38 = vld [vmem:[%s17175_s10] sm:$0x3]  ;;  %s17183_s26 = sld [smem:[#allocation62_spill]] }
 0x170   :  { %vm487_vm8 = vcmp.eq.s32.totalorder %v486_v38, 0  ;;  %v861_v25 = vld [vmem:[%s17180_s27] sm:$0xff]  ;;  %s17185_s24 = sld [smem:[#allocation70_spill]] }
 0x171   :  { %v490_v42 = vsel %vm487_vm8, 1, %v15342_v0  ;;  %s17186_s1 = sld [smem:[#allocation53_spill]] }
 0x172   :  { %679 = vperm.xlu1 %14532, %v672_v17   ;;  %v497_v43 = vrot.slane %v490_v42, %v15742_v41  ;;  %s17191_s19 = sld [smem:[#allocation65_spill]] }
 0x173   :  { %s17192_s30 = sld [smem:[#allocation68_spill]] }
 0x174   :  { %v498_v44 = vcombine.high %v497_v43, %v497_v43  ;;  %v505_v45 = vrot.slane %v497_v43, %v15742_v41  ;;  %s17193_s16 = sld [smem:[#allocation71_spill]] }
 0x176   :  { %v512_v46 = vrot.slane %v498_v44, %v15742_v41  ;;  %vm513_vm9 = vcmp.ne.s32.totalorder %v505_v45, 0  ;;  %v15816_v45 = vld [vmem:[#allocation8] ss:$0 sm:$0xff] }
 0x177   :  { %v515_v48 = vsel %vm513_vm9, 1, %v15342_v0 }
 0x178   :  { %vm514_vm10 = vcmp.ne.s32.totalorder %v512_v46, 0  ;;  %v520_v49 = vrot.slane %v515_v48, %v15749_v47 }
 0x179   :  { %v516_v51 = vsel %vm514_vm10, 1, %v15342_v0 }
 0x17a   :  { %v524_v52 = vrot.slane %v516_v51, %v15749_v47  ;;  %vm15757_vm11 = vcmp.eq.s32.totalorder %v520_v49, 1 }
 0x17c   :  { %vm15765_vm12 = vcmp.eq.s32.totalorder %v524_v52, 1 }
 0x1e6   :  { %v579_v8 = vpop.permute.xlu0 %578 }
 0x1e7   :  { %vm583_vm1 = vcmp.eq.s32.totalorder %v15683_v7, %v579_v8 }
 0x1e8   :  { %v585_v10 = vsel %vm583_vm1, 1.0, %v15343_v9 }
 0x1e9   :  { %13625 = vmatprep.mubr.msk.f32.mxu0 %vm587_vm0, %v585_v10  ;;  %v677_v23 = vpop.permute.xlu1 %676 }
 0x1ea   :  { %v582_v11 = vpop.permute.xlu0 %581  ;;  %vm681_vm4 = vcmp.eq.s32.totalorder %v15683_v7, %v677_v23 }
 0x1eb   :  { %vm584_vm2 = vcmp.eq.s32.totalorder %v15683_v7, %v582_v11  ;;  %v683_v26 = vsel %vm681_vm4, 1.0, %v15343_v9 }
 0x1ec   :  { %v586_v12 = vsel %vm584_vm2, 1.0, %v15343_v9  ;;  %13632 = vmatprep.mubr.msk.f32.mxu1 %vm587_vm0, %v683_v26  ;;  %vm531_vm2 = vcmp.gt.s32.totalorder %v15683_v7, %v15739_v40 }
 0x1ed   :  { %13626 = vmatmul.mubr.msk.f32.vlgmr.msra.gmra.mxu0 %vm587_vm0, %v586_v12  ;;  %v680_v27 = vpop.permute.xlu1 %679 }
 0x1ee   :  { %13636 = vmatpush3.msra.mxu0 %v771_v5  ;;  %vm682_vm5 = vcmp.eq.s32.totalorder %v15683_v7, %v680_v27 }
 0x1ef   :  { %13637 = vmatprep.subr.mxu0 %v770_v13  ;;  %v684_v28 = vsel %vm682_vm5, 1.0, %v15343_v9 }
 0x1f0   :  { %13638 = vmatpush3.msra.mxu0 %v770_v13  ;;  %13633 = vmatmul.mubr.msk.f32.vlgmr.msra.gmra.mxu1 %vm587_vm0, %v684_v28 }
 0x1f1   :  { %13639 = vmatprep.subr.mxu0 %v769_v14  ;;  %13648 = vmatprep.mubr.msk.f32.mxu1 %vm15344_vm6, %v15343_v9 }
 0x1f2   :  { %13640 = vmatpush3.msra.mxu0 %v769_v14 }
 0x1f3   :  { %13641 = vmatprep.subr.mxu0 %v768_v15 }
 0x1f4   :  { %13642 = vmatpush3.msra.mxu0 %v768_v15 }
 0x1f5   :  { %13656 = vmatprep.subr.mxu0 %v15343_v9 }
 0x2ad   :  { %v13627_v18 = vpop.f32.mrf.mxu0 }
 0x2ae   :  { %v15700_v22 = vadd.f32 %v13627_v18, %v485_v19 }
 0x2af   :  { %v660_v20 = vpop.f32.mrf.mxu0 }
 0x2b0   :  { %v15698_v21 = vadd.f32 %v660_v20, %v485_v19  ;;  %v15753_v50 = vpop.f32.mrf.mxu1  ;;  %v875_v46 = vadd.f32 %v15816_v45, %v15700_v22 }
 0x2b2   :  { %13643 = vmatprep.mubr.msk.f32.mxu0 %vm779_vm3, %v15698_v21  ;;  %v15761_v54 = vpop.f32.mrf.mxu1 }
 0x2b3   :  { %13644 = vmatmul.mubr.msk.f32.vlgmr.msra.gmra.mxu0 %vm779_vm3, %v15700_v22 }
 0x2b4   :  { %13658 = vmatprep.mubr.msk.f32.mxu0 %vm15344_vm6, %v15343_v9 }
 0x373   :  { %v13645_v30 = vpop.f32.mrf.mxu0 }
 0x374   :  { %v15717_v31 = vadd.f32 %v13645_v30, %v12903_v29 }
 0x375   :  { %v852_v32 = vpop.f32.mrf.mxu0 }
 0x376   :  { %v15719_v33 = vadd.f32 %v12903_v29, %v852_v32  ;;  %955 = vrot.lane.b32.xlu1 %v15717_v31, %s15345_s7 }
 0x378   :  { %877 = vrot.lane.b32.xlu0 %v15719_v33, %s15345_s7 }
 0x3e8   :  { %v956_v35 = vpop.permute.xlu1 %955 }
 0x3ea   :  { %v878_v34 = vpop.permute.xlu0 %877 }
 0x3eb   :  { %13647 = vmatpush3.xpose.msk.msra.mxu1 %vm879_vm7, %v878_v34 }
 0x3ec   :  { %13651 = vmatprep.subr.mxu1 %v15343_v9 }
 0x3ee   :  { %13649 = vmatmul.mubr.msk.f32.vlgmr.msra.gmra.mxu1 %vm879_vm7, %v15719_v33 }
 0x3ef   :  { %13652 = vmatpush3.xpose.msk.msra.mxu1 %vm879_vm7, %v956_v35  ;;  %13653 = vmatprep.mubr.msk.f32.mxu1 %vm15344_vm6, %v15343_v9 }
 0x3f0   :  { %13661 = vmatprep.subr.mxu1 %v15343_v9 }
 0x3f2   :  { %13654 = vmatmul.mubr.msk.f32.vlgmr.msra.gmra.mxu1 %vm879_vm7, %v15717_v31 }
 0x3f3   :  { %13663 = vmatprep.mubr.msk.f32.mxu1 %vm15344_vm6, %v15343_v9 }
 0x4ae   :  { %v950_v55 = vpop.f32.mrf.mxu1 }
 0x4af   :  { %v1031_v56 = vsel %vm15757_vm11, -1e+09, %v950_v55 }
 0x4b0   :  { %v13650_v58 = vpop.f32.mrf.mxu1  ;;  %v1033_v59 = vsel %vm879_vm7, %v1031_v56, -inf }
 0x4b1   :  { %1034 = vmax.xlane.f32.xlu0 %v1033_v59 }
 0x4b2   :  { %v1027_v60 = vpop.f32.mrf.mxu1 }
 0x4b3   :  { %v1032_v61 = vsel %vm15765_vm12, -1e+09, %v1027_v60 }
 0x4b4   :  { %v13655_v62 = vpop.f32.mrf.mxu1  ;;  %v1036_v63 = vsel %vm879_vm7, %v1032_v61, -inf }
 0x4b5   :  { %1037 = vmax.xlane.f32.xlu1 %v1036_v63 }
 0x4c6   :  { %1055 = vrot.lane.b32.xlu1 %v15719_v33, %s15347_s11 }
 0x4ca   :  { %1292 = vrot.lane.b32.xlu1 %v15719_v33, %s15348_s5 }
 0x4ce   :  { %1370 = vrot.lane.b32.xlu1 %v15717_v31, %s15348_s5 }
 0x4d2   :  { %1368 = vrot.lane.b32.xlu1 %v15717_v31, %s15349_s4 }
 0x53a   :  { %v1035_v1 = vpop.xlane.xlu0 %1034 }
 0x53b   :  { %v1039_v2 = vsub.f32 %v1031_v56, %v1035_v1 }
 0x53d   :  { %v1041_v3 = vmul.f32 1.442695, %v1039_v2 }
 0x53e   :  { %v1038_v4 = vpop.xlane.xlu1 %1037 }
 0x53f   :  { %14533 = vpow2.f32 %v1041_v3  ;;  %v1040_v5 = vsub.f32 %v1032_v61, %v1038_v4  ;;  %v862_v4 = vld [vmem:[%s17180_s27 + $0x8] sm:$0xff] }
 0x541   :  { %v1043_v6 = vmul.f32 1.442695, %v1040_v5 }
 0x542   :  { %v1056_v8 = vpop.permute.xlu1 %1055 }
 0x543   :  { %14535 = vpow2.f32 %v1043_v6  ;;  %13657 = vmatpush3.msra.mxu0 %v1056_v8 }
 0x544   :  { %13666 = vmatprep.subr.mxu0 %v861_v25 }
 0x546   :  { %v1293_v23 = vpop.permute.xlu1 %1292 }
 0x54a   :  { %v1371_v27 = vpop.permute.xlu1 %1370 }
 0x54c   :  { %v14534_v10 = vpop.eup %14533 }
 0x54d   :  { %v1045_v11 = vsel %vm879_vm7, %v14534_v10, 0.0 }
 0x54e   :  { %1046 = vadd.xlane.f32.xlu0 %v1045_v11  ;;  %v1369_v32 = vpop.permute.xlu1 %1368 }
 0x550   :  { %v14536_v12 = vpop.eup %14535 }
 0x551   :  { %v1048_v13 = vsel %vm879_vm7, %v14536_v12, 0.0 }
 0x552   :  { %1049 = vadd.xlane.f32.xlu0 %v1048_v13 }
 0x568   :  { %1131 = vrot.lane.b32.xlu0 %v15717_v31, %s15347_s11 }
 0x56c   :  { %1290 = vrot.lane.b32.xlu0 %v15719_v33, %s15349_s4 }
 0x5d7   :  { %v1047_v14 = vpop.xlane.xlu0 %1046 }
 0x5d8   :  { %14537 = vrcp.f32 %v1047_v14 }
 0x5db   :  { %v1050_v15 = vpop.xlane.xlu0 %1049 }
 0x5dc   :  { %14539 = vrcp.f32 %v1050_v15 }
 0x5df   :  { %v1132_v16 = vpop.permute.xlu0 %1131 }
 0x5e0   :  { %13662 = vmatpush3.msra.mxu1 %v1132_v16 }
 0x5e1   :  { %13671 = vmatprep.subr.mxu1 %v15343_v9 }
 0x5e3   :  { %v1291_v24 = vpop.permute.xlu0 %1290 }
 0x5e5   :  { %v14538_v17 = vpop.eup %14537 }
 0x5e6   :  { %v1053_v18 = vmul.f32 %v14538_v17, %v14534_v10 }
 0x5e8   :  { %13659 = vmatmul.mubr.msk.f32.vlgmr.msra.gmra.mxu0 %vm879_vm7, %v1053_v18  ;;  %2578 = vst.msk [vmem:[%s15573_s12] sm:$0xff] %vm879_vm7, %v1053_v18 }
 0x5e9   :  { %v14540_v19 = vpop.eup %14539  ;;  %13667 = vmatpush3.msra.mxu0 %v861_v25 }
 0x5ea   :  { %v1054_v20 = vmul.f32 %v14540_v19, %v14536_v12  ;;  %13676 = vmatprep.subr.mxu0 %v15343_v9 }
 0x5ec   :  { %13664 = vmatmul.mubr.msk.f32.vlgmr.msra.gmra.mxu1 %vm879_vm7, %v1054_v20  ;;  %2582 = vst.msk [vmem:[%s15573_s12 + $0x20] sm:$0xff] %vm879_vm7, %v1054_v20 }
 0x5ed   :  { %13672 = vmatpush3.xpose.msk.msra.mxu1 %vm879_vm7, %v1293_v23  ;;  %13673 = vmatprep.mubr.msk.f32.mxu1 %vm15344_vm6, %v15343_v9 }
 0x5ee   :  { %13681 = vmatprep.subr.mxu1 %v15343_v9 }
 0x5f0   :  { %13674 = vmatmul.mubr.msk.f32.vlgmr.msra.gmra.mxu1 %vm879_vm7, %v1291_v24 }
 0x5f1   :  { %13683 = vmatprep.mubr.msk.f32.mxu1 %vm15344_vm6, %v15343_v9 }
 0x6a8   :  { %v1127_v26 = vpop.f32.mrf.mxu0 }
 0x6a9   :  { %13668 = vmatprep.mubr.msk.f32.mxu0 %vm879_vm7, %v1127_v26 }
 0x6aa   :  { %v13660_v28 = vpop.f32.mrf.mxu0 }
 0x6ac   :  { %v1203_v29 = vpop.f32.mrf.mxu1 }
 0x6ad   :  { %13669 = vmatmul.mubr.msk.f32.vlgmr.msra.gmra.mxu0 %vm879_vm7, %v1203_v29 }
 0x6ae   :  { %13677 = vmatpush3.xpose.msk.msra.mxu0 %vm879_vm7, %v1371_v27  ;;  %v13665_v30 = vpop.f32.mrf.mxu1  ;;  %13678 = vmatprep.mubr.msk.f32.mxu0 %vm15344_vm6, %v15343_v9 }
 0x6af   :  { %13686 = vmatprep.subr.mxu0 %v15343_v9 }
 0x6b0   :  { %v1364_v34 = vpop.f32.mrf.mxu1 }
 0x6b1   :  { %v1446_v35 = vsel %vm15757_vm11, -1e+09, %v1364_v34  ;;  %13679 = vmatmul.mubr.msk.f32.vlgmr.msra.gmra.mxu0 %vm879_vm7, %v1369_v32 }
 0x6b2   :  { %v13675_v36 = vpop.f32.mrf.mxu1  ;;  %v1448_v37 = vsel %vm879_vm7, %v1446_v35, -inf  ;;  %13688 = vmatprep.mubr.msk.f32.mxu0 %vm15344_vm6, %v15343_v9 }
 0x6b3   :  { %1449 = vmax.xlane.f32.xlu0 %v1448_v37 }
 0x73c   :  { %v1450_v38 = vpop.xlane.xlu0 %1449 }
 0x73d   :  { %v1454_v39 = vsub.f32 %v1446_v35, %v1450_v38 }
 0x73f   :  { %v1456_v42 = vmul.f32 1.442695, %v1454_v39 }
 0x741   :  { %14541 = vpow2.f32 %v1456_v42 }
 0x74e   :  { %v14542_v43 = vpop.eup %14541 }
 0x74f   :  { %v1460_v44 = vsel %vm879_vm7, %v14542_v43, 0.0 }
 0x750   :  { %1461 = vadd.xlane.f32.xlu0 %v1460_v44 }
 0x76d   :  { %v13670_v48 = vpop.f32.mrf.mxu0 }
 0x76e   :  { %v15820_v49 = vadd.f32 %v13670_v48, %v875_v46 }
 0x76f   :  { %v15822_v51 = vpop.f32.mrf.mxu0 }
 0x771   :  { %v1442_v52 = vpop.f32.mrf.mxu0 }
 0x772   :  { %v1447_v55 = vsel %vm15765_vm12, -1e+09, %v1442_v52 }
 0x773   :  { %v13680_v56 = vpop.f32.mrf.mxu0  ;;  %v1451_v58 = vsel %vm879_vm7, %v1447_v55, -inf }
 0x774   :  { %1452 = vmax.xlane.f32.xlu1 %v1451_v58  ;;  %v863_v56 = vld [vmem:[%s17180_s27 + $0x10] sm:$0xff] }
 0x785   :  { %1470 = vrot.lane.b32.xlu1 %v15719_v33, %s15350_s6 }
 0x789   :  { %1707 = vrot.lane.b32.xlu1 %v15719_v33, %s15351_s25 }
 0x78d   :  { %1785 = vrot.lane.b32.xlu1 %v15717_v31, %s15351_s25 }
 0x791   :  { %1783 = vrot.lane.b32.xlu1 %v15717_v31, %s15352_s18 }
 0x7d9   :  { %v1462_v22 = vpop.xlane.xlu0 %1461 }
 0x7da   :  { %14543 = vrcp.f32 %v1462_v22 }
 0x7e7   :  { %v14544_v59 = vpop.eup %14543 }
 0x7e8   :  { %v1468_v60 = vmul.f32 %v14544_v59, %v14542_v43 }
 0x7ea   :  { %2579 = vst.msk [vmem:[%s15573_s12 + $0x8] sm:$0xff] %vm879_vm7, %v1468_v60 }
 0x7fd   :  { %v1453_v61 = vpop.xlane.xlu1 %1452 }
 0x7fe   :  { %v1455_v62 = vsub.f32 %v1447_v55, %v1453_v61 }
 0x800   :  { %v1458_v63 = vmul.f32 1.442695, %v1455_v62 }
 0x801   :  { %v1471_v1 = vpop.permute.xlu1 %1470 }
 0x802   :  { %14545 = vpow2.f32 %v1458_v63  ;;  %13682 = vmatpush3.msra.mxu1 %v1471_v1 }
 0x803   :  { %13684 = vmatmul.mubr.msk.f32.vlgmr.msra.gmra.mxu1 %vm879_vm7, %v1468_v60  ;;  %13691 = vmatprep.subr.mxu1 %v862_v4 }
 0x804   :  { %13692 = vmatpush3.msra.mxu1 %v862_v4 }
 0x805   :  { %13701 = vmatprep.subr.mxu1 %v15343_v9  ;;  %v1708_v11 = vpop.permute.xlu1 %1707 }
 0x809   :  { %v1786_v15 = vpop.permute.xlu1 %1785 }
 0x80d   :  { %v1784_v18 = vpop.permute.xlu1 %1783 }
 0x80f   :  { %v14546_v2 = vpop.eup %14545 }
 0x810   :  { %v1463_v3 = vsel %vm879_vm7, %v14546_v2, 0.0 }
 0x811   :  { %1464 = vadd.xlane.f32.xlu0 %v1463_v3 }
 0x827   :  { %1546 = vrot.lane.b32.xlu0 %v15717_v31, %s15350_s6 }
 0x82b   :  { %1705 = vrot.lane.b32.xlu0 %v15719_v33, %s15352_s18 }
 0x89a   :  { %v1465_v5 = vpop.xlane.xlu0 %1464 }
 0x89b   :  { %14547 = vrcp.f32 %v1465_v5 }
 0x89e   :  { %v1547_v6 = vpop.permute.xlu0 %1546 }
 0x89f   :  { %13687 = vmatpush3.msra.mxu0 %v1547_v6 }
 0x8a0   :  { %13696 = vmatprep.subr.mxu0 %v15343_v9 }
 0x8a2   :  { %v1706_v12 = vpop.permute.xlu0 %1705 }
 0x8a8   :  { %v14548_v8 = vpop.eup %14547 }
 0x8a9   :  { %v1469_v10 = vmul.f32 %v14548_v8, %v14546_v2 }
 0x8ab   :  { %13689 = vmatmul.mubr.msk.f32.vlgmr.msra.gmra.mxu0 %vm879_vm7, %v1469_v10  ;;  %2583 = vst.msk [vmem:[%s15573_s12 + $0x28] sm:$0xff] %vm879_vm7, %v1469_v10 }
 0x8ac   :  { %13697 = vmatpush3.xpose.msk.msra.mxu0 %vm879_vm7, %v1708_v11  ;;  %13698 = vmatprep.mubr.msk.f32.mxu0 %vm15344_vm6, %v15343_v9 }
 0x8ad   :  { %13706 = vmatprep.subr.mxu0 %v15343_v9 }
 0x8af   :  { %13699 = vmatmul.mubr.msk.f32.vlgmr.msra.gmra.mxu0 %vm879_vm7, %v1706_v12 }
 0x8b0   :  { %13708 = vmatprep.mubr.msk.f32.mxu0 %vm15344_vm6, %v15343_v9 }
 0x8c3   :  { %v1542_v13 = vpop.f32.mrf.mxu1 }
 0x8c4   :  { %13693 = vmatprep.mubr.msk.f32.mxu1 %vm879_vm7, %v1542_v13 }
 0x8c5   :  { %v13685_v14 = vpop.f32.mrf.mxu1 }
 0x96b   :  { %v1618_v16 = vpop.f32.mrf.mxu0 }
 0x96c   :  { %13694 = vmatmul.mubr.msk.f32.vlgmr.msra.gmra.mxu1 %vm879_vm7, %v1618_v16 }
 0x96d   :  { %13702 = vmatpush3.xpose.msk.msra.mxu1 %vm879_vm7, %v1786_v15  ;;  %v13690_v17 = vpop.f32.mrf.mxu0  ;;  %13703 = vmatprep.mubr.msk.f32.mxu1 %vm15344_vm6, %v15343_v9 }
 0x96e   :  { %13711 = vmatprep.subr.mxu1 %v15343_v9 }
 0x96f   :  { %v1779_v19 = vpop.f32.mrf.mxu0 }
 0x970   :  { %v1861_v20 = vsel %vm15757_vm11, -1e+09, %v1779_v19  ;;  %13704 = vmatmul.mubr.msk.f32.vlgmr.msra.gmra.mxu1 %vm879_vm7, %v1784_v18 }
 0x971   :  { %v13700_v23 = vpop.f32.mrf.mxu0  ;;  %v1863_v24 = vsel %vm879_vm7, %v1861_v20, -inf  ;;  %13713 = vmatprep.mubr.msk.f32.mxu1 %vm15344_vm6, %v15343_v9 }
 0x972   :  { %1864 = vmax.xlane.f32.xlu0 %v1863_v24 }
 0x9fb   :  { %v1865_v25 = vpop.xlane.xlu0 %1864 }
 0x9fc   :  { %v1869_v26 = vsub.f32 %v1861_v20, %v1865_v25 }
 0x9fe   :  { %v1871_v27 = vmul.f32 1.442695, %v1869_v26 }
 0xa00   :  { %14549 = vpow2.f32 %v1871_v27 }
 0xa0d   :  { %v14550_v28 = vpop.eup %14549 }
 0xa0e   :  { %v1875_v29 = vsel %vm879_vm7, %v14550_v28, 0.0 }
 0xa0f   :  { %1876 = vadd.xlane.f32.xlu0 %v1875_v29 }
 0xa2c   :  { %v13695_v30 = vpop.f32.mrf.mxu1 }
 0xa2d   :  { %v15870_v32 = vadd.f32 %v13695_v30, %v15820_v49 }
 0xa2e   :  { %v15872_v34 = vpop.f32.mrf.mxu1 }
 0xa30   :  { %v1857_v35 = vpop.f32.mrf.mxu1 }
 0xa31   :  { %v1862_v36 = vsel %vm15765_vm12, -1e+09, %v1857_v35 }
 0xa32   :  { %v13705_v37 = vpop.f32.mrf.mxu1  ;;  %v1866_v38 = vsel %vm879_vm7, %v1862_v36, -inf }
 0xa33   :  { %1867 = vmax.xlane.f32.xlu1 %v1866_v38 }
 0xa44   :  { %1885 = vrot.lane.b32.xlu1 %v15719_v33, %s15353_s21 }
 0xa48   :  { %2122 = vrot.lane.b32.xlu1 %v15719_v33, %s15354_s8 }
 0xa4c   :  { %2200 = vrot.lane.b32.xlu1 %v15717_v31, %s15354_s8 }
 0xa50   :  { %2198 = vrot.lane.b32.xlu1 %v15717_v31, %s15355_s22 }
 0xa98   :  { %v1877_v39 = vpop.xlane.xlu0 %1876 }
 0xa99   :  { %14551 = vrcp.f32 %v1877_v39 }
 0xaa6   :  { %v14552_v42 = vpop.eup %14551 }
 0xaa7   :  { %v1883_v43 = vmul.f32 %v14552_v42, %v14550_v28 }
 0xaa9   :  { %2580 = vst.msk [vmem:[%s15573_s12 + $0x10] sm:$0xff] %vm879_vm7, %v1883_v43 }
 0xabc   :  { %v1868_v44 = vpop.xlane.xlu1 %1867 }
 0xabd   :  { %v1870_v46 = vsub.f32 %v1862_v36, %v1868_v44 }
 0xabf   :  { %v1873_v48 = vmul.f32 1.442695, %v1870_v46 }
 0xac0   :  { %v1886_v49 = vpop.permute.xlu1 %1885 }
 0xac1   :  { %14553 = vpow2.f32 %v1873_v48  ;;  %13707 = vmatpush3.msra.mxu0 %v1886_v49  ;;  %v874_v49 = vadd.f32 %v15816_v45, %v15698_v21 }
 0xac2   :  { %13709 = vmatmul.mubr.msk.f32.vlgmr.msra.gmra.mxu0 %vm879_vm7, %v1883_v43  ;;  %13716 = vmatprep.subr.mxu0 %v863_v56 }
 0xac3   :  { %13717 = vmatpush3.msra.mxu0 %v863_v56 }
 0xac4   :  { %13726 = vmatprep.subr.mxu0 %v15343_v9  ;;  %v2123_v61 = vpop.permute.xlu1 %2122 }
 0xac8   :  { %v2201_v2 = vpop.permute.xlu1 %2200 }
 0xacc   :  { %v2199_v5 = vpop.permute.xlu1 %2198 }
 0xace   :  { %v14554_v52 = vpop.eup %14553 }
 0xacf   :  { %v1878_v55 = vsel %vm879_vm7, %v14554_v52, 0.0 }
 0xad0   :  { %1879 = vadd.xlane.f32.xlu0 %v1878_v55 }
 0xae6   :  { %1961 = vrot.lane.b32.xlu0 %v15717_v31, %s15353_s21 }
 0xaea   :  { %2120 = vrot.lane.b32.xlu0 %v15719_v33, %s15355_s22 }
 0xb59   :  { %v1880_v58 = vpop.xlane.xlu0 %1879 }
 0xb5a   :  { %14555 = vrcp.f32 %v1880_v58 }
 0xb5d   :  { %v1962_v22 = vpop.permute.xlu0 %1961 }
 0xb5e   :  { %13712 = vmatpush3.msra.mxu1 %v1962_v22 }
 0xb5f   :  { %13721 = vmatprep.subr.mxu1 %v15343_v9 }
 0xb61   :  { %v2121_v62 = vpop.permute.xlu0 %2120 }
 0xb67   :  { %v14556_v59 = vpop.eup %14555 }
 0xb68   :  { %v1884_v60 = vmul.f32 %v14556_v59, %v14554_v52  ;;  %v1288_v52 = vadd.f32 %v15822_v51, %v874_v49 }
 0xb6a   :  { %13714 = vmatmul.mubr.msk.f32.vlgmr.msra.gmra.mxu1 %vm879_vm7, %v1884_v60  ;;  %2584 = vst.msk [vmem:[%s15573_s12 + $0x30] sm:$0xff] %vm879_vm7, %v1884_v60  ;;  %v1703_v55 = vadd.f32 %v15872_v34, %v1288_v52  ;;  %v12944_v52 = vld [vmem:[#allocation14] ss:$0 sm:$0xff] }
 0xb6b   :  { %13722 = vmatpush3.xpose.msk.msra.mxu1 %vm879_vm7, %v2123_v61  ;;  %13723 = vmatprep.mubr.msk.f32.mxu1 %vm15344_vm6, %v15343_v9 }
 0xb6c   :  { %13731 = vmatprep.subr.mxu1 %v15343_v9 }
 0xb6e   :  { %13724 = vmatmul.mubr.msk.f32.vlgmr.msra.gmra.mxu1 %vm879_vm7, %v2121_v62 }
 0xb6f   :  { %13733 = vmatprep.mubr.msk.f32.mxu1 %vm15344_vm6, %v15343_v9 }
 0xb82   :  { %v1957_v63 = vpop.f32.mrf.mxu0 }
 0xb83   :  { %13718 = vmatprep.mubr.msk.f32.mxu0 %vm879_vm7, %v1957_v63 }
 0xb84   :  { %v13710_v1 = vpop.f32.mrf.mxu0 }
 0xc2a   :  { %v2033_v3 = vpop.f32.mrf.mxu1 }
 0xc2b   :  { %13719 = vmatmul.mubr.msk.f32.vlgmr.msra.gmra.mxu0 %vm879_vm7, %v2033_v3 }
 0xc2c   :  { %13727 = vmatpush3.xpose.msk.msra.mxu0 %vm879_vm7, %v2201_v2  ;;  %v13715_v4 = vpop.f32.mrf.mxu1  ;;  %13728 = vmatprep.mubr.msk.f32.mxu0 %vm15344_vm6, %v15343_v9 }
 0xc2d   :  { %13736 = vmatprep.subr.mxu0 %v15343_v9 }
 0xc2e   :  { %v2194_v6 = vpop.f32.mrf.mxu1 }
 0xc2f   :  { %v2276_v8 = vsel %vm15757_vm11, -1e+09, %v2194_v6  ;;  %13729 = vmatmul.mubr.msk.f32.vlgmr.msra.gmra.mxu0 %vm879_vm7, %v2199_v5  ;;  %v2589_v6 = vld [vmem:[%s17181_s20 + $0x18] sm:$0xff] }
 0xc30   :  { %v13725_v10 = vpop.f32.mrf.mxu1  ;;  %v2278_v11 = vsel %vm879_vm7, %v2276_v8, -inf  ;;  %13738 = vmatprep.mubr.msk.f32.mxu0 %vm15344_vm6, %v15343_v9 }
 0xc31   :  { %2279 = vmax.xlane.f32.xlu0 %v2278_v11  ;;  %v2587_v10 = vld [vmem:[%s17181_s20 + $0x8] sm:$0xff]  ;;  %v2586_v11 = vld [vmem:[%s17181_s20] sm:$0xff] }
 0xcba   :  { %v2280_v12 = vpop.xlane.xlu0 %2279 }
 0xcbb   :  { %v2284_v13 = vsub.f32 %v2276_v8, %v2280_v12  ;;  %v2588_v8 = vld [vmem:[%s17181_s20 + $0x10] sm:$0xff]  ;;  %v2598_v12 = vld [vmem:[%s17182_s29 + $0x38] sm:$0xff] }
 0xcbd   :  { %v2286_v14 = vmul.f32 1.442695, %v2284_v13  ;;  %v2597_v13 = vld [vmem:[%s17182_s29 + $0x30] sm:$0xff] }
 0xcbf   :  { %14557 = vpow2.f32 %v2286_v14  ;;  %v2596_v14 = vld [vmem:[%s17182_s29 + $0x28] sm:$0xff] }
 0xccc   :  { %v14558_v15 = vpop.eup %14557 }
 0xccd   :  { %v2290_v16 = vsel %vm879_vm7, %v14558_v15, 0.0 }
 0xcce   :  { %2291 = vadd.xlane.f32.xlu0 %v2290_v16 }
 0xceb   :  { %v13720_v17 = vpop.f32.mrf.mxu0 }
 0xcec   :  { %v2119_v18 = vadd.f32 %v13720_v17, %v15870_v32 }
 0xced   :  { %v2109_v19 = vpop.f32.mrf.mxu0 }
 0xcee   :  { %v2118_v58 = vadd.f32 %v2109_v19, %v1703_v55 }
 0xcef   :  { %v2272_v20 = vpop.f32.mrf.mxu0 }
 0xcf0   :  { %v2277_v23 = vsel %vm15765_vm12, -1e+09, %v2272_v20 }
 0xcf1   :  { %v13730_v24 = vpop.f32.mrf.mxu0  ;;  %v2281_v25 = vsel %vm879_vm7, %v2277_v23, -inf }
 0xcf2   :  { %2282 = vmax.xlane.f32.xlu1 %v2281_v25  ;;  %v12939_v25 = vld [vmem:[#allocation10] ss:$0 sm:$0xff] }
 0xd03   :  { %2300 = vrot.lane.b32.xlu1 %v15719_v33, %s15356_s23  ;;  %v864_v33 = vld [vmem:[%s17180_s27 + $0x18] sm:$0xff] }
 0xd57   :  { %v2292_v26 = vpop.xlane.xlu0 %2291 }
 0xd58   :  { %14559 = vrcp.f32 %v2292_v26 }
 0xd65   :  { %v14560_v27 = vpop.eup %14559 }
 0xd66   :  { %v2298_v28 = vmul.f32 %v14560_v27, %v14558_v15  ;;  %v2595_v15 = vld [vmem:[%s17182_s29 + $0x20] sm:$0xff] }
 0xd68   :  { %2581 = vst.msk [vmem:[%s15573_s12 + $0x18] sm:$0xff] %vm879_vm7, %v2298_v28 }
 0xd7b   :  { %v2283_v29 = vpop.xlane.xlu1 %2282 }
 0xd7c   :  { %v2285_v30 = vsub.f32 %v2277_v23, %v2283_v29 }
 0xd7e   :  { %v2288_v32 = vmul.f32 1.442695, %v2285_v30  ;;  %v12940_v30 = vld [vmem:[#allocation11] ss:$0 sm:$0xff] }
 0xd7f   :  { %v2301_v35 = vpop.permute.xlu1 %2300 }
 0xd80   :  { %14561 = vpow2.f32 %v2288_v32  ;;  %13732 = vmatpush3.msra.mxu1 %v2301_v35 }
 0xd81   :  { %13734 = vmatmul.mubr.msk.f32.vlgmr.msra.gmra.mxu1 %vm879_vm7, %v2298_v28  ;;  %13741 = vmatprep.subr.mxu1 %v864_v33 }
 0xd82   :  { %13742 = vmatpush3.msra.mxu1 %v864_v33  ;;  %v2593_v33 = vld [vmem:[%s17182_s29 + $0x10] sm:$0xff] }
 0xd83   :  { %13757 = vmatprep.subr.mxu1 %v2598_v12 }
 0xd8d   :  { %v14562_v36 = vpop.eup %14561 }
 0xd8e   :  { %v2293_v37 = vsel %vm879_vm7, %v14562_v36, 0.0 }
 0xd8f   :  { %2294 = vadd.xlane.f32.xlu0 %v2293_v37  ;;  %v2594_v37 = vld [vmem:[%s17182_s29 + $0x18] sm:$0xff] }
 0xda5   :  { %2376 = vrot.lane.b32.xlu0 %v15717_v31, %s15356_s23 }
 0xe18   :  { %v2295_v38 = vpop.xlane.xlu0 %2294 }
 0xe19   :  { %14563 = vrcp.f32 %v2295_v38  ;;  %v2592_v38 = vld [vmem:[%s17182_s29 + $0x8] sm:$0xff] }
 0xe1c   :  { %v2377_v39 = vpop.permute.xlu0 %2376 }
 0xe1d   :  { %13737 = vmatpush3.msra.mxu0 %v2377_v39  ;;  %v2591_v39 = vld [vmem:[%s17182_s29] sm:$0xff] }
 0xe1e   :  { %13746 = vmatprep.subr.mxu0 %v2589_v6 }
 0xe26   :  { %v14564_v42 = vpop.eup %14563 }
 0xe27   :  { %v2299_v43 = vmul.f32 %v14564_v42, %v14562_v36  ;;  %v12941_v42 = vld [vmem:[#allocation13] ss:$0 sm:$0xff] }
 0xe29   :  { %13739 = vmatmul.mubr.msk.f32.vlgmr.msra.gmra.mxu0 %vm879_vm7, %v2299_v43  ;;  %2585 = vst.msk [vmem:[%s15573_s12 + $0x38] sm:$0xff] %vm879_vm7, %v2299_v43 }
 0xe2a   :  { %13747 = vmatpush3.msra.mxu0 %v2589_v6  ;;  %v12952_v6 = vld [vmem:[%s17172_s13 + $0x38] sm:$0xff] }
 0xe2b   :  { %13748 = vmatprep.subr.mxu0 %v2588_v8 }
 0xe2c   :  { %13749 = vmatpush3.msra.mxu0 %v2588_v8  ;;  %v12951_v8 = vld [vmem:[%s17172_s13 + $0x30] sm:$0xff] }
 0xe2d   :  { %13750 = vmatprep.subr.mxu0 %v2587_v10 }
 0xe2e   :  { %13751 = vmatpush3.msra.mxu0 %v2587_v10  ;;  %v12950_v10 = vld [vmem:[%s17172_s13 + $0x28] sm:$0xff] }
 0xe2f   :  { %13752 = vmatprep.subr.mxu0 %v2586_v11 }
 0xe30   :  { %13753 = vmatpush3.msra.mxu0 %v2586_v11  ;;  %v12949_v11 = vld [vmem:[%s17172_s13 + $0x20] sm:$0xff]  ;;  %s17194_s13 = sld [smem:[#allocation74_spill]] }
 0xe31   :  { %13776 = vmatprep.subr.mxu0 %v12952_v6 }
 0xe41   :  { %v2372_v44 = vpop.f32.mrf.mxu1 }
 0xe42   :  { %13743 = vmatprep.mubr.msk.f32.mxu1 %vm879_vm7, %v2372_v44 }
 0xe43   :  { %v13735_v46 = vpop.f32.mrf.mxu1 }
 0xee9   :  { %v2448_v48 = vpop.f32.mrf.mxu0 }
 0xeea   :  { %13744 = vmatmul.mubr.msk.f32.vlgmr.msra.gmra.mxu1 %vm879_vm7, %v2448_v48 }
 0xeeb   :  { %v13740_v31 = vpop.f32.mrf.mxu0  ;;  %13758 = vmatpush3.msra.mxu1 %v2598_v12 }
 0xeec   :  { %13759 = vmatprep.subr.mxu1 %v2597_v13 }
 0xeed   :  { %13760 = vmatpush3.msra.mxu1 %v2597_v13 }
 0xeee   :  { %13761 = vmatprep.subr.mxu1 %v2596_v14 }
 0xeef   :  { %13762 = vmatpush3.msra.mxu1 %v2596_v14 }
 0xef0   :  { %13763 = vmatprep.subr.mxu1 %v2595_v15 }
 0xef1   :  { %13764 = vmatpush3.msra.mxu1 %v2595_v15 }
 0xef2   :  { %13765 = vmatprep.subr.mxu1 %v2594_v37 }
 0xef3   :  { %13766 = vmatpush3.msra.mxu1 %v2594_v37 }
 0xef4   :  { %13767 = vmatprep.subr.mxu1 %v2593_v33 }
 0xef5   :  { %13768 = vmatpush3.msra.mxu1 %v2593_v33 }
 0xef6   :  { %13769 = vmatprep.subr.mxu1 %v2592_v38 }
 0xef7   :  { %13770 = vmatpush3.msra.mxu1 %v2592_v38 }
 0xef8   :  { %13771 = vmatprep.subr.mxu1 %v2591_v39 }
 0xef9   :  { %13772 = vmatpush3.msra.mxu1 %v2591_v39 }
 0xefa   :  { %13792 = vmatprep.subr.mxu1 %v15343_v9 }
 0xfaa   :  { %v13745_v56 = vpop.f32.mrf.mxu1 }
 0xfab   :  { %v2534_v22 = vadd.f32 %v13745_v56, %v2119_v18 }
 0xfac   :  { %v2524_v59 = vpop.f32.mrf.mxu1 }
 0xfad   :  { %v2533_v60 = vadd.f32 %v2524_v59, %v2118_v58  ;;  %v2538_v61 = vsel %vm779_vm3, %v2534_v22, 0.0 }
 0xfae   :  { %2539 = vadd.xlane.f32.xlu0 %v2538_v61 }
 0xfaf   :  { %v2535_v62 = vsel %vm779_vm3, %v2533_v60, 0.0 }
 0xfb0   :  { %2536 = vadd.xlane.f32.xlu1 %v2535_v62 }
0x1037   :  { %v2540_v63 = vpop.xlane.xlu0 %2539 }
0x1038   :  { %v2543_v21 = vmul.f32 0.03125, %v2540_v63 }
0x1039   :  { %v2537_v45 = vpop.xlane.xlu1 %2536 }
0x103a   :  { %v2545_v51 = vsub.f32 %v2534_v22, %v2543_v21  ;;  %v2542_v34 = vmul.f32 0.03125, %v2537_v45 }
0x103c   :  { %v2544_v1 = vsub.f32 %v2533_v60, %v2542_v34  ;;  %v2547_v2 = vmul.f32 %v2545_v51, %v2545_v51 }
0x103e   :  { %v2551_v3 = vsel %vm779_vm3, %v2547_v2, 0.0  ;;  %v2546_v4 = vmul.f32 %v2544_v1, %v2544_v1 }
0x103f   :  { %2552 = vadd.xlane.f32.xlu0 %v2551_v3 }
0x1040   :  { %v2548_v5 = vsel %vm779_vm3, %v2546_v4, 0.0 }
0x1041   :  { %2549 = vadd.xlane.f32.xlu1 %v2548_v5 }
0x10c8   :  { %v2553_v16 = vpop.xlane.xlu0 %2552 }
0x10c9   :  { %v2555_v17 = vmul.f32 0.03125, %v2553_v16 }
0x10ca   :  { %v2550_v18 = vpop.xlane.xlu1 %2549 }
0x10cb   :  { %v2557_v19 = vadd.f32 1e-05, %v2555_v17  ;;  %v2554_v20 = vmul.f32 0.03125, %v2550_v18 }
0x10cd   :  { %14565 = vrsqrt.f32 %v2557_v19  ;;  %v2556_v23 = vadd.f32 1e-05, %v2554_v20  ;;  %v12947_v19 = vld [vmem:[%s17183_s26] ss:$0 sm:$0xff] }
0x10cf   :  { %14567 = vrsqrt.f32 %v2556_v23 }
0x10da   :  { %v14566_v24 = vpop.eup %14565 }
0x10db   :  { %v2561_v26 = vmul.f32 %v14566_v24, %v2545_v51 }
0x10dc   :  { %v14568_v27 = vpop.eup %14567 }
0x10dd   :  { %v2560_v28 = vmul.f32 %v14568_v27, %v2544_v1  ;;  %v2569_v29 = vmul.f32 %v12939_v25, %v2561_v26  ;;  %v12948_v26 = vld [vmem:[#allocation16] ss:$0 sm:$0xff] }
0x10df   :  { %v2568_v32 = vmul.f32 %v12939_v25, %v2560_v28  ;;  %v2577_v36 = vadd.f32 %v12940_v30, %v2569_v29 }
0x10e1   :  { %v2576_v35 = vadd.f32 %v12940_v30, %v2568_v32  ;;  %v12953_v30 = vld [vmem:[#allocation7 + $0x1] ss:$0 sm:$0xff] }
0x10e3   :  { %13754 = vmatprep.mubr.msk.f32.mxu0 %vm779_vm3, %v2576_v35 }
0x10e4   :  { %13755 = vmatmul.mubr.msk.f32.vlgmr.msra.gmra.mxu0 %vm779_vm3, %v2577_v36 }
0x10e5   :  { %13777 = vmatpush3.msra.mxu0 %v12952_v6 }
0x10e6   :  { %13778 = vmatprep.subr.mxu0 %v12951_v8 }
0x10e7   :  { %13779 = vmatpush3.msra.mxu0 %v12951_v8  ;;  %v12956_v8 = vld [vmem:[%s17180_s27 + $0x20] sm:$0xff] }
0x10e8   :  { %13780 = vmatprep.subr.mxu0 %v12950_v10 }
0x10e9   :  { %13781 = vmatpush3.msra.mxu0 %v12950_v10 }
0x10ea   :  { %13782 = vmatprep.subr.mxu0 %v12949_v11 }
0x10eb   :  { %13783 = vmatpush3.msra.mxu0 %v12949_v11 }
0x10ec   :  { %13787 = vmatprep.subr.mxu0 %v15343_v9 }
0x11a4   :  { %v13756_v43 = vpop.f32.mrf.mxu0 }
0x11a5   :  { %v2686_v44 = vadd.f32 %v13756_v43, %v12941_v42 }
0x11a6   :  { %v2680_v46 = vpop.f32.mrf.mxu0 }
0x11a7   :  { %v2681_v48 = vadd.f32 %v12941_v42, %v2680_v46  ;;  %v2690_v49 = vmax.f32 %v2686_v44, 0.0 }
0x11a9   :  { %v2689_v31 = vmax.f32 %v2681_v48, 0.0 }
0x11ab   :  { %13773 = vmatprep.mubr.msk.f32.mxu1 %vm2697_vm13, %v2689_v31 }
0x11ac   :  { %13774 = vmatmul.mubr.msk.f32.vlgmr.msra.gmra.mxu1 %vm2697_vm13, %v2690_v49 }
0x11ad   :  { %13794 = vmatprep.mubr.msk.f32.mxu1 %vm15344_vm6, %v15343_v9 }
0x126c   :  { %v13775_v55 = vpop.f32.mrf.mxu1 }
0x126d   :  { %v2776_v56 = vadd.f32 %v13775_v55, %v12944_v52 }
0x126e   :  { %v2770_v58 = vpop.f32.mrf.mxu1 }
0x126f   :  { %v2771_v22 = vadd.f32 %v12944_v52, %v2770_v58  ;;  %v2780_v59 = vadd.f32 %v2776_v56, %v2577_v36 }
0x1271   :  { %v2784_v60 = vsel %vm779_vm3, %v2780_v59, 0.0  ;;  %v2779_v61 = vadd.f32 %v2771_v22, %v2576_v35 }
0x1272   :  { %2785 = vadd.xlane.f32.xlu0 %v2784_v60 }
0x1273   :  { %v2781_v62 = vsel %vm779_vm3, %v2779_v61, 0.0 }
0x1274   :  { %2782 = vadd.xlane.f32.xlu1 %v2781_v62 }
0x12fb   :  { %v2786_v63 = vpop.xlane.xlu0 %2785 }
0x12fc   :  { %v2788_v21 = vmul.f32 0.03125, %v2786_v63 }
0x12fd   :  { %v2783_v45 = vpop.xlane.xlu1 %2782 }
0x12fe   :  { %v2790_v51 = vsub.f32 %v2780_v59, %v2788_v21  ;;  %v2787_v34 = vmul.f32 0.03125, %v2783_v45 }
0x1300   :  { %v2789_v1 = vsub.f32 %v2779_v61, %v2787_v34  ;;  %v2792_v2 = vmul.f32 %v2790_v51, %v2790_v51 }
0x1302   :  { %v2796_v3 = vsel %vm779_vm3, %v2792_v2, 0.0  ;;  %v2791_v4 = vmul.f32 %v2789_v1, %v2789_v1 }
0x1303   :  { %2797 = vadd.xlane.f32.xlu0 %v2796_v3 }
0x1304   :  { %v2793_v5 = vsel %vm779_vm3, %v2791_v4, 0.0 }
0x1305   :  { %2794 = vadd.xlane.f32.xlu1 %v2793_v5 }
0x138c   :  { %v2798_v12 = vpop.xlane.xlu0 %2797 }
0x138d   :  { %v2800_v13 = vmul.f32 0.03125, %v2798_v12 }
0x138e   :  { %v2795_v14 = vpop.xlane.xlu1 %2794 }
0x138f   :  { %v2802_v15 = vadd.f32 1e-05, %v2800_v13  ;;  %v2799_v16 = vmul.f32 0.03125, %v2795_v14 }
0x1391   :  { %14569 = vrsqrt.f32 %v2802_v15  ;;  %v2801_v17 = vadd.f32 1e-05, %v2799_v16 }
0x1393   :  { %14571 = vrsqrt.f32 %v2801_v17 }
0x139e   :  { %v14570_v18 = vpop.eup %14569 }
0x139f   :  { %v2806_v20 = vmul.f32 %v14570_v18, %v2790_v51 }
0x13a0   :  { %v14572_v23 = vpop.eup %14571 }
0x13a1   :  { %v2805_v24 = vmul.f32 %v14572_v23, %v2789_v1  ;;  %v2814_v25 = vmul.f32 %v12947_v19, %v2806_v20 }
0x13a3   :  { %v2813_v27 = vmul.f32 %v12947_v19, %v2805_v24  ;;  %v15976_v29 = vadd.f32 %v12948_v26, %v2814_v25 }
0x13a5   :  { %v15974_v28 = vadd.f32 %v12948_v26, %v2813_v27  ;;  %v12960_v27 = vld [vmem:[#allocation8 + $0x1] ss:$0 sm:$0xff] }
0x13a7   :  { %13784 = vmatprep.mubr.msk.f32.mxu0 %vm779_vm3, %v15974_v28 }
0x13a8   :  { %13785 = vmatmul.mubr.msk.f32.vlgmr.msra.gmra.mxu0 %vm779_vm3, %v15976_v29 }
0x13a9   :  { %13789 = vmatprep.mubr.msk.f32.mxu0 %vm15344_vm6, %v15343_v9 }
0x1468   :  { %v13786_v32 = vpop.f32.mrf.mxu0 }
0x1469   :  { %v15984_v35 = vadd.f32 %v13786_v32, %v12953_v30 }
0x146a   :  { %v2908_v36 = vpop.f32.mrf.mxu0 }
0x146b   :  { %v15986_v37 = vadd.f32 %v12953_v30, %v2908_v36  ;;  %3014 = vrot.lane.b32.xlu0 %v15984_v35, %s15345_s7  ;;  %v2935_v30 = vadd.f32 %v12960_v27, %v15976_v29 }
0x146d   :  { %2937 = vrot.lane.b32.xlu1 %v15986_v37, %s15345_s7 }
0x14dd   :  { %v3015_v33 = vpop.permute.xlu0 %3014 }
0x14de   :  { %13793 = vmatpush3.xpose.msk.msra.mxu1 %vm879_vm7, %v3015_v33  ;;  %v2934_v33 = vadd.f32 %v12960_v27, %v15974_v28 }
0x14df   :  { %v2938_v38 = vpop.permute.xlu1 %2937  ;;  %13802 = vmatprep.subr.mxu1 %v15343_v9 }
0x14e0   :  { %13788 = vmatpush3.xpose.msk.msra.mxu0 %vm879_vm7, %v2938_v38 }
0x14e1   :  { %13795 = vmatmul.mubr.msk.f32.vlgmr.msra.gmra.mxu1 %vm879_vm7, %v15984_v35  ;;  %13797 = vmatprep.subr.mxu0 %v15343_v9 }
0x14e2   :  { %13804 = vmatprep.mubr.msk.f32.mxu1 %vm15344_vm6, %v15343_v9 }
0x14e3   :  { %13790 = vmatmul.mubr.msk.f32.vlgmr.msra.gmra.mxu0 %vm879_vm7, %v15986_v37 }
0x14e4   :  { %13799 = vmatprep.mubr.msk.f32.mxu0 %vm15344_vm6, %v15343_v9 }
0x15a1   :  { %v3086_v39 = vpop.f32.mrf.mxu1 }
0x15a2   :  { %v3091_v42 = vsel %vm15765_vm12, -1e+09, %v3086_v39 }
0x15a3   :  { %v3009_v43 = vpop.f32.mrf.mxu0  ;;  %v13796_v44 = vpop.f32.mrf.mxu1  ;;  %v3095_v46 = vsel %vm879_vm7, %v3091_v42, -inf }
0x15a4   :  { %v3090_v48 = vsel %vm15757_vm11, -1e+09, %v3009_v43  ;;  %3096 = vmax.xlane.f32.xlu0 %v3095_v46 }
0x15a5   :  { %v13791_v31 = vpop.f32.mrf.mxu0  ;;  %v3092_v49 = vsel %vm879_vm7, %v3090_v48, -inf }
0x15a6   :  { %3093 = vmax.xlane.f32.xlu1 %v3092_v49 }
0x162d   :  { %v3097_v52 = vpop.xlane.xlu0 %3096 }
0x162e   :  { %v3099_v55 = vsub.f32 %v3091_v42, %v3097_v52 }
0x162f   :  { %v3094_v56 = vpop.xlane.xlu1 %3093 }
0x1630   :  { %v3102_v58 = vmul.f32 1.442695, %v3099_v55  ;;  %v3098_v22 = vsub.f32 %v3090_v48, %v3094_v56 }
0x1632   :  { %14573 = vpow2.f32 %v3102_v58  ;;  %v3100_v59 = vmul.f32 1.442695, %v3098_v22  ;;  %v12957_v22 = vld [vmem:[%s17180_s27 + $0x28] sm:$0xff] }
0x1634   :  { %14575 = vpow2.f32 %v3100_v59 }
0x163f   :  { %v14574_v60 = vpop.eup %14573 }
0x1640   :  { %v3107_v61 = vsel %vm879_vm7, %v14574_v60, 0.0 }
0x1641   :  { %v14576_v62 = vpop.eup %14575  ;;  %3108 = vadd.xlane.f32.xlu0 %v3107_v61 }
0x1642   :  { %v3104_v63 = vsel %vm879_vm7, %v14576_v62, 0.0 }
0x1643   :  { %3105 = vadd.xlane.f32.xlu1 %v3104_v63 }
0x1654   :  { %3114 = vrot.lane.b32.xlu1 %v15986_v37, %s15347_s11 }
0x1657   :  { %3190 = vrot.lane.b32.xlu0 %v15984_v35, %s15347_s11 }
0x1658   :  { %3351 = vrot.lane.b32.xlu1 %v15986_v37, %s15348_s5 }
0x165b   :  { %3349 = vrot.lane.b32.xlu0 %v15986_v37, %s15349_s4 }
0x165c   :  { %3429 = vrot.lane.b32.xlu1 %v15984_v35, %s15348_s5 }
0x1660   :  { %3427 = vrot.lane.b32.xlu1 %v15984_v35, %s15349_s4 }
0x16ca   :  { %v3109_v21 = vpop.xlane.xlu0 %3108 }
0x16cb   :  { %14577 = vrcp.f32 %v3109_v21 }
0x16cc   :  { %v3106_v45 = vpop.xlane.xlu1 %3105 }
0x16cd   :  { %14579 = vrcp.f32 %v3106_v45 }
0x16ce   :  { %v3191_v51 = vpop.permute.xlu0 %3190 }
0x16cf   :  { %13803 = vmatpush3.msra.mxu1 %v3191_v51 }
0x16d0   :  { %v3115_v34 = vpop.permute.xlu1 %3114  ;;  %13812 = vmatprep.subr.mxu1 %v15343_v9 }
0x16d1   :  { %13798 = vmatpush3.msra.mxu0 %v3115_v34 }
0x16d2   :  { %v3350_v6 = vpop.permute.xlu0 %3349  ;;  %13807 = vmatprep.subr.mxu0 %v12956_v8 }
0x16d4   :  { %v3352_v4 = vpop.permute.xlu1 %3351 }
0x16d8   :  { %v14578_v1 = vpop.eup %14577  ;;  %v3430_v11 = vpop.permute.xlu1 %3429 }
0x16d9   :  { %v3113_v2 = vmul.f32 %v14578_v1, %v14574_v60 }
0x16da   :  { %v14580_v3 = vpop.eup %14579 }
0x16db   :  { %13805 = vmatmul.mubr.msk.f32.vlgmr.msra.gmra.mxu1 %vm879_vm7, %v3113_v2  ;;  %12999 = vst.msk [vmem:[%s15573_s12 + $0x60] sm:$0xff] %vm879_vm7, %v3113_v2  ;;  %v3112_v5 = vmul.f32 %v14580_v3, %v14576_v62 }
0x16dc   :  { %13813 = vmatpush3.xpose.msk.msra.mxu1 %vm879_vm7, %v3352_v4  ;;  %13814 = vmatprep.mubr.msk.f32.mxu1 %vm15344_vm6, %v15343_v9  ;;  %v3428_v19 = vpop.permute.xlu1 %3427 }
0x16dd   :  { %13800 = vmatmul.mubr.msk.f32.vlgmr.msra.gmra.mxu0 %vm879_vm7, %v3112_v5  ;;  %12995 = vst.msk [vmem:[%s15573_s12 + $0x40] sm:$0xff] %vm879_vm7, %v3112_v5  ;;  %13822 = vmatprep.subr.mxu1 %v15343_v9 }
0x16de   :  { %13808 = vmatpush3.msra.mxu0 %v12956_v8 }
0x16df   :  { %13815 = vmatmul.mubr.msk.f32.vlgmr.msra.gmra.mxu1 %vm879_vm7, %v3350_v6  ;;  %13817 = vmatprep.subr.mxu0 %v15343_v9 }
0x16e0   :  { %13824 = vmatprep.mubr.msk.f32.mxu1 %vm15344_vm6, %v15343_v9 }
0x179b   :  { %v3262_v10 = vpop.f32.mrf.mxu1 }
0x179d   :  { %v3186_v12 = vpop.f32.mrf.mxu0  ;;  %v13806_v13 = vpop.f32.mrf.mxu1 }
0x179e   :  { %13809 = vmatprep.mubr.msk.f32.mxu0 %vm879_vm7, %v3186_v12 }
0x179f   :  { %v13801_v14 = vpop.f32.mrf.mxu0  ;;  %13810 = vmatmul.mubr.msk.f32.vlgmr.msra.gmra.mxu0 %vm879_vm7, %v3262_v10  ;;  %v3423_v15 = vpop.f32.mrf.mxu1 }
0x17a0   :  { %v3505_v16 = vsel %vm15757_vm11, -1e+09, %v3423_v15  ;;  %13818 = vmatpush3.xpose.msk.msra.mxu0 %vm879_vm7, %v3430_v11  ;;  %13819 = vmatprep.mubr.msk.f32.mxu0 %vm15344_vm6, %v15343_v9 }
0x17a1   :  { %v13816_v17 = vpop.f32.mrf.mxu1  ;;  %v3507_v18 = vsel %vm879_vm7, %v3505_v16, -inf  ;;  %13827 = vmatprep.subr.mxu0 %v15343_v9 }
0x17a2   :  { %3508 = vmax.xlane.f32.xlu0 %v3507_v18 }
0x17a3   :  { %13820 = vmatmul.mubr.msk.f32.vlgmr.msra.gmra.mxu0 %vm879_vm7, %v3428_v19 }
0x17a4   :  { %13829 = vmatprep.mubr.msk.f32.mxu0 %vm15344_vm6, %v15343_v9 }
0x182b   :  { %v3509_v20 = vpop.xlane.xlu0 %3508 }
0x182c   :  { %v3513_v23 = vsub.f32 %v3505_v16, %v3509_v20 }
0x182e   :  { %v3515_v24 = vmul.f32 1.442695, %v3513_v23 }
0x1830   :  { %14581 = vpow2.f32 %v3515_v24 }
0x183d   :  { %v14582_v25 = vpop.eup %14581 }
0x183e   :  { %v3519_v26 = vsel %vm879_vm7, %v14582_v25, 0.0 }
0x183f   :  { %3520 = vadd.xlane.f32.xlu0 %v3519_v26 }
0x185f   :  { %v13811_v32 = vpop.f32.mrf.mxu0 }
0x1860   :  { %v16054_v36 = vadd.f32 %v13811_v32, %v2935_v30 }
0x1861   :  { %v3338_v38 = vpop.f32.mrf.mxu0 }
0x1862   :  { %v16057_v39 = vadd.f32 %v3338_v38, %v2934_v33 }
0x1863   :  { %v3501_v42 = vpop.f32.mrf.mxu0 }
0x1864   :  { %v3506_v43 = vsel %vm15765_vm12, -1e+09, %v3501_v42  ;;  %v12958_v42 = vld [vmem:[%s17180_s27 + $0x30] sm:$0xff] }
0x1865   :  { %v13821_v44 = vpop.f32.mrf.mxu0  ;;  %v3510_v46 = vsel %vm879_vm7, %v3506_v43, -inf }
0x1866   :  { %3511 = vmax.xlane.f32.xlu1 %v3510_v46 }
0x1877   :  { %3529 = vrot.lane.b32.xlu1 %v15986_v37, %s15350_s6 }
0x187b   :  { %3766 = vrot.lane.b32.xlu1 %v15986_v37, %s15351_s25 }
0x187f   :  { %3844 = vrot.lane.b32.xlu1 %v15984_v35, %s15351_s25 }
0x1883   :  { %3842 = vrot.lane.b32.xlu1 %v15984_v35, %s15352_s18 }
0x18c8   :  { %v3521_v28 = vpop.xlane.xlu0 %3520 }
0x18c9   :  { %14583 = vrcp.f32 %v3521_v28 }
0x18d6   :  { %v14584_v29 = vpop.eup %14583 }
0x18d7   :  { %v3527_v48 = vmul.f32 %v14584_v29, %v14582_v25 }
0x18d9   :  { %12996 = vst.msk [vmem:[%s15573_s12 + $0x48] sm:$0xff] %vm879_vm7, %v3527_v48 }
0x18ef   :  { %v3512_v31 = vpop.xlane.xlu1 %3511 }
0x18f0   :  { %v3514_v49 = vsub.f32 %v3506_v43, %v3512_v31 }
0x18f2   :  { %v3517_v52 = vmul.f32 1.442695, %v3514_v49 }
0x18f3   :  { %v3530_v55 = vpop.permute.xlu1 %3529 }
0x18f4   :  { %14585 = vpow2.f32 %v3517_v52  ;;  %13823 = vmatpush3.msra.mxu1 %v3530_v55 }
0x18f5   :  { %13825 = vmatmul.mubr.msk.f32.vlgmr.msra.gmra.mxu1 %vm879_vm7, %v3527_v48  ;;  %13832 = vmatprep.subr.mxu1 %v12957_v22 }
0x18f6   :  { %13833 = vmatpush3.msra.mxu1 %v12957_v22 }
0x18f7   :  { %13842 = vmatprep.subr.mxu1 %v15343_v9  ;;  %v3767_v63 = vpop.permute.xlu1 %3766 }
0x18fb   :  { %v3845_v34 = vpop.permute.xlu1 %3844 }
0x18ff   :  { %v3843_v3 = vpop.permute.xlu1 %3842 }
0x1901   :  { %v14586_v56 = vpop.eup %14585 }
0x1902   :  { %v3522_v58 = vsel %vm879_vm7, %v14586_v56, 0.0 }
0x1903   :  { %3523 = vadd.xlane.f32.xlu0 %v3522_v58 }
0x1919   :  { %3605 = vrot.lane.b32.xlu0 %v15984_v35, %s15350_s6 }
0x191d   :  { %3764 = vrot.lane.b32.xlu0 %v15986_v37, %s15352_s18 }
0x198c   :  { %v3524_v59 = vpop.xlane.xlu0 %3523 }
0x198d   :  { %14587 = vrcp.f32 %v3524_v59 }
0x1990   :  { %v3606_v60 = vpop.permute.xlu0 %3605 }
0x1991   :  { %13828 = vmatpush3.msra.mxu0 %v3606_v60 }
0x1992   :  { %13837 = vmatprep.subr.mxu0 %v15343_v9 }
0x1994   :  { %v3765_v21 = vpop.permute.xlu0 %3764 }
0x199a   :  { %v14588_v61 = vpop.eup %14587 }
0x199b   :  { %v3528_v62 = vmul.f32 %v14588_v61, %v14586_v56 }
0x199d   :  { %13830 = vmatmul.mubr.msk.f32.vlgmr.msra.gmra.mxu0 %vm879_vm7, %v3528_v62  ;;  %13000 = vst.msk [vmem:[%s15573_s12 + $0x68] sm:$0xff] %vm879_vm7, %v3528_v62 }
0x199e   :  { %13838 = vmatpush3.xpose.msk.msra.mxu0 %vm879_vm7, %v3767_v63  ;;  %13839 = vmatprep.mubr.msk.f32.mxu0 %vm15344_vm6, %v15343_v9 }
0x199f   :  { %13847 = vmatprep.subr.mxu0 %v15343_v9 }
0x19a1   :  { %13840 = vmatmul.mubr.msk.f32.vlgmr.msra.gmra.mxu0 %vm879_vm7, %v3765_v21 }
0x19a2   :  { %13849 = vmatprep.mubr.msk.f32.mxu0 %vm15344_vm6, %v15343_v9 }
0x19b5   :  { %v3601_v45 = vpop.f32.mrf.mxu1 }
0x19b6   :  { %13834 = vmatprep.mubr.msk.f32.mxu1 %vm879_vm7, %v3601_v45 }
0x19b7   :  { %v13826_v51 = vpop.f32.mrf.mxu1 }
0x1a5d   :  { %v3677_v1 = vpop.f32.mrf.mxu0 }
0x1a5e   :  { %13835 = vmatmul.mubr.msk.f32.vlgmr.msra.gmra.mxu1 %vm879_vm7, %v3677_v1 }
0x1a5f   :  { %13843 = vmatpush3.xpose.msk.msra.mxu1 %vm879_vm7, %v3845_v34  ;;  %v13831_v2 = vpop.f32.mrf.mxu0  ;;  %13844 = vmatprep.mubr.msk.f32.mxu1 %vm15344_vm6, %v15343_v9 }
0x1a60   :  { %13852 = vmatprep.subr.mxu1 %v15343_v9 }
0x1a61   :  { %v3838_v4 = vpop.f32.mrf.mxu0 }
0x1a62   :  { %v3920_v5 = vsel %vm15757_vm11, -1e+09, %v3838_v4  ;;  %13845 = vmatmul.mubr.msk.f32.vlgmr.msra.gmra.mxu1 %vm879_vm7, %v3843_v3 }
0x1a63   :  { %v13841_v6 = vpop.f32.mrf.mxu0  ;;  %v3922_v8 = vsel %vm879_vm7, %v3920_v5, -inf  ;;  %13854 = vmatprep.mubr.msk.f32.mxu1 %vm15344_vm6, %v15343_v9 }
0x1a64   :  { %3923 = vmax.xlane.f32.xlu0 %v3922_v8 }
0x1aed   :  { %v3924_v10 = vpop.xlane.xlu0 %3923 }
0x1aee   :  { %v3928_v11 = vsub.f32 %v3920_v5, %v3924_v10 }
0x1af0   :  { %v3930_v12 = vmul.f32 1.442695, %v3928_v11 }
0x1af2   :  { %14589 = vpow2.f32 %v3930_v12 }
0x1aff   :  { %v14590_v13 = vpop.eup %14589 }
0x1b00   :  { %v3934_v14 = vsel %vm879_vm7, %v14590_v13, 0.0 }
0x1b01   :  { %3935 = vadd.xlane.f32.xlu0 %v3934_v14 }
0x1b1e   :  { %v13836_v15 = vpop.f32.mrf.mxu1 }
0x1b1f   :  { %v16105_v16 = vadd.f32 %v13836_v15, %v16054_v36 }
0x1b20   :  { %v3753_v17 = vpop.f32.mrf.mxu1 }
0x1b21   :  { %v16108_v18 = vadd.f32 %v3753_v17, %v16057_v39 }
0x1b22   :  { %v3916_v19 = vpop.f32.mrf.mxu1 }
0x1b23   :  { %v3921_v20 = vsel %vm15765_vm12, -1e+09, %v3916_v19 }
0x1b24   :  { %v13846_v23 = vpop.f32.mrf.mxu1  ;;  %v3925_v24 = vsel %vm879_vm7, %v3921_v20, -inf }
0x1b25   :  { %3926 = vmax.xlane.f32.xlu1 %v3925_v24 }
0x1b36   :  { %3944 = vrot.lane.b32.xlu1 %v15986_v37, %s15353_s21 }
0x1b3a   :  { %4181 = vrot.lane.b32.xlu1 %v15986_v37, %s15354_s8 }
0x1b3e   :  { %4259 = vrot.lane.b32.xlu1 %v15984_v35, %s15354_s8 }
0x1b42   :  { %4257 = vrot.lane.b32.xlu1 %v15984_v35, %s15355_s22 }
0x1b8a   :  { %v3936_v25 = vpop.xlane.xlu0 %3935 }
0x1b8b   :  { %14591 = vrcp.f32 %v3936_v25 }
0x1b98   :  { %v14592_v26 = vpop.eup %14591 }
0x1b99   :  { %v3942_v27 = vmul.f32 %v14592_v26, %v14590_v13 }
0x1b9b   :  { %12997 = vst.msk [vmem:[%s15573_s12 + $0x50] sm:$0xff] %vm879_vm7, %v3942_v27 }
0x1bae   :  { %v3927_v30 = vpop.xlane.xlu1 %3926 }
0x1baf   :  { %v3929_v32 = vsub.f32 %v3921_v20, %v3927_v30 }
0x1bb1   :  { %v3932_v36 = vmul.f32 1.442695, %v3929_v32 }
0x1bb2   :  { %v3945_v33 = vpop.permute.xlu1 %3944 }
0x1bb3   :  { %14593 = vpow2.f32 %v3932_v36  ;;  %13848 = vmatpush3.msra.mxu0 %v3945_v33 }
0x1bb4   :  { %13850 = vmatmul.mubr.msk.f32.vlgmr.msra.gmra.mxu0 %vm879_vm7, %v3942_v27  ;;  %13857 = vmatprep.subr.mxu0 %v12958_v42 }
0x1bb5   :  { %13858 = vmatpush3.msra.mxu0 %v12958_v42 }
0x1bb6   :  { %13867 = vmatprep.subr.mxu0 %v15343_v9  ;;  %v4182_v29 = vpop.permute.xlu1 %4181 }
0x1bba   :  { %v4260_v52 = vpop.permute.xlu1 %4259 }
0x1bbe   :  { %v4258_v58 = vpop.permute.xlu1 %4257 }
0x1bc0   :  { %v14594_v38 = vpop.eup %14593 }
0x1bc1   :  { %v3937_v39 = vsel %vm879_vm7, %v14594_v38, 0.0 }
0x1bc2   :  { %3938 = vadd.xlane.f32.xlu0 %v3937_v39 }
0x1bd8   :  { %4020 = vrot.lane.b32.xlu0 %v15984_v35, %s15353_s21 }
0x1bdc   :  { %4179 = vrot.lane.b32.xlu0 %v15986_v37, %s15355_s22 }
0x1c4b   :  { %v3939_v43 = vpop.xlane.xlu0 %3938 }
0x1c4c   :  { %14595 = vrcp.f32 %v3939_v43 }
0x1c4f   :  { %v4021_v44 = vpop.permute.xlu0 %4020 }
0x1c50   :  { %13853 = vmatpush3.msra.mxu1 %v4021_v44 }
0x1c51   :  { %13862 = vmatprep.subr.mxu1 %v15343_v9 }
0x1c53   :  { %v4180_v48 = vpop.permute.xlu0 %4179 }
0x1c59   :  { %v14596_v46 = vpop.eup %14595 }
0x1c5a   :  { %v3943_v28 = vmul.f32 %v14596_v46, %v14594_v38 }
0x1c5c   :  { %13855 = vmatmul.mubr.msk.f32.vlgmr.msra.gmra.mxu1 %vm879_vm7, %v3943_v28  ;;  %13001 = vst.msk [vmem:[%s15573_s12 + $0x70] sm:$0xff] %vm879_vm7, %v3943_v28 }
0x1c5d   :  { %13863 = vmatpush3.xpose.msk.msra.mxu1 %vm879_vm7, %v4182_v29  ;;  %13864 = vmatprep.mubr.msk.f32.mxu1 %vm15344_vm6, %v15343_v9 }
0x1c5e   :  { %13872 = vmatprep.subr.mxu1 %v15343_v9 }
0x1c60   :  { %13865 = vmatmul.mubr.msk.f32.vlgmr.msra.gmra.mxu1 %vm879_vm7, %v4180_v48 }
0x1c61   :  { %13874 = vmatprep.mubr.msk.f32.mxu1 %vm15344_vm6, %v15343_v9 }
0x1c74   :  { %v4016_v31 = vpop.f32.mrf.mxu0 }
0x1c75   :  { %13859 = vmatprep.mubr.msk.f32.mxu0 %vm879_vm7, %v4016_v31 }
0x1c76   :  { %v13851_v49 = vpop.f32.mrf.mxu0 }
0x1d1c   :  { %v4092_v55 = vpop.f32.mrf.mxu1 }
0x1d1d   :  { %13860 = vmatmul.mubr.msk.f32.vlgmr.msra.gmra.mxu0 %vm879_vm7, %v4092_v55  ;;  %v13006_v55 = vld [vmem:[%s17181_s20 + $0x38] sm:$0xff] }
0x1d1e   :  { %13868 = vmatpush3.xpose.msk.msra.mxu0 %vm879_vm7, %v4260_v52  ;;  %v13856_v56 = vpop.f32.mrf.mxu1  ;;  %13869 = vmatprep.mubr.msk.f32.mxu0 %vm15344_vm6, %v15343_v9 }
0x1d1f   :  { %13877 = vmatprep.subr.mxu0 %v15343_v9  ;;  %v13005_v56 = vld [vmem:[%s17181_s20 + $0x30] sm:$0xff] }
0x1d20   :  { %v4253_v22 = vpop.f32.mrf.mxu1 }
0x1d21   :  { %v4335_v59 = vsel %vm15757_vm11, -1e+09, %v4253_v22  ;;  %13870 = vmatmul.mubr.msk.f32.vlgmr.msra.gmra.mxu0 %vm879_vm7, %v4258_v58  ;;  %v13004_v58 = vld [vmem:[%s17181_s20 + $0x28] sm:$0xff]  ;;  %v13003_v22 = vld [vmem:[%s17181_s20 + $0x20] sm:$0xff] }
0x1d22   :  { %v13866_v60 = vpop.f32.mrf.mxu1  ;;  %v4337_v61 = vsel %vm879_vm7, %v4335_v59, -inf  ;;  %13879 = vmatprep.mubr.msk.f32.mxu0 %vm15344_vm6, %v15343_v9 }
0x1d23   :  { %4338 = vmax.xlane.f32.xlu0 %v4337_v61  ;;  %v13013_v60 = vld [vmem:[%s17182_s29 + $0x70] sm:$0xff]  ;;  %v13012_v61 = vld [vmem:[%s17182_s29 + $0x68] sm:$0xff] }
0x1dac   :  { %v4339_v62 = vpop.xlane.xlu0 %4338 }
0x1dad   :  { %v4343_v63 = vsub.f32 %v4335_v59, %v4339_v62  ;;  %v13014_v59 = vld [vmem:[%s17182_s29 + $0x78] sm:$0xff]  ;;  %v13011_v62 = vld [vmem:[%s17182_s29 + $0x60] sm:$0xff] }
0x1daf   :  { %v4345_v21 = vmul.f32 1.442695, %v4343_v63 }
0x1db1   :  { %14597 = vpow2.f32 %v4345_v21 }
0x1dbe   :  { %v14598_v45 = vpop.eup %14597 }
0x1dbf   :  { %v4349_v51 = vsel %vm879_vm7, %v14598_v45, 0.0 }
0x1dc0   :  { %4350 = vadd.xlane.f32.xlu0 %v4349_v51 }
0x1ddd   :  { %v13861_v34 = vpop.f32.mrf.mxu0 }
0x1dde   :  { %v4178_v1 = vadd.f32 %v13861_v34, %v16105_v16 }
0x1ddf   :  { %v4168_v2 = vpop.f32.mrf.mxu0 }
0x1de0   :  { %v4177_v3 = vadd.f32 %v4168_v2, %v16108_v18 }
0x1de1   :  { %v4331_v4 = vpop.f32.mrf.mxu0 }
0x1de2   :  { %v4336_v5 = vsel %vm15765_vm12, -1e+09, %v4331_v4 }
0x1de3   :  { %v13871_v6 = vpop.f32.mrf.mxu0  ;;  %v4340_v8 = vsel %vm879_vm7, %v4336_v5, -inf }
0x1de4   :  { %4341 = vmax.xlane.f32.xlu1 %v4340_v8 }
0x1df5   :  { %4359 = vrot.lane.b32.xlu1 %v15986_v37, %s15356_s23  ;;  %v12959_v37 = vld [vmem:[%s17180_s27 + $0x38] sm:$0xff] }
0x1e49   :  { %v4351_v10 = vpop.xlane.xlu0 %4350 }
0x1e4a   :  { %14599 = vrcp.f32 %v4351_v10  ;;  %v12994_v10 = vld [vmem:[#allocation11 + $0x1] ss:$0 sm:$0xff] }
0x1e57   :  { %v14600_v11 = vpop.eup %14599 }
0x1e58   :  { %v4357_v12 = vmul.f32 %v14600_v11, %v14598_v45 }
0x1e5a   :  { %12998 = vst.msk [vmem:[%s15573_s12 + $0x58] sm:$0xff] %vm879_vm7, %v4357_v12 }
0x1e6d   :  { %v4342_v13 = vpop.xlane.xlu1 %4341 }
0x1e6e   :  { %v4344_v14 = vsub.f32 %v4336_v5, %v4342_v13 }
0x1e70   :  { %v4347_v15 = vmul.f32 1.442695, %v4344_v14  ;;  %v13010_v14 = vld [vmem:[%s17182_s29 + $0x58] sm:$0xff] }
0x1e71   :  { %v4360_v16 = vpop.permute.xlu1 %4359 }
0x1e72   :  { %14601 = vpow2.f32 %v4347_v15  ;;  %13873 = vmatpush3.msra.mxu1 %v4360_v16  ;;  %v13009_v15 = vld [vmem:[%s17182_s29 + $0x50] sm:$0xff]  ;;  %v13008_v16 = vld [vmem:[%s17182_s29 + $0x48] sm:$0xff] }
0x1e73   :  { %13875 = vmatmul.mubr.msk.f32.vlgmr.msra.gmra.mxu1 %vm879_vm7, %v4357_v12  ;;  %13882 = vmatprep.subr.mxu1 %v12959_v37 }
0x1e74   :  { %13883 = vmatpush3.msra.mxu1 %v12959_v37 }
0x1e75   :  { %13898 = vmatprep.subr.mxu1 %v13014_v59 }
0x1e7f   :  { %v14602_v17 = vpop.eup %14601 }
0x1e80   :  { %v4352_v18 = vsel %vm879_vm7, %v14602_v17, 0.0 }
0x1e81   :  { %4353 = vadd.xlane.f32.xlu0 %v4352_v18  ;;  %v13016_v18 = vld [vmem:[#allocation13 + $0x1] ss:$0 sm:$0xff] }
0x1e97   :  { %4435 = vrot.lane.b32.xlu0 %v15984_v35, %s15356_s23 }
0x1f0a   :  { %v4354_v19 = vpop.xlane.xlu0 %4353 }
0x1f0b   :  { %14603 = vrcp.f32 %v4354_v19 }
0x1f0e   :  { %v4436_v20 = vpop.permute.xlu0 %4435 }
0x1f0f   :  { %13878 = vmatpush3.msra.mxu0 %v4436_v20 }
0x1f10   :  { %13887 = vmatprep.subr.mxu0 %v13006_v55 }
0x1f18   :  { %v14604_v23 = vpop.eup %14603 }
0x1f19   :  { %v4358_v24 = vmul.f32 %v14604_v23, %v14602_v17  ;;  %v13007_v17 = vld [vmem:[%s17182_s29 + $0x40] sm:$0xff] }
0x1f1b   :  { %13880 = vmatmul.mubr.msk.f32.vlgmr.msra.gmra.mxu0 %vm879_vm7, %v4358_v24  ;;  %13002 = vst.msk [vmem:[%s15573_s12 + $0x78] sm:$0xff] %vm879_vm7, %v4358_v24  ;;  %s17184_s12 = sld [smem:[#allocation64_spill]] }
0x1f1c   :  { %13888 = vmatpush3.msra.mxu0 %v13006_v55  ;;  %v4890_v55 = vld [vmem:[#allocation25 + $0x18] sm:$0xff] }
0x1f1d   :  { %13889 = vmatprep.subr.mxu0 %v13005_v56 }
0x1f1e   :  { %13890 = vmatpush3.msra.mxu0 %v13005_v56  ;;  %v4889_v56 = vld [vmem:[#allocation25 + $0x10] sm:$0xff] }
0x1f1f   :  { %13891 = vmatprep.subr.mxu0 %v13004_v58 }
0x1f20   :  { %13892 = vmatpush3.msra.mxu0 %v13004_v58  ;;  %v4888_v58 = vld [vmem:[#allocation25 + $0x8] sm:$0xff] }
0x1f21   :  { %13893 = vmatprep.subr.mxu0 %v13003_v22 }
0x1f22   :  { %13894 = vmatpush3.msra.mxu0 %v13003_v22  ;;  %v4887_v22 = vld [vmem:[#allocation25] sm:$0xff] }
0x1f23   :  { %13917 = vmatprep.subr.mxu0 %v4890_v55 }
0x1f33   :  { %v4431_v25 = vpop.f32.mrf.mxu1 }
0x1f34   :  { %13884 = vmatprep.mubr.msk.f32.mxu1 %vm879_vm7, %v4431_v25 }
0x1f35   :  { %v13876_v26 = vpop.f32.mrf.mxu1 }
0x1f36   :  { %v13019_v26 = vld [vmem:[#allocation14 + $0x1] ss:$0 sm:$0xff] }
0x1fdb   :  { %v4507_v27 = vpop.f32.mrf.mxu0 }
0x1fdc   :  { %13885 = vmatmul.mubr.msk.f32.vlgmr.msra.gmra.mxu1 %vm879_vm7, %v4507_v27 }
0x1fdd   :  { %v13881_v35 = vpop.f32.mrf.mxu0  ;;  %13899 = vmatpush3.msra.mxu1 %v13014_v59  ;;  %v4982_v59 = vld [vmem:[%s17184_s12 + $0x18] sm:$0xff] }
0x1fde   :  { %13900 = vmatprep.subr.mxu1 %v13013_v60 }
0x1fdf   :  { %13901 = vmatpush3.msra.mxu1 %v13013_v60 }
0x1fe0   :  { %13902 = vmatprep.subr.mxu1 %v13012_v61 }
0x1fe1   :  { %13903 = vmatpush3.msra.mxu1 %v13012_v61 }
0x1fe2   :  { %13904 = vmatprep.subr.mxu1 %v13011_v62 }
0x1fe3   :  { %13905 = vmatpush3.msra.mxu1 %v13011_v62 }
0x1fe4   :  { %13906 = vmatprep.subr.mxu1 %v13010_v14 }
0x1fe5   :  { %13907 = vmatpush3.msra.mxu1 %v13010_v14  ;;  %v4980_v14 = vld [vmem:[%s17184_s12 + $0x8] sm:$0xff] }
0x1fe6   :  { %13908 = vmatprep.subr.mxu1 %v13009_v15 }
0x1fe7   :  { %13909 = vmatpush3.msra.mxu1 %v13009_v15  ;;  %v4979_v15 = vld [vmem:[%s17184_s12] sm:$0xff] }
0x1fe8   :  { %13910 = vmatprep.subr.mxu1 %v13008_v16 }
0x1fe9   :  { %13911 = vmatpush3.msra.mxu1 %v13008_v16 }
0x1fea   :  { %13912 = vmatprep.subr.mxu1 %v13007_v17 }
0x1feb   :  { %13913 = vmatpush3.msra.mxu1 %v13007_v17 }
0x1fec   :  { %13939 = vmatprep.subr.mxu1 %v15343_v9 }
0x209c   :  { %v13886_v30 = vpop.f32.mrf.mxu1 }
0x209d   :  { %v4593_v32 = vadd.f32 %v13886_v30, %v4178_v1 }
0x209e   :  { %v4583_v36 = vpop.f32.mrf.mxu1 }
0x209f   :  { %v4592_v33 = vadd.f32 %v4583_v36, %v4177_v3  ;;  %v4597_v38 = vsel %vm779_vm3, %v4593_v32, 0.0  ;;  %v12993_v3 = vld [vmem:[#allocation10 + $0x1] ss:$0 sm:$0xff] }
0x20a0   :  { %4598 = vadd.xlane.f32.xlu0 %v4597_v38 }
0x20a1   :  { %v4594_v39 = vsel %vm779_vm3, %v4592_v33, 0.0 }
0x20a2   :  { %4595 = vadd.xlane.f32.xlu1 %v4594_v39 }
0x2129   :  { %v4599_v42 = vpop.xlane.xlu0 %4598 }
0x212a   :  { %v4601_v43 = vmul.f32 0.03125, %v4599_v42 }
0x212b   :  { %v4596_v44 = vpop.xlane.xlu1 %4595 }
0x212c   :  { %v4603_v46 = vsub.f32 %v4593_v32, %v4601_v43  ;;  %v4600_v28 = vmul.f32 0.03125, %v4596_v44 }
0x212e   :  { %v4602_v29 = vsub.f32 %v4592_v33, %v4600_v28  ;;  %v4605_v48 = vmul.f32 %v4603_v46, %v4603_v46 }
0x2130   :  { %v4609_v31 = vsel %vm779_vm3, %v4605_v48, 0.0  ;;  %v4604_v49 = vmul.f32 %v4602_v29, %v4602_v29 }
0x2131   :  { %4610 = vadd.xlane.f32.xlu0 %v4609_v31 }
0x2132   :  { %v4606_v52 = vsel %vm779_vm3, %v4604_v49, 0.0 }
0x2133   :  { %4607 = vadd.xlane.f32.xlu1 %v4606_v52 }
0x21ba   :  { %v4611_v63 = vpop.xlane.xlu0 %4610 }
0x21bb   :  { %v4613_v21 = vmul.f32 0.03125, %v4611_v63 }
0x21bc   :  { %v4608_v45 = vpop.xlane.xlu1 %4607 }
0x21bd   :  { %v4615_v51 = vadd.f32 1e-05, %v4613_v21  ;;  %v4612_v34 = vmul.f32 0.03125, %v4608_v45 }
0x21bf   :  { %14605 = vrsqrt.f32 %v4615_v51  ;;  %v4614_v1 = vadd.f32 1e-05, %v4612_v34  ;;  %v13022_v34 = vld [vmem:[%s17183_s26 + $0x1] ss:$0 sm:$0xff] }
0x21c1   :  { %14607 = vrsqrt.f32 %v4614_v1 }
0x21cc   :  { %v14606_v2 = vpop.eup %14605 }
0x21cd   :  { %v4619_v4 = vmul.f32 %v14606_v2, %v4603_v46 }
0x21ce   :  { %v14608_v5 = vpop.eup %14607 }
0x21cf   :  { %v4618_v6 = vmul.f32 %v14608_v5, %v4602_v29  ;;  %v4627_v8 = vmul.f32 %v12993_v3, %v4619_v4  ;;  %v13023_v5 = vld [vmem:[#allocation16 + $0x1] ss:$0 sm:$0xff] }
0x21d1   :  { %v4626_v11 = vmul.f32 %v12993_v3, %v4618_v6  ;;  %v4635_v13 = vadd.f32 %v12994_v10, %v4627_v8 }
0x21d3   :  { %v4634_v12 = vadd.f32 %v12994_v10, %v4626_v11  ;;  %v14765_v11 = vld [vmem:[%s17174_s2] sm:$0xff] }
0x21d4   :  { %v16215_v16 = vadd.f32 %v14765_v11, %v15753_v50  ;;  %v13027_v50 = vld [vmem:[#allocation17] ss:$0 sm:$0xff] }
0x21d5   :  { %13895 = vmatprep.mubr.msk.f32.mxu0 %vm779_vm3, %v4634_v12 }
0x21d6   :  { %13896 = vmatmul.mubr.msk.f32.vlgmr.msra.gmra.mxu0 %vm779_vm3, %v4635_v13 }
0x21d7   :  { %13918 = vmatpush3.msra.mxu0 %v4890_v55 }
0x21d8   :  { %13919 = vmatprep.subr.mxu0 %v4889_v56 }
0x21d9   :  { %13920 = vmatpush3.msra.mxu0 %v4889_v56 }
0x21da   :  { %13921 = vmatprep.subr.mxu0 %v4888_v58 }
0x21db   :  { %13922 = vmatpush3.msra.mxu0 %v4888_v58 }
0x21dc   :  { %13923 = vmatprep.subr.mxu0 %v4887_v22 }
0x21dd   :  { %13924 = vmatpush3.msra.mxu0 %v4887_v22 }
0x21de   :  { %13928 = vmatprep.subr.mxu0 %v4982_v59 }
0x2296   :  { %v13897_v37 = vpop.f32.mrf.mxu0 }
0x2297   :  { %v4751_v19 = vadd.f32 %v13897_v37, %v13016_v18 }
0x2298   :  { %v4745_v20 = vpop.f32.mrf.mxu0 }
0x2299   :  { %v4746_v23 = vadd.f32 %v13016_v18, %v4745_v20  ;;  %v4755_v25 = vmax.f32 %v4751_v19, 0.0 }
0x229b   :  { %v4754_v24 = vmax.f32 %v4746_v23, 0.0 }
0x229d   :  { %13914 = vmatprep.mubr.msk.f32.mxu1 %vm2697_vm13, %v4754_v24 }
0x229e   :  { %13915 = vmatmul.mubr.msk.f32.vlgmr.msra.gmra.mxu1 %vm2697_vm13, %v4755_v25 }
0x229f   :  { %13941 = vmatprep.mubr.msk.f32.mxu1 %vm15344_vm6, %v15343_v9 }
0x235e   :  { %v13916_v27 = vpop.f32.mrf.mxu1 }
0x235f   :  { %v4840_v35 = vadd.f32 %v13916_v27, %v13019_v26  ;;  %v488_v27 = vld [vmem:[%s17186_s1] sm:$0x3] }
0x2360   :  { %v4834_v30 = vpop.f32.mrf.mxu1  ;;  %vm489_vm14 = vcmp.eq.s32.totalorder %v488_v27, 0 }
0x2361   :  { %v4835_v32 = vadd.f32 %v13019_v26, %v4834_v30  ;;  %v4844_v36 = vadd.f32 %v4840_v35, %v4635_v13  ;;  %v4981_v13 = vld [vmem:[%s17184_s12 + $0x10] sm:$0xff]  ;;  %v532_v35 = vsel %vm489_vm14, 1, %v15342_v0 }
0x2362   :  { %v539_v30 = vrot.slane %v532_v35, %v15742_v41 }
0x2363   :  { %v4848_v33 = vsel %vm779_vm3, %v4844_v36, 0.0  ;;  %v4843_v38 = vadd.f32 %v4835_v32, %v4634_v12  ;;  %v16205_v12 = vadd.f32 %v14765_v11, %v15761_v54  ;;  %v16223_v54 = vld [vmem:[%s17185_s24] ss:$0 sm:$0xff] }
0x2364   :  { %4849 = vadd.xlane.f32.xlu0 %v4848_v33  ;;  %v547_v32 = vrot.slane %v539_v30, %v15742_v41 }
0x2365   :  { %v4845_v39 = vsel %vm779_vm3, %v4843_v38, 0.0 }
0x2366   :  { %4846 = vadd.xlane.f32.xlu1 %v4845_v39  ;;  %vm555_vm15 = vcmp.ne.s32.totalorder %v547_v32, 0 }
0x23ed   :  { %v4850_v42 = vpop.xlane.xlu0 %4849 }
0x23ee   :  { %v4852_v43 = vmul.f32 0.03125, %v4850_v42 }
0x23ef   :  { %v4847_v44 = vpop.xlane.xlu1 %4846 }
0x23f0   :  { %v4854_v46 = vsub.f32 %v4844_v36, %v4852_v43  ;;  %v4851_v28 = vmul.f32 0.03125, %v4847_v44  ;;  %v540_v36 = vcombine.high %v539_v30, %v539_v30 }
0x23f2   :  { %v4853_v29 = vsub.f32 %v4843_v38, %v4851_v28  ;;  %v4856_v48 = vmul.f32 %v4854_v46, %v4854_v46  ;;  %v554_v33 = vrot.slane %v540_v36, %v15742_v41  ;;  %v557_v38 = vsel %vm555_vm15, 1, %v15342_v0 }
0x23f3   :  { %v562_v39 = vrot.slane %v557_v38, %v15749_v47 }
0x23f4   :  { %v4860_v31 = vsel %vm779_vm3, %v4856_v48, 0.0  ;;  %v4855_v49 = vmul.f32 %v4853_v29, %v4853_v29  ;;  %vm556_vm1 = vcmp.ne.s32.totalorder %v554_v33, 0 }
0x23f5   :  { %4861 = vadd.xlane.f32.xlu0 %v4860_v31  ;;  %v558_v42 = vsel %vm556_vm1, 1, %v15342_v0  ;;  %vm567_vm4 = vcmp.eq.s32.totalorder %v562_v39, 1 }
0x23f6   :  { %v4857_v52 = vsel %vm779_vm3, %v4855_v49, 0.0  ;;  %v566_v43 = vrot.slane %v558_v42, %v15749_v47  ;;  %vm16261_vm5 = vmor %vm567_vm4, %vm531_vm2 }
0x23f7   :  { %4858 = vadd.xlane.f32.xlu1 %v4857_v52 }
0x23f8   :  { %vm568_vm8 = vcmp.eq.s32.totalorder %v566_v43, 1 }
0x23f9   :  { %vm16268_vm9 = vmor %vm568_vm8, %vm531_vm2 }
0x247e   :  { %v4862_v60 = vpop.xlane.xlu0 %4861 }
0x247f   :  { %v4864_v61 = vmul.f32 0.03125, %v4862_v60 }
0x2480   :  { %v4859_v62 = vpop.xlane.xlu1 %4858 }
0x2481   :  { %v4866_v63 = vadd.f32 1e-05, %v4864_v61  ;;  %v4863_v21 = vmul.f32 0.03125, %v4859_v62 }
0x2483   :  { %14609 = vrsqrt.f32 %v4866_v63  ;;  %v4865_v45 = vadd.f32 1e-05, %v4863_v21 }
0x2485   :  { %14611 = vrsqrt.f32 %v4865_v45 }
0x2490   :  { %v14610_v51 = vpop.eup %14609 }
0x2491   :  { %v4870_v1 = vmul.f32 %v14610_v51, %v4854_v46 }
0x2492   :  { %v14612_v2 = vpop.eup %14611 }
0x2493   :  { %v4869_v3 = vmul.f32 %v14612_v2, %v4853_v29  ;;  %v4878_v4 = vmul.f32 %v13022_v34, %v4870_v1 }
0x2495   :  { %v4877_v6 = vmul.f32 %v13022_v34, %v4869_v3  ;;  %v4886_v10 = vadd.f32 %v13023_v5, %v4878_v4 }
0x2497   :  { %v4885_v8 = vadd.f32 %v13023_v5, %v4877_v6  ;;  %v5071_v5 = vld [vmem:[%s17191_s19] sm:$0xff] }
0x2499   :  { %13925 = vmatprep.mubr.msk.f32.mxu0 %vm779_vm3, %v4885_v8 }
0x249a   :  { %13926 = vmatmul.mubr.msk.f32.vlgmr.msra.gmra.mxu0 %vm779_vm3, %v4886_v10 }
0x249b   :  { %13929 = vmatpush3.msra.mxu0 %v4982_v59  ;;  %13936 = vmatprep.mubr.msk.f32.mxu0 %vm779_vm3, %v16205_v12 }
0x249c   :  { %13930 = vmatprep.subr.mxu0 %v4981_v13 }
0x249d   :  { %13931 = vmatpush3.msra.mxu0 %v4981_v13 }
0x249e   :  { %13932 = vmatprep.subr.mxu0 %v4980_v14 }
0x249f   :  { %13933 = vmatpush3.msra.mxu0 %v4980_v14 }
0x24a0   :  { %13934 = vmatprep.subr.mxu0 %v4979_v15 }
0x24a1   :  { %13935 = vmatpush3.msra.mxu0 %v4979_v15 }
0x24a2   :  { %13937 = vmatmul.mubr.msk.f32.vlgmr.msra.gmra.mxu0 %vm779_vm3, %v16215_v16  ;;  %13949 = vmatprep.subr.mxu0 %v15343_v9 }
0x24a3   :  { %13951 = vmatprep.mubr.msk.f32.mxu0 %vm15344_vm6, %v15343_v9 }
0x255a   :  { %v13927_v17 = vpop.f32.mrf.mxu0 }
0x255b   :  { %v16226_v18 = vadd.f32 %v13927_v17, %v16223_v54 }
0x255c   :  { %v16228_v37 = vpop.f32.mrf.mxu0 }
0x2562   :  { %v13938_v19 = vpop.f32.mrf.mxu0 }
0x2563   :  { %v16230_v20 = vadd.f32 %v13938_v19, %v13027_v50 }
0x2564   :  { %v5062_v23 = vpop.f32.mrf.mxu0 }
0x2565   :  { %v16232_v24 = vadd.f32 %v13027_v50, %v5062_v23  ;;  %5164 = vrot.lane.b32.xlu0 %v16230_v20, %s15345_s7 }
0x2567   :  { %5087 = vrot.lane.b32.xlu1 %v16232_v24, %s15345_s7 }
0x25d7   :  { %v5165_v26 = vpop.permute.xlu0 %5164 }
0x25d9   :  { %v5088_v25 = vpop.permute.xlu1 %5087 }
0x25da   :  { %13940 = vmatpush3.xpose.msk.msra.mxu1 %vm879_vm7, %v5088_v25 }
0x25db   :  { %13944 = vmatprep.subr.mxu1 %v15343_v9 }
0x25dd   :  { %13942 = vmatmul.mubr.msk.f32.vlgmr.msra.gmra.mxu1 %vm879_vm7, %v16232_v24 }
0x25de   :  { %13945 = vmatpush3.xpose.msk.msra.mxu1 %vm879_vm7, %v5165_v26  ;;  %13946 = vmatprep.mubr.msk.f32.mxu1 %vm15344_vm6, %v15343_v9 }
0x25df   :  { %13954 = vmatprep.subr.mxu1 %v15343_v9 }
0x25e1   :  { %13947 = vmatmul.mubr.msk.f32.vlgmr.msra.gmra.mxu1 %vm879_vm7, %v16230_v20 }
0x25e2   :  { %13956 = vmatprep.mubr.msk.f32.mxu1 %vm15344_vm6, %v15343_v9 }
0x269d   :  { %v5159_v46 = vpop.f32.mrf.mxu1 }
0x269e   :  { %v5240_v41 = vsel %vm16261_vm5, -1e+09, %v5159_v46 }
0x269f   :  { %v13943_v28 = vpop.f32.mrf.mxu1  ;;  %v5242_v29 = vsel %vm879_vm7, %v5240_v41, -inf }
0x26a0   :  { %5243 = vmax.xlane.f32.xlu1 %v5242_v29 }
0x26a1   :  { %v5236_v7 = vpop.f32.mrf.mxu1 }
0x26a2   :  { %v5241_v40 = vsel %vm16268_vm9, -1e+09, %v5236_v7 }
0x26a3   :  { %v5245_v47 = vsel %vm879_vm7, %v5241_v40, -inf  ;;  %v13948_v48 = vpop.f32.mrf.mxu1 }
0x26a4   :  { %5246 = vmax.xlane.f32.xlu0 %v5245_v47  ;;  %v5072_v48 = vld [vmem:[%s17191_s19 + $0x8] sm:$0xff] }
0x2729   :  { %v5244_v31 = vpop.xlane.xlu1 %5243 }
0x272a   :  { %v5248_v49 = vsub.f32 %v5240_v41, %v5244_v31 }
0x272c   :  { %v5250_v52 = vmul.f32 1.442695, %v5248_v49 }
0x272d   :  { %v5247_v55 = vpop.xlane.xlu0 %5246 }
0x272e   :  { %14613 = vpow2.f32 %v5250_v52  ;;  %v5249_v56 = vsub.f32 %v5241_v40, %v5247_v55 }
0x2730   :  { %v5252_v58 = vmul.f32 1.442695, %v5249_v56 }
0x2732   :  { %14615 = vpow2.f32 %v5252_v58 }
0x273b   :  { %v14614_v22 = vpop.eup %14613 }
0x273c   :  { %v5254_v59 = vsel %vm879_vm7, %v14614_v22, 0.0 }
0x273d   :  { %5255 = vadd.xlane.f32.xlu1 %v5254_v59 }
0x273f   :  { %v14616_v60 = vpop.eup %14615 }
0x2740   :  { %v5257_v61 = vsel %vm879_vm7, %v14616_v60, 0.0 }
0x2741   :  { %5258 = vadd.xlane.f32.xlu0 %v5257_v61 }
0x274e   :  { %5264 = vrot.lane.b32.xlu1 %v16232_v24, %s15347_s11 }
0x2752   :  { %5501 = vrot.lane.b32.xlu1 %v16232_v24, %s15348_s5 }
0x2756   :  { %5579 = vrot.lane.b32.xlu1 %v16230_v20, %s15348_s5 }
0x2757   :  { %5340 = vrot.lane.b32.xlu0 %v16230_v20, %s15347_s11 }
0x275a   :  { %5577 = vrot.lane.b32.xlu1 %v16230_v20, %s15349_s4 }
0x275b   :  { %5499 = vrot.lane.b32.xlu0 %v16232_v24, %s15349_s4 }
0x27c6   :  { %v5256_v62 = vpop.xlane.xlu1 %5255 }
0x27c7   :  { %14617 = vrcp.f32 %v5256_v62 }
0x27ca   :  { %v5265_v63 = vpop.permute.xlu1 %5264  ;;  %v5259_v21 = vpop.xlane.xlu0 %5258 }
0x27cb   :  { %14619 = vrcp.f32 %v5259_v21  ;;  %13950 = vmatpush3.msra.mxu0 %v5265_v63 }
0x27cc   :  { %13959 = vmatprep.subr.mxu0 %v5071_v5 }
0x27ce   :  { %v5341_v45 = vpop.permute.xlu0 %5340  ;;  %v5502_v3 = vpop.permute.xlu1 %5501 }
0x27cf   :  { %13955 = vmatpush3.msra.mxu1 %v5341_v45 }
0x27d0   :  { %13964 = vmatprep.subr.mxu1 %v15343_v9 }
0x27d2   :  { %v5500_v4 = vpop.permute.xlu0 %5499  ;;  %v5580_v8 = vpop.permute.xlu1 %5579 }
0x27d4   :  { %v14618_v51 = vpop.eup %14617 }
0x27d5   :  { %v5262_v34 = vmul.f32 %v14618_v51, %v14614_v22 }
0x27d6   :  { %v5578_v14 = vpop.permute.xlu1 %5577 }
0x27d7   :  { %13952 = vmatmul.mubr.msk.f32.vlgmr.msra.gmra.mxu0 %vm879_vm7, %v5262_v34  ;;  %6786 = vst.msk [vmem:[%s15578_s9] sm:$0xff] %vm879_vm7, %v5262_v34 }
0x27d8   :  { %v14620_v1 = vpop.eup %14619  ;;  %13960 = vmatpush3.msra.mxu0 %v5071_v5 }
0x27d9   :  { %v5263_v2 = vmul.f32 %v14620_v1, %v14616_v60  ;;  %13969 = vmatprep.subr.mxu0 %v15343_v9 }
0x27db   :  { %13957 = vmatmul.mubr.msk.f32.vlgmr.msra.gmra.mxu1 %vm879_vm7, %v5263_v2  ;;  %6790 = vst.msk [vmem:[%s15578_s9 + $0x20] sm:$0xff] %vm879_vm7, %v5263_v2 }
0x27dc   :  { %13965 = vmatpush3.xpose.msk.msra.mxu1 %vm879_vm7, %v5502_v3  ;;  %13966 = vmatprep.mubr.msk.f32.mxu1 %vm15344_vm6, %v15343_v9 }
0x27dd   :  { %13974 = vmatprep.subr.mxu1 %v15343_v9 }
0x27df   :  { %13967 = vmatmul.mubr.msk.f32.vlgmr.msra.gmra.mxu1 %vm879_vm7, %v5500_v4 }
0x27e0   :  { %13976 = vmatprep.mubr.msk.f32.mxu1 %vm15344_vm6, %v15343_v9 }
0x2897   :  { %v5336_v6 = vpop.f32.mrf.mxu0 }
0x2898   :  { %13961 = vmatprep.mubr.msk.f32.mxu0 %vm879_vm7, %v5336_v6  ;;  %v13030_v6 = vld [vmem:[#allocation19] ss:$0 sm:$0xff] }
0x2899   :  { %v13953_v10 = vpop.f32.mrf.mxu0 }
0x289b   :  { %v5412_v11 = vpop.f32.mrf.mxu1 }
0x289c   :  { %13962 = vmatmul.mubr.msk.f32.vlgmr.msra.gmra.mxu0 %vm879_vm7, %v5412_v11  ;;  %v5084_v11 = vadd.f32 %v13030_v6, %v16205_v12 }
0x289d   :  { %13970 = vmatpush3.xpose.msk.msra.mxu0 %vm879_vm7, %v5580_v8  ;;  %v13958_v13 = vpop.f32.mrf.mxu1  ;;  %13971 = vmatprep.mubr.msk.f32.mxu0 %vm15344_vm6, %v15343_v9  ;;  %v5085_v8 = vadd.f32 %v13030_v6, %v16215_v16 }
0x289e   :  { %13979 = vmatprep.subr.mxu0 %v15343_v9 }
0x289f   :  { %v5573_v15 = vpop.f32.mrf.mxu1 }
0x28a0   :  { %v5655_v17 = vsel %vm16261_vm5, -1e+09, %v5573_v15  ;;  %13972 = vmatmul.mubr.msk.f32.vlgmr.msra.gmra.mxu0 %vm879_vm7, %v5578_v14 }
0x28a1   :  { %v5657_v50 = vsel %vm879_vm7, %v5655_v17, -inf  ;;  %v13968_v19 = vpop.f32.mrf.mxu1  ;;  %13981 = vmatprep.mubr.msk.f32.mxu0 %vm15344_vm6, %v15343_v9 }
0x28a2   :  { %5658 = vmax.xlane.f32.xlu0 %v5657_v50 }
0x292b   :  { %v5659_v23 = vpop.xlane.xlu0 %5658 }
0x292c   :  { %v5663_v25 = vsub.f32 %v5655_v17, %v5659_v23 }
0x292e   :  { %v5665_v26 = vmul.f32 1.442695, %v5663_v25 }
0x2930   :  { %14621 = vpow2.f32 %v5665_v26 }
0x293d   :  { %v14622_v27 = vpop.eup %14621 }
0x293e   :  { %v5669_v35 = vsel %vm879_vm7, %v14622_v27, 0.0 }
0x293f   :  { %5670 = vadd.xlane.f32.xlu0 %v5669_v35 }
0x295c   :  { %v16318_v30 = vpop.f32.mrf.mxu0 }
0x295d   :  { %v5498_v10 = vadd.f32 %v16318_v30, %v5085_v8 }
0x295e   :  { %v16320_v32 = vpop.f32.mrf.mxu0 }
0x295f   :  { %v5497_v14 = vadd.f32 %v16320_v32, %v5084_v11 }
0x2960   :  { %v5651_v36 = vpop.f32.mrf.mxu0 }
0x2961   :  { %v5656_v33 = vsel %vm16268_vm9, -1e+09, %v5651_v36 }
0x2962   :  { %v5660_v38 = vsel %vm879_vm7, %v5656_v33, -inf  ;;  %v13973_v39 = vpop.f32.mrf.mxu0 }
0x2963   :  { %5661 = vmax.xlane.f32.xlu1 %v5660_v38  ;;  %v5073_v39 = vld [vmem:[%s17191_s19 + $0x10] sm:$0xff] }
0x2974   :  { %5679 = vrot.lane.b32.xlu1 %v16232_v24, %s15350_s6 }
0x2978   :  { %5916 = vrot.lane.b32.xlu1 %v16232_v24, %s15351_s25 }
0x297c   :  { %5994 = vrot.lane.b32.xlu1 %v16230_v20, %s15351_s25 }
0x2980   :  { %5992 = vrot.lane.b32.xlu1 %v16230_v20, %s15352_s18 }
0x29c8   :  { %v5671_v42 = vpop.xlane.xlu0 %5670 }
0x29c9   :  { %14623 = vrcp.f32 %v5671_v42 }
0x29d6   :  { %v14624_v43 = vpop.eup %14623 }
0x29d7   :  { %v5677_v46 = vmul.f32 %v14624_v43, %v14622_v27 }
0x29d9   :  { %6787 = vst.msk [vmem:[%s15578_s9 + $0x8] sm:$0xff] %vm879_vm7, %v5677_v46 }
0x29ec   :  { %v5662_v41 = vpop.xlane.xlu1 %5661 }
0x29ed   :  { %v5664_v28 = vsub.f32 %v5656_v33, %v5662_v41 }
0x29ef   :  { %v5667_v29 = vmul.f32 1.442695, %v5664_v28 }
0x29f0   :  { %v5680_v7 = vpop.permute.xlu1 %5679 }
0x29f1   :  { %14625 = vpow2.f32 %v5667_v29  ;;  %13975 = vmatpush3.msra.mxu1 %v5680_v7 }
0x29f2   :  { %13977 = vmatmul.mubr.msk.f32.vlgmr.msra.gmra.mxu1 %vm879_vm7, %v5677_v46  ;;  %13984 = vmatprep.subr.mxu1 %v5072_v48 }
0x29f3   :  { %13985 = vmatpush3.msra.mxu1 %v5072_v48 }
0x29f4   :  { %13994 = vmatprep.subr.mxu1 %v15343_v9  ;;  %v5917_v56 = vpop.permute.xlu1 %5916 }
0x29f8   :  { %v5995_v60 = vpop.permute.xlu1 %5994 }
0x29fc   :  { %v5993_v63 = vpop.permute.xlu1 %5992 }
0x29fe   :  { %v14626_v40 = vpop.eup %14625 }
0x29ff   :  { %v5672_v47 = vsel %vm879_vm7, %v14626_v40, 0.0 }
0x2a00   :  { %5673 = vadd.xlane.f32.xlu0 %v5672_v47 }
0x2a16   :  { %5755 = vrot.lane.b32.xlu0 %v16230_v20, %s15350_s6 }
0x2a1a   :  { %5914 = vrot.lane.b32.xlu0 %v16232_v24, %s15352_s18 }
0x2a89   :  { %v5674_v31 = vpop.xlane.xlu0 %5673 }
0x2a8a   :  { %14627 = vrcp.f32 %v5674_v31 }
0x2a8d   :  { %v5756_v49 = vpop.permute.xlu0 %5755 }
0x2a8e   :  { %13980 = vmatpush3.msra.mxu0 %v5756_v49 }
0x2a8f   :  { %13989 = vmatprep.subr.mxu0 %v15343_v9 }
0x2a91   :  { %v5915_v58 = vpop.permute.xlu0 %5914 }
0x2a97   :  { %v14628_v52 = vpop.eup %14627 }
0x2a98   :  { %v5678_v55 = vmul.f32 %v14628_v52, %v14626_v40 }
0x2a9a   :  { %13982 = vmatmul.mubr.msk.f32.vlgmr.msra.gmra.mxu0 %vm879_vm7, %v5678_v55  ;;  %6791 = vst.msk [vmem:[%s15578_s9 + $0x28] sm:$0xff] %vm879_vm7, %v5678_v55 }
0x2a9b   :  { %13990 = vmatpush3.xpose.msk.msra.mxu0 %vm879_vm7, %v5917_v56  ;;  %13991 = vmatprep.mubr.msk.f32.mxu0 %vm15344_vm6, %v15343_v9 }
0x2a9c   :  { %13999 = vmatprep.subr.mxu0 %v15343_v9 }
0x2a9e   :  { %13992 = vmatmul.mubr.msk.f32.vlgmr.msra.gmra.mxu0 %vm879_vm7, %v5915_v58 }
0x2a9f   :  { %14001 = vmatprep.mubr.msk.f32.mxu0 %vm15344_vm6, %v15343_v9 }
0x2ab2   :  { %v5751_v22 = vpop.f32.mrf.mxu1 }
0x2ab3   :  { %13986 = vmatprep.mubr.msk.f32.mxu1 %vm879_vm7, %v5751_v22 }
0x2ab4   :  { %v13978_v59 = vpop.f32.mrf.mxu1 }
0x2b5a   :  { %v5827_v61 = vpop.f32.mrf.mxu0 }
0x2b5b   :  { %13987 = vmatmul.mubr.msk.f32.vlgmr.msra.gmra.mxu1 %vm879_vm7, %v5827_v61 }
0x2b5c   :  { %13995 = vmatpush3.xpose.msk.msra.mxu1 %vm879_vm7, %v5995_v60  ;;  %v13983_v62 = vpop.f32.mrf.mxu0  ;;  %13996 = vmatprep.mubr.msk.f32.mxu1 %vm15344_vm6, %v15343_v9 }
0x2b5d   :  { %14004 = vmatprep.subr.mxu1 %v15343_v9 }
0x2b5e   :  { %v5988_v21 = vpop.f32.mrf.mxu0 }
0x2b5f   :  { %v6070_v45 = vsel %vm16261_vm5, -1e+09, %v5988_v21  ;;  %13997 = vmatmul.mubr.msk.f32.vlgmr.msra.gmra.mxu1 %vm879_vm7, %v5993_v63 }
0x2b60   :  { %v6072_v51 = vsel %vm879_vm7, %v6070_v45, -inf  ;;  %v13993_v34 = vpop.f32.mrf.mxu0  ;;  %14006 = vmatprep.mubr.msk.f32.mxu1 %vm15344_vm6, %v15343_v9 }
0x2b61   :  { %6073 = vmax.xlane.f32.xlu0 %v6072_v51 }
0x2bea   :  { %v6074_v1 = vpop.xlane.xlu0 %6073 }
0x2beb   :  { %v6078_v2 = vsub.f32 %v6070_v45, %v6074_v1 }
0x2bed   :  { %v6080_v3 = vmul.f32 1.442695, %v6078_v2 }
0x2bef   :  { %14629 = vpow2.f32 %v6080_v3 }
0x2bfc   :  { %v14630_v4 = vpop.eup %14629 }
0x2bfd   :  { %v6084_v5 = vsel %vm879_vm7, %v14630_v4, 0.0 }
0x2bfe   :  { %6085 = vadd.xlane.f32.xlu0 %v6084_v5 }
0x2c1b   :  { %v13988_v13 = vpop.f32.mrf.mxu1 }
0x2c1c   :  { %v16371_v15 = vadd.f32 %v13988_v13, %v5498_v10 }
0x2c1d   :  { %v5903_v17 = vpop.f32.mrf.mxu1 }
0x2c1e   :  { %v16373_v50 = vadd.f32 %v5903_v17, %v5497_v14 }
0x2c1f   :  { %v6066_v19 = vpop.f32.mrf.mxu1 }
0x2c20   :  { %v6071_v23 = vsel %vm16268_vm9, -1e+09, %v6066_v19 }
0x2c21   :  { %v6075_v25 = vsel %vm879_vm7, %v6071_v23, -inf  ;;  %v13998_v16 = vpop.f32.mrf.mxu1 }
0x2c22   :  { %6076 = vmax.xlane.f32.xlu1 %v6075_v25 }
0x2c33   :  { %6094 = vrot.lane.b32.xlu1 %v16232_v24, %s15353_s21 }
0x2c37   :  { %6331 = vrot.lane.b32.xlu1 %v16232_v24, %s15354_s8 }
0x2c3b   :  { %6409 = vrot.lane.b32.xlu1 %v16230_v20, %s15354_s8 }
0x2c3f   :  { %6407 = vrot.lane.b32.xlu1 %v16230_v20, %s15355_s22 }
0x2c87   :  { %v6086_v12 = vpop.xlane.xlu0 %6085 }
0x2c88   :  { %14631 = vrcp.f32 %v6086_v12 }
0x2c95   :  { %v14632_v26 = vpop.eup %14631 }
0x2c96   :  { %v6092_v27 = vmul.f32 %v14632_v26, %v14630_v4 }
0x2c98   :  { %6788 = vst.msk [vmem:[%s15578_s9 + $0x10] sm:$0xff] %vm879_vm7, %v6092_v27 }
0x2cab   :  { %v6077_v35 = vpop.xlane.xlu1 %6076 }
0x2cac   :  { %v6079_v30 = vsub.f32 %v6071_v23, %v6077_v35 }
0x2cae   :  { %v6082_v32 = vmul.f32 1.442695, %v6079_v30 }
0x2caf   :  { %v6095_v36 = vpop.permute.xlu1 %6094 }
0x2cb0   :  { %14633 = vpow2.f32 %v6082_v32  ;;  %14000 = vmatpush3.msra.mxu0 %v6095_v36 }
0x2cb1   :  { %14002 = vmatmul.mubr.msk.f32.vlgmr.msra.gmra.mxu0 %vm879_vm7, %v6092_v27  ;;  %14009 = vmatprep.subr.mxu0 %v5073_v39 }
0x2cb2   :  { %14010 = vmatpush3.msra.mxu0 %v5073_v39 }
0x2cb3   :  { %14019 = vmatprep.subr.mxu0 %v15343_v9  ;;  %v6332_v28 = vpop.permute.xlu1 %6331 }
0x2cb7   :  { %v6410_v47 = vpop.permute.xlu1 %6409 }
0x2cbb   :  { %v6408_v49 = vpop.permute.xlu1 %6407 }
0x2cbd   :  { %v14634_v33 = vpop.eup %14633 }
0x2cbe   :  { %v6087_v38 = vsel %vm879_vm7, %v14634_v33, 0.0 }
0x2cbf   :  { %6088 = vadd.xlane.f32.xlu0 %v6087_v38 }
0x2cd5   :  { %6170 = vrot.lane.b32.xlu0 %v16230_v20, %s15353_s21 }
0x2cd9   :  { %6329 = vrot.lane.b32.xlu0 %v16232_v24, %s15355_s22 }
0x2d48   :  { %v6089_v42 = vpop.xlane.xlu0 %6088 }
0x2d49   :  { %14635 = vrcp.f32 %v6089_v42 }
0x2d4c   :  { %v6171_v43 = vpop.permute.xlu0 %6170 }
0x2d4d   :  { %14005 = vmatpush3.msra.mxu1 %v6171_v43 }
0x2d4e   :  { %14014 = vmatprep.subr.mxu1 %v15343_v9 }
0x2d50   :  { %v6330_v29 = vpop.permute.xlu0 %6329 }
0x2d56   :  { %v14636_v46 = vpop.eup %14635 }
0x2d57   :  { %v6093_v41 = vmul.f32 %v14636_v46, %v14634_v33 }
0x2d59   :  { %14007 = vmatmul.mubr.msk.f32.vlgmr.msra.gmra.mxu1 %vm879_vm7, %v6093_v41  ;;  %6792 = vst.msk [vmem:[%s15578_s9 + $0x30] sm:$0xff] %vm879_vm7, %v6093_v41 }
0x2d5a   :  { %14015 = vmatpush3.xpose.msk.msra.mxu1 %vm879_vm7, %v6332_v28  ;;  %14016 = vmatprep.mubr.msk.f32.mxu1 %vm15344_vm6, %v15343_v9 }
0x2d5b   :  { %14024 = vmatprep.subr.mxu1 %v15343_v9 }
0x2d5d   :  { %14017 = vmatmul.mubr.msk.f32.vlgmr.msra.gmra.mxu1 %vm879_vm7, %v6330_v29 }
0x2d5e   :  { %14026 = vmatprep.mubr.msk.f32.mxu1 %vm15344_vm6, %v15343_v9 }
0x2d71   :  { %v6166_v7 = vpop.f32.mrf.mxu0 }
0x2d72   :  { %14011 = vmatprep.mubr.msk.f32.mxu0 %vm879_vm7, %v6166_v7  ;;  %v6797_v7 = vld [vmem:[%s17192_s30 + $0x18] sm:$0xff] }
0x2d73   :  { %v14003_v40 = vpop.f32.mrf.mxu0 }
0x2d74   :  { %v6796_v40 = vld [vmem:[%s17192_s30 + $0x10] sm:$0xff] }
0x2e19   :  { %v6242_v48 = vpop.f32.mrf.mxu1 }
0x2e1a   :  { %14012 = vmatmul.mubr.msk.f32.vlgmr.msra.gmra.mxu0 %vm879_vm7, %v6242_v48  ;;  %v6794_v48 = vld [vmem:[%s17192_s30] sm:$0xff] }
0x2e1b   :  { %14020 = vmatpush3.xpose.msk.msra.mxu0 %vm879_vm7, %v6410_v47  ;;  %v14008_v31 = vpop.f32.mrf.mxu1  ;;  %14021 = vmatprep.mubr.msk.f32.mxu0 %vm15344_vm6, %v15343_v9  ;;  %v6795_v47 = vld [vmem:[%s17192_s30 + $0x8] sm:$0xff] }
0x2e1c   :  { %14029 = vmatprep.subr.mxu0 %v15343_v9 }
0x2e1d   :  { %v6403_v52 = vpop.f32.mrf.mxu1 }
0x2e1e   :  { %v6485_v55 = vsel %vm16261_vm5, -1e+09, %v6403_v52  ;;  %14022 = vmatmul.mubr.msk.f32.vlgmr.msra.gmra.mxu0 %vm879_vm7, %v6408_v49 }
0x2e1f   :  { %v6487_v56 = vsel %vm879_vm7, %v6485_v55, -inf  ;;  %v14018_v58 = vpop.f32.mrf.mxu1  ;;  %14031 = vmatprep.mubr.msk.f32.mxu0 %vm15344_vm6, %v15343_v9 }
0x2e20   :  { %6488 = vmax.xlane.f32.xlu0 %v6487_v56 }
0x2ea9   :  { %v6489_v22 = vpop.xlane.xlu0 %6488 }
0x2eaa   :  { %v6493_v59 = vsub.f32 %v6485_v55, %v6489_v22 }
0x2eac   :  { %v6495_v60 = vmul.f32 1.442695, %v6493_v59  ;;  %v13063_v59 = vld [vmem:[#allocation20] ss:$0 sm:$0xff] }
0x2eae   :  { %14637 = vpow2.f32 %v6495_v60 }
0x2ebb   :  { %v14638_v61 = vpop.eup %14637 }
0x2ebc   :  { %v6499_v62 = vsel %vm879_vm7, %v14638_v61, 0.0 }
0x2ebd   :  { %6500 = vadd.xlane.f32.xlu0 %v6499_v62 }
0x2eda   :  { %v14013_v63 = vpop.f32.mrf.mxu0 }
0x2edb   :  { %v6328_v21 = vadd.f32 %v14013_v63, %v16371_v15 }
0x2edc   :  { %v6318_v45 = vpop.f32.mrf.mxu0 }
0x2edd   :  { %v6327_v51 = vadd.f32 %v6318_v45, %v16373_v50 }
0x2ede   :  { %v6481_v34 = vpop.f32.mrf.mxu0 }
0x2edf   :  { %v6486_v1 = vsel %vm16268_vm9, -1e+09, %v6481_v34 }
0x2ee0   :  { %v6490_v2 = vsel %vm879_vm7, %v6486_v1, -inf  ;;  %v14023_v3 = vpop.f32.mrf.mxu0 }
0x2ee1   :  { %6491 = vmax.xlane.f32.xlu1 %v6490_v2  ;;  %v13065_v2 = vld [vmem:[#allocation23] ss:$0 sm:$0xff] }
0x2ef2   :  { %6509 = vrot.lane.b32.xlu1 %v16232_v24, %s15356_s23  ;;  %v5074_v24 = vld [vmem:[%s17191_s19 + $0x18] sm:$0xff] }
0x2f46   :  { %v6501_v4 = vpop.xlane.xlu0 %6500 }
0x2f47   :  { %14639 = vrcp.f32 %v6501_v4 }
0x2f54   :  { %v14640_v5 = vpop.eup %14639 }
0x2f55   :  { %v6507_v6 = vmul.f32 %v14640_v5, %v14638_v61 }
0x2f57   :  { %6789 = vst.msk [vmem:[%s15578_s9 + $0x18] sm:$0xff] %vm879_vm7, %v6507_v6 }
0x2f6a   :  { %v6492_v8 = vpop.xlane.xlu1 %6491 }
0x2f6b   :  { %v6494_v10 = vsub.f32 %v6486_v1, %v6492_v8 }
0x2f6d   :  { %v6497_v11 = vmul.f32 1.442695, %v6494_v10 }
0x2f6e   :  { %v6510_v13 = vpop.permute.xlu1 %6509 }
0x2f6f   :  { %14641 = vpow2.f32 %v6497_v11  ;;  %14025 = vmatpush3.msra.mxu1 %v6510_v13 }
0x2f70   :  { %14027 = vmatmul.mubr.msk.f32.vlgmr.msra.gmra.mxu1 %vm879_vm7, %v6507_v6  ;;  %14034 = vmatprep.subr.mxu1 %v5074_v24 }
0x2f71   :  { %14035 = vmatpush3.msra.mxu1 %v5074_v24 }
0x2f72   :  { %14050 = vmatprep.subr.mxu1 %v15343_v9 }
0x2f7c   :  { %v14642_v14 = vpop.eup %14641 }
0x2f7d   :  { %v6502_v15 = vsel %vm879_vm7, %v14642_v14, 0.0 }
0x2f7e   :  { %6503 = vadd.xlane.f32.xlu0 %v6502_v15 }
0x2f94   :  { %6585 = vrot.lane.b32.xlu0 %v16230_v20, %s15356_s23  ;;  %v16441_v20 = vadd.f32 %v16223_v54, %v16228_v37 }
0x3007   :  { %v6504_v17 = vpop.xlane.xlu0 %6503 }
0x3008   :  { %14643 = vrcp.f32 %v6504_v17 }
0x300b   :  { %v6586_v50 = vpop.permute.xlu0 %6585 }
0x300c   :  { %14030 = vmatpush3.msra.mxu0 %v6586_v50 }
0x300d   :  { %14039 = vmatprep.subr.mxu0 %v6797_v7 }
0x3015   :  { %v14644_v19 = vpop.eup %14643 }
0x3016   :  { %v6508_v23 = vmul.f32 %v14644_v19, %v14642_v14 }
0x3018   :  { %14032 = vmatmul.mubr.msk.f32.vlgmr.msra.gmra.mxu0 %vm879_vm7, %v6508_v23  ;;  %6793 = vst.msk [vmem:[%s15578_s9 + $0x38] sm:$0xff] %vm879_vm7, %v6508_v23 }
0x3019   :  { %14040 = vmatpush3.msra.mxu0 %v6797_v7 }
0x301a   :  { %14041 = vmatprep.subr.mxu0 %v6796_v40 }
0x301b   :  { %14042 = vmatpush3.msra.mxu0 %v6796_v40 }
0x301c   :  { %14043 = vmatprep.subr.mxu0 %v6795_v47 }
0x301d   :  { %14044 = vmatpush3.msra.mxu0 %v6795_v47 }
0x301e   :  { %14045 = vmatprep.subr.mxu0 %v6794_v48 }
0x301f   :  { %14046 = vmatpush3.msra.mxu0 %v6794_v48 }
0x3020   :  { %14060 = vmatprep.subr.mxu0 %v15343_v9 }
0x3030   :  { %v6581_v25 = vpop.f32.mrf.mxu1 }
0x3031   :  { %14036 = vmatprep.mubr.msk.f32.mxu1 %vm879_vm7, %v6581_v25 }
0x3032   :  { %v14028_v16 = vpop.f32.mrf.mxu1 }
0x30d8   :  { %v6657_v12 = vpop.f32.mrf.mxu0 }
0x30d9   :  { %14037 = vmatmul.mubr.msk.f32.vlgmr.msra.gmra.mxu1 %vm879_vm7, %v6657_v12 }
0x30da   :  { %14051 = vmatpush3.xpose.msk.msra.mxu1 %vm879_vm7, %v16441_v20  ;;  %v14033_v26 = vpop.f32.mrf.mxu0  ;;  %14052 = vmatprep.mubr.msk.f32.mxu1 %vm15344_vm6, %v15343_v9 }
0x30db   :  { %14055 = vmatprep.subr.mxu1 %v15343_v9 }
0x3199   :  { %v14038_v27 = vpop.f32.mrf.mxu1 }
0x319a   :  { %v6743_v35 = vadd.f32 %v14038_v27, %v6328_v21  ;;  %v13064_v21 = vld [vmem:[#allocation22] ss:$0 sm:$0xff] }
0x319b   :  { %v6733_v30 = vpop.f32.mrf.mxu1 }
0x319c   :  { %v6742_v32 = vadd.f32 %v6733_v30, %v6327_v51  ;;  %v6747_v36 = vsel %vm779_vm3, %v6743_v35, 0.0 }
0x319d   :  { %6748 = vadd.xlane.f32.xlu0 %v6747_v36 }
0x319e   :  { %v6744_v54 = vsel %vm779_vm3, %v6742_v32, 0.0 }
0x319f   :  { %6745 = vadd.xlane.f32.xlu1 %v6744_v54 }
0x3226   :  { %v6749_v37 = vpop.xlane.xlu0 %6748 }
0x3227   :  { %v6751_v33 = vmul.f32 0.03125, %v6749_v37 }
0x3228   :  { %v6746_v38 = vpop.xlane.xlu1 %6745 }
0x3229   :  { %v6753_v39 = vsub.f32 %v6743_v35, %v6751_v33  ;;  %v6750_v42 = vmul.f32 0.03125, %v6746_v38 }
0x322b   :  { %v6752_v43 = vsub.f32 %v6742_v32, %v6750_v42  ;;  %v6755_v46 = vmul.f32 %v6753_v39, %v6753_v39 }
0x322d   :  { %v6759_v41 = vsel %vm779_vm3, %v6755_v46, 0.0  ;;  %v6754_v28 = vmul.f32 %v6752_v43, %v6752_v43  ;;  %v6886_v46 = vld [vmem:[%s17193_s16] sm:$0xff] }
0x322e   :  { %6760 = vadd.xlane.f32.xlu0 %v6759_v41 }
0x322f   :  { %v6756_v29 = vsel %vm779_vm3, %v6754_v28, 0.0 }
0x3230   :  { %6757 = vadd.xlane.f32.xlu1 %v6756_v29 }
0x32b7   :  { %v6761_v31 = vpop.xlane.xlu0 %6760 }
0x32b8   :  { %v6763_v49 = vmul.f32 0.03125, %v6761_v31 }
0x32b9   :  { %v6758_v52 = vpop.xlane.xlu1 %6757 }
0x32ba   :  { %v6765_v55 = vadd.f32 1e-05, %v6763_v49  ;;  %v6762_v56 = vmul.f32 0.03125, %v6758_v52 }
0x32bc   :  { %14645 = vrsqrt.f32 %v6765_v55  ;;  %v6764_v58 = vadd.f32 1e-05, %v6762_v56 }
0x32be   :  { %14647 = vrsqrt.f32 %v6764_v58 }
0x32c9   :  { %v14646_v22 = vpop.eup %14645 }
0x32ca   :  { %v6769_v60 = vmul.f32 %v14646_v22, %v6753_v39 }
0x32cb   :  { %v14648_v61 = vpop.eup %14647 }
0x32cc   :  { %v6768_v62 = vmul.f32 %v14648_v61, %v6752_v43  ;;  %v6777_v63 = vmul.f32 %v13063_v59, %v6769_v60  ;;  %v13068_v60 = vld [vmem:[#allocation26] ss:$0 sm:$0xff] }
0x32ce   :  { %v6776_v45 = vmul.f32 %v13063_v59, %v6768_v62  ;;  %v16460_v34 = vadd.f32 %v13064_v21, %v6777_v63 }
0x32d0   :  { %v16458_v51 = vadd.f32 %v13064_v21, %v6776_v45  ;;  %v6900_v61 = vadd.f32 %v13068_v60, %v16460_v34 }
0x32d2   :  { %14047 = vmatprep.mubr.msk.f32.mxu0 %vm779_vm3, %v16458_v51  ;;  %v6899_v21 = vadd.f32 %v13068_v60, %v16458_v51 }
0x32d3   :  { %14048 = vmatmul.mubr.msk.f32.vlgmr.msra.gmra.mxu0 %vm779_vm3, %v16460_v34 }
0x32d4   :  { %14062 = vmatprep.mubr.msk.f32.mxu0 %vm15344_vm6, %v15343_v9 }
0x3393   :  { %v14049_v1 = vpop.f32.mrf.mxu0 }
0x3394   :  { %v16476_v5 = vadd.f32 %v14049_v1, %v13065_v2 }
0x3395   :  { %v6877_v3 = vpop.f32.mrf.mxu0 }
0x3396   :  { %v16468_v4 = vadd.f32 %v13065_v2, %v6877_v3 }
0x3398   :  { %14053 = vmatmul.mubr.msk.f32.vlgmr.msra.gmra.mxu1 %vm879_vm7, %v16468_v4 }
0x3399   :  { %14056 = vmatpush3.xpose.msk.msra.mxu1 %vm879_vm7, %v16226_v18  ;;  %14057 = vmatprep.mubr.msk.f32.mxu1 %vm15344_vm6, %v15343_v9 }
0x339a   :  { %14065 = vmatprep.subr.mxu1 %v15343_v9 }
0x339c   :  { %14058 = vmatmul.mubr.msk.f32.vlgmr.msra.gmra.mxu1 %vm879_vm7, %v16476_v5 }
0x339d   :  { %14067 = vmatprep.mubr.msk.f32.mxu1 %vm15344_vm6, %v15343_v9 }
0x3458   :  { %v6973_v6 = vpop.f32.mrf.mxu1 }
0x3459   :  { %v7053_v8 = vsel %vm15757_vm11, -1e+09, %v6973_v6 }
0x345a   :  { %v7055_v10 = vsel %vm879_vm7, %v7053_v8, -inf  ;;  %v14054_v11 = vpop.f32.mrf.mxu1 }
0x345b   :  { %7056 = vmax.xlane.f32.xlu1 %v7055_v10 }
0x345c   :  { %v7049_v13 = vpop.f32.mrf.mxu1 }
0x345d   :  { %v7054_v14 = vsel %vm15765_vm12, -1e+09, %v7049_v13 }
0x345e   :  { %v7058_v15 = vsel %vm879_vm7, %v7054_v14, -inf  ;;  %v14059_v24 = vpop.f32.mrf.mxu1 }
0x345f   :  { %7059 = vmax.xlane.f32.xlu0 %v7058_v15 }
0x34e4   :  { %v7057_v17 = vpop.xlane.xlu1 %7056 }
0x34e5   :  { %v7061_v50 = vsub.f32 %v7053_v8, %v7057_v17 }
0x34e7   :  { %v7063_v19 = vmul.f32 1.442695, %v7061_v50  ;;  %v6887_v50 = vld [vmem:[%s17193_s16 + $0x8] sm:$0xff] }
0x34e8   :  { %v7060_v23 = vpop.xlane.xlu0 %7059 }
0x34e9   :  { %14649 = vpow2.f32 %v7063_v19  ;;  %v7062_v25 = vsub.f32 %v7054_v14, %v7060_v23 }
0x34eb   :  { %v7065_v16 = vmul.f32 1.442695, %v7062_v25 }
0x34ed   :  { %14651 = vpow2.f32 %v7065_v16 }
0x34f6   :  { %v14650_v12 = vpop.eup %14649 }
0x34f7   :  { %v7067_v26 = vsel %vm879_vm7, %v14650_v12, 0.0 }
0x34f8   :  { %7068 = vadd.xlane.f32.xlu1 %v7067_v26 }
0x34fa   :  { %v14652_v27 = vpop.eup %14651 }
0x34fb   :  { %v7070_v35 = vsel %vm879_vm7, %v14652_v27, 0.0 }
0x34fc   :  { %7071 = vadd.xlane.f32.xlu0 %v7070_v35 }
0x3509   :  { %7077 = vrot.lane.b32.xlu1 %v16441_v20, %s15345_s7 }
0x350d   :  { %7314 = vrot.lane.b32.xlu1 %v16441_v20, %s15349_s4 }
0x3511   :  { %7392 = vrot.lane.b32.xlu1 %v16226_v18, %s15349_s4 }
0x3512   :  { %7153 = vrot.lane.b32.xlu0 %v16226_v18, %s15345_s7 }
0x3515   :  { %7390 = vrot.lane.b32.xlu1 %v16476_v5, %s15349_s4 }
0x3516   :  { %7312 = vrot.lane.b32.xlu0 %v16468_v4, %s15349_s4 }
0x3581   :  { %v7069_v30 = vpop.xlane.xlu1 %7068 }
0x3582   :  { %14653 = vrcp.f32 %v7069_v30 }
0x3585   :  { %v7078_v32 = vpop.permute.xlu1 %7077  ;;  %v7072_v36 = vpop.xlane.xlu0 %7071 }
0x3586   :  { %14655 = vrcp.f32 %v7072_v36  ;;  %14061 = vmatpush3.msra.mxu0 %v7078_v32 }
0x3587   :  { %14070 = vmatprep.subr.mxu0 %v6886_v46 }
0x3589   :  { %v7154_v54 = vpop.permute.xlu0 %7153  ;;  %v7315_v42 = vpop.permute.xlu1 %7314 }
0x358a   :  { %14066 = vmatpush3.msra.mxu1 %v7154_v54 }
0x358b   :  { %14075 = vmatprep.subr.mxu1 %v15343_v9 }
0x358d   :  { %v7313_v43 = vpop.permute.xlu0 %7312  ;;  %v7393_v28 = vpop.permute.xlu1 %7392 }
0x358f   :  { %v14654_v37 = vpop.eup %14653 }
0x3590   :  { %v7075_v33 = vmul.f32 %v14654_v37, %v14650_v12 }
0x3591   :  { %v7391_v47 = vpop.permute.xlu1 %7390 }
0x3592   :  { %14063 = vmatmul.mubr.msk.f32.vlgmr.msra.gmra.mxu0 %vm879_vm7, %v7075_v33  ;;  %8599 = vst.msk [vmem:[%s15583_s17] sm:$0xff] %vm879_vm7, %v7075_v33 }
0x3593   :  { %v14656_v38 = vpop.eup %14655  ;;  %14071 = vmatpush3.msra.mxu0 %v6886_v46 }
0x3594   :  { %v7076_v39 = vmul.f32 %v14656_v38, %v14652_v27  ;;  %14080 = vmatprep.subr.mxu0 %v15343_v9 }
0x3596   :  { %14068 = vmatmul.mubr.msk.f32.vlgmr.msra.gmra.mxu1 %vm879_vm7, %v7076_v39  ;;  %8603 = vst.msk [vmem:[%s15583_s17 + $0x20] sm:$0xff] %vm879_vm7, %v7076_v39 }
0x3597   :  { %14076 = vmatpush3.xpose.msk.msra.mxu1 %vm879_vm7, %v7315_v42  ;;  %14077 = vmatprep.mubr.msk.f32.mxu1 %vm15344_vm6, %v15343_v9 }
0x3598   :  { %14085 = vmatprep.subr.mxu1 %v15343_v9 }
0x359a   :  { %14078 = vmatmul.mubr.msk.f32.vlgmr.msra.gmra.mxu1 %vm879_vm7, %v7313_v43 }
0x359b   :  { %14087 = vmatprep.mubr.msk.f32.mxu1 %vm15344_vm6, %v15343_v9 }
0x3652   :  { %v7149_v41 = vpop.f32.mrf.mxu0 }
0x3653   :  { %14072 = vmatprep.mubr.msk.f32.mxu0 %vm879_vm7, %v7149_v41 }
0x3654   :  { %v14064_v29 = vpop.f32.mrf.mxu0 }
0x3656   :  { %v7225_v7 = vpop.f32.mrf.mxu1 }
0x3657   :  { %14073 = vmatmul.mubr.msk.f32.vlgmr.msra.gmra.mxu0 %vm879_vm7, %v7225_v7 }
0x3658   :  { %14081 = vmatpush3.xpose.msk.msra.mxu0 %vm879_vm7, %v7393_v28  ;;  %v14069_v40 = vpop.f32.mrf.mxu1  ;;  %14082 = vmatprep.mubr.msk.f32.mxu0 %vm15344_vm6, %v15343_v9 }
0x3659   :  { %14090 = vmatprep.subr.mxu0 %v15343_v9 }
0x365a   :  { %v7386_v48 = vpop.f32.mrf.mxu1 }
0x365b   :  { %v7468_v31 = vsel %vm15757_vm11, -1e+09, %v7386_v48  ;;  %14083 = vmatmul.mubr.msk.f32.vlgmr.msra.gmra.mxu0 %vm879_vm7, %v7391_v47 }
0x365c   :  { %v7470_v49 = vsel %vm879_vm7, %v7468_v31, -inf  ;;  %v14079_v52 = vpop.f32.mrf.mxu1  ;;  %14092 = vmatprep.mubr.msk.f32.mxu0 %vm15344_vm6, %v15343_v9 }
0x365d   :  { %7471 = vmax.xlane.f32.xlu0 %v7470_v49 }
0x36e6   :  { %v7472_v55 = vpop.xlane.xlu0 %7471 }
0x36e7   :  { %v7476_v56 = vsub.f32 %v7468_v31, %v7472_v55 }
0x36e9   :  { %v7478_v58 = vmul.f32 1.442695, %v7476_v56 }
0x36eb   :  { %14657 = vpow2.f32 %v7478_v58 }
0x36f8   :  { %v14658_v22 = vpop.eup %14657 }
0x36f9   :  { %v7482_v59 = vsel %vm879_vm7, %v14658_v22, 0.0 }
0x36fa   :  { %7483 = vadd.xlane.f32.xlu0 %v7482_v59 }
0x3717   :  { %v14074_v62 = vpop.f32.mrf.mxu0 }
0x3718   :  { %v16533_v63 = vadd.f32 %v14074_v62, %v6900_v61 }
0x3719   :  { %v7301_v45 = vpop.f32.mrf.mxu0 }
0x371a   :  { %v16536_v1 = vadd.f32 %v7301_v45, %v6899_v21 }
0x371b   :  { %v7464_v2 = vpop.f32.mrf.mxu0 }
0x371c   :  { %v7469_v3 = vsel %vm15765_vm12, -1e+09, %v7464_v2 }
0x371d   :  { %v7473_v6 = vsel %vm879_vm7, %v7469_v3, -inf  ;;  %v14084_v8 = vpop.f32.mrf.mxu0 }
0x371e   :  { %7474 = vmax.xlane.f32.xlu1 %v7473_v6 }
0x372f   :  { %7492 = vrot.lane.b32.xlu1 %v16441_v20, %s15348_s5 }
0x3733   :  { %7729 = vrot.lane.b32.xlu1 %v16441_v20, %s15352_s18 }
0x3737   :  { %7807 = vrot.lane.b32.xlu1 %v16226_v18, %s15352_s18 }
0x373b   :  { %7805 = vrot.lane.b32.xlu1 %v16476_v5, %s15352_s18 }
0x3783   :  { %v7484_v51 = vpop.xlane.xlu0 %7483 }
0x3784   :  { %14659 = vrcp.f32 %v7484_v51 }
0x3791   :  { %v14660_v34 = vpop.eup %14659 }
0x3792   :  { %v7490_v10 = vmul.f32 %v14660_v34, %v14658_v22 }
0x3794   :  { %8600 = vst.msk [vmem:[%s15583_s17 + $0x8] sm:$0xff] %vm879_vm7, %v7490_v10 }
0x37a7   :  { %v7475_v11 = vpop.xlane.xlu1 %7474 }
0x37a8   :  { %v7477_v13 = vsub.f32 %v7469_v3, %v7475_v11 }
0x37aa   :  { %v7480_v14 = vmul.f32 1.442695, %v7477_v13 }
0x37ab   :  { %v7493_v15 = vpop.permute.xlu1 %7492 }
0x37ac   :  { %14661 = vpow2.f32 %v7480_v14  ;;  %14086 = vmatpush3.msra.mxu1 %v7493_v15 }
0x37ad   :  { %14088 = vmatmul.mubr.msk.f32.vlgmr.msra.gmra.mxu1 %vm879_vm7, %v7490_v10  ;;  %14095 = vmatprep.subr.mxu1 %v6887_v50 }
0x37ae   :  { %14096 = vmatpush3.msra.mxu1 %v6887_v50 }
0x37af   :  { %14105 = vmatprep.subr.mxu1 %v15343_v9  ;;  %v7730_v12 = vpop.permute.xlu1 %7729 }
0x37b3   :  { %v7808_v30 = vpop.permute.xlu1 %7807 }
0x37b7   :  { %v7806_v54 = vpop.permute.xlu1 %7805 }
0x37b9   :  { %v14662_v24 = vpop.eup %14661 }
0x37ba   :  { %v7485_v17 = vsel %vm879_vm7, %v14662_v24, 0.0 }
0x37bb   :  { %7486 = vadd.xlane.f32.xlu0 %v7485_v17 }
0x37d1   :  { %7568 = vrot.lane.b32.xlu0 %v16226_v18, %s15348_s5 }
0x37d5   :  { %7727 = vrot.lane.b32.xlu0 %v16468_v4, %s15352_s18 }
0x3844   :  { %v7487_v19 = vpop.xlane.xlu0 %7486 }
0x3845   :  { %14663 = vrcp.f32 %v7487_v19 }
0x3848   :  { %v7569_v23 = vpop.permute.xlu0 %7568 }
0x3849   :  { %14091 = vmatpush3.msra.mxu0 %v7569_v23 }
0x384a   :  { %14100 = vmatprep.subr.mxu0 %v15343_v9 }
0x384c   :  { %v7728_v26 = vpop.permute.xlu0 %7727 }
0x3852   :  { %v14664_v25 = vpop.eup %14663 }
0x3853   :  { %v7491_v16 = vmul.f32 %v14664_v25, %v14662_v24 }
0x3855   :  { %14093 = vmatmul.mubr.msk.f32.vlgmr.msra.gmra.mxu0 %vm879_vm7, %v7491_v16  ;;  %8604 = vst.msk [vmem:[%s15583_s17 + $0x28] sm:$0xff] %vm879_vm7, %v7491_v16 }
0x3856   :  { %14101 = vmatpush3.xpose.msk.msra.mxu0 %vm879_vm7, %v7730_v12  ;;  %14102 = vmatprep.mubr.msk.f32.mxu0 %vm15344_vm6, %v15343_v9 }
0x3857   :  { %14110 = vmatprep.subr.mxu0 %v15343_v9 }
0x3859   :  { %14103 = vmatmul.mubr.msk.f32.vlgmr.msra.gmra.mxu0 %vm879_vm7, %v7728_v26 }
0x385a   :  { %14112 = vmatprep.mubr.msk.f32.mxu0 %vm15344_vm6, %v15343_v9 }
0x386d   :  { %v7564_v27 = vpop.f32.mrf.mxu1 }
0x386e   :  { %14097 = vmatprep.mubr.msk.f32.mxu1 %vm879_vm7, %v7564_v27 }
0x386f   :  { %v14089_v35 = vpop.f32.mrf.mxu1 }
0x3915   :  { %v7640_v32 = vpop.f32.mrf.mxu0 }
0x3916   :  { %14098 = vmatmul.mubr.msk.f32.vlgmr.msra.gmra.mxu1 %vm879_vm7, %v7640_v32 }
0x3917   :  { %14106 = vmatpush3.xpose.msk.msra.mxu1 %vm879_vm7, %v7808_v30  ;;  %v14094_v36 = vpop.f32.mrf.mxu0  ;;  %14107 = vmatprep.mubr.msk.f32.mxu1 %vm15344_vm6, %v15343_v9 }
0x3918   :  { %14115 = vmatprep.subr.mxu1 %v15343_v9 }
0x3919   :  { %v7801_v37 = vpop.f32.mrf.mxu0 }
0x391a   :  { %v7883_v33 = vsel %vm15757_vm11, -1e+09, %v7801_v37  ;;  %14108 = vmatmul.mubr.msk.f32.vlgmr.msra.gmra.mxu1 %vm879_vm7, %v7806_v54 }
0x391b   :  { %v7885_v38 = vsel %vm879_vm7, %v7883_v33, -inf  ;;  %v14104_v39 = vpop.f32.mrf.mxu0  ;;  %14117 = vmatprep.mubr.msk.f32.mxu1 %vm15344_vm6, %v15343_v9 }
0x391c   :  { %7886 = vmax.xlane.f32.xlu0 %v7885_v38 }
0x39a5   :  { %v7887_v42 = vpop.xlane.xlu0 %7886 }
0x39a6   :  { %v7891_v43 = vsub.f32 %v7883_v33, %v7887_v42 }
0x39a8   :  { %v7893_v46 = vmul.f32 1.442695, %v7891_v43 }
0x39aa   :  { %14665 = vpow2.f32 %v7893_v46 }
0x39b7   :  { %v14666_v41 = vpop.eup %14665 }
0x39b8   :  { %v7897_v28 = vsel %vm879_vm7, %v14666_v41, 0.0 }
0x39b9   :  { %7898 = vadd.xlane.f32.xlu0 %v7897_v28  ;;  %v6889_v28 = vld [vmem:[%s17193_s16 + $0x18] sm:$0xff] }
0x39d6   :  { %v14099_v29 = vpop.f32.mrf.mxu1 }
0x39d7   :  { %v16584_v7 = vadd.f32 %v14099_v29, %v16533_v63 }
0x39d8   :  { %v7716_v40 = vpop.f32.mrf.mxu1 }
0x39d9   :  { %v16587_v47 = vadd.f32 %v7716_v40, %v16536_v1 }
0x39da   :  { %v7879_v48 = vpop.f32.mrf.mxu1 }
0x39db   :  { %v7884_v31 = vsel %vm15765_vm12, -1e+09, %v7879_v48 }
0x39dc   :  { %v7888_v49 = vsel %vm879_vm7, %v7884_v31, -inf  ;;  %v14109_v52 = vpop.f32.mrf.mxu1 }
0x39dd   :  { %7889 = vmax.xlane.f32.xlu1 %v7888_v49 }
0x39ee   :  { %7907 = vrot.lane.b32.xlu1 %v16441_v20, %s15351_s25 }
0x39f2   :  { %8144 = vrot.lane.b32.xlu1 %v16441_v20, %s15355_s22 }
0x39f6   :  { %8222 = vrot.lane.b32.xlu1 %v16226_v18, %s15355_s22 }
0x39fa   :  { %8220 = vrot.lane.b32.xlu1 %v16476_v5, %s15355_s22  ;;  %v6888_v5 = vld [vmem:[%s17193_s16 + $0x10] sm:$0xff] }
0x3a42   :  { %v7899_v55 = vpop.xlane.xlu0 %7898 }
0x3a43   :  { %14667 = vrcp.f32 %v7899_v55 }
0x3a50   :  { %v14668_v56 = vpop.eup %14667 }
0x3a51   :  { %v7905_v58 = vmul.f32 %v14668_v56, %v14666_v41 }
0x3a53   :  { %8601 = vst.msk [vmem:[%s15583_s17 + $0x10] sm:$0xff] %vm879_vm7, %v7905_v58 }
0x3a66   :  { %v7890_v22 = vpop.xlane.xlu1 %7889 }
0x3a67   :  { %v7892_v59 = vsub.f32 %v7884_v31, %v7890_v22 }
0x3a69   :  { %v7895_v60 = vmul.f32 1.442695, %v7892_v59 }
0x3a6a   :  { %v7908_v61 = vpop.permute.xlu1 %7907 }
0x3a6b   :  { %14669 = vpow2.f32 %v7895_v60  ;;  %14111 = vmatpush3.msra.mxu0 %v7908_v61 }
0x3a6c   :  { %14113 = vmatmul.mubr.msk.f32.vlgmr.msra.gmra.mxu0 %vm879_vm7, %v7905_v58  ;;  %14120 = vmatprep.subr.mxu0 %v6888_v5 }
0x3a6d   :  { %14121 = vmatpush3.msra.mxu0 %v6888_v5 }
0x3a6e   :  { %14130 = vmatprep.subr.mxu0 %v15343_v9  ;;  %v8145_v3 = vpop.permute.xlu1 %8144 }
0x3a72   :  { %v8223_v51 = vpop.permute.xlu1 %8222 }
0x3a76   :  { %v8221_v11 = vpop.permute.xlu1 %8220 }
0x3a78   :  { %v14670_v62 = vpop.eup %14669 }
0x3a79   :  { %v7900_v63 = vsel %vm879_vm7, %v14670_v62, 0.0 }
0x3a7a   :  { %7901 = vadd.xlane.f32.xlu0 %v7900_v63 }
0x3a90   :  { %7983 = vrot.lane.b32.xlu0 %v16226_v18, %s15351_s25 }
0x3a94   :  { %8142 = vrot.lane.b32.xlu0 %v16468_v4, %s15355_s22 }
0x3b03   :  { %v7902_v21 = vpop.xlane.xlu0 %7901 }
0x3b04   :  { %14671 = vrcp.f32 %v7902_v21 }
0x3b07   :  { %v7984_v45 = vpop.permute.xlu0 %7983 }
0x3b08   :  { %14116 = vmatpush3.msra.mxu1 %v7984_v45 }
0x3b09   :  { %14125 = vmatprep.subr.mxu1 %v15343_v9 }
0x3b0b   :  { %v8143_v4 = vpop.permute.xlu0 %8142 }
0x3b11   :  { %v14672_v1 = vpop.eup %14671 }
0x3b12   :  { %v7906_v2 = vmul.f32 %v14672_v1, %v14670_v62 }
0x3b14   :  { %14118 = vmatmul.mubr.msk.f32.vlgmr.msra.gmra.mxu1 %vm879_vm7, %v7906_v2  ;;  %8605 = vst.msk [vmem:[%s15583_s17 + $0x30] sm:$0xff] %vm879_vm7, %v7906_v2 }
0x3b15   :  { %14126 = vmatpush3.xpose.msk.msra.mxu1 %vm879_vm7, %v8145_v3  ;;  %14127 = vmatprep.mubr.msk.f32.mxu1 %vm15344_vm6, %v15343_v9 }
0x3b16   :  { %14135 = vmatprep.subr.mxu1 %v15343_v9 }
0x3b18   :  { %14128 = vmatmul.mubr.msk.f32.vlgmr.msra.gmra.mxu1 %vm879_vm7, %v8143_v4 }
0x3b19   :  { %14137 = vmatprep.mubr.msk.f32.mxu1 %vm15344_vm6, %v15343_v9 }
0x3b2c   :  { %v7979_v6 = vpop.f32.mrf.mxu0 }
0x3b2d   :  { %14122 = vmatprep.mubr.msk.f32.mxu0 %vm879_vm7, %v7979_v6  ;;  %v8610_v6 = vld [vmem:[#allocation31 + $0x18] sm:$0xff] }
0x3b2e   :  { %v14114_v8 = vpop.f32.mrf.mxu0 }
0x3b2f   :  { %v8609_v8 = vld [vmem:[#allocation31 + $0x10] sm:$0xff] }
0x3bd4   :  { %v8055_v34 = vpop.f32.mrf.mxu1 }
0x3bd5   :  { %14123 = vmatmul.mubr.msk.f32.vlgmr.msra.gmra.mxu0 %vm879_vm7, %v8055_v34  ;;  %v8607_v34 = vld [vmem:[#allocation31] sm:$0xff] }
0x3bd6   :  { %14131 = vmatpush3.xpose.msk.msra.mxu0 %vm879_vm7, %v8223_v51  ;;  %v14119_v10 = vpop.f32.mrf.mxu1  ;;  %14132 = vmatprep.mubr.msk.f32.mxu0 %vm15344_vm6, %v15343_v9  ;;  %v8608_v51 = vld [vmem:[#allocation31 + $0x8] sm:$0xff] }
0x3bd7   :  { %14140 = vmatprep.subr.mxu0 %v15343_v9  ;;  %v8619_v10 = vld [vmem:[%s17194_s13 + $0x38] sm:$0xff] }
0x3bd8   :  { %v8216_v13 = vpop.f32.mrf.mxu1 }
0x3bd9   :  { %v8298_v14 = vsel %vm15757_vm11, -1e+09, %v8216_v13  ;;  %14133 = vmatmul.mubr.msk.f32.vlgmr.msra.gmra.mxu0 %vm879_vm7, %v8221_v11  ;;  %v8618_v11 = vld [vmem:[%s17194_s13 + $0x30] sm:$0xff]  ;;  %v8617_v13 = vld [vmem:[%s17194_s13 + $0x28] sm:$0xff] }
0x3bda   :  { %v8300_v15 = vsel %vm879_vm7, %v8298_v14, -inf  ;;  %v14129_v24 = vpop.f32.mrf.mxu1  ;;  %14142 = vmatprep.mubr.msk.f32.mxu0 %vm15344_vm6, %v15343_v9 }
0x3bdb   :  { %8301 = vmax.xlane.f32.xlu0 %v8300_v15 }
0x3c64   :  { %v8302_v17 = vpop.xlane.xlu0 %8301 }
0x3c65   :  { %v8306_v50 = vsub.f32 %v8298_v14, %v8302_v17  ;;  %v8616_v14 = vld [vmem:[%s17194_s13 + $0x20] sm:$0xff] }
0x3c67   :  { %v8308_v19 = vmul.f32 1.442695, %v8306_v50 }
0x3c69   :  { %14673 = vpow2.f32 %v8308_v19 }
0x3c76   :  { %v14674_v23 = vpop.eup %14673 }
0x3c77   :  { %v8312_v25 = vsel %vm879_vm7, %v14674_v23, 0.0 }
0x3c78   :  { %8313 = vadd.xlane.f32.xlu0 %v8312_v25 }
0x3c95   :  { %v14124_v16 = vpop.f32.mrf.mxu0 }
0x3c96   :  { %v8141_v12 = vadd.f32 %v14124_v16, %v16584_v7  ;;  %v13101_v16 = vld [vmem:[#allocation28] ss:$0 sm:$0xff] }
0x3c97   :  { %v8131_v26 = vpop.f32.mrf.mxu0 }
0x3c98   :  { %v8140_v27 = vadd.f32 %v8131_v26, %v16587_v47 }
0x3c99   :  { %v8294_v35 = vpop.f32.mrf.mxu0 }
0x3c9a   :  { %v8299_v30 = vsel %vm15765_vm12, -1e+09, %v8294_v35 }
0x3c9b   :  { %v8303_v32 = vsel %vm879_vm7, %v8299_v30, -inf  ;;  %v14134_v36 = vpop.f32.mrf.mxu0 }
0x3c9c   :  { %8304 = vmax.xlane.f32.xlu1 %v8303_v32 }
0x3cad   :  { %8322 = vrot.lane.b32.xlu1 %v16441_v20, %s15354_s8 }
0x3d01   :  { %v8314_v54 = vpop.xlane.xlu0 %8313 }
0x3d02   :  { %14675 = vrcp.f32 %v8314_v54 }
0x3d0f   :  { %v14676_v37 = vpop.eup %14675 }
0x3d10   :  { %v8320_v33 = vmul.f32 %v14676_v37, %v14674_v23  ;;  %v8615_v37 = vld [vmem:[%s17194_s13 + $0x18] sm:$0xff] }
0x3d12   :  { %8602 = vst.msk [vmem:[%s15583_s17 + $0x18] sm:$0xff] %vm879_vm7, %v8320_v33 }
0x3d25   :  { %v8305_v38 = vpop.xlane.xlu1 %8304 }
0x3d26   :  { %v8307_v39 = vsub.f32 %v8299_v30, %v8305_v38  ;;  %v13102_v30 = vld [vmem:[#allocation29] ss:$0 sm:$0xff]  ;;  %v8613_v38 = vld [vmem:[%s17194_s13 + $0x8] sm:$0xff] }
0x3d28   :  { %v8310_v42 = vmul.f32 1.442695, %v8307_v39  ;;  %v8612_v39 = vld [vmem:[%s17194_s13] sm:$0xff] }
0x3d29   :  { %v8323_v43 = vpop.permute.xlu1 %8322 }
0x3d2a   :  { %14677 = vpow2.f32 %v8310_v42  ;;  %14136 = vmatpush3.msra.mxu1 %v8323_v43  ;;  %v13103_v42 = vld [vmem:[#allocation32] ss:$0 sm:$0xff] }
0x3d2b   :  { %14138 = vmatmul.mubr.msk.f32.vlgmr.msra.gmra.mxu1 %vm879_vm7, %v8320_v33  ;;  %14145 = vmatprep.subr.mxu1 %v6889_v28  ;;  %v8614_v33 = vld [vmem:[%s17194_s13 + $0x10] sm:$0xff] }
0x3d2c   :  { %14146 = vmatpush3.msra.mxu1 %v6889_v28 }
0x3d2d   :  { %14161 = vmatprep.subr.mxu1 %v8619_v10 }
0x3d37   :  { %v14678_v46 = vpop.eup %14677 }
0x3d38   :  { %v8315_v41 = vsel %vm879_vm7, %v14678_v46, 0.0 }
0x3d39   :  { %8316 = vadd.xlane.f32.xlu0 %v8315_v41 }
0x3d4f   :  { %8398 = vrot.lane.b32.xlu0 %v16226_v18, %s15354_s8 }
0x3dc2   :  { %v8317_v29 = vpop.xlane.xlu0 %8316 }
0x3dc3   :  { %14679 = vrcp.f32 %v8317_v29 }
0x3dc6   :  { %v8399_v7 = vpop.permute.xlu0 %8398 }
0x3dc7   :  { %14141 = vmatpush3.msra.mxu0 %v8399_v7 }
0x3dc8   :  { %14150 = vmatprep.subr.mxu0 %v8610_v6 }
0x3dd0   :  { %v14680_v40 = vpop.eup %14679 }
0x3dd1   :  { %v8321_v47 = vmul.f32 %v14680_v40, %v14678_v46  ;;  %v13106_v40 = vld [vmem:[#allocation34] ss:$0 sm:$0xff] }
0x3dd3   :  { %14143 = vmatmul.mubr.msk.f32.vlgmr.msra.gmra.mxu0 %vm879_vm7, %v8321_v47  ;;  %8606 = vst.msk [vmem:[%s15583_s17 + $0x38] sm:$0xff] %vm879_vm7, %v8321_v47 }
0x3dd4   :  { %14151 = vmatpush3.msra.mxu0 %v8610_v6  ;;  %v13111_v6 = vld [vmem:[%s17184_s12 + $0x20] sm:$0xff] }
0x3dd5   :  { %14152 = vmatprep.subr.mxu0 %v8609_v8 }
0x3dd6   :  { %14153 = vmatpush3.msra.mxu0 %v8609_v8 }
0x3dd7   :  { %14154 = vmatprep.subr.mxu0 %v8608_v51 }
0x3dd8   :  { %14155 = vmatpush3.msra.mxu0 %v8608_v51 }
0x3dd9   :  { %14156 = vmatprep.subr.mxu0 %v8607_v34 }
0x3dda   :  { %14157 = vmatpush3.msra.mxu0 %v8607_v34 }
0x3deb   :  { %v8394_v48 = vpop.f32.mrf.mxu1 }
0x3dec   :  { %14147 = vmatprep.mubr.msk.f32.mxu1 %vm879_vm7, %v8394_v48 }
0x3ded   :  { %v14139_v31 = vpop.f32.mrf.mxu1 }
0x3e93   :  { %v8470_v49 = vpop.f32.mrf.mxu0 }
0x3e94   :  { %14148 = vmatmul.mubr.msk.f32.vlgmr.msra.gmra.mxu1 %vm879_vm7, %v8470_v49 }
0x3e95   :  { %v14144_v52 = vpop.f32.mrf.mxu0  ;;  %14162 = vmatpush3.msra.mxu1 %v8619_v10 }
0x3e96   :  { %14163 = vmatprep.subr.mxu1 %v8618_v11 }
0x3e97   :  { %14164 = vmatpush3.msra.mxu1 %v8618_v11 }
0x3e98   :  { %14165 = vmatprep.subr.mxu1 %v8617_v13 }
0x3e99   :  { %14166 = vmatpush3.msra.mxu1 %v8617_v13 }
0x3e9a   :  { %14167 = vmatprep.subr.mxu1 %v8616_v14 }
0x3e9b   :  { %14168 = vmatpush3.msra.mxu1 %v8616_v14 }
0x3e9c   :  { %14169 = vmatprep.subr.mxu1 %v8615_v37 }
0x3e9d   :  { %14170 = vmatpush3.msra.mxu1 %v8615_v37 }
0x3e9e   :  { %14171 = vmatprep.subr.mxu1 %v8614_v33 }
0x3e9f   :  { %14172 = vmatpush3.msra.mxu1 %v8614_v33 }
0x3ea0   :  { %14173 = vmatprep.subr.mxu1 %v8613_v38 }
0x3ea1   :  { %14174 = vmatpush3.msra.mxu1 %v8613_v38 }
0x3ea2   :  { %14175 = vmatprep.subr.mxu1 %v8612_v39 }
0x3ea3   :  { %14176 = vmatpush3.msra.mxu1 %v8612_v39 }
0x3ea4   :  { %14196 = vmatprep.subr.mxu1 %v15343_v9 }
0x3f54   :  { %v14149_v55 = vpop.f32.mrf.mxu1 }
0x3f55   :  { %v8556_v56 = vadd.f32 %v14149_v55, %v8141_v12 }
0x3f56   :  { %v8546_v58 = vpop.f32.mrf.mxu1 }
0x3f57   :  { %v8555_v22 = vadd.f32 %v8546_v58, %v8140_v27  ;;  %v8560_v59 = vsel %vm779_vm3, %v8556_v56, 0.0 }
0x3f58   :  { %8561 = vadd.xlane.f32.xlu0 %v8560_v59 }
0x3f59   :  { %v8557_v60 = vsel %vm779_vm3, %v8555_v22, 0.0 }
0x3f5a   :  { %8558 = vadd.xlane.f32.xlu1 %v8557_v60 }
0x3fe1   :  { %v8562_v61 = vpop.xlane.xlu0 %8561 }
0x3fe2   :  { %v8564_v62 = vmul.f32 0.03125, %v8562_v61 }
0x3fe3   :  { %v8559_v63 = vpop.xlane.xlu1 %8558 }
0x3fe4   :  { %v8566_v5 = vsub.f32 %v8556_v56, %v8564_v62  ;;  %v8563_v21 = vmul.f32 0.03125, %v8559_v63 }
0x3fe6   :  { %v8565_v45 = vsub.f32 %v8555_v22, %v8563_v21  ;;  %v8568_v1 = vmul.f32 %v8566_v5, %v8566_v5 }
0x3fe8   :  { %v8572_v2 = vsel %vm779_vm3, %v8568_v1, 0.0  ;;  %v8567_v3 = vmul.f32 %v8565_v45, %v8565_v45 }
0x3fe9   :  { %8573 = vadd.xlane.f32.xlu0 %v8572_v2  ;;  %v13114_v2 = vld [vmem:[%s17184_s12 + $0x38] sm:$0xff] }
0x3fea   :  { %v8569_v4 = vsel %vm779_vm3, %v8567_v3, 0.0  ;;  %v13113_v3 = vld [vmem:[%s17184_s12 + $0x30] sm:$0xff]  ;;  %14180 = vmatprep.subr.mxu0 %v13114_v2 }
0x3feb   :  { %8570 = vadd.xlane.f32.xlu1 %v8569_v4  ;;  %v13112_v4 = vld [vmem:[%s17184_s12 + $0x28] sm:$0xff] }
0x4072   :  { %v8574_v15 = vpop.xlane.xlu0 %8573 }
0x4073   :  { %v8576_v24 = vmul.f32 0.03125, %v8574_v15  ;;  %v13109_v15 = vld [vmem:[#allocation35] ss:$0 sm:$0xff] }
0x4074   :  { %v8571_v17 = vpop.xlane.xlu1 %8570 }
0x4075   :  { %v8578_v50 = vadd.f32 1e-05, %v8576_v24  ;;  %v8575_v19 = vmul.f32 0.03125, %v8571_v17 }
0x4077   :  { %14681 = vrsqrt.f32 %v8578_v50  ;;  %v8577_v23 = vadd.f32 1e-05, %v8575_v19 }
0x4079   :  { %14683 = vrsqrt.f32 %v8577_v23  ;;  %v13110_v23 = vld [vmem:[#allocation37] ss:$0 sm:$0xff] }
0x4084   :  { %v14682_v25 = vpop.eup %14681 }
0x4085   :  { %v8582_v12 = vmul.f32 %v14682_v25, %v8566_v5 }
0x4086   :  { %v14684_v26 = vpop.eup %14683 }
0x4087   :  { %v8581_v27 = vmul.f32 %v14684_v26, %v8565_v45  ;;  %v8590_v35 = vmul.f32 %v13101_v16, %v8582_v12  ;;  %v13115_v26 = vld [vmem:[#allocation17 + $0x1] ss:$0 sm:$0xff] }
0x4089   :  { %v8589_v32 = vmul.f32 %v13101_v16, %v8581_v27  ;;  %v8598_v54 = vadd.f32 %v13102_v30, %v8590_v35 }
0x408b   :  { %v8597_v36 = vadd.f32 %v13102_v30, %v8589_v32 }
0x408d   :  { %14158 = vmatprep.mubr.msk.f32.mxu0 %vm779_vm3, %v8597_v36 }
0x408e   :  { %14159 = vmatmul.mubr.msk.f32.vlgmr.msra.gmra.mxu0 %vm779_vm3, %v8598_v54 }
0x408f   :  { %14181 = vmatpush3.msra.mxu0 %v13114_v2 }
0x4090   :  { %14182 = vmatprep.subr.mxu0 %v13113_v3 }
0x4091   :  { %14183 = vmatpush3.msra.mxu0 %v13113_v3 }
0x4092   :  { %14184 = vmatprep.subr.mxu0 %v13112_v4 }
0x4093   :  { %14185 = vmatpush3.msra.mxu0 %v13112_v4 }
0x4094   :  { %14186 = vmatprep.subr.mxu0 %v13111_v6 }
0x4095   :  { %14187 = vmatpush3.msra.mxu0 %v13111_v6 }
0x4096   :  { %14191 = vmatprep.subr.mxu0 %v15343_v9 }
0x414e   :  { %v14160_v43 = vpop.f32.mrf.mxu0 }
0x414f   :  { %v8707_v46 = vadd.f32 %v14160_v43, %v13103_v42 }
0x4150   :  { %v8701_v41 = vpop.f32.mrf.mxu0 }
0x4151   :  { %v8702_v28 = vadd.f32 %v13103_v42, %v8701_v41  ;;  %v8711_v7 = vmax.f32 %v8707_v46, 0.0 }
0x4153   :  { %v8710_v29 = vmax.f32 %v8702_v28, 0.0 }
0x4155   :  { %14177 = vmatprep.mubr.msk.f32.mxu1 %vm2697_vm13, %v8710_v29 }
0x4156   :  { %14178 = vmatmul.mubr.msk.f32.vlgmr.msra.gmra.mxu1 %vm2697_vm13, %v8711_v7 }
0x4157   :  { %14198 = vmatprep.mubr.msk.f32.mxu1 %vm15344_vm6, %v15343_v9 }
0x4216   :  { %v14179_v47 = vpop.f32.mrf.mxu1 }
0x4217   :  { %v8796_v48 = vadd.f32 %v14179_v47, %v13106_v40 }
0x4218   :  { %v8790_v31 = vpop.f32.mrf.mxu1 }
0x4219   :  { %v8800_v49 = vadd.f32 %v8796_v48, %v8598_v54  ;;  %v8791_v52 = vadd.f32 %v13106_v40, %v8790_v31 }
0x421b   :  { %v8799_v55 = vadd.f32 %v8791_v52, %v8597_v36  ;;  %v8804_v56 = vsel %vm779_vm3, %v8800_v49, 0.0 }
0x421c   :  { %8805 = vadd.xlane.f32.xlu0 %v8804_v56 }
0x421d   :  { %v8801_v58 = vsel %vm779_vm3, %v8799_v55, 0.0 }
0x421e   :  { %8802 = vadd.xlane.f32.xlu1 %v8801_v58 }
0x42a5   :  { %v8806_v22 = vpop.xlane.xlu0 %8805 }
0x42a6   :  { %v8808_v59 = vmul.f32 0.03125, %v8806_v22 }
0x42a7   :  { %v8803_v60 = vpop.xlane.xlu1 %8802 }
0x42a8   :  { %v8810_v61 = vsub.f32 %v8800_v49, %v8808_v59  ;;  %v8807_v62 = vmul.f32 0.03125, %v8803_v60 }
0x42aa   :  { %v8809_v63 = vsub.f32 %v8799_v55, %v8807_v62  ;;  %v8812_v5 = vmul.f32 %v8810_v61, %v8810_v61 }
0x42ac   :  { %v8816_v21 = vsel %vm779_vm3, %v8812_v5, 0.0  ;;  %v8811_v45 = vmul.f32 %v8809_v63, %v8809_v63 }
0x42ad   :  { %8817 = vadd.xlane.f32.xlu0 %v8816_v21 }
0x42ae   :  { %v8813_v1 = vsel %vm779_vm3, %v8811_v45, 0.0  ;;  %v13118_v45 = vld [vmem:[%s17191_s19 + $0x20] sm:$0xff] }
0x42af   :  { %8814 = vadd.xlane.f32.xlu1 %v8813_v1 }
0x4336   :  { %v8818_v8 = vpop.xlane.xlu0 %8817 }
0x4337   :  { %v8820_v51 = vmul.f32 0.03125, %v8818_v8 }
0x4338   :  { %v8815_v34 = vpop.xlane.xlu1 %8814 }
0x4339   :  { %v8822_v10 = vadd.f32 1e-05, %v8820_v51  ;;  %v8819_v11 = vmul.f32 0.03125, %v8815_v34 }
0x433b   :  { %14685 = vrsqrt.f32 %v8822_v10  ;;  %v8821_v13 = vadd.f32 1e-05, %v8819_v11 }
0x433d   :  { %14687 = vrsqrt.f32 %v8821_v13 }
0x4348   :  { %v14686_v14 = vpop.eup %14685 }
0x4349   :  { %v8826_v24 = vmul.f32 %v14686_v14, %v8810_v61 }
0x434a   :  { %v14688_v17 = vpop.eup %14687 }
0x434b   :  { %v8825_v50 = vmul.f32 %v14688_v17, %v8809_v63  ;;  %v8834_v19 = vmul.f32 %v13109_v15, %v8826_v24 }
0x434d   :  { %v8833_v25 = vmul.f32 %v13109_v15, %v8825_v50  ;;  %v16683_v12 = vadd.f32 %v13110_v23, %v8834_v19  ;;  %v13122_v50 = vld [vmem:[#allocation19 + $0x1] ss:$0 sm:$0xff] }
0x434f   :  { %v16681_v16 = vadd.f32 %v13110_v23, %v8833_v25  ;;  %v8955_v19 = vadd.f32 %v13122_v50, %v16683_v12 }
0x4351   :  { %14188 = vmatprep.mubr.msk.f32.mxu0 %vm779_vm3, %v16681_v16 }
0x4352   :  { %14189 = vmatmul.mubr.msk.f32.vlgmr.msra.gmra.mxu0 %vm779_vm3, %v16683_v12 }
0x4353   :  { %14193 = vmatprep.mubr.msk.f32.mxu0 %vm15344_vm6, %v15343_v9 }
0x4412   :  { %v14190_v27 = vpop.f32.mrf.mxu0 }
0x4413   :  { %v16691_v35 = vadd.f32 %v14190_v27, %v13115_v26 }
0x4414   :  { %v8928_v30 = vpop.f32.mrf.mxu0 }
0x4415   :  { %v16693_v32 = vadd.f32 %v13115_v26, %v8928_v30  ;;  %9034 = vrot.lane.b32.xlu0 %v16691_v35, %s15345_s7  ;;  %v8954_v26 = vadd.f32 %v13122_v50, %v16681_v16 }
0x4417   :  { %8957 = vrot.lane.b32.xlu1 %v16693_v32, %s15345_s7 }
0x4487   :  { %v9035_v36 = vpop.permute.xlu0 %9034 }
0x4488   :  { %14197 = vmatpush3.xpose.msk.msra.mxu1 %vm879_vm7, %v9035_v36 }
0x4489   :  { %v8958_v54 = vpop.permute.xlu1 %8957  ;;  %14206 = vmatprep.subr.mxu1 %v15343_v9 }
0x448a   :  { %14192 = vmatpush3.xpose.msk.msra.mxu0 %vm879_vm7, %v8958_v54 }
0x448b   :  { %14199 = vmatmul.mubr.msk.f32.vlgmr.msra.gmra.mxu1 %vm879_vm7, %v16691_v35  ;;  %14201 = vmatprep.subr.mxu0 %v15343_v9 }
0x448c   :  { %14208 = vmatprep.mubr.msk.f32.mxu1 %vm15344_vm6, %v15343_v9 }
0x448d   :  { %14194 = vmatmul.mubr.msk.f32.vlgmr.msra.gmra.mxu0 %vm879_vm7, %v16693_v32 }
0x448e   :  { %14203 = vmatprep.mubr.msk.f32.mxu0 %vm15344_vm6, %v15343_v9 }
0x454b   :  { %v9106_v37 = vpop.f32.mrf.mxu1 }
0x454c   :  { %v9111_v33 = vsel %vm16268_vm9, -1e+09, %v9106_v37 }
0x454d   :  { %v9115_v38 = vsel %vm879_vm7, %v9111_v33, -inf  ;;  %v9029_v39 = vpop.f32.mrf.mxu0  ;;  %v14200_v42 = vpop.f32.mrf.mxu1 }
0x454e   :  { %v9110_v43 = vsel %vm16261_vm5, -1e+09, %v9029_v39  ;;  %9116 = vmax.xlane.f32.xlu0 %v9115_v38 }
0x454f   :  { %v9112_v46 = vsel %vm879_vm7, %v9110_v43, -inf  ;;  %v14195_v41 = vpop.f32.mrf.mxu0 }
0x4550   :  { %9113 = vmax.xlane.f32.xlu1 %v9112_v46 }
0x45d7   :  { %v9117_v28 = vpop.xlane.xlu0 %9116 }
0x45d8   :  { %v9119_v29 = vsub.f32 %v9111_v33, %v9117_v28 }
0x45d9   :  { %v9114_v7 = vpop.xlane.xlu1 %9113 }
0x45da   :  { %v9122_v40 = vmul.f32 1.442695, %v9119_v29  ;;  %v9118_v47 = vsub.f32 %v9110_v43, %v9114_v7  ;;  %v13119_v29 = vld [vmem:[%s17191_s19 + $0x28] sm:$0xff] }
0x45dc   :  { %14689 = vpow2.f32 %v9122_v40  ;;  %v9120_v48 = vmul.f32 1.442695, %v9118_v47 }
0x45de   :  { %14691 = vpow2.f32 %v9120_v48 }
0x45e9   :  { %v14690_v31 = vpop.eup %14689 }
0x45ea   :  { %v9127_v49 = vsel %vm879_vm7, %v14690_v31, 0.0 }
0x45eb   :  { %v14692_v52 = vpop.eup %14691  ;;  %9128 = vadd.xlane.f32.xlu0 %v9127_v49 }
0x45ec   :  { %v9124_v55 = vsel %vm879_vm7, %v14692_v52, 0.0 }
0x45ed   :  { %9125 = vadd.xlane.f32.xlu1 %v9124_v55 }
0x45fe   :  { %9134 = vrot.lane.b32.xlu1 %v16693_v32, %s15347_s11 }
0x4601   :  { %9210 = vrot.lane.b32.xlu0 %v16691_v35, %s15347_s11 }
0x4602   :  { %9371 = vrot.lane.b32.xlu1 %v16693_v32, %s15348_s5 }
0x4605   :  { %9369 = vrot.lane.b32.xlu0 %v16693_v32, %s15349_s4 }
0x4606   :  { %9449 = vrot.lane.b32.xlu1 %v16691_v35, %s15348_s5 }
0x460a   :  { %9447 = vrot.lane.b32.xlu1 %v16691_v35, %s15349_s4 }
0x4674   :  { %v9129_v56 = vpop.xlane.xlu0 %9128 }
0x4675   :  { %14693 = vrcp.f32 %v9129_v56 }
0x4676   :  { %v9126_v58 = vpop.xlane.xlu1 %9125 }
0x4677   :  { %14695 = vrcp.f32 %v9126_v58 }
0x4678   :  { %v9211_v22 = vpop.permute.xlu0 %9210 }
0x4679   :  { %14207 = vmatpush3.msra.mxu1 %v9211_v22 }
0x467a   :  { %v9135_v59 = vpop.permute.xlu1 %9134  ;;  %14216 = vmatprep.subr.mxu1 %v15343_v9 }
0x467b   :  { %14202 = vmatpush3.msra.mxu0 %v9135_v59 }
0x467c   :  { %v9370_v21 = vpop.permute.xlu0 %9369  ;;  %14211 = vmatprep.subr.mxu0 %v13118_v45 }
0x467e   :  { %v9372_v63 = vpop.permute.xlu1 %9371 }
0x4682   :  { %v14694_v60 = vpop.eup %14693  ;;  %v9450_v2 = vpop.permute.xlu1 %9449 }
0x4683   :  { %v9133_v61 = vmul.f32 %v14694_v60, %v14690_v31 }
0x4684   :  { %v14696_v62 = vpop.eup %14695 }
0x4685   :  { %14209 = vmatmul.mubr.msk.f32.vlgmr.msra.gmra.mxu1 %vm879_vm7, %v9133_v61  ;;  %13161 = vst.msk [vmem:[%s15578_s9 + $0x60] sm:$0xff] %vm879_vm7, %v9133_v61  ;;  %v9132_v5 = vmul.f32 %v14696_v62, %v14692_v52 }
0x4686   :  { %14217 = vmatpush3.xpose.msk.msra.mxu1 %vm879_vm7, %v9372_v63  ;;  %14218 = vmatprep.mubr.msk.f32.mxu1 %vm15344_vm6, %v15343_v9  ;;  %v9448_v11 = vpop.permute.xlu1 %9447 }
0x4687   :  { %14204 = vmatmul.mubr.msk.f32.vlgmr.msra.gmra.mxu0 %vm879_vm7, %v9132_v5  ;;  %13157 = vst.msk [vmem:[%s15578_s9 + $0x40] sm:$0xff] %vm879_vm7, %v9132_v5  ;;  %14226 = vmatprep.subr.mxu1 %v15343_v9 }
0x4688   :  { %14212 = vmatpush3.msra.mxu0 %v13118_v45 }
0x4689   :  { %14219 = vmatmul.mubr.msk.f32.vlgmr.msra.gmra.mxu1 %vm879_vm7, %v9370_v21  ;;  %14221 = vmatprep.subr.mxu0 %v15343_v9 }
0x468a   :  { %14228 = vmatprep.mubr.msk.f32.mxu1 %vm15344_vm6, %v15343_v9 }
0x4745   :  { %v9282_v1 = vpop.f32.mrf.mxu1 }
0x4747   :  { %v9206_v3 = vpop.f32.mrf.mxu0  ;;  %v14210_v4 = vpop.f32.mrf.mxu1 }
0x4748   :  { %14213 = vmatprep.mubr.msk.f32.mxu0 %vm879_vm7, %v9206_v3 }
0x4749   :  { %v14205_v6 = vpop.f32.mrf.mxu0  ;;  %14214 = vmatmul.mubr.msk.f32.vlgmr.msra.gmra.mxu0 %vm879_vm7, %v9282_v1  ;;  %v9443_v8 = vpop.f32.mrf.mxu1 }
0x474a   :  { %v9525_v51 = vsel %vm16261_vm5, -1e+09, %v9443_v8  ;;  %14222 = vmatpush3.xpose.msk.msra.mxu0 %vm879_vm7, %v9450_v2  ;;  %14223 = vmatprep.mubr.msk.f32.mxu0 %vm15344_vm6, %v15343_v9 }
0x474b   :  { %v9527_v34 = vsel %vm879_vm7, %v9525_v51, -inf  ;;  %v14220_v10 = vpop.f32.mrf.mxu1  ;;  %14231 = vmatprep.subr.mxu0 %v15343_v9 }
0x474c   :  { %9528 = vmax.xlane.f32.xlu0 %v9527_v34 }
0x474d   :  { %14224 = vmatmul.mubr.msk.f32.vlgmr.msra.gmra.mxu0 %vm879_vm7, %v9448_v11 }
0x474e   :  { %14233 = vmatprep.mubr.msk.f32.mxu0 %vm15344_vm6, %v15343_v9 }
0x47d5   :  { %v9529_v13 = vpop.xlane.xlu0 %9528 }
0x47d6   :  { %v9533_v14 = vsub.f32 %v9525_v51, %v9529_v13 }
0x47d8   :  { %v9535_v15 = vmul.f32 1.442695, %v9533_v14 }
0x47da   :  { %14697 = vpow2.f32 %v9535_v15 }
0x47e7   :  { %v14698_v24 = vpop.eup %14697 }
0x47e8   :  { %v9539_v17 = vsel %vm879_vm7, %v14698_v24, 0.0 }
0x47e9   :  { %9540 = vadd.xlane.f32.xlu0 %v9539_v17 }
0x4809   :  { %v14215_v23 = vpop.f32.mrf.mxu0 }
0x480a   :  { %v16761_v25 = vadd.f32 %v14215_v23, %v8955_v19 }
0x480b   :  { %v9358_v27 = vpop.f32.mrf.mxu0 }
0x480c   :  { %v16764_v30 = vadd.f32 %v9358_v27, %v8954_v26  ;;  %v13120_v26 = vld [vmem:[%s17191_s19 + $0x30] sm:$0xff] }
0x480d   :  { %v9521_v36 = vpop.f32.mrf.mxu0 }
0x480e   :  { %v9526_v54 = vsel %vm16268_vm9, -1e+09, %v9521_v36 }
0x480f   :  { %v9530_v37 = vsel %vm879_vm7, %v9526_v54, -inf  ;;  %v14225_v33 = vpop.f32.mrf.mxu0 }
0x4810   :  { %9531 = vmax.xlane.f32.xlu1 %v9530_v37 }
0x4821   :  { %9549 = vrot.lane.b32.xlu1 %v16693_v32, %s15350_s6 }
0x4825   :  { %9786 = vrot.lane.b32.xlu1 %v16693_v32, %s15351_s25 }
0x4829   :  { %9864 = vrot.lane.b32.xlu1 %v16691_v35, %s15351_s25 }
0x482d   :  { %9862 = vrot.lane.b32.xlu1 %v16691_v35, %s15352_s18 }
0x4872   :  { %v9541_v16 = vpop.xlane.xlu0 %9540 }
0x4873   :  { %14699 = vrcp.f32 %v9541_v16 }
0x4880   :  { %v14700_v12 = vpop.eup %14699 }
0x4881   :  { %v9547_v38 = vmul.f32 %v14700_v12, %v14698_v24 }
0x4883   :  { %13158 = vst.msk [vmem:[%s15578_s9 + $0x48] sm:$0xff] %vm879_vm7, %v9547_v38 }
0x4899   :  { %v9532_v39 = vpop.xlane.xlu1 %9531 }
0x489a   :  { %v9534_v42 = vsub.f32 %v9526_v54, %v9532_v39 }
0x489c   :  { %v9537_v43 = vmul.f32 1.442695, %v9534_v42 }
0x489d   :  { %v9550_v46 = vpop.permute.xlu1 %9549 }
0x489e   :  { %14701 = vpow2.f32 %v9537_v43  ;;  %14227 = vmatpush3.msra.mxu1 %v9550_v46 }
0x489f   :  { %14229 = vmatmul.mubr.msk.f32.vlgmr.msra.gmra.mxu1 %vm879_vm7, %v9547_v38  ;;  %14236 = vmatprep.subr.mxu1 %v13119_v29 }
0x48a0   :  { %14237 = vmatpush3.msra.mxu1 %v13119_v29 }
0x48a1   :  { %14246 = vmatprep.subr.mxu1 %v15343_v9  ;;  %v9787_v31 = vpop.permute.xlu1 %9786 }
0x48a5   :  { %v9865_v56 = vpop.permute.xlu1 %9864 }
0x48a9   :  { %v9863_v59 = vpop.permute.xlu1 %9862 }
0x48ab   :  { %v14702_v41 = vpop.eup %14701 }
0x48ac   :  { %v9542_v28 = vsel %vm879_vm7, %v14702_v41, 0.0 }
0x48ad   :  { %9543 = vadd.xlane.f32.xlu0 %v9542_v28 }
0x48c3   :  { %9625 = vrot.lane.b32.xlu0 %v16691_v35, %s15350_s6 }
0x48c7   :  { %9784 = vrot.lane.b32.xlu0 %v16693_v32, %s15352_s18 }
0x4936   :  { %v9544_v7 = vpop.xlane.xlu0 %9543 }
0x4937   :  { %14703 = vrcp.f32 %v9544_v7 }
0x493a   :  { %v9626_v40 = vpop.permute.xlu0 %9625 }
0x493b   :  { %14232 = vmatpush3.msra.mxu0 %v9626_v40 }
0x493c   :  { %14241 = vmatprep.subr.mxu0 %v15343_v9 }
0x493e   :  { %v9785_v49 = vpop.permute.xlu0 %9784 }
0x4944   :  { %v14704_v47 = vpop.eup %14703 }
0x4945   :  { %v9548_v48 = vmul.f32 %v14704_v47, %v14702_v41 }
0x4947   :  { %14234 = vmatmul.mubr.msk.f32.vlgmr.msra.gmra.mxu0 %vm879_vm7, %v9548_v48  ;;  %13162 = vst.msk [vmem:[%s15578_s9 + $0x68] sm:$0xff] %vm879_vm7, %v9548_v48 }
0x4948   :  { %14242 = vmatpush3.xpose.msk.msra.mxu0 %vm879_vm7, %v9787_v31  ;;  %14243 = vmatprep.mubr.msk.f32.mxu0 %vm15344_vm6, %v15343_v9 }
0x4949   :  { %14251 = vmatprep.subr.mxu0 %v15343_v9 }
0x494b   :  { %14244 = vmatmul.mubr.msk.f32.vlgmr.msra.gmra.mxu0 %vm879_vm7, %v9785_v49 }
0x494c   :  { %14253 = vmatprep.mubr.msk.f32.mxu0 %vm15344_vm6, %v15343_v9 }
0x495f   :  { %v9621_v52 = vpop.f32.mrf.mxu1 }
0x4960   :  { %14238 = vmatprep.mubr.msk.f32.mxu1 %vm879_vm7, %v9621_v52 }
0x4961   :  { %v14230_v55 = vpop.f32.mrf.mxu1 }
0x4a07   :  { %v9697_v58 = vpop.f32.mrf.mxu0 }
0x4a08   :  { %14239 = vmatmul.mubr.msk.f32.vlgmr.msra.gmra.mxu1 %vm879_vm7, %v9697_v58 }
0x4a09   :  { %14247 = vmatpush3.xpose.msk.msra.mxu1 %vm879_vm7, %v9865_v56  ;;  %v14235_v22 = vpop.f32.mrf.mxu0  ;;  %14248 = vmatprep.mubr.msk.f32.mxu1 %vm15344_vm6, %v15343_v9 }
0x4a0a   :  { %14256 = vmatprep.subr.mxu1 %v15343_v9 }
0x4a0b   :  { %v9858_v60 = vpop.f32.mrf.mxu0 }
0x4a0c   :  { %v9940_v61 = vsel %vm16261_vm5, -1e+09, %v9858_v60  ;;  %14249 = vmatmul.mubr.msk.f32.vlgmr.msra.gmra.mxu1 %vm879_vm7, %v9863_v59 }
0x4a0d   :  { %v9942_v62 = vsel %vm879_vm7, %v9940_v61, -inf  ;;  %v14245_v63 = vpop.f32.mrf.mxu0  ;;  %14258 = vmatprep.mubr.msk.f32.mxu1 %vm15344_vm6, %v15343_v9 }
0x4a0e   :  { %9943 = vmax.xlane.f32.xlu0 %v9942_v62 }
0x4a97   :  { %v9944_v5 = vpop.xlane.xlu0 %9943 }
0x4a98   :  { %v9948_v21 = vsub.f32 %v9940_v61, %v9944_v5 }
0x4a9a   :  { %v9950_v45 = vmul.f32 1.442695, %v9948_v21 }
0x4a9c   :  { %14705 = vpow2.f32 %v9950_v45 }
0x4aa9   :  { %v14706_v1 = vpop.eup %14705 }
0x4aaa   :  { %v9954_v2 = vsel %vm879_vm7, %v14706_v1, 0.0 }
0x4aab   :  { %9955 = vadd.xlane.f32.xlu0 %v9954_v2 }
0x4ac8   :  { %v14240_v3 = vpop.f32.mrf.mxu1 }
0x4ac9   :  { %v16812_v4 = vadd.f32 %v14240_v3, %v16761_v25 }
0x4aca   :  { %v9773_v6 = vpop.f32.mrf.mxu1 }
0x4acb   :  { %v16815_v8 = vadd.f32 %v9773_v6, %v16764_v30 }
0x4acc   :  { %v9936_v51 = vpop.f32.mrf.mxu1 }
0x4acd   :  { %v9941_v34 = vsel %vm16268_vm9, -1e+09, %v9936_v51 }
0x4ace   :  { %v9945_v10 = vsel %vm879_vm7, %v9941_v34, -inf  ;;  %v14250_v11 = vpop.f32.mrf.mxu1 }
0x4acf   :  { %9946 = vmax.xlane.f32.xlu1 %v9945_v10 }
0x4ae0   :  { %9964 = vrot.lane.b32.xlu1 %v16693_v32, %s15353_s21 }
0x4ae4   :  { %10201 = vrot.lane.b32.xlu1 %v16693_v32, %s15354_s8 }
0x4ae8   :  { %10279 = vrot.lane.b32.xlu1 %v16691_v35, %s15354_s8 }
0x4aec   :  { %10277 = vrot.lane.b32.xlu1 %v16691_v35, %s15355_s22 }
0x4b34   :  { %v9956_v13 = vpop.xlane.xlu0 %9955 }
0x4b35   :  { %14707 = vrcp.f32 %v9956_v13 }
0x4b42   :  { %v14708_v14 = vpop.eup %14707 }
0x4b43   :  { %v9962_v15 = vmul.f32 %v14708_v14, %v14706_v1 }
0x4b45   :  { %13159 = vst.msk [vmem:[%s15578_s9 + $0x50] sm:$0xff] %vm879_vm7, %v9962_v15 }
0x4b58   :  { %v9947_v24 = vpop.xlane.xlu1 %9946 }
0x4b59   :  { %v9949_v17 = vsub.f32 %v9941_v34, %v9947_v24 }
0x4b5b   :  { %v9952_v50 = vmul.f32 1.442695, %v9949_v17 }
0x4b5c   :  { %v9965_v19 = vpop.permute.xlu1 %9964 }
0x4b5d   :  { %14709 = vpow2.f32 %v9952_v50  ;;  %14252 = vmatpush3.msra.mxu0 %v9965_v19 }
0x4b5e   :  { %14254 = vmatmul.mubr.msk.f32.vlgmr.msra.gmra.mxu0 %vm879_vm7, %v9962_v15  ;;  %14261 = vmatprep.subr.mxu0 %v13120_v26 }
0x4b5f   :  { %14262 = vmatpush3.msra.mxu0 %v13120_v26 }
0x4b60   :  { %14271 = vmatprep.subr.mxu0 %v15343_v9  ;;  %v10202_v37 = vpop.permute.xlu1 %10201 }
0x4b64   :  { %v10280_v38 = vpop.permute.xlu1 %10279 }
0x4b68   :  { %v10278_v43 = vpop.permute.xlu1 %10277 }
0x4b6a   :  { %v14710_v23 = vpop.eup %14709 }
0x4b6b   :  { %v9957_v25 = vsel %vm879_vm7, %v14710_v23, 0.0 }
0x4b6c   :  { %9958 = vadd.xlane.f32.xlu0 %v9957_v25 }
0x4b82   :  { %10040 = vrot.lane.b32.xlu0 %v16691_v35, %s15353_s21 }
0x4b86   :  { %10199 = vrot.lane.b32.xlu0 %v16693_v32, %s15355_s22 }
0x4bf5   :  { %v9959_v27 = vpop.xlane.xlu0 %9958 }
0x4bf6   :  { %14711 = vrcp.f32 %v9959_v27 }
0x4bf9   :  { %v10041_v30 = vpop.permute.xlu0 %10040 }
0x4bfa   :  { %14257 = vmatpush3.msra.mxu1 %v10041_v30 }
0x4bfb   :  { %14266 = vmatprep.subr.mxu1 %v15343_v9 }
0x4bfd   :  { %v10200_v33 = vpop.permute.xlu0 %10199 }
0x4c03   :  { %v14712_v36 = vpop.eup %14711 }
0x4c04   :  { %v9963_v54 = vmul.f32 %v14712_v36, %v14710_v23 }
0x4c06   :  { %14259 = vmatmul.mubr.msk.f32.vlgmr.msra.gmra.mxu1 %vm879_vm7, %v9963_v54  ;;  %13163 = vst.msk [vmem:[%s15578_s9 + $0x70] sm:$0xff] %vm879_vm7, %v9963_v54 }
0x4c07   :  { %14267 = vmatpush3.xpose.msk.msra.mxu1 %vm879_vm7, %v10202_v37  ;;  %14268 = vmatprep.mubr.msk.f32.mxu1 %vm15344_vm6, %v15343_v9  ;;  %v13168_v37 = vld [vmem:[%s17192_s30 + $0x38] sm:$0xff] }
0x4c08   :  { %14276 = vmatprep.subr.mxu1 %v15343_v9 }
0x4c0a   :  { %14269 = vmatmul.mubr.msk.f32.vlgmr.msra.gmra.mxu1 %vm879_vm7, %v10200_v33  ;;  %v13167_v33 = vld [vmem:[%s17192_s30 + $0x30] sm:$0xff] }
0x4c0b   :  { %14278 = vmatprep.mubr.msk.f32.mxu1 %vm15344_vm6, %v15343_v9 }
0x4c1e   :  { %v10036_v16 = vpop.f32.mrf.mxu0 }
0x4c1f   :  { %14263 = vmatprep.mubr.msk.f32.mxu0 %vm879_vm7, %v10036_v16  ;;  %v13166_v16 = vld [vmem:[%s17192_s30 + $0x28] sm:$0xff] }
0x4c20   :  { %v14255_v12 = vpop.f32.mrf.mxu0 }
0x4c21   :  { %v13165_v12 = vld [vmem:[%s17192_s30 + $0x20] sm:$0xff] }
0x4cc6   :  { %v10112_v39 = vpop.f32.mrf.mxu1 }
0x4cc7   :  { %14264 = vmatmul.mubr.msk.f32.vlgmr.msra.gmra.mxu0 %vm879_vm7, %v10112_v39 }
0x4cc8   :  { %14272 = vmatpush3.xpose.msk.msra.mxu0 %vm879_vm7, %v10280_v38  ;;  %v14260_v42 = vpop.f32.mrf.mxu1  ;;  %14273 = vmatprep.mubr.msk.f32.mxu0 %vm15344_vm6, %v15343_v9 }
0x4cc9   :  { %14281 = vmatprep.subr.mxu0 %v15343_v9 }
0x4cca   :  { %v10273_v46 = vpop.f32.mrf.mxu1 }
0x4ccb   :  { %v10355_v41 = vsel %vm16261_vm5, -1e+09, %v10273_v46  ;;  %14274 = vmatmul.mubr.msk.f32.vlgmr.msra.gmra.mxu0 %vm879_vm7, %v10278_v43 }
0x4ccc   :  { %v10357_v28 = vsel %vm879_vm7, %v10355_v41, -inf  ;;  %v14270_v29 = vpop.f32.mrf.mxu1  ;;  %14283 = vmatprep.mubr.msk.f32.mxu0 %vm15344_vm6, %v15343_v9 }
0x4ccd   :  { %10358 = vmax.xlane.f32.xlu0 %v10357_v28 }
0x4d56   :  { %v10359_v7 = vpop.xlane.xlu0 %10358 }
0x4d57   :  { %v10363_v40 = vsub.f32 %v10355_v41, %v10359_v7  ;;  %v13155_v7 = vld [vmem:[#allocation20 + $0x1] ss:$0 sm:$0xff] }
0x4d59   :  { %v10365_v47 = vmul.f32 1.442695, %v10363_v40 }
0x4d5b   :  { %14713 = vpow2.f32 %v10365_v47 }
0x4d68   :  { %v14714_v48 = vpop.eup %14713 }
0x4d69   :  { %v10369_v31 = vsel %vm879_vm7, %v14714_v48, 0.0 }
0x4d6a   :  { %10370 = vadd.xlane.f32.xlu0 %v10369_v31 }
0x4d87   :  { %v14265_v44 = vpop.f32.mrf.mxu0 }
0x4d88   :  { %v10198_v49 = vadd.f32 %v14265_v44, %v16812_v4  ;;  %v13156_v44 = vld [vmem:[#allocation22 + $0x1] ss:$0 sm:$0xff] }
0x4d89   :  { %v10188_v52 = vpop.f32.mrf.mxu0 }
0x4d8a   :  { %v10197_v55 = vadd.f32 %v10188_v52, %v16815_v8 }
0x4d8b   :  { %v10351_v56 = vpop.f32.mrf.mxu0 }
0x4d8c   :  { %v10356_v58 = vsel %vm16268_vm9, -1e+09, %v10351_v56 }
0x4d8d   :  { %v10360_v22 = vsel %vm879_vm7, %v10356_v58, -inf  ;;  %v14275_v59 = vpop.f32.mrf.mxu0 }
0x4d8e   :  { %10361 = vmax.xlane.f32.xlu1 %v10360_v22 }
0x4d9f   :  { %10379 = vrot.lane.b32.xlu1 %v16693_v32, %s15356_s23  ;;  %v13121_v32 = vld [vmem:[%s17191_s19 + $0x38] sm:$0xff] }
0x4df3   :  { %v10371_v60 = vpop.xlane.xlu0 %10370 }
0x4df4   :  { %14715 = vrcp.f32 %v10371_v60 }
0x4e01   :  { %v14716_v61 = vpop.eup %14715 }
0x4e02   :  { %v10377_v62 = vmul.f32 %v14716_v61, %v14714_v48 }
0x4e04   :  { %13160 = vst.msk [vmem:[%s15578_s9 + $0x58] sm:$0xff] %vm879_vm7, %v10377_v62 }
0x4e17   :  { %v10362_v63 = vpop.xlane.xlu1 %10361 }
0x4e18   :  { %v10364_v5 = vsub.f32 %v10356_v58, %v10362_v63  ;;  %v13169_v58 = vld [vmem:[#allocation23 + $0x1] ss:$0 sm:$0xff] }
0x4e1a   :  { %v10367_v21 = vmul.f32 1.442695, %v10364_v5 }
0x4e1b   :  { %v10380_v45 = vpop.permute.xlu1 %10379 }
0x4e1c   :  { %14717 = vpow2.f32 %v10367_v21  ;;  %14277 = vmatpush3.msra.mxu1 %v10380_v45 }
0x4e1d   :  { %14279 = vmatmul.mubr.msk.f32.vlgmr.msra.gmra.mxu1 %vm879_vm7, %v10377_v62  ;;  %14286 = vmatprep.subr.mxu1 %v13121_v32 }
0x4e1e   :  { %14287 = vmatpush3.msra.mxu1 %v13121_v32 }
0x4e1f   :  { %14302 = vmatprep.subr.mxu1 %v15343_v9 }
0x4e29   :  { %v14718_v0 = vpop.eup %14717 }
0x4e2a   :  { %v10372_v1 = vsel %vm879_vm7, %v14718_v0, 0.0 }
0x4e2b   :  { %10373 = vadd.xlane.f32.xlu0 %v10372_v1 }
0x4e41   :  { %10455 = vrot.lane.b32.xlu0 %v16691_v35, %s15356_s23 }
0x4eb4   :  { %v10374_v2 = vpop.xlane.xlu0 %10373 }
0x4eb5   :  { %14719 = vrcp.f32 %v10374_v2 }
0x4eb8   :  { %v10456_v3 = vpop.permute.xlu0 %10455 }
0x4eb9   :  { %14282 = vmatpush3.msra.mxu0 %v10456_v3 }
0x4eba   :  { %14291 = vmatprep.subr.mxu0 %v13168_v37 }
0x4ec2   :  { %v14720_v4 = vpop.eup %14719 }
0x4ec3   :  { %v10378_v6 = vmul.f32 %v14720_v4, %v14718_v0 }
0x4ec5   :  { %13164 = vst.msk [vmem:[%s15578_s9 + $0x78] sm:$0xff] %vm879_vm7, %v10378_v6  ;;  %14284 = vmatmul.mubr.msk.f32.vlgmr.msra.gmra.mxu0 %vm879_vm7, %v10378_v6  ;;  %s15357_s9 = smov 32  }
0x4ec6   :  { %14292 = vmatpush3.msra.mxu0 %v13168_v37 }
0x4ec7   :  { %14293 = vmatprep.subr.mxu0 %v13167_v33 }
0x4ec8   :  { %14294 = vmatpush3.msra.mxu0 %v13167_v33 }
0x4ec9   :  { %14295 = vmatprep.subr.mxu0 %v13166_v16 }
0x4eca   :  { %14296 = vmatpush3.msra.mxu0 %v13166_v16 }
0x4ecb   :  { %14297 = vmatprep.subr.mxu0 %v13165_v12 }
0x4ecc   :  { %14298 = vmatpush3.msra.mxu0 %v13165_v12 }
0x4ecd   :  { %14312 = vmatprep.subr.mxu0 %v15343_v9 }
0x4edd   :  { %v10451_v8 = vpop.f32.mrf.mxu1 }
0x4ede   :  { %14288 = vmatprep.mubr.msk.f32.mxu1 %vm879_vm7, %v10451_v8 }
0x4edf   :  { %v14280_v51 = vpop.f32.mrf.mxu1 }
0x4f85   :  { %v10527_v35 = vpop.f32.mrf.mxu0 }
0x4f86   :  { %14289 = vmatmul.mubr.msk.f32.vlgmr.msra.gmra.mxu1 %vm879_vm7, %v10527_v35 }
0x4f87   :  { %v14285_v34 = vpop.f32.mrf.mxu0  ;;  %14304 = vmatprep.mubr.msk.f32.mxu1 %vm15344_vm6, %v15343_v9 }
0x5046   :  { %v14290_v10 = vpop.f32.mrf.mxu1 }
0x5047   :  { %v10613_v11 = vadd.f32 %v14290_v10, %v10198_v49 }
0x5048   :  { %v10603_v13 = vpop.f32.mrf.mxu1 }
0x5049   :  { %v10612_v14 = vadd.f32 %v10603_v13, %v10197_v55  ;;  %v10617_v15 = vsel %vm779_vm3, %v10613_v11, 0.0 }
0x504a   :  { %10618 = vadd.xlane.f32.xlu0 %v10617_v15 }
0x504b   :  { %v10614_v24 = vsel %vm779_vm3, %v10612_v14, 0.0 }
0x504c   :  { %10615 = vadd.xlane.f32.xlu1 %v10614_v24 }
0x50d3   :  { %v10619_v17 = vpop.xlane.xlu0 %10618 }
0x50d4   :  { %v10621_v50 = vmul.f32 0.03125, %v10619_v17 }
0x50d5   :  { %v10616_v19 = vpop.xlane.xlu1 %10615 }
0x50d6   :  { %v10623_v23 = vsub.f32 %v10613_v11, %v10621_v50  ;;  %v10620_v25 = vmul.f32 0.03125, %v10616_v19 }
0x50d8   :  { %v10622_v26 = vsub.f32 %v10612_v14, %v10620_v25  ;;  %v10625_v27 = vmul.f32 %v10623_v23, %v10623_v23 }
0x50da   :  { %v10629_v30 = vsel %vm779_vm3, %v10625_v27, 0.0  ;;  %v10624_v36 = vmul.f32 %v10622_v26, %v10622_v26  ;;  %v13172_v27 = vld [vmem:[%s17193_s16 + $0x20] sm:$0xff] }
0x50db   :  { %10630 = vadd.xlane.f32.xlu0 %v10629_v30 }
0x50dc   :  { %v10626_v54 = vsel %vm779_vm3, %v10624_v36, 0.0 }
0x50dd   :  { %10627 = vadd.xlane.f32.xlu1 %v10626_v54 }
0x50ee   :  { %10778 = vrot.lane.b32.xlu1 %v16441_v20, %s15347_s11 }
0x50f1   :  { %10855 = vrot.lane.b32.xlu0 %v16226_v18, %s15347_s11 }
0x5164   :  { %v10631_v38 = vpop.xlane.xlu0 %10630 }
0x5165   :  { %v10633_v39 = vmul.f32 0.03125, %v10631_v38 }
0x5166   :  { %v10628_v42 = vpop.xlane.xlu1 %10627 }
0x5167   :  { %v10635_v43 = vadd.f32 1e-05, %v10633_v39  ;;  %v10632_v46 = vmul.f32 0.03125, %v10628_v42 }
0x5168   :  { %v10856_v60 = vpop.permute.xlu0 %10855 }
0x5169   :  { %14721 = vrsqrt.f32 %v10635_v43  ;;  %v10634_v41 = vadd.f32 1e-05, %v10632_v46 }
0x516a   :  { %v10779_v28 = vpop.permute.xlu1 %10778 }
0x516b   :  { %14723 = vrsqrt.f32 %v10634_v41  ;;  %14303 = vmatpush3.xpose.msk.msra.mxu1 %vm879_vm7, %v10779_v28 }
0x516c   :  { %14307 = vmatprep.subr.mxu1 %v15343_v9 }
0x5176   :  { %v14722_v29 = vpop.eup %14721 }
0x5177   :  { %v10639_v40 = vmul.f32 %v14722_v29, %v10623_v23 }
0x5178   :  { %v14724_v47 = vpop.eup %14723 }
0x5179   :  { %v10638_v48 = vmul.f32 %v14724_v47, %v10622_v26  ;;  %v10647_v31 = vmul.f32 %v13155_v7, %v10639_v40 }
0x517b   :  { %v10646_v49 = vmul.f32 %v13155_v7, %v10638_v48  ;;  %v16901_v55 = vadd.f32 %v13156_v44, %v10647_v31  ;;  %v13176_v7 = vld [vmem:[#allocation26 + $0x1] ss:$0 sm:$0xff] }
0x517d   :  { %v16899_v52 = vadd.f32 %v13156_v44, %v10646_v49  ;;  %v10777_v40 = vadd.f32 %v13176_v7, %v16901_v55 }
0x517f   :  { %14299 = vmatprep.mubr.msk.f32.mxu0 %vm779_vm3, %v16899_v52  ;;  %v10776_v31 = vadd.f32 %v13176_v7, %v16899_v52 }
0x5180   :  { %14300 = vmatmul.mubr.msk.f32.vlgmr.msra.gmra.mxu0 %vm779_vm3, %v16901_v55 }
0x5181   :  { %14314 = vmatprep.mubr.msk.f32.mxu0 %vm15344_vm6, %v15343_v9 }
0x5240   :  { %v14301_v56 = vpop.f32.mrf.mxu0 }
0x5241   :  { %v16916_v61 = vadd.f32 %v14301_v56, %v13169_v58 }
0x5242   :  { %v10750_v22 = vpop.f32.mrf.mxu0 }
0x5243   :  { %v16909_v59 = vadd.f32 %v13169_v58, %v10750_v22 }
0x5245   :  { %14305 = vmatmul.mubr.msk.f32.vlgmr.msra.gmra.mxu1 %vm879_vm7, %v16909_v59 }
0x5246   :  { %14308 = vmatpush3.xpose.msk.msra.mxu1 %vm879_vm7, %v10856_v60  ;;  %14309 = vmatprep.mubr.msk.f32.mxu1 %vm15344_vm6, %v15343_v9 }
0x5247   :  { %14317 = vmatprep.subr.mxu1 %v15343_v9 }
0x5249   :  { %14310 = vmatmul.mubr.msk.f32.vlgmr.msra.gmra.mxu1 %vm879_vm7, %v16916_v61 }
0x524a   :  { %14319 = vmatprep.mubr.msk.f32.mxu1 %vm15344_vm6, %v15343_v9 }
0x5305   :  { %v10851_v62 = vpop.f32.mrf.mxu1 }
0x5306   :  { %v10932_v63 = vsel %vm15757_vm11, -1e+09, %v10851_v62 }
0x5307   :  { %v10934_v5 = vsel %vm879_vm7, %v10932_v63, -inf  ;;  %v14306_v21 = vpop.f32.mrf.mxu1 }
0x5308   :  { %10935 = vmax.xlane.f32.xlu1 %v10934_v5 }
0x5309   :  { %v10928_v45 = vpop.f32.mrf.mxu1 }
0x530a   :  { %v10933_v0 = vsel %vm15765_vm12, -1e+09, %v10928_v45 }
0x530b   :  { %v10937_v1 = vsel %vm879_vm7, %v10933_v0, -inf  ;;  %v14311_v32 = vpop.f32.mrf.mxu1 }
0x530c   :  { %10938 = vmax.xlane.f32.xlu0 %v10937_v1  ;;  %v13173_v32 = vld [vmem:[%s17193_s16 + $0x28] sm:$0xff] }
0x5391   :  { %v10936_v2 = vpop.xlane.xlu1 %10935 }
0x5392   :  { %v10940_v3 = vsub.f32 %v10932_v63, %v10936_v2 }
0x5394   :  { %v10942_v4 = vmul.f32 1.442695, %v10940_v3 }
0x5395   :  { %v10939_v6 = vpop.xlane.xlu0 %10938 }
0x5396   :  { %14725 = vpow2.f32 %v10942_v4  ;;  %v10941_v8 = vsub.f32 %v10933_v0, %v10939_v6 }
0x5398   :  { %v10944_v51 = vmul.f32 1.442695, %v10941_v8 }
0x539a   :  { %14727 = vpow2.f32 %v10944_v51 }
0x53a3   :  { %v14726_v35 = vpop.eup %14725 }
0x53a4   :  { %v10946_v34 = vsel %vm879_vm7, %v14726_v35, 0.0 }
0x53a5   :  { %10947 = vadd.xlane.f32.xlu1 %v10946_v34 }
0x53a7   :  { %v14728_v10 = vpop.eup %14727 }
0x53a8   :  { %v10949_v11 = vsel %vm879_vm7, %v14728_v10, 0.0 }
0x53a9   :  { %10950 = vadd.xlane.f32.xlu0 %v10949_v11 }
0x53b6   :  { %10956 = vrot.lane.b32.xlu1 %v16441_v20, %s15357_s9 }
0x53ba   :  { %11193 = vrot.lane.b32.xlu1 %v16441_v20, %s15350_s6 }
0x53be   :  { %11271 = vrot.lane.b32.xlu1 %v16226_v18, %s15350_s6 }
0x53bf   :  { %11032 = vrot.lane.b32.xlu0 %v16226_v18, %s15357_s9 }
0x53c2   :  { %11269 = vrot.lane.b32.xlu1 %v16916_v61, %s15349_s4 }
0x53c3   :  { %11191 = vrot.lane.b32.xlu0 %v16909_v59, %s15349_s4 }
0x542e   :  { %v10948_v13 = vpop.xlane.xlu1 %10947 }
0x542f   :  { %14729 = vrcp.f32 %v10948_v13 }
0x5432   :  { %v10957_v14 = vpop.permute.xlu1 %10956  ;;  %v10951_v15 = vpop.xlane.xlu0 %10950 }
0x5433   :  { %14731 = vrcp.f32 %v10951_v15  ;;  %14313 = vmatpush3.msra.mxu0 %v10957_v14 }
0x5434   :  { %14322 = vmatprep.subr.mxu0 %v13172_v27 }
0x5436   :  { %v11033_v24 = vpop.permute.xlu0 %11032  ;;  %v11194_v25 = vpop.permute.xlu1 %11193 }
0x5437   :  { %14318 = vmatpush3.msra.mxu1 %v11033_v24 }
0x5438   :  { %14327 = vmatprep.subr.mxu1 %v15343_v9 }
0x543a   :  { %v11192_v26 = vpop.permute.xlu0 %11191  ;;  %v11272_v36 = vpop.permute.xlu1 %11271 }
0x543c   :  { %v14730_v17 = vpop.eup %14729 }
0x543d   :  { %v10954_v50 = vmul.f32 %v14730_v17, %v14726_v35 }
0x543e   :  { %v11270_v16 = vpop.permute.xlu1 %11269 }
0x543f   :  { %13211 = vst.msk [vmem:[%s15583_s17 + $0x40] sm:$0xff] %vm879_vm7, %v10954_v50  ;;  %14315 = vmatmul.mubr.msk.f32.vlgmr.msra.gmra.mxu0 %vm879_vm7, %v10954_v50 }
0x5440   :  { %v14732_v19 = vpop.eup %14731  ;;  %14323 = vmatpush3.msra.mxu0 %v13172_v27 }
0x5441   :  { %v10955_v23 = vmul.f32 %v14732_v19, %v14728_v10  ;;  %14332 = vmatprep.subr.mxu0 %v15343_v9 }
0x5443   :  { %13215 = vst.msk [vmem:[%s15583_s17 + $0x60] sm:$0xff] %vm879_vm7, %v10955_v23  ;;  %14320 = vmatmul.mubr.msk.f32.vlgmr.msra.gmra.mxu1 %vm879_vm7, %v10955_v23 }
0x5444   :  { %14328 = vmatpush3.xpose.msk.msra.mxu1 %vm879_vm7, %v11194_v25  ;;  %14329 = vmatprep.mubr.msk.f32.mxu1 %vm15344_vm6, %v15343_v9 }
0x5445   :  { %14337 = vmatprep.subr.mxu1 %v15343_v9 }
0x5447   :  { %14330 = vmatmul.mubr.msk.f32.vlgmr.msra.gmra.mxu1 %vm879_vm7, %v11192_v26 }
0x5448   :  { %14339 = vmatprep.mubr.msk.f32.mxu1 %vm15344_vm6, %v15343_v9 }
0x54ff   :  { %v11028_v30 = vpop.f32.mrf.mxu0 }
0x5500   :  { %14324 = vmatprep.mubr.msk.f32.mxu0 %vm879_vm7, %v11028_v30 }
0x5501   :  { %v14316_v54 = vpop.f32.mrf.mxu0 }
0x5503   :  { %v11104_v37 = vpop.f32.mrf.mxu1 }
0x5504   :  { %14325 = vmatmul.mubr.msk.f32.vlgmr.msra.gmra.mxu0 %vm879_vm7, %v11104_v37 }
0x5505   :  { %14333 = vmatpush3.xpose.msk.msra.mxu0 %vm879_vm7, %v11272_v36  ;;  %v14321_v33 = vpop.f32.mrf.mxu1  ;;  %14334 = vmatprep.mubr.msk.f32.mxu0 %vm15344_vm6, %v15343_v9 }
0x5506   :  { %14342 = vmatprep.subr.mxu0 %v15343_v9 }
0x5507   :  { %v11265_v12 = vpop.f32.mrf.mxu1 }
0x5508   :  { %v11347_v38 = vsel %vm15757_vm11, -1e+09, %v11265_v12  ;;  %14335 = vmatmul.mubr.msk.f32.vlgmr.msra.gmra.mxu0 %vm879_vm7, %v11270_v16 }
0x5509   :  { %v11349_v39 = vsel %vm879_vm7, %v11347_v38, -inf  ;;  %v14331_v42 = vpop.f32.mrf.mxu1  ;;  %14344 = vmatprep.mubr.msk.f32.mxu0 %vm15344_vm6, %v15343_v9 }
0x550a   :  { %11350 = vmax.xlane.f32.xlu0 %v11349_v39 }
0x5593   :  { %v11351_v43 = vpop.xlane.xlu0 %11350 }
0x5594   :  { %v11355_v46 = vsub.f32 %v11347_v38, %v11351_v43 }
0x5596   :  { %v11357_v41 = vmul.f32 1.442695, %v11355_v46 }
0x5598   :  { %14733 = vpow2.f32 %v11357_v41 }
0x55a5   :  { %v14734_v28 = vpop.eup %14733 }
0x55a6   :  { %v11361_v29 = vsel %vm879_vm7, %v14734_v28, 0.0 }
0x55a7   :  { %11362 = vadd.xlane.f32.xlu0 %v11361_v29 }
0x55c4   :  { %v14326_v47 = vpop.f32.mrf.mxu0 }
0x55c5   :  { %v16971_v48 = vadd.f32 %v14326_v47, %v10777_v40 }
0x55c6   :  { %v11180_v44 = vpop.f32.mrf.mxu0 }
0x55c7   :  { %v16974_v49 = vadd.f32 %v11180_v44, %v10776_v31 }
0x55c8   :  { %v11343_v56 = vpop.f32.mrf.mxu0 }
0x55c9   :  { %v11348_v58 = vsel %vm15765_vm12, -1e+09, %v11343_v56 }
0x55ca   :  { %v11352_v22 = vsel %vm879_vm7, %v11348_v58, -inf  ;;  %v14336_v60 = vpop.f32.mrf.mxu0 }
0x55cb   :  { %11353 = vmax.xlane.f32.xlu1 %v11352_v22 }
0x55dc   :  { %11371 = vrot.lane.b32.xlu1 %v16441_v20, %s15358_s3 }
0x55e0   :  { %11608 = vrot.lane.b32.xlu1 %v16441_v20, %s15353_s21 }
0x55e4   :  { %11686 = vrot.lane.b32.xlu1 %v16226_v18, %s15353_s21 }
0x55e8   :  { %11684 = vrot.lane.b32.xlu1 %v16916_v61, %s15352_s18 }
0x5630   :  { %v11363_v52 = vpop.xlane.xlu0 %11362 }
0x5631   :  { %14735 = vrcp.f32 %v11363_v52 }
0x563e   :  { %v14736_v55 = vpop.eup %14735 }
0x563f   :  { %v11369_v62 = vmul.f32 %v14736_v55, %v14734_v28 }
0x5641   :  { %13212 = vst.msk [vmem:[%s15583_s17 + $0x48] sm:$0xff] %vm879_vm7, %v11369_v62 }
0x5654   :  { %v11354_v63 = vpop.xlane.xlu1 %11353 }
0x5655   :  { %v11356_v5 = vsub.f32 %v11348_v58, %v11354_v63 }
0x5657   :  { %v11359_v21 = vmul.f32 1.442695, %v11356_v5 }
0x5658   :  { %v11372_v45 = vpop.permute.xlu1 %11371 }
0x5659   :  { %14737 = vpow2.f32 %v11359_v21  ;;  %14338 = vmatpush3.msra.mxu1 %v11372_v45 }
0x565a   :  { %14340 = vmatmul.mubr.msk.f32.vlgmr.msra.gmra.mxu1 %vm879_vm7, %v11369_v62  ;;  %14347 = vmatprep.subr.mxu1 %v13173_v32 }
0x565b   :  { %14348 = vmatpush3.msra.mxu1 %v13173_v32 }
0x565c   :  { %14357 = vmatprep.subr.mxu1 %v15343_v9  ;;  %v11609_v8 = vpop.permute.xlu1 %11608 }
0x5660   :  { %v11687_v10 = vpop.permute.xlu1 %11686 }
0x5664   :  { %v11685_v14 = vpop.permute.xlu1 %11684 }
0x5666   :  { %v14738_v0 = vpop.eup %14737 }
0x5667   :  { %v11364_v1 = vsel %vm879_vm7, %v14738_v0, 0.0 }
0x5668   :  { %11365 = vadd.xlane.f32.xlu0 %v11364_v1 }
0x567e   :  { %11447 = vrot.lane.b32.xlu0 %v16226_v18, %s15358_s3 }
0x5682   :  { %11606 = vrot.lane.b32.xlu0 %v16909_v59, %s15352_s18 }
0x56f1   :  { %v11366_v2 = vpop.xlane.xlu0 %11365 }
0x56f2   :  { %14739 = vrcp.f32 %v11366_v2 }
0x56f5   :  { %v11448_v3 = vpop.permute.xlu0 %11447 }
0x56f6   :  { %14343 = vmatpush3.msra.mxu0 %v11448_v3 }
0x56f7   :  { %14352 = vmatprep.subr.mxu0 %v15343_v9 }
0x56f9   :  { %v11607_v51 = vpop.permute.xlu0 %11606 }
0x56ff   :  { %v14740_v4 = vpop.eup %14739 }
0x5700   :  { %v11370_v6 = vmul.f32 %v14740_v4, %v14738_v0 }
0x5702   :  { %13216 = vst.msk [vmem:[%s15583_s17 + $0x68] sm:$0xff] %vm879_vm7, %v11370_v6  ;;  %14345 = vmatmul.mubr.msk.f32.vlgmr.msra.gmra.mxu0 %vm879_vm7, %v11370_v6 }
0x5703   :  { %14353 = vmatpush3.xpose.msk.msra.mxu0 %vm879_vm7, %v11609_v8  ;;  %14354 = vmatprep.mubr.msk.f32.mxu0 %vm15344_vm6, %v15343_v9 }
0x5704   :  { %14362 = vmatprep.subr.mxu0 %v15343_v9 }
0x5706   :  { %14355 = vmatmul.mubr.msk.f32.vlgmr.msra.gmra.mxu0 %vm879_vm7, %v11607_v51 }
0x5707   :  { %14364 = vmatprep.mubr.msk.f32.mxu0 %vm15344_vm6, %v15343_v9 }
0x571a   :  { %v11443_v35 = vpop.f32.mrf.mxu1 }
0x571b   :  { %14349 = vmatprep.mubr.msk.f32.mxu1 %vm879_vm7, %v11443_v35 }
0x571c   :  { %v14341_v34 = vpop.f32.mrf.mxu1 }
0x57c2   :  { %v11519_v11 = vpop.f32.mrf.mxu0 }
0x57c3   :  { %14350 = vmatmul.mubr.msk.f32.vlgmr.msra.gmra.mxu1 %vm879_vm7, %v11519_v11 }
0x57c4   :  { %14358 = vmatpush3.xpose.msk.msra.mxu1 %vm879_vm7, %v11687_v10  ;;  %v14346_v13 = vpop.f32.mrf.mxu0  ;;  %14359 = vmatprep.mubr.msk.f32.mxu1 %vm15344_vm6, %v15343_v9 }
0x57c5   :  { %14367 = vmatprep.subr.mxu1 %v15343_v9 }
0x57c6   :  { %v11680_v15 = vpop.f32.mrf.mxu0 }
0x57c7   :  { %v11762_v24 = vsel %vm15757_vm11, -1e+09, %v11680_v15  ;;  %14360 = vmatmul.mubr.msk.f32.vlgmr.msra.gmra.mxu1 %vm879_vm7, %v11685_v14 }
0x57c8   :  { %v11764_v17 = vsel %vm879_vm7, %v11762_v24, -inf  ;;  %v14356_v50 = vpop.f32.mrf.mxu0  ;;  %14369 = vmatprep.mubr.msk.f32.mxu1 %vm15344_vm6, %v15343_v9 }
0x57c9   :  { %11765 = vmax.xlane.f32.xlu0 %v11764_v17 }
0x5852   :  { %v11766_v19 = vpop.xlane.xlu0 %11765 }
0x5853   :  { %v11770_v23 = vsub.f32 %v11762_v24, %v11766_v19 }
0x5855   :  { %v11772_v25 = vmul.f32 1.442695, %v11770_v23 }
0x5857   :  { %14741 = vpow2.f32 %v11772_v25 }
0x5864   :  { %v14742_v26 = vpop.eup %14741 }
0x5865   :  { %v11776_v27 = vsel %vm879_vm7, %v14742_v26, 0.0 }
0x5866   :  { %11777 = vadd.xlane.f32.xlu0 %v11776_v27 }
0x5883   :  { %v14351_v30 = vpop.f32.mrf.mxu1 }
0x5884   :  { %v17020_v36 = vadd.f32 %v14351_v30, %v16971_v48 }
0x5885   :  { %v11595_v54 = vpop.f32.mrf.mxu1 }
0x5886   :  { %v17023_v37 = vadd.f32 %v11595_v54, %v16974_v49 }
0x5887   :  { %v11758_v33 = vpop.f32.mrf.mxu1 }
0x5888   :  { %v11763_v16 = vsel %vm15765_vm12, -1e+09, %v11758_v33 }
0x5889   :  { %v11767_v12 = vsel %vm879_vm7, %v11763_v16, -inf  ;;  %v14361_v38 = vpop.f32.mrf.mxu1 }
0x588a   :  { %11768 = vmax.xlane.f32.xlu1 %v11767_v12 }
0x589b   :  { %11786 = vrot.lane.b32.xlu1 %v16441_v20, %s15320_s15 }
0x589f   :  { %12023 = vrot.lane.b32.xlu1 %v16441_v20, %s15356_s23 }
0x58a3   :  { %12101 = vrot.lane.b32.xlu1 %v16226_v18, %s15356_s23 }
0x58a7   :  { %12099 = vrot.lane.b32.xlu1 %v16916_v61, %s15355_s22  ;;  %v13174_v61 = vld [vmem:[%s17193_s16 + $0x30] sm:$0xff] }
0x58ef   :  { %v11778_v39 = vpop.xlane.xlu0 %11777 }
0x58f0   :  { %14743 = vrcp.f32 %v11778_v39 }
0x58fd   :  { %v14744_v42 = vpop.eup %14743 }
0x58fe   :  { %v11784_v43 = vmul.f32 %v14744_v42, %v14742_v26 }
0x5900   :  { %13213 = vst.msk [vmem:[%s15583_s17 + $0x50] sm:$0xff] %vm879_vm7, %v11784_v43 }
0x5913   :  { %v11769_v46 = vpop.xlane.xlu1 %11768 }
0x5914   :  { %v11771_v41 = vsub.f32 %v11763_v16, %v11769_v46 }
0x5916   :  { %v11774_v28 = vmul.f32 1.442695, %v11771_v41 }
0x5917   :  { %v11787_v29 = vpop.permute.xlu1 %11786 }
0x5918   :  { %14745 = vpow2.f32 %v11774_v28  ;;  %14363 = vmatpush3.msra.mxu0 %v11787_v29 }
0x5919   :  { %14365 = vmatmul.mubr.msk.f32.vlgmr.msra.gmra.mxu0 %vm879_vm7, %v11784_v43  ;;  %14372 = vmatprep.subr.mxu0 %v13174_v61 }
0x591a   :  { %14373 = vmatpush3.msra.mxu0 %v13174_v61  ;;  %v12491_v61 = vld [vmem:[#allocation31 + $0x38] sm:$0xff] }
0x591b   :  { %14382 = vmatprep.subr.mxu0 %v15343_v9  ;;  %v12024_v49 = vpop.permute.xlu1 %12023 }
0x591f   :  { %v12102_v22 = vpop.permute.xlu1 %12101 }
0x5923   :  { %v12100_v55 = vpop.permute.xlu1 %12099 }
0x5925   :  { %v14746_v7 = vpop.eup %14745 }
0x5926   :  { %v11779_v40 = vsel %vm879_vm7, %v14746_v7, 0.0 }
0x5927   :  { %11780 = vadd.xlane.f32.xlu0 %v11779_v40 }
0x593d   :  { %11862 = vrot.lane.b32.xlu0 %v16226_v18, %s15320_s15  ;;  %s15359_s15 = smov [#allocation38]  }
0x593e   :  { %s12821_s2 = sshll.u32 %s15359_s15, 4  ;;  %s12822_s2 = int_to_ptr.vmem [resolvable:$true] %s12821_s2 }
0x593f   :  { %s15226_s7 = scalar_lea.vmem %s12822_s2, 256  ;;  %p15231_p4 = scmp.lt.s32.totalorder %s12822_s2, %s12822_s2 }
0x5940   :  { %p15227_p3 = scmp.ne.s32.totalorder %s12822_s2, %s15226_s7  ;;  %p15232_p5 = scmp.lt.s32.totalorder %s15226_s7, %s15226_s7 }
0x5941   :  { %12021 = vrot.lane.b32.xlu0 %v16909_v59, %s15355_s22 }
0x5942   :  { %p15233_p6 = por %p15232_p5, %p15231_p4 }
0x5944   :  { %p15234_p7 = pnand %p15233_p6, %p15227_p3 }
0x59b0   :  { %v11781_v47 = vpop.xlane.xlu0 %11780 }
0x59b1   :  { %14747 = vrcp.f32 %v11781_v47  ;;  %v12490_v47 = vld [vmem:[#allocation31 + $0x30] sm:$0xff] }
0x59b4   :  { %v11863_v48 = vpop.permute.xlu0 %11862 }
0x59b5   :  { %14368 = vmatpush3.msra.mxu1 %v11863_v48  ;;  %v12489_v48 = vld [vmem:[#allocation31 + $0x28] sm:$0xff] }
0x59b6   :  { %14377 = vmatprep.subr.mxu1 %v15343_v9 }
0x59b8   :  { %v12022_v59 = vpop.permute.xlu0 %12021 }
0x59be   :  { %v14748_v31 = vpop.eup %14747 }
0x59bf   :  { %v11785_v44 = vmul.f32 %v14748_v31, %v14746_v7  ;;  %v12488_v31 = vld [vmem:[#allocation31 + $0x20] sm:$0xff] }
0x59c1   :  { %13217 = vst.msk [vmem:[%s15583_s17 + $0x70] sm:$0xff] %vm879_vm7, %v11785_v44  ;;  %14370 = vmatmul.mubr.msk.f32.vlgmr.msra.gmra.mxu1 %vm879_vm7, %v11785_v44  ;;  %v13226_v44 = vld [vmem:[%s17194_s13 + $0x78] sm:$0xff] }
0x59c2   :  { %14378 = vmatpush3.xpose.msk.msra.mxu1 %vm879_vm7, %v12024_v49  ;;  %14379 = vmatprep.mubr.msk.f32.mxu1 %vm15344_vm6, %v15343_v9  ;;  %v13225_v49 = vld [vmem:[%s17194_s13 + $0x70] sm:$0xff] }
0x59c3   :  { %14387 = vmatprep.subr.mxu1 %v15343_v9 }
0x59c5   :  { %14380 = vmatmul.mubr.msk.f32.vlgmr.msra.gmra.mxu1 %vm879_vm7, %v12022_v59  ;;  %v13224_v59 = vld [vmem:[%s17194_s13 + $0x68] sm:$0xff] }
0x59c6   :  { %14389 = vmatprep.mubr.msk.f32.mxu1 %vm15344_vm6, %v15343_v9 }
0x59d9   :  { %v11858_v56 = vpop.f32.mrf.mxu0 }
0x59da   :  { %14374 = vmatprep.mubr.msk.f32.mxu0 %vm879_vm7, %v11858_v56  ;;  %v13223_v56 = vld [vmem:[%s17194_s13 + $0x60] sm:$0xff] }
0x59db   :  { %v14366_v58 = vpop.f32.mrf.mxu0 }
0x5a81   :  { %v11934_v60 = vpop.f32.mrf.mxu1 }
0x5a82   :  { %14375 = vmatmul.mubr.msk.f32.vlgmr.msra.gmra.mxu0 %vm879_vm7, %v11934_v60 }
0x5a83   :  { %14383 = vmatpush3.xpose.msk.msra.mxu0 %vm879_vm7, %v12102_v22  ;;  %v14371_v52 = vpop.f32.mrf.mxu1  ;;  %14384 = vmatprep.mubr.msk.f32.mxu0 %vm15344_vm6, %v15343_v9 }
0x5a84   :  { %14392 = vmatprep.subr.mxu0 %v15343_v9 }
0x5a85   :  { %v12095_v62 = vpop.f32.mrf.mxu1 }
0x5a86   :  { %v12177_v63 = vsel %vm15757_vm11, -1e+09, %v12095_v62  ;;  %14385 = vmatmul.mubr.msk.f32.vlgmr.msra.gmra.mxu0 %vm879_vm7, %v12100_v55 }
0x5a87   :  { %v12179_v5 = vsel %vm879_vm7, %v12177_v63, -inf  ;;  %v14381_v21 = vpop.f32.mrf.mxu1  ;;  %14394 = vmatprep.mubr.msk.f32.mxu0 %vm15344_vm6, %v15343_v9 }
0x5a88   :  { %12180 = vmax.xlane.f32.xlu0 %v12179_v5  ;;  %v13209_v5 = vld [vmem:[#allocation28 + $0x1] ss:$0 sm:$0xff] }
0x5b11   :  { %v12181_v45 = vpop.xlane.xlu0 %12180 }
0x5b12   :  { %v12185_v0 = vsub.f32 %v12177_v63, %v12181_v45 }
0x5b14   :  { %v12187_v1 = vmul.f32 1.442695, %v12185_v0 }
0x5b16   :  { %14749 = vpow2.f32 %v12187_v1 }
0x5b23   :  { %v14750_v32 = vpop.eup %14749 }
0x5b24   :  { %v12191_v2 = vsel %vm879_vm7, %v14750_v32, 0.0 }
0x5b25   :  { %12192 = vadd.xlane.f32.xlu0 %v12191_v2 }
0x5b42   :  { %v14376_v53 = vpop.f32.mrf.mxu0 }
0x5b43   :  { %v12020_v3 = vadd.f32 %v14376_v53, %v17020_v36 }
0x5b44   :  { %v12010_v4 = vpop.f32.mrf.mxu0 }
0x5b45   :  { %v12019_v6 = vadd.f32 %v12010_v4, %v17023_v37  ;;  %v13222_v4 = vld [vmem:[%s17194_s13 + $0x58] sm:$0xff] }
0x5b46   :  { %v12173_v8 = vpop.f32.mrf.mxu0 }
0x5b47   :  { %v12178_v9 = vsel %vm15765_vm12, -1e+09, %v12173_v8  ;;  %v13220_v8 = vld [vmem:[%s17194_s13 + $0x48] sm:$0xff] }
0x5b48   :  { %v12182_v51 = vsel %vm879_vm7, %v12178_v9, -inf  ;;  %v14386_v35 = vpop.f32.mrf.mxu0 }
0x5b49   :  { %12183 = vmax.xlane.f32.xlu1 %v12182_v51  ;;  %v13227_v51 = vld [vmem:[#allocation32 + $0x1] ss:$0 sm:$0xff] }
0x5b5a   :  { %12201 = vrot.lane.b32.xlu1 %v16441_v20, %s15317_s28  ;;  %v13175_v20 = vld [vmem:[%s17193_s16 + $0x38] sm:$0xff] }
0x5bae   :  { %v12193_v34 = vpop.xlane.xlu0 %12192 }
0x5baf   :  { %14751 = vrcp.f32 %v12193_v34 }
0x5bbc   :  { %v14752_v10 = vpop.eup %14751 }
0x5bbd   :  { %v12199_v11 = vmul.f32 %v14752_v10, %v14750_v32  ;;  %v13210_v32 = vld [vmem:[#allocation29 + $0x1] ss:$0 sm:$0xff] }
0x5bbf   :  { %13214 = vst.msk [vmem:[%s15583_s17 + $0x58] sm:$0xff] %vm879_vm7, %v12199_v11 }
0x5bd2   :  { %v12184_v13 = vpop.xlane.xlu1 %12183 }
0x5bd3   :  { %v12186_v14 = vsub.f32 %v12178_v9, %v12184_v13  ;;  %v13219_v9 = vld [vmem:[%s17194_s13 + $0x40] sm:$0xff] }
0x5bd5   :  { %v12189_v15 = vmul.f32 1.442695, %v12186_v14 }
0x5bd6   :  { %v12202_v24 = vpop.permute.xlu1 %12201 }
0x5bd7   :  { %14753 = vpow2.f32 %v12189_v15  ;;  %14388 = vmatpush3.msra.mxu1 %v12202_v24  ;;  %v13230_v15 = vld [vmem:[#allocation34 + $0x1] ss:$0 sm:$0xff] }
0x5bd8   :  { %14390 = vmatmul.mubr.msk.f32.vlgmr.msra.gmra.mxu1 %vm879_vm7, %v12199_v11  ;;  %14397 = vmatprep.subr.mxu1 %v13175_v20 }
0x5bd9   :  { %14398 = vmatpush3.msra.mxu1 %v13175_v20 }
0x5bda   :  { %14413 = vmatprep.subr.mxu1 %v13226_v44 }
0x5be4   :  { %v14754_v57 = vpop.eup %14753 }
0x5be5   :  { %v12194_v17 = vsel %vm879_vm7, %v14754_v57, 0.0 }
0x5be6   :  { %12195 = vadd.xlane.f32.xlu0 %v12194_v17 }
0x5bfc   :  { %12277 = vrot.lane.b32.xlu0 %v16226_v18, %s15317_s28 }
0x5c6f   :  { %v12196_v50 = vpop.xlane.xlu0 %12195 }
0x5c70   :  { %14755 = vrcp.f32 %v12196_v50 }
0x5c73   :  { %v12278_v19 = vpop.permute.xlu0 %12277 }
0x5c74   :  { %14393 = vmatpush3.msra.mxu0 %v12278_v19 }
0x5c75   :  { %14402 = vmatprep.subr.mxu0 %v12491_v61 }
0x5c7d   :  { %v14756_v23 = vpop.eup %14755 }
0x5c7e   :  { %v12200_v25 = vmul.f32 %v14756_v23, %v14754_v57 }
0x5c80   :  { %13218 = vst.msk [vmem:[%s15583_s17 + $0x78] sm:$0xff] %vm879_vm7, %v12200_v25  ;;  %14395 = vmatmul.mubr.msk.f32.vlgmr.msra.gmra.mxu0 %vm879_vm7, %v12200_v25  ;;  %s17195_s17 = sld [smem:[#allocation77_spill]] }
0x5c81   :  { %14403 = vmatpush3.msra.mxu0 %v12491_v61 }
0x5c82   :  { %14404 = vmatprep.subr.mxu0 %v12490_v47 }
0x5c83   :  { %14405 = vmatpush3.msra.mxu0 %v12490_v47  ;;  %v13233_v47 = vld [vmem:[#allocation35 + $0x1] ss:$0 sm:$0xff] }
0x5c84   :  { %14406 = vmatprep.subr.mxu0 %v12489_v48 }
0x5c85   :  { %14407 = vmatpush3.msra.mxu0 %v12489_v48 }
0x5c86   :  { %14408 = vmatprep.subr.mxu0 %v12488_v31 }
0x5c87   :  { %14409 = vmatpush3.msra.mxu0 %v12488_v31 }
0x5c98   :  { %v12273_v26 = vpop.f32.mrf.mxu1 }
0x5c99   :  { %14399 = vmatprep.mubr.msk.f32.mxu1 %vm879_vm7, %v12273_v26 }
0x5c9a   :  { %v14391_v27 = vpop.f32.mrf.mxu1 }
0x5d40   :  { %v12349_v30 = vpop.f32.mrf.mxu0 }
0x5d41   :  { %14400 = vmatmul.mubr.msk.f32.vlgmr.msra.gmra.mxu1 %vm879_vm7, %v12349_v30 }
0x5d42   :  { %v14396_v18 = vpop.f32.mrf.mxu0  ;;  %14414 = vmatpush3.msra.mxu1 %v13226_v44 }
0x5d43   :  { %14415 = vmatprep.subr.mxu1 %v13225_v49 }
0x5d44   :  { %14416 = vmatpush3.msra.mxu1 %v13225_v49 }
0x5d45   :  { %14417 = vmatprep.subr.mxu1 %v13224_v59 }
0x5d46   :  { %14418 = vmatpush3.msra.mxu1 %v13224_v59  ;;  %v13234_v59 = vld [vmem:[#allocation37 + $0x1] ss:$0 sm:$0xff] }
0x5d47   :  { %14419 = vmatprep.subr.mxu1 %v13223_v56 }
0x5d48   :  { %14420 = vmatpush3.msra.mxu1 %v13223_v56 }
0x5d49   :  { %14421 = vmatprep.subr.mxu1 %v13222_v4 }
0x5d4a   :  { %14422 = vmatpush3.msra.mxu1 %v13222_v4 }
0x5e01   :  { %v14401_v36 = vpop.f32.mrf.mxu1 }
0x5e02   :  { %v12435_v54 = vadd.f32 %v14401_v36, %v12020_v3 }
0x5e03   :  { %v12425_v37 = vpop.f32.mrf.mxu1 }
0x5e04   :  { %v12434_v33 = vadd.f32 %v12425_v37, %v12019_v6  ;;  %v12439_v16 = vsel %vm779_vm3, %v12435_v54, 0.0  ;;  %v13221_v6 = vld [vmem:[%s17194_s13 + $0x50] sm:$0xff] }
0x5e05   :  { %12440 = vadd.xlane.f32.xlu0 %v12439_v16  ;;  %14423 = vmatprep.subr.mxu1 %v13221_v6 }
0x5e06   :  { %v12436_v12 = vsel %vm779_vm3, %v12434_v33, 0.0  ;;  %14424 = vmatpush3.msra.mxu1 %v13221_v6 }
0x5e07   :  { %12437 = vadd.xlane.f32.xlu1 %v12436_v12  ;;  %14425 = vmatprep.subr.mxu1 %v13220_v8 }
0x5e08   :  { %14426 = vmatpush3.msra.mxu1 %v13220_v8 }
0x5e09   :  { %14427 = vmatprep.subr.mxu1 %v13219_v9 }
0x5e0a   :  { %14428 = vmatpush3.msra.mxu1 %v13219_v9 }
0x5e8e   :  { %v12441_v38 = vpop.xlane.xlu0 %12440 }
0x5e8f   :  { %v12443_v39 = vmul.f32 0.03125, %v12441_v38  ;;  %v12732_v38 = vld [vmem:[%s17195_s17 + $0x18] sm:$0xff] }
0x5e90   :  { %v12438_v42 = vpop.xlane.xlu1 %12437  ;;  %14432 = vmatprep.subr.mxu0 %v12732_v38 }
0x5e91   :  { %v12445_v43 = vsub.f32 %v12435_v54, %v12443_v39  ;;  %v12442_v46 = vmul.f32 0.03125, %v12438_v42  ;;  %v12731_v39 = vld [vmem:[%s17195_s17 + $0x10] sm:$0xff]  ;;  %v12730_v42 = vld [vmem:[%s17195_s17 + $0x8] sm:$0xff] }
0x5e93   :  { %v12444_v41 = vsub.f32 %v12434_v33, %v12442_v46  ;;  %v12447_v28 = vmul.f32 %v12445_v43, %v12445_v43 }
0x5e95   :  { %v12451_v29 = vsel %vm779_vm3, %v12447_v28, 0.0  ;;  %v12446_v7 = vmul.f32 %v12444_v41, %v12444_v41 }
0x5e96   :  { %12452 = vadd.xlane.f32.xlu0 %v12451_v29 }
0x5e97   :  { %v12448_v40 = vsel %vm779_vm3, %v12446_v7, 0.0 }
0x5e98   :  { %12449 = vadd.xlane.f32.xlu1 %v12448_v40 }
0x5f1f   :  { %v12453_v58 = vpop.xlane.xlu0 %12452 }
0x5f20   :  { %v12455_v22 = vmul.f32 0.03125, %v12453_v58 }
0x5f21   :  { %v12450_v60 = vpop.xlane.xlu1 %12449 }
0x5f22   :  { %v12457_v52 = vadd.f32 1e-05, %v12455_v22  ;;  %v12454_v55 = vmul.f32 0.03125, %v12450_v60 }
0x5f24   :  { %14757 = vrsqrt.f32 %v12457_v52  ;;  %v12456_v62 = vadd.f32 1e-05, %v12454_v55 }
0x5f26   :  { %14759 = vrsqrt.f32 %v12456_v62 }
0x5f31   :  { %v14758_v63 = vpop.eup %14757 }
0x5f32   :  { %v12461_v21 = vmul.f32 %v14758_v63, %v12445_v43  ;;  %v12729_v43 = vld [vmem:[%s17195_s17] sm:$0xff] }
0x5f33   :  { %v14760_v45 = vpop.eup %14759 }
0x5f34   :  { %v12460_v0 = vmul.f32 %v14760_v45, %v12444_v41  ;;  %v12469_v1 = vmul.f32 %v13209_v5, %v12461_v21 }
0x5f36   :  { %v12468_v2 = vmul.f32 %v13209_v5, %v12460_v0  ;;  %v12477_v3 = vadd.f32 %v13210_v32, %v12469_v1 }
0x5f38   :  { %v12476_v53 = vadd.f32 %v13210_v32, %v12468_v2 }
0x5f3a   :  { %14410 = vmatprep.mubr.msk.f32.mxu0 %vm779_vm3, %v12476_v53 }
0x5f3b   :  { %14411 = vmatmul.mubr.msk.f32.vlgmr.msra.gmra.mxu0 %vm779_vm3, %v12477_v3 }
0x5f3c   :  { %14433 = vmatpush3.msra.mxu0 %v12732_v38 }
0x5f3d   :  { %14434 = vmatprep.subr.mxu0 %v12731_v39 }
0x5f3e   :  { %14435 = vmatpush3.msra.mxu0 %v12731_v39 }
0x5f3f   :  { %14436 = vmatprep.subr.mxu0 %v12730_v42 }
0x5f40   :  { %14437 = vmatpush3.msra.mxu0 %v12730_v42 }
0x5f41   :  { %14438 = vmatprep.subr.mxu0 %v12729_v43 }
0x5f42   :  { %14439 = vmatpush3.msra.mxu0 %v12729_v43 }
0x5ffb   :  { %v14412_v35 = vpop.f32.mrf.mxu0 }
0x5ffc   :  { %v12593_v34 = vadd.f32 %v14412_v35, %v13227_v51 }
0x5ffd   :  { %v12587_v10 = vpop.f32.mrf.mxu0 }
0x5ffe   :  { %v12588_v11 = vadd.f32 %v13227_v51, %v12587_v10  ;;  %v12597_v14 = vmax.f32 %v12593_v34, 0.0 }
0x6000   :  { %v12596_v13 = vmax.f32 %v12588_v11, 0.0 }
0x6002   :  { %14429 = vmatprep.mubr.msk.f32.mxu1 %vm2697_vm13, %v12596_v13 }
0x6003   :  { %14430 = vmatmul.mubr.msk.f32.vlgmr.msra.gmra.mxu1 %vm2697_vm13, %v12597_v14 }
0x60c3   :  { %v14431_v24 = vpop.f32.mrf.mxu1 }
0x60c4   :  { %v12682_v57 = vadd.f32 %v14431_v24, %v13230_v15 }
0x60c5   :  { %v12676_v17 = vpop.f32.mrf.mxu1 }
0x60c6   :  { %v12686_v20 = vadd.f32 %v12682_v57, %v12477_v3  ;;  %v12677_v50 = vadd.f32 %v13230_v15, %v12676_v17 }
0x60c8   :  { %v12685_v19 = vadd.f32 %v12677_v50, %v12476_v53  ;;  %v12690_v23 = vsel %vm779_vm3, %v12686_v20, 0.0 }
0x60c9   :  { %12691 = vadd.xlane.f32.xlu0 %v12690_v23 }
0x60ca   :  { %v12687_v25 = vsel %vm779_vm3, %v12685_v19, 0.0 }
0x60cb   :  { %12688 = vadd.xlane.f32.xlu1 %v12687_v25 }
0x6152   :  { %v12692_v26 = vpop.xlane.xlu0 %12691 }
0x6153   :  { %v12694_v27 = vmul.f32 0.03125, %v12692_v26 }
0x6154   :  { %v12689_v30 = vpop.xlane.xlu1 %12688 }
0x6155   :  { %v12696_v18 = vsub.f32 %v12686_v20, %v12694_v27  ;;  %v12693_v36 = vmul.f32 0.03125, %v12689_v30 }
0x6157   :  { %v12695_v54 = vsub.f32 %v12685_v19, %v12693_v36  ;;  %v12698_v37 = vmul.f32 %v12696_v18, %v12696_v18 }
0x6159   :  { %v12702_v33 = vsel %vm779_vm3, %v12698_v37, 0.0  ;;  %v12697_v16 = vmul.f32 %v12695_v54, %v12695_v54 }
0x615a   :  { %12703 = vadd.xlane.f32.xlu0 %v12702_v33 }
0x615b   :  { %v12699_v12 = vsel %vm779_vm3, %v12697_v16, 0.0 }
0x615c   :  { %12700 = vadd.xlane.f32.xlu1 %v12699_v12 }
0x61e3   :  { %v12704_v46 = vpop.xlane.xlu0 %12703 }
0x61e4   :  { %v12706_v41 = vmul.f32 0.03125, %v12704_v46 }
0x61e5   :  { %v12701_v28 = vpop.xlane.xlu1 %12700 }
0x61e6   :  { %v12708_v29 = vadd.f32 1e-05, %v12706_v41  ;;  %v12705_v7 = vmul.f32 0.03125, %v12701_v28 }
0x61e8   :  { %14761 = vrsqrt.f32 %v12708_v29  ;;  %v12707_v40 = vadd.f32 1e-05, %v12705_v7 }
0x61ea   :  { %14763 = vrsqrt.f32 %v12707_v40 }
0x61f5   :  { %v14762_v61 = vpop.eup %14761 }
0x61f6   :  { %v12712_v48 = vmul.f32 %v14762_v61, %v12696_v18 }
0x61f7   :  { %v14764_v31 = vpop.eup %14763 }
0x61f8   :  { %v12711_v44 = vmul.f32 %v14764_v31, %v12695_v54  ;;  %v12720_v49 = vmul.f32 %v13233_v47, %v12712_v48 }
0x61fa   :  { %v12719_v56 = vmul.f32 %v13233_v47, %v12711_v44  ;;  %v12728_v22 = vadd.f32 %v13234_v59, %v12720_v49 }
0x61fc   :  { %v12727_v58 = vadd.f32 %v13234_v59, %v12719_v56 }
0x61fe   :  { %14440 = vmatprep.mubr.msk.f32.mxu0 %vm779_vm3, %v12727_v58 }
0x61ff   :  { %14441 = vmatmul.mubr.msk.f32.vlgmr.msra.gmra.mxu0 %vm779_vm3, %v12728_v22 }
0x62bf   :  { %v14442_v60 = vpop.f32.mrf.mxu0 }
0x62c0   :  { %12815 = vst.msk [vmem:[#allocation38 + $0x8] sm:$0xff] %vm587_vm0, %v14442_v60 }
0x62c1   :  { %v12805_v52 = vpop.f32.mrf.mxu0 }
0x62c2   :  { %12814 = vst.msk [vmem:[#allocation38] sm:$0xff] %vm587_vm0, %v12805_v52 }
0x62c3   :  { %15237 = shalt.err (!%p15234_p7)
}
0x62c4   :  { %12827 = dma.vmem_to_hbm [thread:$0]  %s12822_s2, 256, %s15568_s14, [#allocation4], %s15316_s0, %s15316_s0, %s15317_s28  }
0x62c5   :  { %15270 = dma.done.wait [#allocation4], 256  }
0x62c6   :  { %15271 = vsyncadd [#allocation4], 4294967040 }
0x62c7   :  { %12843 = vsyncpa [#allocation3], 1 }
0x62c8   :  { %12844 = vsyncpa [#allocation6], 1 }
0x62c9   :  { %12845 = vsyncpa [#allocation9], 1 }
0x62ca   :  { %12846 = vsyncpa [#allocation12], 1 }
0x62cb   :  { %12847 = vsyncpa [#allocation15], 1 }
0x62cc   :  { %12848 = vsyncpa [#allocation18], 1 }
0x62cd   :  { %12849 = vsyncpa [#allocation21], 1 }
0x62ce   :  { %12850 = vsyncpa [#allocation24], 1 }
0x62cf   :  { %12851 = vsyncpa [#allocation27], 1 }
0x62d0   :  { %12852 = vsyncpa [#allocation30], 1 }
0x62d1   :  { %12853 = vsyncpa [#allocation33], 1 }
0x62d2   :  { %12854 = vsyncpa [#allocation36], 1 }
0x62d3   :  { %12855 = vsyncpa [#allocation4], 1 }

</bundles_post_ra>
